<compile_context>
chip_gen: v5e
topology: v5e:2x2
jax: 0.10.0
libtpu: 0.0.40
codegen_flags: <defaults>
</compile_context>

<pallas_src>
import functools
import jax
import jax.numpy as jnp
from jax.experimental import pallas as pl
from jax.experimental.pallas import tpu as pltpu


def _round_up(x, m):
    return (x + m - 1) // m * m


def _pick_tile(padded, candidates):
    for c in candidates:
        if padded % c == 0:
            return c
    return candidates[-1]


# ----------------------------------------------------------------------------
# Fused matmul kernel:  out = act((A @ B) + bias [+ residual])
#   A, B, residual are bf16; accumulation is f32 in VMEM scratch.
#   (BN scale is pre-folded into B, so the epilogue is bias/residual/ReLU only.)
# ----------------------------------------------------------------------------
def _make_matmul_kernel(relu, add_residual):
    def kernel(*refs):
        if add_residual:
            a_ref, b_ref, bias_ref, r_ref, o_ref, acc_ref = refs
        else:
            a_ref, b_ref, bias_ref, o_ref, acc_ref = refs
            r_ref = None
        k = pl.program_id(2)

        @pl.when(k == 0)
        def _():
            acc_ref[...] = jnp.zeros_like(acc_ref)

        acc_ref[...] += jnp.dot(a_ref[...], b_ref[...],
                                preferred_element_type=jnp.float32)

        @pl.when(k == pl.num_programs(2) - 1)
        def _():
            out = acc_ref[...] + bias_ref[...]
            if add_residual:
                out = out + r_ref[...].astype(jnp.float32)
            if relu:
                out = jnp.maximum(out, 0.0)
            o_ref[...] = out.astype(o_ref.dtype)

    return kernel


def matmul_fused(a, b, bias, residual=None, relu=False, out_dtype=jnp.bfloat16):
    """a:[M,K], b:[K,N] (cast to bf16), bias:[N] f32, residual:[M,N] or None."""
    M, K = a.shape
    K2, N = b.shape
    assert K == K2
    a = a.astype(jnp.bfloat16)
    b = b.astype(jnp.bfloat16)

    Mp = _round_up(M, 16)
    Kp = _round_up(K, 128)
    Np = _round_up(N, 128)
    tm = _pick_tile(Mp, (256, 128, 64, 32, 16))
    tk = _pick_tile(Kp, (512, 384, 256, 128))
    tn = _pick_tile(Np, (512, 384, 256, 128))

    a_p = a if (Mp, Kp) == (M, K) else jnp.pad(a, ((0, Mp - M), (0, Kp - K)))
    b_p = b if (Kp, Np) == (K, N) else jnp.pad(b, ((0, Kp - K), (0, Np - N)))
    bias_p = jnp.pad(bias.astype(jnp.float32), (0, Np - N)).reshape(1, Np)

    add_res = residual is not None
    inputs = [a_p, b_p, bias_p]
    in_specs = [
        pl.BlockSpec((tm, tk), lambda i, j, k: (i, k)),
        pl.BlockSpec((tk, tn), lambda i, j, k: (k, j)),
        pl.BlockSpec((1, tn), lambda i, j, k: (0, j)),
    ]
    if add_res:
        r = residual.astype(jnp.bfloat16)
        if (Mp, Np) != (M, N):
            r = jnp.pad(r, ((0, Mp - M), (0, Np - N)))
        inputs.append(r)
        in_specs.append(pl.BlockSpec((tm, tn), lambda i, j, k: (i, j)))

    out = pl.pallas_call(
        _make_matmul_kernel(relu, add_res),
        out_shape=jax.ShapeDtypeStruct((Mp, Np), out_dtype),
        grid_spec=pltpu.PrefetchScalarGridSpec(
            num_scalar_prefetch=0,
            grid=(Mp // tm, Np // tn, Kp // tk),
            in_specs=in_specs,
            out_specs=pl.BlockSpec((tm, tn), lambda i, j, k: (i, j)),
            scratch_shapes=[pltpu.VMEM((tm, tn), jnp.float32)],
        ),
        compiler_params=pltpu.CompilerParams(
            dimension_semantics=("parallel", "parallel", "arbitrary")),
    )(*inputs)
    if (Mp, Np) != (M, N):
        out = out[:M, :N]
    return out


# ----------------------------------------------------------------------------
# Max-pool 3x3 / stride 2 / pad 1: 9-way maximum fold (XLA fuses the shifted
# views; avoids materializing a 9x stacked tensor and any whole-array VMEM
# block that could overflow v7x's 64 MiB VMEM for realistic inputs).
# ----------------------------------------------------------------------------
def maxpool2d_3x3_s2(x):
    N, H, W, C = x.shape
    k, s, pad = 3, 2, 1
    Ho = (H + 2 * pad - k) // s + 1
    Wo = (W + 2 * pad - k) // s + 1
    xp = jnp.pad(x, ((0, 0), (pad, pad), (pad, pad), (0, 0)),
                 constant_values=-jnp.inf)
    out = None
    for i in range(k):
        for j in range(k):
            v = xp[:, i:i + s * Ho:s, j:j + s * Wo:s, :]
            out = v if out is None else jnp.maximum(out, v)
    return out


# ----------------------------------------------------------------------------
# Convolution via im2col (bf16) + fused matmul
# ----------------------------------------------------------------------------
def im2col(x, kh, kw, stride, pad):
    # TODO(synk): a true implicit-GEMM conv (tap axis in the Pallas grid with
    # element-offset index maps) would avoid materializing the kh*kw-expanded
    # patches in HBM; here the expansion is kept but built in bf16.
    N, H, W, C = x.shape
    Ho = (H + 2 * pad - kh) // stride + 1
    Wo = (W + 2 * pad - kw) // stride + 1
    xp = jnp.pad(x, ((0, 0), (pad, pad), (pad, pad), (0, 0)))
    cols = [xp[:, i:i + stride * Ho:stride, j:j + stride * Wo:stride, :]
            for i in range(kh) for j in range(kw)]
    patches = jnp.concatenate(cols, axis=-1)          # [N,Ho,Wo,kh*kw*C]
    return patches.reshape(N * Ho * Wo, kh * kw * C), (N, Ho, Wo)


def _bn_fold(bn, eps=1e-5):
    scale = bn['gamma'] / jnp.sqrt(bn['var'] + eps)
    bias = bn['beta'] - bn['mean'] * scale
    return scale, bias


def conv_bn(x, w, bn, stride, pad, relu, residual=None,
            out_dtype=jnp.bfloat16):
    """x: NHWC bf16, w: [Cout, Cin, kh, kw] (PyTorch layout), folded BN."""
    Cout, Cin, kh, kw = w.shape
    cols, (N, Ho, Wo) = im2col(x, kh, kw, stride, pad)
    scale, bias = _bn_fold(bn)
    wmat = jnp.transpose(w, (2, 3, 1, 0)).reshape(kh * kw * Cin, Cout)
    wmat = (wmat * scale[None, :]).astype(jnp.bfloat16)   # fold BN scale
    res = residual.reshape(-1, Cout) if residual is not None else None
    out = matmul_fused(cols, wmat, bias, residual=res, relu=relu,
                       out_dtype=out_dtype)
    return out.reshape(N, Ho, Wo, Cout)


def basic_block(x, p, stride):
    if 'down_w' in p:
        identity = conv_bn(x, p['down_w'], p['down_bn'], stride, 0, relu=False)
    else:
        identity = x
    out = conv_bn(x, p['conv1_w'], p['bn1'], stride, 1, relu=True)
    # second conv: BN + residual add + ReLU fused in the matmul epilogue
    out = conv_bn(out, p['conv2_w'], p['bn2'], 1, 1, relu=True,
                  residual=identity)
    return out


# ----------------------------------------------------------------------------
# Parameters (deterministic synthetic init; shapes match torchvision resnet18)
# ----------------------------------------------------------------------------
def init_params(key, num_classes=576, hidden_dim=1024):
    keys = iter(jax.random.split(key, 256))

    def conv_w(cout, cin, k):
        return 0.05 * jax.random.normal(next(keys), (cout, cin, k, k), jnp.float32)

    def bn(c):
        return dict(
            gamma=1.0 + 0.05 * jax.random.normal(next(keys), (c,), jnp.float32),
            beta=0.05 * jax.random.normal(next(keys), (c,), jnp.float32),
            mean=0.05 * jax.random.normal(next(keys), (c,), jnp.float32),
            var=0.5 + jnp.abs(0.5 * jax.random.normal(next(keys), (c,), jnp.float32)),
        )

    def linear(cin, cout):
        w = 0.05 * jax.random.normal(next(keys), (cout, cin), jnp.float32)
        b = 0.05 * jax.random.normal(next(keys), (cout,), jnp.float32)
        return w, b

    params = {'conv1_w': conv_w(64, 3, 7), 'bn1': bn(64)}
    layer_cfg = [(64, 64, 1), (64, 128, 2), (128, 256, 2), (256, 512, 2)]
    layers = []
    for cin, cout, stride in layer_cfg:
        b0 = dict(conv1_w=conv_w(cout, cin, 3), bn1=bn(cout),
                  conv2_w=conv_w(cout, cout, 3), bn2=bn(cout))
        if stride != 1 or cin != cout:
            b0['down_w'] = conv_w(cout, cin, 1)
            b0['down_bn'] = bn(cout)
        b1 = dict(conv1_w=conv_w(cout, cout, 3), bn1=bn(cout),
                  conv2_w=conv_w(cout, cout, 3), bn2=bn(cout))
        layers.append([b0, b1])
    params['layers'] = layers
    params['emb_w'], params['emb_b'] = linear(512, hidden_dim)
    params['emb_bn'] = bn(hidden_dim)
    params['cls_w'], params['cls_b'] = linear(hidden_dim, num_classes)
    return params


# ----------------------------------------------------------------------------
# Forward pass (matches SE_ResNet18.forward; BN uses running stats, i.e. eval)
# ----------------------------------------------------------------------------
def se_resnet18_forward(params, x_nchw, training=False, loss=frozenset({'xent'})):
    # TODO(synk): training-mode BatchNorm (batch statistics) not implemented;
    # BN is folded with running stats (model.eval() semantics).
    x = jnp.transpose(x_nchw, (0, 2, 3, 1)).astype(jnp.bfloat16)  # NCHW -> NHWC

    x = conv_bn(x, params['conv1_w'], params['bn1'], stride=2, pad=3, relu=True)
    x = maxpool2d_3x3_s2(x)

    strides = [1, 2, 2, 2]
    for li, blocks in enumerate(params['layers']):
        x = basic_block(x, blocks[0], strides[li])
        x = basic_block(x, blocks[1], 1)

    # adaptive avgpool(1,1) + flatten (glue: tiny spatial reduction, f32 acc)
    feat = jnp.mean(x.astype(jnp.float32), axis=(1, 2))  # [N, 512]

    # embedding: Linear(512,1024) + BatchNorm1d + ReLU fused in the epilogue
    # (BN scale folded into the weight, linear bias folded into the BN bias)
    s_bn, b_bn = _bn_fold(params['emb_bn'])
    emb_w = (params['emb_w'].T * s_bn[None, :]).astype(jnp.bfloat16)
    emb_bias = params['emb_b'] * s_bn + b_bn
    v = matmul_fused(feat.astype(jnp.bfloat16), emb_w, emb_bias,
                     relu=True, out_dtype=jnp.float32)

    if not training:
        return v

    y = matmul_fused(v.astype(jnp.bfloat16),
                     params['cls_w'].T.astype(jnp.bfloat16),
                     params['cls_b'], relu=False, out_dtype=jnp.float32)
    if loss == {'xent'}:
        return y
    elif loss == {'xent', 'htri'}:
        return (y, v)
    else:
        raise KeyError(f'Unsupported loss: {loss}')


if __name__ == "__main__":
    key = jax.random.PRNGKey(0)
    pkey, xkey = jax.random.split(key)
    params = init_params(pkey)

    # NCHW input like PyTorch (batch=2, 3 channels, 32x32 spatial)
    x = jax.random.normal(xkey, (2, 3, 32, 32), jnp.float32)

    fwd = jax.jit(functools.partial(se_resnet18_forward, training=False))
    v = fwd(params, x)
    v = jax.block_until_ready(v)
    assert v.shape == (2, 1024) and v.dtype == jnp.float32

    print("KERNEL_OK")
</pallas_src>

<mosaic_0001>
module attributes {stable_mosaic.version = 11 : i64} {
  func.func @kernel(%arg0: i32, %arg1: i32, %arg2: i32, %arg3: memref<256x256xbf16, #tpu.memory_space<vmem>>, %arg4: memref<256x128xbf16, #tpu.memory_space<vmem>>, %arg5: memref<1x128xf32, #tpu.memory_space<vmem>>, %arg6: memref<256x128xbf16, #tpu.memory_space<vmem>>, %arg7: memref<256x128xf32, #tpu.memory_space<vmem>>) attributes {dimension_semantics = [#tpu.dimension_semantics<parallel>, #tpu.dimension_semantics<parallel>, #tpu.dimension_semantics<arbitrary>], iteration_bounds = array<i64: 2, 1, 1>, scalar_prefetch = 0 : i64, scratch_operands = 1 : i64, tpu.core_type = #tpu.core_type<tc>, window_params = [{transform_indices = @transform_0, window_bounds = array<i64: 256, 256>}, {transform_indices = @transform_1, window_bounds = array<i64: 256, 128>}, {transform_indices = @transform_2, window_bounds = array<i64: 1, 128>}, {transform_indices = @transform_3, window_bounds = array<i64: 256, 128>}]} {
    %c0_i32 = arith.constant 0 : i32
    %0 = arith.cmpi eq, %arg2, %c0_i32 : i32
    %1 = arith.extui %0 : i1 to i32
    %c0_i32_0 = arith.constant 0 : i32
    %2 = arith.cmpi ne, %1, %c0_i32_0 : i32
    scf.if %2 {
      %cst_10 = arith.constant 0.000000e+00 : f32
      %12 = vector.broadcast %cst_10 : f32 to vector<256x128xf32>
      %c0_11 = arith.constant 0 : index
      %c0_12 = arith.constant 0 : index
      %13 = vector.load %arg7[%c0_11, %c0_12] : memref<256x128xf32, #tpu.memory_space<vmem>>, vector<256x128xf32>
      tpu.vector_store %arg7[%c0_11, %c0_12], %12 {strides = array<i32>} : memref<256x128xf32, #tpu.memory_space<vmem>>, vector<256x128xf32>,
    } else {
    }
    %c0 = arith.constant 0 : index
    %c0_1 = arith.constant 0 : index
    %3 = vector.load %arg7[%c0, %c0_1] : memref<256x128xf32, #tpu.memory_space<vmem>>, vector<256x128xf32>
    %c0_2 = arith.constant 0 : index
    %c0_3 = arith.constant 0 : index
    %4 = vector.load %arg3[%c0_2, %c0_3] : memref<256x256xbf16, #tpu.memory_space<vmem>>, vector<256x256xbf16>
    %c0_4 = arith.constant 0 : index
    %c0_5 = arith.constant 0 : index
    %5 = vector.load %arg4[%c0_4, %c0_5] : memref<256x128xbf16, #tpu.memory_space<vmem>>, vector<256x128xbf16>
    %cst = arith.constant dense<0.000000e+00> : vector<256x128xf32>
    %6 = tpu.matmul %4, %5, %cst {dimension_numbers = #tpu.dot_dimension_numbers<[1], [0], [0], [1], [0, 0, 1, 1], [], []>} : vector<256x256xbf16>, vector<256x128xbf16>, vector<256x128xf32> -> vector<256x128xf32>
    %7 = arith.addf %3, %6 : vector<256x128xf32>
    %c0_6 = arith.constant 0 : index
    %c0_7 = arith.constant 0 : index
    %8 = vector.load %arg7[%c0_6, %c0_7] : memref<256x128xf32, #tpu.memory_space<vmem>>, vector<256x128xf32>
    tpu.vector_store %arg7[%c0_6, %c0_7], %7 {strides = array<i32>} : memref<256x128xf32, #tpu.memory_space<vmem>>, vector<256x128xf32>,
    %c0_i32_8 = arith.constant 0 : i32
    %9 = arith.cmpi eq, %arg2, %c0_i32_8 : i32
    %10 = arith.extui %9 : i1 to i32
    %c0_i32_9 = arith.constant 0 : i32
    %11 = arith.cmpi ne, %10, %c0_i32_9 : i32
    scf.if %11 {
      %c0_10 = arith.constant 0 : index
      %c0_11 = arith.constant 0 : index
      %12 = vector.load %arg7[%c0_10, %c0_11] : memref<256x128xf32, #tpu.memory_space<vmem>>, vector<256x128xf32>
      %c0_12 = arith.constant 0 : index
      %c0_13 = arith.constant 0 : index
      %13 = vector.load %arg5[%c0_12, %c0_13] : memref<1x128xf32, #tpu.memory_space<vmem>>, vector<1x128xf32>
      %14 = vector.broadcast %13 : vector<1x128xf32> to vector<256x128xf32>
      %15 = arith.addf %12, %14 : vector<256x128xf32>
      %cst_14 = arith.constant 0.000000e+00 : f32
      %16 = vector.broadcast %cst_14 : f32 to vector<256x128xf32>
      %17 = arith.maximumf %15, %16 : vector<256x128xf32>
      %18 = arith.truncf %17 : vector<256x128xf32> to vector<256x128xbf16>
      %c0_15 = arith.constant 0 : index
      %c0_16 = arith.constant 0 : index
      %19 = vector.load %arg6[%c0_15, %c0_16] : memref<256x128xbf16, #tpu.memory_space<vmem>>, vector<256x128xbf16>
      tpu.vector_store %arg6[%c0_15, %c0_16], %18 {strides = array<i32>} : memref<256x128xbf16, #tpu.memory_space<vmem>>, vector<256x128xbf16>,
    } else {
    }
    return
  }
  func.func @transform_0(%arg0: i32, %arg1: i32, %arg2: i32) -> (i32, i32) {
    %c0_i32 = arith.constant 0 : i32
    return %arg0, %arg2 : i32, i32
  }
  func.func @transform_1(%arg0: i32, %arg1: i32, %arg2: i32) -> (i32, i32) {
    %c0_i32 = arith.constant 0 : i32
    return %arg2, %arg1 : i32, i32
  }
  func.func @transform_2(%arg0: i32, %arg1: i32, %arg2: i32) -> (i32, i32) {
    %c0_i32 = arith.constant 0 : i32
    %c0_i32_0 = arith.constant 0 : i32
    return %c0_i32, %arg1 : i32, i32
  }
  func.func @transform_3(%arg0: i32, %arg1: i32, %arg2: i32) -> (i32, i32) {
    %c0_i32 = arith.constant 0 : i32
    return %arg0, %arg1 : i32, i32
  }
}

module attributes {stable_mosaic.version = 11 : i64} {
  func.func @kernel(%arg0: i32, %arg1: i32, %arg2: i32, %arg3: memref<128x128xbf16, #tpu.memory_space<vmem>>, %arg4: memref<128x128xbf16, #tpu.memory_space<vmem>>, %arg5: memref<1x128xf32, #tpu.memory_space<vmem>>, %arg6: memref<128x128xbf16, #tpu.memory_space<vmem>>, %arg7: memref<128x128xf32, #tpu.memory_space<vmem>>) attributes {dimension_semantics = [#tpu.dimension_semantics<parallel>, #tpu.dimension_semantics<parallel>, #tpu.dimension_semantics<arbitrary>], iteration_bounds = array<i64: 1, 1, 5>, scalar_prefetch = 0 : i64, scratch_operands = 1 : i64, tpu.core_type = #tpu.core_type<tc>, window_params = [{transform_indices = @transform_0, window_bounds = array<i64: 128, 128>}, {transform_indices = @transform_1, window_bounds = array<i64: 128, 128>}, {transform_indices = @transform_2, window_bounds = array<i64: 1, 128>}, {transform_indices = @transform_3, window_bounds = array<i64: 128, 128>}]} {
    %c0_i32 = arith.constant 0 : i32
    %0 = arith.cmpi eq, %arg2, %c0_i32 : i32
    %1 = arith.extui %0 : i1 to i32
    %c0_i32_0 = arith.constant 0 : i32
    %2 = arith.cmpi ne, %1, %c0_i32_0 : i32
    scf.if %2 {
      %cst_9 = arith.constant 0.000000e+00 : f32
      %12 = vector.broadcast %cst_9 : f32 to vector<128x128xf32>
      %c0_10 = arith.constant 0 : index
      %c0_11 = arith.constant 0 : index
      %13 = vector.load %arg7[%c0_10, %c0_11] : memref<128x128xf32, #tpu.memory_space<vmem>>, vector<128x128xf32>
      tpu.vector_store %arg7[%c0_10, %c0_11], %12 {strides = array<i32>} : memref<128x128xf32, #tpu.memory_space<vmem>>, vector<128x128xf32>,
    } else {
    }
    %c0 = arith.constant 0 : index
    %c0_1 = arith.constant 0 : index
    %3 = vector.load %arg7[%c0, %c0_1] : memref<128x128xf32, #tpu.memory_space<vmem>>, vector<128x128xf32>
    %c0_2 = arith.constant 0 : index
    %c0_3 = arith.constant 0 : index
    %4 = vector.load %arg3[%c0_2, %c0_3] : memref<128x128xbf16, #tpu.memory_space<vmem>>, vector<128x128xbf16>
    %c0_4 = arith.constant 0 : index
    %c0_5 = arith.constant 0 : index
    %5 = vector.load %arg4[%c0_4, %c0_5] : memref<128x128xbf16, #tpu.memory_space<vmem>>, vector<128x128xbf16>
    %cst = arith.constant dense<0.000000e+00> : vector<128x128xf32>
    %6 = tpu.matmul %4, %5, %cst {dimension_numbers = #tpu.dot_dimension_numbers<[1], [0], [0], [1], [0, 0, 1, 1], [], []>} : vector<128x128xbf16>, vector<128x128xbf16>, vector<128x128xf32> -> vector<128x128xf32>
    %7 = arith.addf %3, %6 : vector<128x128xf32>
    %c0_6 = arith.constant 0 : index
    %c0_7 = arith.constant 0 : index
    %8 = vector.load %arg7[%c0_6, %c0_7] : memref<128x128xf32, #tpu.memory_space<vmem>>, vector<128x128xf32>
    tpu.vector_store %arg7[%c0_6, %c0_7], %7 {strides = array<i32>} : memref<128x128xf32, #tpu.memory_space<vmem>>, vector<128x128xf32>,
    %c4_i32 = arith.constant 4 : i32
    %9 = arith.cmpi eq, %arg2, %c4_i32 : i32
    %10 = arith.extui %9 : i1 to i32
    %c0_i32_8 = arith.constant 0 : i32
    %11 = arith.cmpi ne, %10, %c0_i32_8 : i32
    scf.if %11 {
      %c0_9 = arith.constant 0 : index
      %c0_10 = arith.constant 0 : index
      %12 = vector.load %arg7[%c0_9, %c0_10] : memref<128x128xf32, #tpu.memory_space<vmem>>, vector<128x128xf32>
      %c0_11 = arith.constant 0 : index
      %c0_12 = arith.constant 0 : index
      %13 = vector.load %arg5[%c0_11, %c0_12] : memref<1x128xf32, #tpu.memory_space<vmem>>, vector<1x128xf32>
      %14 = vector.broadcast %13 : vector<1x128xf32> to vector<128x128xf32>
      %15 = arith.addf %12, %14 : vector<128x128xf32>
      %cst_13 = arith.constant 0.000000e+00 : f32
      %16 = vector.broadcast %cst_13 : f32 to vector<128x128xf32>
      %17 = arith.maximumf %15, %16 : vector<128x128xf32>
      %18 = arith.truncf %17 : vector<128x128xf32> to vector<128x128xbf16>
      %c0_14 = arith.constant 0 : index
      %c0_15 = arith.constant 0 : index
      %19 = vector.load %arg6[%c0_14, %c0_15] : memref<128x128xbf16, #tpu.memory_space<vmem>>, vector<128x128xbf16>
      tpu.vector_store %arg6[%c0_14, %c0_15], %18 {strides = array<i32>} : memref<128x128xbf16, #tpu.memory_space<vmem>>, vector<128x128xbf16>,
    } else {
    }
    return
  }
  func.func @transform_0(%arg0: i32, %arg1: i32, %arg2: i32) -> (i32, i32) {
    %c0_i32 = arith.constant 0 : i32
    return %arg0, %arg2 : i32, i32
  }
  func.func @transform_1(%arg0: i32, %arg1: i32, %arg2: i32) -> (i32, i32) {
    %c0_i32 = arith.constant 0 : i32
    return %arg2, %arg1 : i32, i32
  }
  func.func @transform_2(%arg0: i32, %arg1: i32, %arg2: i32) -> (i32, i32) {
    %c0_i32 = arith.constant 0 : i32
    %c0_i32_0 = arith.constant 0 : i32
    return %c0_i32, %arg1 : i32, i32
  }
  func.func @transform_3(%arg0: i32, %arg1: i32, %arg2: i32) -> (i32, i32) {
    %c0_i32 = arith.constant 0 : i32
    return %arg0, %arg1 : i32, i32
  }
}

module attributes {stable_mosaic.version = 11 : i64} {
  func.func @kernel(%arg0: i32, %arg1: i32, %arg2: i32, %arg3: memref<128x128xbf16, #tpu.memory_space<vmem>>, %arg4: memref<128x128xbf16, #tpu.memory_space<vmem>>, %arg5: memref<1x128xf32, #tpu.memory_space<vmem>>, %arg6: memref<128x128xbf16, #tpu.memory_space<vmem>>, %arg7: memref<128x128xbf16, #tpu.memory_space<vmem>>, %arg8: memref<128x128xf32, #tpu.memory_space<vmem>>) attributes {dimension_semantics = [#tpu.dimension_semantics<parallel>, #tpu.dimension_semantics<parallel>, #tpu.dimension_semantics<arbitrary>], iteration_bounds = array<i64: 1, 1, 5>, scalar_prefetch = 0 : i64, scratch_operands = 1 : i64, tpu.core_type = #tpu.core_type<tc>, window_params = [{transform_indices = @transform_0, window_bounds = array<i64: 128, 128>}, {transform_indices = @transform_1, window_bounds = array<i64: 128, 128>}, {transform_indices = @transform_2, window_bounds = array<i64: 1, 128>}, {transform_indices = @transform_3, window_bounds = array<i64: 128, 128>}, {transform_indices = @transform_4, window_bounds = array<i64: 128, 128>}]} {
    %c0_i32 = arith.constant 0 : i32
    %0 = arith.cmpi eq, %arg2, %c0_i32 : i32
    %1 = arith.extui %0 : i1 to i32
    %c0_i32_0 = arith.constant 0 : i32
    %2 = arith.cmpi ne, %1, %c0_i32_0 : i32
    scf.if %2 {
      %cst_9 = arith.constant 0.000000e+00 : f32
      %12 = vector.broadcast %cst_9 : f32 to vector<128x128xf32>
      %c0_10 = arith.constant 0 : index
      %c0_11 = arith.constant 0 : index
      %13 = vector.load %arg8[%c0_10, %c0_11] : memref<128x128xf32, #tpu.memory_space<vmem>>, vector<128x128xf32>
      tpu.vector_store %arg8[%c0_10, %c0_11], %12 {strides = array<i32>} : memref<128x128xf32, #tpu.memory_space<vmem>>, vector<128x128xf32>,
    } else {
    }
    %c0 = arith.constant 0 : index
    %c0_1 = arith.constant 0 : index
    %3 = vector.load %arg8[%c0, %c0_1] : memref<128x128xf32, #tpu.memory_space<vmem>>, vector<128x128xf32>
    %c0_2 = arith.constant 0 : index
    %c0_3 = arith.constant 0 : index
    %4 = vector.load %arg3[%c0_2, %c0_3] : memref<128x128xbf16, #tpu.memory_space<vmem>>, vector<128x128xbf16>
    %c0_4 = arith.constant 0 : index
    %c0_5 = arith.constant 0 : index
    %5 = vector.load %arg4[%c0_4, %c0_5] : memref<128x128xbf16, #tpu.memory_space<vmem>>, vector<128x128xbf16>
    %cst = arith.constant dense<0.000000e+00> : vector<128x128xf32>
    %6 = tpu.matmul %4, %5, %cst {dimension_numbers = #tpu.dot_dimension_numbers<[1], [0], [0], [1], [0, 0, 1, 1], [], []>} : vector<128x128xbf16>, vector<128x128xbf16>, vector<128x128xf32> -> vector<128x128xf32>
    %7 = arith.addf %3, %6 : vector<128x128xf32>
    %c0_6 = arith.constant 0 : index
    %c0_7 = arith.constant 0 : index
    %8 = vector.load %arg8[%c0_6, %c0_7] : memref<128x128xf32, #tpu.memory_space<vmem>>, vector<128x128xf32>
    tpu.vector_store %arg8[%c0_6, %c0_7], %7 {strides = array<i32>} : memref<128x128xf32, #tpu.memory_space<vmem>>, vector<128x128xf32>,
    %c4_i32 = arith.constant 4 : i32
    %9 = arith.cmpi eq, %arg2, %c4_i32 : i32
    %10 = arith.extui %9 : i1 to i32
    %c0_i32_8 = arith.constant 0 : i32
    %11 = arith.cmpi ne, %10, %c0_i32_8 : i32
    scf.if %11 {
      %c0_9 = arith.constant 0 : index
      %c0_10 = arith.constant 0 : index
      %12 = vector.load %arg8[%c0_9, %c0_10] : memref<128x128xf32, #tpu.memory_space<vmem>>, vector<128x128xf32>
      %c0_11 = arith.constant 0 : index
      %c0_12 = arith.constant 0 : index
      %13 = vector.load %arg5[%c0_11, %c0_12] : memref<1x128xf32, #tpu.memory_space<vmem>>, vector<1x128xf32>
      %14 = vector.broadcast %13 : vector<1x128xf32> to vector<128x128xf32>
      %15 = arith.addf %12, %14 : vector<128x128xf32>
      %c0_13 = arith.constant 0 : index
      %c0_14 = arith.constant 0 : index
      %16 = vector.load %arg6[%c0_13, %c0_14] : memref<128x128xbf16, #tpu.memory_space<vmem>>, vector<128x128xbf16>
      %17 = arith.extf %16 : vector<128x128xbf16> to vector<128x128xf32>
      %18 = arith.addf %15, %17 : vector<128x128xf32>
      %cst_15 = arith.constant 0.000000e+00 : f32
      %19 = vector.broadcast %cst_15 : f32 to vector<128x128xf32>
      %20 = arith.maximumf %18, %19 : vector<128x128xf32>
      %21 = arith.truncf %20 : vector<128x128xf32> to vector<128x128xbf16>
      %c0_16 = arith.constant 0 : index
      %c0_17 = arith.constant 0 : index
      %22 = vector.load %arg7[%c0_16, %c0_17] : memref<128x128xbf16, #tpu.memory_space<vmem>>, vector<128x128xbf16>
      tpu.vector_store %arg7[%c0_16, %c0_17], %21 {strides = array<i32>} : memref<128x128xbf16, #tpu.memory_space<vmem>>, vector<128x128xbf16>,
    } else {
    }
    return
  }
  func.func @transform_0(%arg0: i32, %arg1: i32, %arg2: i32) -> (i32, i32) {
    %c0_i32 = arith.constant 0 : i32
    return %arg0, %arg2 : i32, i32
  }
  func.func @transform_1(%arg0: i32, %arg1: i32, %arg2: i32) -> (i32, i32) {
    %c0_i32 = arith.constant 0 : i32
    return %arg2, %arg1 : i32, i32
  }
  func.func @transform_2(%arg0: i32, %arg1: i32, %arg2: i32) -> (i32, i32) {
    %c0_i32 = arith.constant 0 : i32
    %c0_i32_0 = arith.constant 0 : i32
    return %c0_i32, %arg1 : i32, i32
  }
  func.func @transform_3(%arg0: i32, %arg1: i32, %arg2: i32) -> (i32, i32) {
    %c0_i32 = arith.constant 0 : i32
    return %arg0, %arg1 : i32, i32
  }
  func.func @transform_4(%arg0: i32, %arg1: i32, %arg2: i32) -> (i32, i32) {
    %c0_i32 = arith.constant 0 : i32
    return %arg0, %arg1 : i32, i32
  }
}

module attributes {stable_mosaic.version = 11 : i64} {
  func.func @kernel(%arg0: i32, %arg1: i32, %arg2: i32, %arg3: memref<32x128xbf16, #tpu.memory_space<vmem>>, %arg4: memref<128x128xbf16, #tpu.memory_space<vmem>>, %arg5: memref<1x128xf32, #tpu.memory_space<vmem>>, %arg6: memref<32x128xbf16, #tpu.memory_space<vmem>>, %arg7: memref<32x128xf32, #tpu.memory_space<vmem>>) attributes {dimension_semantics = [#tpu.dimension_semantics<parallel>, #tpu.dimension_semantics<parallel>, #tpu.dimension_semantics<arbitrary>], iteration_bounds = array<i64: 1, 1, 1>, scalar_prefetch = 0 : i64, scratch_operands = 1 : i64, tpu.core_type = #tpu.core_type<tc>, window_params = [{transform_indices = @transform_0, window_bounds = array<i64: 32, 128>}, {transform_indices = @transform_1, window_bounds = array<i64: 128, 128>}, {transform_indices = @transform_2, window_bounds = array<i64: 1, 128>}, {transform_indices = @transform_3, window_bounds = array<i64: 32, 128>}]} {
    %c0_i32 = arith.constant 0 : i32
    %0 = arith.cmpi eq, %arg2, %c0_i32 : i32
    %1 = arith.extui %0 : i1 to i32
    %c0_i32_0 = arith.constant 0 : i32
    %2 = arith.cmpi ne, %1, %c0_i32_0 : i32
    scf.if %2 {
      %cst_10 = arith.constant 0.000000e+00 : f32
      %12 = vector.broadcast %cst_10 : f32 to vector<32x128xf32>
      %c0_11 = arith.constant 0 : index
      %c0_12 = arith.constant 0 : index
      %13 = vector.load %arg7[%c0_11, %c0_12] : memref<32x128xf32, #tpu.memory_space<vmem>>, vector<32x128xf32>
      tpu.vector_store %arg7[%c0_11, %c0_12], %12 {strides = array<i32>} : memref<32x128xf32, #tpu.memory_space<vmem>>, vector<32x128xf32>,
    } else {
    }
    %c0 = arith.constant 0 : index
    %c0_1 = arith.constant 0 : index
    %3 = vector.load %arg7[%c0, %c0_1] : memref<32x128xf32, #tpu.memory_space<vmem>>, vector<32x128xf32>
    %c0_2 = arith.constant 0 : index
    %c0_3 = arith.constant 0 : index
    %4 = vector.load %arg3[%c0_2, %c0_3] : memref<32x128xbf16, #tpu.memory_space<vmem>>, vector<32x128xbf16>
    %c0_4 = arith.constant 0 : index
    %c0_5 = arith.constant 0 : index
    %5 = vector.load %arg4[%c0_4, %c0_5] : memref<128x128xbf16, #tpu.memory_space<vmem>>, vector<128x128xbf16>
    %cst = arith.constant dense<0.000000e+00> : vector<32x128xf32>
    %6 = tpu.matmul %4, %5, %cst {dimension_numbers = #tpu.dot_dimension_numbers<[1], [0], [0], [1], [0, 0, 1, 1], [], []>} : vector<32x128xbf16>, vector<128x128xbf16>, vector<32x128xf32> -> vector<32x128xf32>
    %7 = arith.addf %3, %6 : vector<32x128xf32>
    %c0_6 = arith.constant 0 : index
    %c0_7 = arith.constant 0 : index
    %8 = vector.load %arg7[%c0_6, %c0_7] : memref<32x128xf32, #tpu.memory_space<vmem>>, vector<32x128xf32>
    tpu.vector_store %arg7[%c0_6, %c0_7], %7 {strides = array<i32>} : memref<32x128xf32, #tpu.memory_space<vmem>>, vector<32x128xf32>,
    %c0_i32_8 = arith.constant 0 : i32
    %9 = arith.cmpi eq, %arg2, %c0_i32_8 : i32
    %10 = arith.extui %9 : i1 to i32
    %c0_i32_9 = arith.constant 0 : i32
    %11 = arith.cmpi ne, %10, %c0_i32_9 : i32
    scf.if %11 {
      %c0_10 = arith.constant 0 : index
      %c0_11 = arith.constant 0 : index
      %12 = vector.load %arg7[%c0_10, %c0_11] : memref<32x128xf32, #tpu.memory_space<vmem>>, vector<32x128xf32>
      %c0_12 = arith.constant 0 : index
      %c0_13 = arith.constant 0 : index
      %13 = vector.load %arg5[%c0_12, %c0_13] : memref<1x128xf32, #tpu.memory_space<vmem>>, vector<1x128xf32>
      %14 = vector.broadcast %13 : vector<1x128xf32> to vector<32x128xf32>
      %15 = arith.addf %12, %14 : vector<32x128xf32>
      %16 = arith.truncf %15 : vector<32x128xf32> to vector<32x128xbf16>
      %c0_14 = arith.constant 0 : index
      %c0_15 = arith.constant 0 : index
      %17 = vector.load %arg6[%c0_14, %c0_15] : memref<32x128xbf16, #tpu.memory_space<vmem>>, vector<32x128xbf16>
      tpu.vector_store %arg6[%c0_14, %c0_15], %16 {strides = array<i32>} : memref<32x128xbf16, #tpu.memory_space<vmem>>, vector<32x128xbf16>,
    } else {
    }
    return
  }
  func.func @transform_0(%arg0: i32, %arg1: i32, %arg2: i32) -> (i32, i32) {
    %c0_i32 = arith.constant 0 : i32
    return %arg0, %arg2 : i32, i32
  }
  func.func @transform_1(%arg0: i32, %arg1: i32, %arg2: i32) -> (i32, i32) {
    %c0_i32 = arith.constant 0 : i32
    return %arg2, %arg1 : i32, i32
  }
  func.func @transform_2(%arg0: i32, %arg1: i32, %arg2: i32) -> (i32, i32) {
    %c0_i32 = arith.constant 0 : i32
    %c0_i32_0 = arith.constant 0 : i32
    return %c0_i32, %arg1 : i32, i32
  }
  func.func @transform_3(%arg0: i32, %arg1: i32, %arg2: i32) -> (i32, i32) {
    %c0_i32 = arith.constant 0 : i32
    return %arg0, %arg1 : i32, i32
  }
}

module attributes {stable_mosaic.version = 11 : i64} {
  func.func @kernel(%arg0: i32, %arg1: i32, %arg2: i32, %arg3: memref<32x128xbf16, #tpu.memory_space<vmem>>, %arg4: memref<128x128xbf16, #tpu.memory_space<vmem>>, %arg5: memref<1x128xf32, #tpu.memory_space<vmem>>, %arg6: memref<32x128xbf16, #tpu.memory_space<vmem>>, %arg7: memref<32x128xf32, #tpu.memory_space<vmem>>) attributes {dimension_semantics = [#tpu.dimension_semantics<parallel>, #tpu.dimension_semantics<parallel>, #tpu.dimension_semantics<arbitrary>], iteration_bounds = array<i64: 1, 1, 5>, scalar_prefetch = 0 : i64, scratch_operands = 1 : i64, tpu.core_type = #tpu.core_type<tc>, window_params = [{transform_indices = @transform_0, window_bounds = array<i64: 32, 128>}, {transform_indices = @transform_1, window_bounds = array<i64: 128, 128>}, {transform_indices = @transform_2, window_bounds = array<i64: 1, 128>}, {transform_indices = @transform_3, window_bounds = array<i64: 32, 128>}]} {
    %c0_i32 = arith.constant 0 : i32
    %0 = arith.cmpi eq, %arg2, %c0_i32 : i32
    %1 = arith.extui %0 : i1 to i32
    %c0_i32_0 = arith.constant 0 : i32
    %2 = arith.cmpi ne, %1, %c0_i32_0 : i32
    scf.if %2 {
      %cst_9 = arith.constant 0.000000e+00 : f32
      %12 = vector.broadcast %cst_9 : f32 to vector<32x128xf32>
      %c0_10 = arith.constant 0 : index
      %c0_11 = arith.constant 0 : index
      %13 = vector.load %arg7[%c0_10, %c0_11] : memref<32x128xf32, #tpu.memory_space<vmem>>, vector<32x128xf32>
      tpu.vector_store %arg7[%c0_10, %c0_11], %12 {strides = array<i32>} : memref<32x128xf32, #tpu.memory_space<vmem>>, vector<32x128xf32>,
    } else {
    }
    %c0 = arith.constant 0 : index
    %c0_1 = arith.constant 0 : index
    %3 = vector.load %arg7[%c0, %c0_1] : memref<32x128xf32, #tpu.memory_space<vmem>>, vector<32x128xf32>
    %c0_2 = arith.constant 0 : index
    %c0_3 = arith.constant 0 : index
    %4 = vector.load %arg3[%c0_2, %c0_3] : memref<32x128xbf16, #tpu.memory_space<vmem>>, vector<32x128xbf16>
    %c0_4 = arith.constant 0 : index
    %c0_5 = arith.constant 0 : index
    %5 = vector.load %arg4[%c0_4, %c0_5] : memref<128x128xbf16, #tpu.memory_space<vmem>>, vector<128x128xbf16>
    %cst = arith.constant dense<0.000000e+00> : vector<32x128xf32>
    %6 = tpu.matmul %4, %5, %cst {dimension_numbers = #tpu.dot_dimension_numbers<[1], [0], [0], [1], [0, 0, 1, 1], [], []>} : vector<32x128xbf16>, vector<128x128xbf16>, vector<32x128xf32> -> vector<32x128xf32>
    %7 = arith.addf %3, %6 : vector<32x128xf32>
    %c0_6 = arith.constant 0 : index
    %c0_7 = arith.constant 0 : index
    %8 = vector.load %arg7[%c0_6, %c0_7] : memref<32x128xf32, #tpu.memory_space<vmem>>, vector<32x128xf32>
    tpu.vector_store %arg7[%c0_6, %c0_7], %7 {strides = array<i32>} : memref<32x128xf32, #tpu.memory_space<vmem>>, vector<32x128xf32>,
    %c4_i32 = arith.constant 4 : i32
    %9 = arith.cmpi eq, %arg2, %c4_i32 : i32
    %10 = arith.extui %9 : i1 to i32
    %c0_i32_8 = arith.constant 0 : i32
    %11 = arith.cmpi ne, %10, %c0_i32_8 : i32
    scf.if %11 {
      %c0_9 = arith.constant 0 : index
      %c0_10 = arith.constant 0 : index
      %12 = vector.load %arg7[%c0_9, %c0_10] : memref<32x128xf32, #tpu.memory_space<vmem>>, vector<32x128xf32>
      %c0_11 = arith.constant 0 : index
      %c0_12 = arith.constant 0 : index
      %13 = vector.load %arg5[%c0_11, %c0_12] : memref<1x128xf32, #tpu.memory_space<vmem>>, vector<1x128xf32>
      %14 = vector.broadcast %13 : vector<1x128xf32> to vector<32x128xf32>
      %15 = arith.addf %12, %14 : vector<32x128xf32>
      %cst_13 = arith.constant 0.000000e+00 : f32
      %16 = vector.broadcast %cst_13 : f32 to vector<32x128xf32>
      %17 = arith.maximumf %15, %16 : vector<32x128xf32>
      %18 = arith.truncf %17 : vector<32x128xf32> to vector<32x128xbf16>
      %c0_14 = arith.constant 0 : index
      %c0_15 = arith.constant 0 : index
      %19 = vector.load %arg6[%c0_14, %c0_15] : memref<32x128xbf16, #tpu.memory_space<vmem>>, vector<32x128xbf16>
      tpu.vector_store %arg6[%c0_14, %c0_15], %18 {strides = array<i32>} : memref<32x128xbf16, #tpu.memory_space<vmem>>, vector<32x128xbf16>,
    } else {
    }
    return
  }
  func.func @transform_0(%arg0: i32, %arg1: i32, %arg2: i32) -> (i32, i32) {
    %c0_i32 = arith.constant 0 : i32
    return %arg0, %arg2 : i32, i32
  }
  func.func @transform_1(%arg0: i32, %arg1: i32, %arg2: i32) -> (i32, i32) {
    %c0_i32 = arith.constant 0 : i32
    return %arg2, %arg1 : i32, i32
  }
  func.func @transform_2(%arg0: i32, %arg1: i32, %arg2: i32) -> (i32, i32) {
    %c0_i32 = arith.constant 0 : i32
    %c0_i32_0 = arith.constant 0 : i32
    return %c0_i32, %arg1 : i32, i32
  }
  func.func @transform_3(%arg0: i32, %arg1: i32, %arg2: i32) -> (i32, i32) {
    %c0_i32 = arith.constant 0 : i32
    return %arg0, %arg1 : i32, i32
  }
}

module attributes {stable_mosaic.version = 11 : i64} {
  func.func @kernel(%arg0: i32, %arg1: i32, %arg2: i32, %arg3: memref<32x384xbf16, #tpu.memory_space<vmem>>, %arg4: memref<384x128xbf16, #tpu.memory_space<vmem>>, %arg5: memref<1x128xf32, #tpu.memory_space<vmem>>, %arg6: memref<32x128xbf16, #tpu.memory_space<vmem>>, %arg7: memref<32x128xbf16, #tpu.memory_space<vmem>>, %arg8: memref<32x128xf32, #tpu.memory_space<vmem>>) attributes {dimension_semantics = [#tpu.dimension_semantics<parallel>, #tpu.dimension_semantics<parallel>, #tpu.dimension_semantics<arbitrary>], iteration_bounds = array<i64: 1, 1, 3>, scalar_prefetch = 0 : i64, scratch_operands = 1 : i64, tpu.core_type = #tpu.core_type<tc>, window_params = [{transform_indices = @transform_0, window_bounds = array<i64: 32, 384>}, {transform_indices = @transform_1, window_bounds = array<i64: 384, 128>}, {transform_indices = @transform_2, window_bounds = array<i64: 1, 128>}, {transform_indices = @transform_3, window_bounds = array<i64: 32, 128>}, {transform_indices = @transform_4, window_bounds = array<i64: 32, 128>}]} {
    %c0_i32 = arith.constant 0 : i32
    %0 = arith.cmpi eq, %arg2, %c0_i32 : i32
    %1 = arith.extui %0 : i1 to i32
    %c0_i32_0 = arith.constant 0 : i32
    %2 = arith.cmpi ne, %1, %c0_i32_0 : i32
    scf.if %2 {
      %cst_9 = arith.constant 0.000000e+00 : f32
      %12 = vector.broadcast %cst_9 : f32 to vector<32x128xf32>
      %c0_10 = arith.constant 0 : index
      %c0_11 = arith.constant 0 : index
      %13 = vector.load %arg8[%c0_10, %c0_11] : memref<32x128xf32, #tpu.memory_space<vmem>>, vector<32x128xf32>
      tpu.vector_store %arg8[%c0_10, %c0_11], %12 {strides = array<i32>} : memref<32x128xf32, #tpu.memory_space<vmem>>, vector<32x128xf32>,
    } else {
    }
    %c0 = arith.constant 0 : index
    %c0_1 = arith.constant 0 : index
    %3 = vector.load %arg8[%c0, %c0_1] : memref<32x128xf32, #tpu.memory_space<vmem>>, vector<32x128xf32>
    %c0_2 = arith.constant 0 : index
    %c0_3 = arith.constant 0 : index
    %4 = vector.load %arg3[%c0_2, %c0_3] : memref<32x384xbf16, #tpu.memory_space<vmem>>, vector<32x384xbf16>
    %c0_4 = arith.constant 0 : index
    %c0_5 = arith.constant 0 : index
    %5 = vector.load %arg4[%c0_4, %c0_5] : memref<384x128xbf16, #tpu.memory_space<vmem>>, vector<384x128xbf16>
    %cst = arith.constant dense<0.000000e+00> : vector<32x128xf32>
    %6 = tpu.matmul %4, %5, %cst {dimension_numbers = #tpu.dot_dimension_numbers<[1], [0], [0], [1], [0, 0, 1, 1], [], []>} : vector<32x384xbf16>, vector<384x128xbf16>, vector<32x128xf32> -> vector<32x128xf32>
    %7 = arith.addf %3, %6 : vector<32x128xf32>
    %c0_6 = arith.constant 0 : index
    %c0_7 = arith.constant 0 : index
    %8 = vector.load %arg8[%c0_6, %c0_7] : memref<32x128xf32, #tpu.memory_space<vmem>>, vector<32x128xf32>
    tpu.vector_store %arg8[%c0_6, %c0_7], %7 {strides = array<i32>} : memref<32x128xf32, #tpu.memory_space<vmem>>, vector<32x128xf32>,
    %c2_i32 = arith.constant 2 : i32
    %9 = arith.cmpi eq, %arg2, %c2_i32 : i32
    %10 = arith.extui %9 : i1 to i32
    %c0_i32_8 = arith.constant 0 : i32
    %11 = arith.cmpi ne, %10, %c0_i32_8 : i32
    scf.if %11 {
      %c0_9 = arith.constant 0 : index
      %c0_10 = arith.constant 0 : index
      %12 = vector.load %arg8[%c0_9, %c0_10] : memref<32x128xf32, #tpu.memory_space<vmem>>, vector<32x128xf32>
      %c0_11 = arith.constant 0 : index
      %c0_12 = arith.constant 0 : index
      %13 = vector.load %arg5[%c0_11, %c0_12] : memref<1x128xf32, #tpu.memory_space<vmem>>, vector<1x128xf32>
      %14 = vector.broadcast %13 : vector<1x128xf32> to vector<32x128xf32>
      %15 = arith.addf %12, %14 : vector<32x128xf32>
      %c0_13 = arith.constant 0 : index
      %c0_14 = arith.constant 0 : index
      %16 = vector.load %arg6[%c0_13, %c0_14] : memref<32x128xbf16, #tpu.memory_space<vmem>>, vector<32x128xbf16>
      %17 = arith.extf %16 : vector<32x128xbf16> to vector<32x128xf32>
      %18 = arith.addf %15, %17 : vector<32x128xf32>
      %cst_15 = arith.constant 0.000000e+00 : f32
      %19 = vector.broadcast %cst_15 : f32 to vector<32x128xf32>
      %20 = arith.maximumf %18, %19 : vector<32x128xf32>
      %21 = arith.truncf %20 : vector<32x128xf32> to vector<32x128xbf16>
      %c0_16 = arith.constant 0 : index
      %c0_17 = arith.constant 0 : index
      %22 = vector.load %arg7[%c0_16, %c0_17] : memref<32x128xbf16, #tpu.memory_space<vmem>>, vector<32x128xbf16>
      tpu.vector_store %arg7[%c0_16, %c0_17], %21 {strides = array<i32>} : memref<32x128xbf16, #tpu.memory_space<vmem>>, vector<32x128xbf16>,
    } else {
    }
    return
  }
  func.func @transform_0(%arg0: i32, %arg1: i32, %arg2: i32) -> (i32, i32) {
    %c0_i32 = arith.constant 0 : i32
    return %arg0, %arg2 : i32, i32
  }
  func.func @transform_1(%arg0: i32, %arg1: i32, %arg2: i32) -> (i32, i32) {
    %c0_i32 = arith.constant 0 : i32
    return %arg2, %arg1 : i32, i32
  }
  func.func @transform_2(%arg0: i32, %arg1: i32, %arg2: i32) -> (i32, i32) {
    %c0_i32 = arith.constant 0 : i32
    %c0_i32_0 = arith.constant 0 : i32
    return %c0_i32, %arg1 : i32, i32
  }
  func.func @transform_3(%arg0: i32, %arg1: i32, %arg2: i32) -> (i32, i32) {
    %c0_i32 = arith.constant 0 : i32
    return %arg0, %arg1 : i32, i32
  }
  func.func @transform_4(%arg0: i32, %arg1: i32, %arg2: i32) -> (i32, i32) {
    %c0_i32 = arith.constant 0 : i32
    return %arg0, %arg1 : i32, i32
  }
}

module attributes {stable_mosaic.version = 11 : i64} {
  func.func @kernel(%arg0: i32, %arg1: i32, %arg2: i32, %arg3: memref<32x384xbf16, #tpu.memory_space<vmem>>, %arg4: memref<384x128xbf16, #tpu.memory_space<vmem>>, %arg5: memref<1x128xf32, #tpu.memory_space<vmem>>, %arg6: memref<32x128xbf16, #tpu.memory_space<vmem>>, %arg7: memref<32x128xf32, #tpu.memory_space<vmem>>) attributes {dimension_semantics = [#tpu.dimension_semantics<parallel>, #tpu.dimension_semantics<parallel>, #tpu.dimension_semantics<arbitrary>], iteration_bounds = array<i64: 1, 1, 3>, scalar_prefetch = 0 : i64, scratch_operands = 1 : i64, tpu.core_type = #tpu.core_type<tc>, window_params = [{transform_indices = @transform_0, window_bounds = array<i64: 32, 384>}, {transform_indices = @transform_1, window_bounds = array<i64: 384, 128>}, {transform_indices = @transform_2, window_bounds = array<i64: 1, 128>}, {transform_indices = @transform_3, window_bounds = array<i64: 32, 128>}]} {
    %c0_i32 = arith.constant 0 : i32
    %0 = arith.cmpi eq, %arg2, %c0_i32 : i32
    %1 = arith.extui %0 : i1 to i32
    %c0_i32_0 = arith.constant 0 : i32
    %2 = arith.cmpi ne, %1, %c0_i32_0 : i32
    scf.if %2 {
      %cst_9 = arith.constant 0.000000e+00 : f32
      %12 = vector.broadcast %cst_9 : f32 to vector<32x128xf32>
      %c0_10 = arith.constant 0 : index
      %c0_11 = arith.constant 0 : index
      %13 = vector.load %arg7[%c0_10, %c0_11] : memref<32x128xf32, #tpu.memory_space<vmem>>, vector<32x128xf32>
      tpu.vector_store %arg7[%c0_10, %c0_11], %12 {strides = array<i32>} : memref<32x128xf32, #tpu.memory_space<vmem>>, vector<32x128xf32>,
    } else {
    }
    %c0 = arith.constant 0 : index
    %c0_1 = arith.constant 0 : index
    %3 = vector.load %arg7[%c0, %c0_1] : memref<32x128xf32, #tpu.memory_space<vmem>>, vector<32x128xf32>
    %c0_2 = arith.constant 0 : index
    %c0_3 = arith.constant 0 : index
    %4 = vector.load %arg3[%c0_2, %c0_3] : memref<32x384xbf16, #tpu.memory_space<vmem>>, vector<32x384xbf16>
    %c0_4 = arith.constant 0 : index
    %c0_5 = arith.constant 0 : index
    %5 = vector.load %arg4[%c0_4, %c0_5] : memref<384x128xbf16, #tpu.memory_space<vmem>>, vector<384x128xbf16>
    %cst = arith.constant dense<0.000000e+00> : vector<32x128xf32>
    %6 = tpu.matmul %4, %5, %cst {dimension_numbers = #tpu.dot_dimension_numbers<[1], [0], [0], [1], [0, 0, 1, 1], [], []>} : vector<32x384xbf16>, vector<384x128xbf16>, vector<32x128xf32> -> vector<32x128xf32>
    %7 = arith.addf %3, %6 : vector<32x128xf32>
    %c0_6 = arith.constant 0 : index
    %c0_7 = arith.constant 0 : index
    %8 = vector.load %arg7[%c0_6, %c0_7] : memref<32x128xf32, #tpu.memory_space<vmem>>, vector<32x128xf32>
    tpu.vector_store %arg7[%c0_6, %c0_7], %7 {strides = array<i32>} : memref<32x128xf32, #tpu.memory_space<vmem>>, vector<32x128xf32>,
    %c2_i32 = arith.constant 2 : i32
    %9 = arith.cmpi eq, %arg2, %c2_i32 : i32
    %10 = arith.extui %9 : i1 to i32
    %c0_i32_8 = arith.constant 0 : i32
    %11 = arith.cmpi ne, %10, %c0_i32_8 : i32
    scf.if %11 {
      %c0_9 = arith.constant 0 : index
      %c0_10 = arith.constant 0 : index
      %12 = vector.load %arg7[%c0_9, %c0_10] : memref<32x128xf32, #tpu.memory_space<vmem>>, vector<32x128xf32>
      %c0_11 = arith.constant 0 : index
      %c0_12 = arith.constant 0 : index
      %13 = vector.load %arg5[%c0_11, %c0_12] : memref<1x128xf32, #tpu.memory_space<vmem>>, vector<1x128xf32>
      %14 = vector.broadcast %13 : vector<1x128xf32> to vector<32x128xf32>
      %15 = arith.addf %12, %14 : vector<32x128xf32>
      %cst_13 = arith.constant 0.000000e+00 : f32
      %16 = vector.broadcast %cst_13 : f32 to vector<32x128xf32>
      %17 = arith.maximumf %15, %16 : vector<32x128xf32>
      %18 = arith.truncf %17 : vector<32x128xf32> to vector<32x128xbf16>
      %c0_14 = arith.constant 0 : index
      %c0_15 = arith.constant 0 : index
      %19 = vector.load %arg6[%c0_14, %c0_15] : memref<32x128xbf16, #tpu.memory_space<vmem>>, vector<32x128xbf16>
      tpu.vector_store %arg6[%c0_14, %c0_15], %18 {strides = array<i32>} : memref<32x128xbf16, #tpu.memory_space<vmem>>, vector<32x128xbf16>,
    } else {
    }
    return
  }
  func.func @transform_0(%arg0: i32, %arg1: i32, %arg2: i32) -> (i32, i32) {
    %c0_i32 = arith.constant 0 : i32
    return %arg0, %arg2 : i32, i32
  }
  func.func @transform_1(%arg0: i32, %arg1: i32, %arg2: i32) -> (i32, i32) {
    %c0_i32 = arith.constant 0 : i32
    return %arg2, %arg1 : i32, i32
  }
  func.func @transform_2(%arg0: i32, %arg1: i32, %arg2: i32) -> (i32, i32) {
    %c0_i32 = arith.constant 0 : i32
    %c0_i32_0 = arith.constant 0 : i32
    return %c0_i32, %arg1 : i32, i32
  }
  func.func @transform_3(%arg0: i32, %arg1: i32, %arg2: i32) -> (i32, i32) {
    %c0_i32 = arith.constant 0 : i32
    return %arg0, %arg1 : i32, i32
  }
}

module attributes {stable_mosaic.version = 11 : i64} {
  func.func @kernel(%arg0: i32, %arg1: i32, %arg2: i32, %arg3: memref<16x384xbf16, #tpu.memory_space<vmem>>, %arg4: memref<384x256xbf16, #tpu.memory_space<vmem>>, %arg5: memref<1x256xf32, #tpu.memory_space<vmem>>, %arg6: memref<16x256xbf16, #tpu.memory_space<vmem>>, %arg7: memref<16x256xf32, #tpu.memory_space<vmem>>) attributes {dimension_semantics = [#tpu.dimension_semantics<parallel>, #tpu.dimension_semantics<parallel>, #tpu.dimension_semantics<arbitrary>], iteration_bounds = array<i64: 1, 1, 3>, scalar_prefetch = 0 : i64, scratch_operands = 1 : i64, tpu.core_type = #tpu.core_type<tc>, window_params = [{transform_indices = @transform_0, window_bounds = array<i64: 16, 384>}, {transform_indices = @transform_1, window_bounds = array<i64: 384, 256>}, {transform_indices = @transform_2, window_bounds = array<i64: 1, 256>}, {transform_indices = @transform_3, window_bounds = array<i64: 16, 256>}]} {
    %c0_i32 = arith.constant 0 : i32
    %0 = arith.cmpi eq, %arg2, %c0_i32 : i32
    %1 = arith.extui %0 : i1 to i32
    %c0_i32_0 = arith.constant 0 : i32
    %2 = arith.cmpi ne, %1, %c0_i32_0 : i32
    scf.if %2 {
      %cst_9 = arith.constant 0.000000e+00 : f32
      %12 = vector.broadcast %cst_9 : f32 to vector<16x256xf32>
      %c0_10 = arith.constant 0 : index
      %c0_11 = arith.constant 0 : index
      %13 = vector.load %arg7[%c0_10, %c0_11] : memref<16x256xf32, #tpu.memory_space<vmem>>, vector<16x256xf32>
      tpu.vector_store %arg7[%c0_10, %c0_11], %12 {strides = array<i32>} : memref<16x256xf32, #tpu.memory_space<vmem>>, vector<16x256xf32>,
    } else {
    }
    %c0 = arith.constant 0 : index
    %c0_1 = arith.constant 0 : index
    %3 = vector.load %arg7[%c0, %c0_1] : memref<16x256xf32, #tpu.memory_space<vmem>>, vector<16x256xf32>
    %c0_2 = arith.constant 0 : index
    %c0_3 = arith.constant 0 : index
    %4 = vector.load %arg3[%c0_2, %c0_3] : memref<16x384xbf16, #tpu.memory_space<vmem>>, vector<16x384xbf16>
    %c0_4 = arith.constant 0 : index
    %c0_5 = arith.constant 0 : index
    %5 = vector.load %arg4[%c0_4, %c0_5] : memref<384x256xbf16, #tpu.memory_space<vmem>>, vector<384x256xbf16>
    %cst = arith.constant dense<0.000000e+00> : vector<16x256xf32>
    %6 = tpu.matmul %4, %5, %cst {dimension_numbers = #tpu.dot_dimension_numbers<[1], [0], [0], [1], [0, 0, 1, 1], [], []>} : vector<16x384xbf16>, vector<384x256xbf16>, vector<16x256xf32> -> vector<16x256xf32>
    %7 = arith.addf %3, %6 : vector<16x256xf32>
    %c0_6 = arith.constant 0 : index
    %c0_7 = arith.constant 0 : index
    %8 = vector.load %arg7[%c0_6, %c0_7] : memref<16x256xf32, #tpu.memory_space<vmem>>, vector<16x256xf32>
    tpu.vector_store %arg7[%c0_6, %c0_7], %7 {strides = array<i32>} : memref<16x256xf32, #tpu.memory_space<vmem>>, vector<16x256xf32>,
    %c2_i32 = arith.constant 2 : i32
    %9 = arith.cmpi eq, %arg2, %c2_i32 : i32
    %10 = arith.extui %9 : i1 to i32
    %c0_i32_8 = arith.constant 0 : i32
    %11 = arith.cmpi ne, %10, %c0_i32_8 : i32
    scf.if %11 {
      %c0_9 = arith.constant 0 : index
      %c0_10 = arith.constant 0 : index
      %12 = vector.load %arg7[%c0_9, %c0_10] : memref<16x256xf32, #tpu.memory_space<vmem>>, vector<16x256xf32>
      %c0_11 = arith.constant 0 : index
      %c0_12 = arith.constant 0 : index
      %13 = vector.load %arg5[%c0_11, %c0_12] : memref<1x256xf32, #tpu.memory_space<vmem>>, vector<1x256xf32>
      %14 = vector.broadcast %13 : vector<1x256xf32> to vector<16x256xf32>
      %15 = arith.addf %12, %14 : vector<16x256xf32>
      %cst_13 = arith.constant 0.000000e+00 : f32
      %16 = vector.broadcast %cst_13 : f32 to vector<16x256xf32>
      %17 = arith.maximumf %15, %16 : vector<16x256xf32>
      %18 = arith.truncf %17 : vector<16x256xf32> to vector<16x256xbf16>
      %c0_14 = arith.constant 0 : index
      %c0_15 = arith.constant 0 : index
      %19 = vector.load %arg6[%c0_14, %c0_15] : memref<16x256xbf16, #tpu.memory_space<vmem>>, vector<16x256xbf16>
      tpu.vector_store %arg6[%c0_14, %c0_15], %18 {strides = array<i32>} : memref<16x256xbf16, #tpu.memory_space<vmem>>, vector<16x256xbf16>,
    } else {
    }
    return
  }
  func.func @transform_0(%arg0: i32, %arg1: i32, %arg2: i32) -> (i32, i32) {
    %c0_i32 = arith.constant 0 : i32
    return %arg0, %arg2 : i32, i32
  }
  func.func @transform_1(%arg0: i32, %arg1: i32, %arg2: i32) -> (i32, i32) {
    %c0_i32 = arith.constant 0 : i32
    return %arg2, %arg1 : i32, i32
  }
  func.func @transform_2(%arg0: i32, %arg1: i32, %arg2: i32) -> (i32, i32) {
    %c0_i32 = arith.constant 0 : i32
    %c0_i32_0 = arith.constant 0 : i32
    return %c0_i32, %arg1 : i32, i32
  }
  func.func @transform_3(%arg0: i32, %arg1: i32, %arg2: i32) -> (i32, i32) {
    %c0_i32 = arith.constant 0 : i32
    return %arg0, %arg1 : i32, i32
  }
}

module attributes {stable_mosaic.version = 11 : i64} {
  func.func @kernel(%arg0: i32, %arg1: i32, %arg2: i32, %arg3: memref<16x128xbf16, #tpu.memory_space<vmem>>, %arg4: memref<128x256xbf16, #tpu.memory_space<vmem>>, %arg5: memref<1x256xf32, #tpu.memory_space<vmem>>, %arg6: memref<16x256xbf16, #tpu.memory_space<vmem>>, %arg7: memref<16x256xf32, #tpu.memory_space<vmem>>) attributes {dimension_semantics = [#tpu.dimension_semantics<parallel>, #tpu.dimension_semantics<parallel>, #tpu.dimension_semantics<arbitrary>], iteration_bounds = array<i64: 1, 1, 1>, scalar_prefetch = 0 : i64, scratch_operands = 1 : i64, tpu.core_type = #tpu.core_type<tc>, window_params = [{transform_indices = @transform_0, window_bounds = array<i64: 16, 128>}, {transform_indices = @transform_1, window_bounds = array<i64: 128, 256>}, {transform_indices = @transform_2, window_bounds = array<i64: 1, 256>}, {transform_indices = @transform_3, window_bounds = array<i64: 16, 256>}]} {
    %c0_i32 = arith.constant 0 : i32
    %0 = arith.cmpi eq, %arg2, %c0_i32 : i32
    %1 = arith.extui %0 : i1 to i32
    %c0_i32_0 = arith.constant 0 : i32
    %2 = arith.cmpi ne, %1, %c0_i32_0 : i32
    scf.if %2 {
      %cst_10 = arith.constant 0.000000e+00 : f32
      %12 = vector.broadcast %cst_10 : f32 to vector<16x256xf32>
      %c0_11 = arith.constant 0 : index
      %c0_12 = arith.constant 0 : index
      %13 = vector.load %arg7[%c0_11, %c0_12] : memref<16x256xf32, #tpu.memory_space<vmem>>, vector<16x256xf32>
      tpu.vector_store %arg7[%c0_11, %c0_12], %12 {strides = array<i32>} : memref<16x256xf32, #tpu.memory_space<vmem>>, vector<16x256xf32>,
    } else {
    }
    %c0 = arith.constant 0 : index
    %c0_1 = arith.constant 0 : index
    %3 = vector.load %arg7[%c0, %c0_1] : memref<16x256xf32, #tpu.memory_space<vmem>>, vector<16x256xf32>
    %c0_2 = arith.constant 0 : index
    %c0_3 = arith.constant 0 : index
    %4 = vector.load %arg3[%c0_2, %c0_3] : memref<16x128xbf16, #tpu.memory_space<vmem>>, vector<16x128xbf16>
    %c0_4 = arith.constant 0 : index
    %c0_5 = arith.constant 0 : index
    %5 = vector.load %arg4[%c0_4, %c0_5] : memref<128x256xbf16, #tpu.memory_space<vmem>>, vector<128x256xbf16>
    %cst = arith.constant dense<0.000000e+00> : vector<16x256xf32>
    %6 = tpu.matmul %4, %5, %cst {dimension_numbers = #tpu.dot_dimension_numbers<[1], [0], [0], [1], [0, 0, 1, 1], [], []>} : vector<16x128xbf16>, vector<128x256xbf16>, vector<16x256xf32> -> vector<16x256xf32>
    %7 = arith.addf %3, %6 : vector<16x256xf32>
    %c0_6 = arith.constant 0 : index
    %c0_7 = arith.constant 0 : index
    %8 = vector.load %arg7[%c0_6, %c0_7] : memref<16x256xf32, #tpu.memory_space<vmem>>, vector<16x256xf32>
    tpu.vector_store %arg7[%c0_6, %c0_7], %7 {strides = array<i32>} : memref<16x256xf32, #tpu.memory_space<vmem>>, vector<16x256xf32>,
    %c0_i32_8 = arith.constant 0 : i32
    %9 = arith.cmpi eq, %arg2, %c0_i32_8 : i32
    %10 = arith.extui %9 : i1 to i32
    %c0_i32_9 = arith.constant 0 : i32
    %11 = arith.cmpi ne, %10, %c0_i32_9 : i32
    scf.if %11 {
      %c0_10 = arith.constant 0 : index
      %c0_11 = arith.constant 0 : index
      %12 = vector.load %arg7[%c0_10, %c0_11] : memref<16x256xf32, #tpu.memory_space<vmem>>, vector<16x256xf32>
      %c0_12 = arith.constant 0 : index
      %c0_13 = arith.constant 0 : index
      %13 = vector.load %arg5[%c0_12, %c0_13] : memref<1x256xf32, #tpu.memory_space<vmem>>, vector<1x256xf32>
      %14 = vector.broadcast %13 : vector<1x256xf32> to vector<16x256xf32>
      %15 = arith.addf %12, %14 : vector<16x256xf32>
      %16 = arith.truncf %15 : vector<16x256xf32> to vector<16x256xbf16>
      %c0_14 = arith.constant 0 : index
      %c0_15 = arith.constant 0 : index
      %17 = vector.load %arg6[%c0_14, %c0_15] : memref<16x256xbf16, #tpu.memory_space<vmem>>, vector<16x256xbf16>
      tpu.vector_store %arg6[%c0_14, %c0_15], %16 {strides = array<i32>} : memref<16x256xbf16, #tpu.memory_space<vmem>>, vector<16x256xbf16>,
    } else {
    }
    return
  }
  func.func @transform_0(%arg0: i32, %arg1: i32, %arg2: i32) -> (i32, i32) {
    %c0_i32 = arith.constant 0 : i32
    return %arg0, %arg2 : i32, i32
  }
  func.func @transform_1(%arg0: i32, %arg1: i32, %arg2: i32) -> (i32, i32) {
    %c0_i32 = arith.constant 0 : i32
    return %arg2, %arg1 : i32, i32
  }
  func.func @transform_2(%arg0: i32, %arg1: i32, %arg2: i32) -> (i32, i32) {
    %c0_i32 = arith.constant 0 : i32
    %c0_i32_0 = arith.constant 0 : i32
    return %c0_i32, %arg1 : i32, i32
  }
  func.func @transform_3(%arg0: i32, %arg1: i32, %arg2: i32) -> (i32, i32) {
    %c0_i32 = arith.constant 0 : i32
    return %arg0, %arg1 : i32, i32
  }
}

module attributes {stable_mosaic.version = 11 : i64} {
  func.func @kernel(%arg0: i32, %arg1: i32, %arg2: i32, %arg3: memref<16x384xbf16, #tpu.memory_space<vmem>>, %arg4: memref<384x256xbf16, #tpu.memory_space<vmem>>, %arg5: memref<1x256xf32, #tpu.memory_space<vmem>>, %arg6: memref<16x256xbf16, #tpu.memory_space<vmem>>, %arg7: memref<16x256xbf16, #tpu.memory_space<vmem>>, %arg8: memref<16x256xf32, #tpu.memory_space<vmem>>) attributes {dimension_semantics = [#tpu.dimension_semantics<parallel>, #tpu.dimension_semantics<parallel>, #tpu.dimension_semantics<arbitrary>], iteration_bounds = array<i64: 1, 1, 6>, scalar_prefetch = 0 : i64, scratch_operands = 1 : i64, tpu.core_type = #tpu.core_type<tc>, window_params = [{transform_indices = @transform_0, window_bounds = array<i64: 16, 384>}, {transform_indices = @transform_1, window_bounds = array<i64: 384, 256>}, {transform_indices = @transform_2, window_bounds = array<i64: 1, 256>}, {transform_indices = @transform_3, window_bounds = array<i64: 16, 256>}, {transform_indices = @transform_4, window_bounds = array<i64: 16, 256>}]} {
    %c0_i32 = arith.constant 0 : i32
    %0 = arith.cmpi eq, %arg2, %c0_i32 : i32
    %1 = arith.extui %0 : i1 to i32
    %c0_i32_0 = arith.constant 0 : i32
    %2 = arith.cmpi ne, %1, %c0_i32_0 : i32
    scf.if %2 {
      %cst_9 = arith.constant 0.000000e+00 : f32
      %12 = vector.broadcast %cst_9 : f32 to vector<16x256xf32>
      %c0_10 = arith.constant 0 : index
      %c0_11 = arith.constant 0 : index
      %13 = vector.load %arg8[%c0_10, %c0_11] : memref<16x256xf32, #tpu.memory_space<vmem>>, vector<16x256xf32>
      tpu.vector_store %arg8[%c0_10, %c0_11], %12 {strides = array<i32>} : memref<16x256xf32, #tpu.memory_space<vmem>>, vector<16x256xf32>,
    } else {
    }
    %c0 = arith.constant 0 : index
    %c0_1 = arith.constant 0 : index
    %3 = vector.load %arg8[%c0, %c0_1] : memref<16x256xf32, #tpu.memory_space<vmem>>, vector<16x256xf32>
    %c0_2 = arith.constant 0 : index
    %c0_3 = arith.constant 0 : index
    %4 = vector.load %arg3[%c0_2, %c0_3] : memref<16x384xbf16, #tpu.memory_space<vmem>>, vector<16x384xbf16>
    %c0_4 = arith.constant 0 : index
    %c0_5 = arith.constant 0 : index
    %5 = vector.load %arg4[%c0_4, %c0_5] : memref<384x256xbf16, #tpu.memory_space<vmem>>, vector<384x256xbf16>
    %cst = arith.constant dense<0.000000e+00> : vector<16x256xf32>
    %6 = tpu.matmul %4, %5, %cst {dimension_numbers = #tpu.dot_dimension_numbers<[1], [0], [0], [1], [0, 0, 1, 1], [], []>} : vector<16x384xbf16>, vector<384x256xbf16>, vector<16x256xf32> -> vector<16x256xf32>
    %7 = arith.addf %3, %6 : vector<16x256xf32>
    %c0_6 = arith.constant 0 : index
    %c0_7 = arith.constant 0 : index
    %8 = vector.load %arg8[%c0_6, %c0_7] : memref<16x256xf32, #tpu.memory_space<vmem>>, vector<16x256xf32>
    tpu.vector_store %arg8[%c0_6, %c0_7], %7 {strides = array<i32>} : memref<16x256xf32, #tpu.memory_space<vmem>>, vector<16x256xf32>,
    %c5_i32 = arith.constant 5 : i32
    %9 = arith.cmpi eq, %arg2, %c5_i32 : i32
    %10 = arith.extui %9 : i1 to i32
    %c0_i32_8 = arith.constant 0 : i32
    %11 = arith.cmpi ne, %10, %c0_i32_8 : i32
    scf.if %11 {
      %c0_9 = arith.constant 0 : index
      %c0_10 = arith.constant 0 : index
      %12 = vector.load %arg8[%c0_9, %c0_10] : memref<16x256xf32, #tpu.memory_space<vmem>>, vector<16x256xf32>
      %c0_11 = arith.constant 0 : index
      %c0_12 = arith.constant 0 : index
      %13 = vector.load %arg5[%c0_11, %c0_12] : memref<1x256xf32, #tpu.memory_space<vmem>>, vector<1x256xf32>
      %14 = vector.broadcast %13 : vector<1x256xf32> to vector<16x256xf32>
      %15 = arith.addf %12, %14 : vector<16x256xf32>
      %c0_13 = arith.constant 0 : index
      %c0_14 = arith.constant 0 : index
      %16 = vector.load %arg6[%c0_13, %c0_14] : memref<16x256xbf16, #tpu.memory_space<vmem>>, vector<16x256xbf16>
      %17 = arith.extf %16 : vector<16x256xbf16> to vector<16x256xf32>
      %18 = arith.addf %15, %17 : vector<16x256xf32>
      %cst_15 = arith.constant 0.000000e+00 : f32
      %19 = vector.broadcast %cst_15 : f32 to vector<16x256xf32>
      %20 = arith.maximumf %18, %19 : vector<16x256xf32>
      %21 = arith.truncf %20 : vector<16x256xf32> to vector<16x256xbf16>
      %c0_16 = arith.constant 0 : index
      %c0_17 = arith.constant 0 : index
      %22 = vector.load %arg7[%c0_16, %c0_17] : memref<16x256xbf16, #tpu.memory_space<vmem>>, vector<16x256xbf16>
      tpu.vector_store %arg7[%c0_16, %c0_17], %21 {strides = array<i32>} : memref<16x256xbf16, #tpu.memory_space<vmem>>, vector<16x256xbf16>,
    } else {
    }
    return
  }
  func.func @transform_0(%arg0: i32, %arg1: i32, %arg2: i32) -> (i32, i32) {
    %c0_i32 = arith.constant 0 : i32
    return %arg0, %arg2 : i32, i32
  }
  func.func @transform_1(%arg0: i32, %arg1: i32, %arg2: i32) -> (i32, i32) {
    %c0_i32 = arith.constant 0 : i32
    return %arg2, %arg1 : i32, i32
  }
  func.func @transform_2(%arg0: i32, %arg1: i32, %arg2: i32) -> (i32, i32) {
    %c0_i32 = arith.constant 0 : i32
    %c0_i32_0 = arith.constant 0 : i32
    return %c0_i32, %arg1 : i32, i32
  }
  func.func @transform_3(%arg0: i32, %arg1: i32, %arg2: i32) -> (i32, i32) {
    %c0_i32 = arith.constant 0 : i32
    return %arg0, %arg1 : i32, i32
  }
  func.func @transform_4(%arg0: i32, %arg1: i32, %arg2: i32) -> (i32, i32) {
    %c0_i32 = arith.constant 0 : i32
    return %arg0, %arg1 : i32, i32
  }
}

module attributes {stable_mosaic.version = 11 : i64} {
  func.func @kernel(%arg0: i32, %arg1: i32, %arg2: i32, %arg3: memref<16x384xbf16, #tpu.memory_space<vmem>>, %arg4: memref<384x256xbf16, #tpu.memory_space<vmem>>, %arg5: memref<1x256xf32, #tpu.memory_space<vmem>>, %arg6: memref<16x256xbf16, #tpu.memory_space<vmem>>, %arg7: memref<16x256xf32, #tpu.memory_space<vmem>>) attributes {dimension_semantics = [#tpu.dimension_semantics<parallel>, #tpu.dimension_semantics<parallel>, #tpu.dimension_semantics<arbitrary>], iteration_bounds = array<i64: 1, 1, 6>, scalar_prefetch = 0 : i64, scratch_operands = 1 : i64, tpu.core_type = #tpu.core_type<tc>, window_params = [{transform_indices = @transform_0, window_bounds = array<i64: 16, 384>}, {transform_indices = @transform_1, window_bounds = array<i64: 384, 256>}, {transform_indices = @transform_2, window_bounds = array<i64: 1, 256>}, {transform_indices = @transform_3, window_bounds = array<i64: 16, 256>}]} {
    %c0_i32 = arith.constant 0 : i32
    %0 = arith.cmpi eq, %arg2, %c0_i32 : i32
    %1 = arith.extui %0 : i1 to i32
    %c0_i32_0 = arith.constant 0 : i32
    %2 = arith.cmpi ne, %1, %c0_i32_0 : i32
    scf.if %2 {
      %cst_9 = arith.constant 0.000000e+00 : f32
      %12 = vector.broadcast %cst_9 : f32 to vector<16x256xf32>
      %c0_10 = arith.constant 0 : index
      %c0_11 = arith.constant 0 : index
      %13 = vector.load %arg7[%c0_10, %c0_11] : memref<16x256xf32, #tpu.memory_space<vmem>>, vector<16x256xf32>
      tpu.vector_store %arg7[%c0_10, %c0_11], %12 {strides = array<i32>} : memref<16x256xf32, #tpu.memory_space<vmem>>, vector<16x256xf32>,
    } else {
    }
    %c0 = arith.constant 0 : index
    %c0_1 = arith.constant 0 : index
    %3 = vector.load %arg7[%c0, %c0_1] : memref<16x256xf32, #tpu.memory_space<vmem>>, vector<16x256xf32>
    %c0_2 = arith.constant 0 : index
    %c0_3 = arith.constant 0 : index
    %4 = vector.load %arg3[%c0_2, %c0_3] : memref<16x384xbf16, #tpu.memory_space<vmem>>, vector<16x384xbf16>
    %c0_4 = arith.constant 0 : index
    %c0_5 = arith.constant 0 : index
    %5 = vector.load %arg4[%c0_4, %c0_5] : memref<384x256xbf16, #tpu.memory_space<vmem>>, vector<384x256xbf16>
    %cst = arith.constant dense<0.000000e+00> : vector<16x256xf32>
    %6 = tpu.matmul %4, %5, %cst {dimension_numbers = #tpu.dot_dimension_numbers<[1], [0], [0], [1], [0, 0, 1, 1], [], []>} : vector<16x384xbf16>, vector<384x256xbf16>, vector<16x256xf32> -> vector<16x256xf32>
    %7 = arith.addf %3, %6 : vector<16x256xf32>
    %c0_6 = arith.constant 0 : index
    %c0_7 = arith.constant 0 : index
    %8 = vector.load %arg7[%c0_6, %c0_7] : memref<16x256xf32, #tpu.memory_space<vmem>>, vector<16x256xf32>
    tpu.vector_store %arg7[%c0_6, %c0_7], %7 {strides = array<i32>} : memref<16x256xf32, #tpu.memory_space<vmem>>, vector<16x256xf32>,
    %c5_i32 = arith.constant 5 : i32
    %9 = arith.cmpi eq, %arg2, %c5_i32 : i32
    %10 = arith.extui %9 : i1 to i32
    %c0_i32_8 = arith.constant 0 : i32
    %11 = arith.cmpi ne, %10, %c0_i32_8 : i32
    scf.if %11 {
      %c0_9 = arith.constant 0 : index
      %c0_10 = arith.constant 0 : index
      %12 = vector.load %arg7[%c0_9, %c0_10] : memref<16x256xf32, #tpu.memory_space<vmem>>, vector<16x256xf32>
      %c0_11 = arith.constant 0 : index
      %c0_12 = arith.constant 0 : index
      %13 = vector.load %arg5[%c0_11, %c0_12] : memref<1x256xf32, #tpu.memory_space<vmem>>, vector<1x256xf32>
      %14 = vector.broadcast %13 : vector<1x256xf32> to vector<16x256xf32>
      %15 = arith.addf %12, %14 : vector<16x256xf32>
      %cst_13 = arith.constant 0.000000e+00 : f32
      %16 = vector.broadcast %cst_13 : f32 to vector<16x256xf32>
      %17 = arith.maximumf %15, %16 : vector<16x256xf32>
      %18 = arith.truncf %17 : vector<16x256xf32> to vector<16x256xbf16>
      %c0_14 = arith.constant 0 : index
      %c0_15 = arith.constant 0 : index
      %19 = vector.load %arg6[%c0_14, %c0_15] : memref<16x256xbf16, #tpu.memory_space<vmem>>, vector<16x256xbf16>
      tpu.vector_store %arg6[%c0_14, %c0_15], %18 {strides = array<i32>} : memref<16x256xbf16, #tpu.memory_space<vmem>>, vector<16x256xbf16>,
    } else {
    }
    return
  }
  func.func @transform_0(%arg0: i32, %arg1: i32, %arg2: i32) -> (i32, i32) {
    %c0_i32 = arith.constant 0 : i32
    return %arg0, %arg2 : i32, i32
  }
  func.func @transform_1(%arg0: i32, %arg1: i32, %arg2: i32) -> (i32, i32) {
    %c0_i32 = arith.constant 0 : i32
    return %arg2, %arg1 : i32, i32
  }
  func.func @transform_2(%arg0: i32, %arg1: i32, %arg2: i32) -> (i32, i32) {
    %c0_i32 = arith.constant 0 : i32
    %c0_i32_0 = arith.constant 0 : i32
    return %c0_i32, %arg1 : i32, i32
  }
  func.func @transform_3(%arg0: i32, %arg1: i32, %arg2: i32) -> (i32, i32) {
    %c0_i32 = arith.constant 0 : i32
    return %arg0, %arg1 : i32, i32
  }
}

module attributes {stable_mosaic.version = 11 : i64} {
  func.func @kernel(%arg0: i32, %arg1: i32, %arg2: i32, %arg3: memref<16x384xbf16, #tpu.memory_space<vmem>>, %arg4: memref<384x512xbf16, #tpu.memory_space<vmem>>, %arg5: memref<1x512xf32, #tpu.memory_space<vmem>>, %arg6: memref<16x512xbf16, #tpu.memory_space<vmem>>, %arg7: memref<16x512xf32, #tpu.memory_space<vmem>>) attributes {dimension_semantics = [#tpu.dimension_semantics<parallel>, #tpu.dimension_semantics<parallel>, #tpu.dimension_semantics<arbitrary>], iteration_bounds = array<i64: 1, 1, 6>, scalar_prefetch = 0 : i64, scratch_operands = 1 : i64, tpu.core_type = #tpu.core_type<tc>, window_params = [{transform_indices = @transform_0, window_bounds = array<i64: 16, 384>}, {transform_indices = @transform_1, window_bounds = array<i64: 384, 512>}, {transform_indices = @transform_2, window_bounds = array<i64: 1, 512>}, {transform_indices = @transform_3, window_bounds = array<i64: 16, 512>}]} {
    %c0_i32 = arith.constant 0 : i32
    %0 = arith.cmpi eq, %arg2, %c0_i32 : i32
    %1 = arith.extui %0 : i1 to i32
    %c0_i32_0 = arith.constant 0 : i32
    %2 = arith.cmpi ne, %1, %c0_i32_0 : i32
    scf.if %2 {
      %cst_9 = arith.constant 0.000000e+00 : f32
      %12 = vector.broadcast %cst_9 : f32 to vector<16x512xf32>
      %c0_10 = arith.constant 0 : index
      %c0_11 = arith.constant 0 : index
      %13 = vector.load %arg7[%c0_10, %c0_11] : memref<16x512xf32, #tpu.memory_space<vmem>>, vector<16x512xf32>
      tpu.vector_store %arg7[%c0_10, %c0_11], %12 {strides = array<i32>} : memref<16x512xf32, #tpu.memory_space<vmem>>, vector<16x512xf32>,
    } else {
    }
    %c0 = arith.constant 0 : index
    %c0_1 = arith.constant 0 : index
    %3 = vector.load %arg7[%c0, %c0_1] : memref<16x512xf32, #tpu.memory_space<vmem>>, vector<16x512xf32>
    %c0_2 = arith.constant 0 : index
    %c0_3 = arith.constant 0 : index
    %4 = vector.load %arg3[%c0_2, %c0_3] : memref<16x384xbf16, #tpu.memory_space<vmem>>, vector<16x384xbf16>
    %c0_4 = arith.constant 0 : index
    %c0_5 = arith.constant 0 : index
    %5 = vector.load %arg4[%c0_4, %c0_5] : memref<384x512xbf16, #tpu.memory_space<vmem>>, vector<384x512xbf16>
    %cst = arith.constant dense<0.000000e+00> : vector<16x512xf32>
    %6 = tpu.matmul %4, %5, %cst {dimension_numbers = #tpu.dot_dimension_numbers<[1], [0], [0], [1], [0, 0, 1, 1], [], []>} : vector<16x384xbf16>, vector<384x512xbf16>, vector<16x512xf32> -> vector<16x512xf32>
    %7 = arith.addf %3, %6 : vector<16x512xf32>
    %c0_6 = arith.constant 0 : index
    %c0_7 = arith.constant 0 : index
    %8 = vector.load %arg7[%c0_6, %c0_7] : memref<16x512xf32, #tpu.memory_space<vmem>>, vector<16x512xf32>
    tpu.vector_store %arg7[%c0_6, %c0_7], %7 {strides = array<i32>} : memref<16x512xf32, #tpu.memory_space<vmem>>, vector<16x512xf32>,
    %c5_i32 = arith.constant 5 : i32
    %9 = arith.cmpi eq, %arg2, %c5_i32 : i32
    %10 = arith.extui %9 : i1 to i32
    %c0_i32_8 = arith.constant 0 : i32
    %11 = arith.cmpi ne, %10, %c0_i32_8 : i32
    scf.if %11 {
      %c0_9 = arith.constant 0 : index
      %c0_10 = arith.constant 0 : index
      %12 = vector.load %arg7[%c0_9, %c0_10] : memref<16x512xf32, #tpu.memory_space<vmem>>, vector<16x512xf32>
      %c0_11 = arith.constant 0 : index
      %c0_12 = arith.constant 0 : index
      %13 = vector.load %arg5[%c0_11, %c0_12] : memref<1x512xf32, #tpu.memory_space<vmem>>, vector<1x512xf32>
      %14 = vector.broadcast %13 : vector<1x512xf32> to vector<16x512xf32>
      %15 = arith.addf %12, %14 : vector<16x512xf32>
      %cst_13 = arith.constant 0.000000e+00 : f32
      %16 = vector.broadcast %cst_13 : f32 to vector<16x512xf32>
      %17 = arith.maximumf %15, %16 : vector<16x512xf32>
      %18 = arith.truncf %17 : vector<16x512xf32> to vector<16x512xbf16>
      %c0_14 = arith.constant 0 : index
      %c0_15 = arith.constant 0 : index
      %19 = vector.load %arg6[%c0_14, %c0_15] : memref<16x512xbf16, #tpu.memory_space<vmem>>, vector<16x512xbf16>
      tpu.vector_store %arg6[%c0_14, %c0_15], %18 {strides = array<i32>} : memref<16x512xbf16, #tpu.memory_space<vmem>>, vector<16x512xbf16>,
    } else {
    }
    return
  }
  func.func @transform_0(%arg0: i32, %arg1: i32, %arg2: i32) -> (i32, i32) {
    %c0_i32 = arith.constant 0 : i32
    return %arg0, %arg2 : i32, i32
  }
  func.func @transform_1(%arg0: i32, %arg1: i32, %arg2: i32) -> (i32, i32) {
    %c0_i32 = arith.constant 0 : i32
    return %arg2, %arg1 : i32, i32
  }
  func.func @transform_2(%arg0: i32, %arg1: i32, %arg2: i32) -> (i32, i32) {
    %c0_i32 = arith.constant 0 : i32
    %c0_i32_0 = arith.constant 0 : i32
    return %c0_i32, %arg1 : i32, i32
  }
  func.func @transform_3(%arg0: i32, %arg1: i32, %arg2: i32) -> (i32, i32) {
    %c0_i32 = arith.constant 0 : i32
    return %arg0, %arg1 : i32, i32
  }
}

module attributes {stable_mosaic.version = 11 : i64} {
  func.func @kernel(%arg0: i32, %arg1: i32, %arg2: i32, %arg3: memref<16x256xbf16, #tpu.memory_space<vmem>>, %arg4: memref<256x512xbf16, #tpu.memory_space<vmem>>, %arg5: memref<1x512xf32, #tpu.memory_space<vmem>>, %arg6: memref<16x512xbf16, #tpu.memory_space<vmem>>, %arg7: memref<16x512xf32, #tpu.memory_space<vmem>>) attributes {dimension_semantics = [#tpu.dimension_semantics<parallel>, #tpu.dimension_semantics<parallel>, #tpu.dimension_semantics<arbitrary>], iteration_bounds = array<i64: 1, 1, 1>, scalar_prefetch = 0 : i64, scratch_operands = 1 : i64, tpu.core_type = #tpu.core_type<tc>, window_params = [{transform_indices = @transform_0, window_bounds = array<i64: 16, 256>}, {transform_indices = @transform_1, window_bounds = array<i64: 256, 512>}, {transform_indices = @transform_2, window_bounds = array<i64: 1, 512>}, {transform_indices = @transform_3, window_bounds = array<i64: 16, 512>}]} {
    %c0_i32 = arith.constant 0 : i32
    %0 = arith.cmpi eq, %arg2, %c0_i32 : i32
    %1 = arith.extui %0 : i1 to i32
    %c0_i32_0 = arith.constant 0 : i32
    %2 = arith.cmpi ne, %1, %c0_i32_0 : i32
    scf.if %2 {
      %cst_10 = arith.constant 0.000000e+00 : f32
      %12 = vector.broadcast %cst_10 : f32 to vector<16x512xf32>
      %c0_11 = arith.constant 0 : index
      %c0_12 = arith.constant 0 : index
      %13 = vector.load %arg7[%c0_11, %c0_12] : memref<16x512xf32, #tpu.memory_space<vmem>>, vector<16x512xf32>
      tpu.vector_store %arg7[%c0_11, %c0_12], %12 {strides = array<i32>} : memref<16x512xf32, #tpu.memory_space<vmem>>, vector<16x512xf32>,
    } else {
    }
    %c0 = arith.constant 0 : index
    %c0_1 = arith.constant 0 : index
    %3 = vector.load %arg7[%c0, %c0_1] : memref<16x512xf32, #tpu.memory_space<vmem>>, vector<16x512xf32>
    %c0_2 = arith.constant 0 : index
    %c0_3 = arith.constant 0 : index
    %4 = vector.load %arg3[%c0_2, %c0_3] : memref<16x256xbf16, #tpu.memory_space<vmem>>, vector<16x256xbf16>
    %c0_4 = arith.constant 0 : index
    %c0_5 = arith.constant 0 : index
    %5 = vector.load %arg4[%c0_4, %c0_5] : memref<256x512xbf16, #tpu.memory_space<vmem>>, vector<256x512xbf16>
    %cst = arith.constant dense<0.000000e+00> : vector<16x512xf32>
    %6 = tpu.matmul %4, %5, %cst {dimension_numbers = #tpu.dot_dimension_numbers<[1], [0], [0], [1], [0, 0, 1, 1], [], []>} : vector<16x256xbf16>, vector<256x512xbf16>, vector<16x512xf32> -> vector<16x512xf32>
    %7 = arith.addf %3, %6 : vector<16x512xf32>
    %c0_6 = arith.constant 0 : index
    %c0_7 = arith.constant 0 : index
    %8 = vector.load %arg7[%c0_6, %c0_7] : memref<16x512xf32, #tpu.memory_space<vmem>>, vector<16x512xf32>
    tpu.vector_store %arg7[%c0_6, %c0_7], %7 {strides = array<i32>} : memref<16x512xf32, #tpu.memory_space<vmem>>, vector<16x512xf32>,
    %c0_i32_8 = arith.constant 0 : i32
    %9 = arith.cmpi eq, %arg2, %c0_i32_8 : i32
    %10 = arith.extui %9 : i1 to i32
    %c0_i32_9 = arith.constant 0 : i32
    %11 = arith.cmpi ne, %10, %c0_i32_9 : i32
    scf.if %11 {
      %c0_10 = arith.constant 0 : index
      %c0_11 = arith.constant 0 : index
      %12 = vector.load %arg7[%c0_10, %c0_11] : memref<16x512xf32, #tpu.memory_space<vmem>>, vector<16x512xf32>
      %c0_12 = arith.constant 0 : index
      %c0_13 = arith.constant 0 : index
      %13 = vector.load %arg5[%c0_12, %c0_13] : memref<1x512xf32, #tpu.memory_space<vmem>>, vector<1x512xf32>
      %14 = vector.broadcast %13 : vector<1x512xf32> to vector<16x512xf32>
      %15 = arith.addf %12, %14 : vector<16x512xf32>
      %16 = arith.truncf %15 : vector<16x512xf32> to vector<16x512xbf16>
      %c0_14 = arith.constant 0 : index
      %c0_15 = arith.constant 0 : index
      %17 = vector.load %arg6[%c0_14, %c0_15] : memref<16x512xbf16, #tpu.memory_space<vmem>>, vector<16x512xbf16>
      tpu.vector_store %arg6[%c0_14, %c0_15], %16 {strides = array<i32>} : memref<16x512xbf16, #tpu.memory_space<vmem>>, vector<16x512xbf16>,
    } else {
    }
    return
  }
  func.func @transform_0(%arg0: i32, %arg1: i32, %arg2: i32) -> (i32, i32) {
    %c0_i32 = arith.constant 0 : i32
    return %arg0, %arg2 : i32, i32
  }
  func.func @transform_1(%arg0: i32, %arg1: i32, %arg2: i32) -> (i32, i32) {
    %c0_i32 = arith.constant 0 : i32
    return %arg2, %arg1 : i32, i32
  }
  func.func @transform_2(%arg0: i32, %arg1: i32, %arg2: i32) -> (i32, i32) {
    %c0_i32 = arith.constant 0 : i32
    %c0_i32_0 = arith.constant 0 : i32
    return %c0_i32, %arg1 : i32, i32
  }
  func.func @transform_3(%arg0: i32, %arg1: i32, %arg2: i32) -> (i32, i32) {
    %c0_i32 = arith.constant 0 : i32
    return %arg0, %arg1 : i32, i32
  }
}

module attributes {stable_mosaic.version = 11 : i64} {
  func.func @kernel(%arg0: i32, %arg1: i32, %arg2: i32, %arg3: memref<16x512xbf16, #tpu.memory_space<vmem>>, %arg4: memref<512x512xbf16, #tpu.memory_space<vmem>>, %arg5: memref<1x512xf32, #tpu.memory_space<vmem>>, %arg6: memref<16x512xbf16, #tpu.memory_space<vmem>>, %arg7: memref<16x512xbf16, #tpu.memory_space<vmem>>, %arg8: memref<16x512xf32, #tpu.memory_space<vmem>>) attributes {dimension_semantics = [#tpu.dimension_semantics<parallel>, #tpu.dimension_semantics<parallel>, #tpu.dimension_semantics<arbitrary>], iteration_bounds = array<i64: 1, 1, 9>, scalar_prefetch = 0 : i64, scratch_operands = 1 : i64, tpu.core_type = #tpu.core_type<tc>, window_params = [{transform_indices = @transform_0, window_bounds = array<i64: 16, 512>}, {transform_indices = @transform_1, window_bounds = array<i64: 512, 512>}, {transform_indices = @transform_2, window_bounds = array<i64: 1, 512>}, {transform_indices = @transform_3, window_bounds = array<i64: 16, 512>}, {transform_indices = @transform_4, window_bounds = array<i64: 16, 512>}]} {
    %c0_i32 = arith.constant 0 : i32
    %0 = arith.cmpi eq, %arg2, %c0_i32 : i32
    %1 = arith.extui %0 : i1 to i32
    %c0_i32_0 = arith.constant 0 : i32
    %2 = arith.cmpi ne, %1, %c0_i32_0 : i32
    scf.if %2 {
      %cst_9 = arith.constant 0.000000e+00 : f32
      %12 = vector.broadcast %cst_9 : f32 to vector<16x512xf32>
      %c0_10 = arith.constant 0 : index
      %c0_11 = arith.constant 0 : index
      %13 = vector.load %arg8[%c0_10, %c0_11] : memref<16x512xf32, #tpu.memory_space<vmem>>, vector<16x512xf32>
      tpu.vector_store %arg8[%c0_10, %c0_11], %12 {strides = array<i32>} : memref<16x512xf32, #tpu.memory_space<vmem>>, vector<16x512xf32>,
    } else {
    }
    %c0 = arith.constant 0 : index
    %c0_1 = arith.constant 0 : index
    %3 = vector.load %arg8[%c0, %c0_1] : memref<16x512xf32, #tpu.memory_space<vmem>>, vector<16x512xf32>
    %c0_2 = arith.constant 0 : index
    %c0_3 = arith.constant 0 : index
    %4 = vector.load %arg3[%c0_2, %c0_3] : memref<16x512xbf16, #tpu.memory_space<vmem>>, vector<16x512xbf16>
    %c0_4 = arith.constant 0 : index
    %c0_5 = arith.constant 0 : index
    %5 = vector.load %arg4[%c0_4, %c0_5] : memref<512x512xbf16, #tpu.memory_space<vmem>>, vector<512x512xbf16>
    %cst = arith.constant dense<0.000000e+00> : vector<16x512xf32>
    %6 = tpu.matmul %4, %5, %cst {dimension_numbers = #tpu.dot_dimension_numbers<[1], [0], [0], [1], [0, 0, 1, 1], [], []>} : vector<16x512xbf16>, vector<512x512xbf16>, vector<16x512xf32> -> vector<16x512xf32>
    %7 = arith.addf %3, %6 : vector<16x512xf32>
    %c0_6 = arith.constant 0 : index
    %c0_7 = arith.constant 0 : index
    %8 = vector.load %arg8[%c0_6, %c0_7] : memref<16x512xf32, #tpu.memory_space<vmem>>, vector<16x512xf32>
    tpu.vector_store %arg8[%c0_6, %c0_7], %7 {strides = array<i32>} : memref<16x512xf32, #tpu.memory_space<vmem>>, vector<16x512xf32>,
    %c8_i32 = arith.constant 8 : i32
    %9 = arith.cmpi eq, %arg2, %c8_i32 : i32
    %10 = arith.extui %9 : i1 to i32
    %c0_i32_8 = arith.constant 0 : i32
    %11 = arith.cmpi ne, %10, %c0_i32_8 : i32
    scf.if %11 {
      %c0_9 = arith.constant 0 : index
      %c0_10 = arith.constant 0 : index
      %12 = vector.load %arg8[%c0_9, %c0_10] : memref<16x512xf32, #tpu.memory_space<vmem>>, vector<16x512xf32>
      %c0_11 = arith.constant 0 : index
      %c0_12 = arith.constant 0 : index
      %13 = vector.load %arg5[%c0_11, %c0_12] : memref<1x512xf32, #tpu.memory_space<vmem>>, vector<1x512xf32>
      %14 = vector.broadcast %13 : vector<1x512xf32> to vector<16x512xf32>
      %15 = arith.addf %12, %14 : vector<16x512xf32>
      %c0_13 = arith.constant 0 : index
      %c0_14 = arith.constant 0 : index
      %16 = vector.load %arg6[%c0_13, %c0_14] : memref<16x512xbf16, #tpu.memory_space<vmem>>, vector<16x512xbf16>
      %17 = arith.extf %16 : vector<16x512xbf16> to vector<16x512xf32>
      %18 = arith.addf %15, %17 : vector<16x512xf32>
      %cst_15 = arith.constant 0.000000e+00 : f32
      %19 = vector.broadcast %cst_15 : f32 to vector<16x512xf32>
      %20 = arith.maximumf %18, %19 : vector<16x512xf32>
      %21 = arith.truncf %20 : vector<16x512xf32> to vector<16x512xbf16>
      %c0_16 = arith.constant 0 : index
      %c0_17 = arith.constant 0 : index
      %22 = vector.load %arg7[%c0_16, %c0_17] : memref<16x512xbf16, #tpu.memory_space<vmem>>, vector<16x512xbf16>
      tpu.vector_store %arg7[%c0_16, %c0_17], %21 {strides = array<i32>} : memref<16x512xbf16, #tpu.memory_space<vmem>>, vector<16x512xbf16>,
    } else {
    }
    return
  }
  func.func @transform_0(%arg0: i32, %arg1: i32, %arg2: i32) -> (i32, i32) {
    %c0_i32 = arith.constant 0 : i32
    return %arg0, %arg2 : i32, i32
  }
  func.func @transform_1(%arg0: i32, %arg1: i32, %arg2: i32) -> (i32, i32) {
    %c0_i32 = arith.constant 0 : i32
    return %arg2, %arg1 : i32, i32
  }
  func.func @transform_2(%arg0: i32, %arg1: i32, %arg2: i32) -> (i32, i32) {
    %c0_i32 = arith.constant 0 : i32
    %c0_i32_0 = arith.constant 0 : i32
    return %c0_i32, %arg1 : i32, i32
  }
  func.func @transform_3(%arg0: i32, %arg1: i32, %arg2: i32) -> (i32, i32) {
    %c0_i32 = arith.constant 0 : i32
    return %arg0, %arg1 : i32, i32
  }
  func.func @transform_4(%arg0: i32, %arg1: i32, %arg2: i32) -> (i32, i32) {
    %c0_i32 = arith.constant 0 : i32
    return %arg0, %arg1 : i32, i32
  }
}

module attributes {stable_mosaic.version = 11 : i64} {
  func.func @kernel(%arg0: i32, %arg1: i32, %arg2: i32, %arg3: memref<16x512xbf16, #tpu.memory_space<vmem>>, %arg4: memref<512x512xbf16, #tpu.memory_space<vmem>>, %arg5: memref<1x512xf32, #tpu.memory_space<vmem>>, %arg6: memref<16x512xbf16, #tpu.memory_space<vmem>>, %arg7: memref<16x512xf32, #tpu.memory_space<vmem>>) attributes {dimension_semantics = [#tpu.dimension_semantics<parallel>, #tpu.dimension_semantics<parallel>, #tpu.dimension_semantics<arbitrary>], iteration_bounds = array<i64: 1, 1, 9>, scalar_prefetch = 0 : i64, scratch_operands = 1 : i64, tpu.core_type = #tpu.core_type<tc>, window_params = [{transform_indices = @transform_0, window_bounds = array<i64: 16, 512>}, {transform_indices = @transform_1, window_bounds = array<i64: 512, 512>}, {transform_indices = @transform_2, window_bounds = array<i64: 1, 512>}, {transform_indices = @transform_3, window_bounds = array<i64: 16, 512>}]} {
    %c0_i32 = arith.constant 0 : i32
    %0 = arith.cmpi eq, %arg2, %c0_i32 : i32
    %1 = arith.extui %0 : i1 to i32
    %c0_i32_0 = arith.constant 0 : i32
    %2 = arith.cmpi ne, %1, %c0_i32_0 : i32
    scf.if %2 {
      %cst_9 = arith.constant 0.000000e+00 : f32
      %12 = vector.broadcast %cst_9 : f32 to vector<16x512xf32>
      %c0_10 = arith.constant 0 : index
      %c0_11 = arith.constant 0 : index
      %13 = vector.load %arg7[%c0_10, %c0_11] : memref<16x512xf32, #tpu.memory_space<vmem>>, vector<16x512xf32>
      tpu.vector_store %arg7[%c0_10, %c0_11], %12 {strides = array<i32>} : memref<16x512xf32, #tpu.memory_space<vmem>>, vector<16x512xf32>,
    } else {
    }
    %c0 = arith.constant 0 : index
    %c0_1 = arith.constant 0 : index
    %3 = vector.load %arg7[%c0, %c0_1] : memref<16x512xf32, #tpu.memory_space<vmem>>, vector<16x512xf32>
    %c0_2 = arith.constant 0 : index
    %c0_3 = arith.constant 0 : index
    %4 = vector.load %arg3[%c0_2, %c0_3] : memref<16x512xbf16, #tpu.memory_space<vmem>>, vector<16x512xbf16>
    %c0_4 = arith.constant 0 : index
    %c0_5 = arith.constant 0 : index
    %5 = vector.load %arg4[%c0_4, %c0_5] : memref<512x512xbf16, #tpu.memory_space<vmem>>, vector<512x512xbf16>
    %cst = arith.constant dense<0.000000e+00> : vector<16x512xf32>
    %6 = tpu.matmul %4, %5, %cst {dimension_numbers = #tpu.dot_dimension_numbers<[1], [0], [0], [1], [0, 0, 1, 1], [], []>} : vector<16x512xbf16>, vector<512x512xbf16>, vector<16x512xf32> -> vector<16x512xf32>
    %7 = arith.addf %3, %6 : vector<16x512xf32>
    %c0_6 = arith.constant 0 : index
    %c0_7 = arith.constant 0 : index
    %8 = vector.load %arg7[%c0_6, %c0_7] : memref<16x512xf32, #tpu.memory_space<vmem>>, vector<16x512xf32>
    tpu.vector_store %arg7[%c0_6, %c0_7], %7 {strides = array<i32>} : memref<16x512xf32, #tpu.memory_space<vmem>>, vector<16x512xf32>,
    %c8_i32 = arith.constant 8 : i32
    %9 = arith.cmpi eq, %arg2, %c8_i32 : i32
    %10 = arith.extui %9 : i1 to i32
    %c0_i32_8 = arith.constant 0 : i32
    %11 = arith.cmpi ne, %10, %c0_i32_8 : i32
    scf.if %11 {
      %c0_9 = arith.constant 0 : index
      %c0_10 = arith.constant 0 : index
      %12 = vector.load %arg7[%c0_9, %c0_10] : memref<16x512xf32, #tpu.memory_space<vmem>>, vector<16x512xf32>
      %c0_11 = arith.constant 0 : index
      %c0_12 = arith.constant 0 : index
      %13 = vector.load %arg5[%c0_11, %c0_12] : memref<1x512xf32, #tpu.memory_space<vmem>>, vector<1x512xf32>
      %14 = vector.broadcast %13 : vector<1x512xf32> to vector<16x512xf32>
      %15 = arith.addf %12, %14 : vector<16x512xf32>
      %cst_13 = arith.constant 0.000000e+00 : f32
      %16 = vector.broadcast %cst_13 : f32 to vector<16x512xf32>
      %17 = arith.maximumf %15, %16 : vector<16x512xf32>
      %18 = arith.truncf %17 : vector<16x512xf32> to vector<16x512xbf16>
      %c0_14 = arith.constant 0 : index
      %c0_15 = arith.constant 0 : index
      %19 = vector.load %arg6[%c0_14, %c0_15] : memref<16x512xbf16, #tpu.memory_space<vmem>>, vector<16x512xbf16>
      tpu.vector_store %arg6[%c0_14, %c0_15], %18 {strides = array<i32>} : memref<16x512xbf16, #tpu.memory_space<vmem>>, vector<16x512xbf16>,
    } else {
    }
    return
  }
  func.func @transform_0(%arg0: i32, %arg1: i32, %arg2: i32) -> (i32, i32) {
    %c0_i32 = arith.constant 0 : i32
    return %arg0, %arg2 : i32, i32
  }
  func.func @transform_1(%arg0: i32, %arg1: i32, %arg2: i32) -> (i32, i32) {
    %c0_i32 = arith.constant 0 : i32
    return %arg2, %arg1 : i32, i32
  }
  func.func @transform_2(%arg0: i32, %arg1: i32, %arg2: i32) -> (i32, i32) {
    %c0_i32 = arith.constant 0 : i32
    %c0_i32_0 = arith.constant 0 : i32
    return %c0_i32, %arg1 : i32, i32
  }
  func.func @transform_3(%arg0: i32, %arg1: i32, %arg2: i32) -> (i32, i32) {
    %c0_i32 = arith.constant 0 : i32
    return %arg0, %arg1 : i32, i32
  }
}

module attributes {stable_mosaic.version = 11 : i64} {
  func.func @kernel(%arg0: i32, %arg1: i32, %arg2: i32, %arg3: memref<16x512xbf16, #tpu.memory_space<vmem>>, %arg4: memref<512x512xbf16, #tpu.memory_space<vmem>>, %arg5: memref<1x512xf32, #tpu.memory_space<vmem>>, %arg6: memref<16x512xf32, #tpu.memory_space<vmem>>, %arg7: memref<16x512xf32, #tpu.memory_space<vmem>>) attributes {dimension_semantics = [#tpu.dimension_semantics<parallel>, #tpu.dimension_semantics<parallel>, #tpu.dimension_semantics<arbitrary>], iteration_bounds = array<i64: 1, 2, 1>, scalar_prefetch = 0 : i64, scratch_operands = 1 : i64, tpu.core_type = #tpu.core_type<tc>, window_params = [{transform_indices = @transform_0, window_bounds = array<i64: 16, 512>}, {transform_indices = @transform_1, window_bounds = array<i64: 512, 512>}, {transform_indices = @transform_2, window_bounds = array<i64: 1, 512>}, {transform_indices = @transform_3, window_bounds = array<i64: 16, 512>}]} {
    %c0_i32 = arith.constant 0 : i32
    %0 = arith.cmpi eq, %arg2, %c0_i32 : i32
    %1 = arith.extui %0 : i1 to i32
    %c0_i32_0 = arith.constant 0 : i32
    %2 = arith.cmpi ne, %1, %c0_i32_0 : i32
    scf.if %2 {
      %cst_10 = arith.constant 0.000000e+00 : f32
      %12 = vector.broadcast %cst_10 : f32 to vector<16x512xf32>
      %c0_11 = arith.constant 0 : index
      %c0_12 = arith.constant 0 : index
      %13 = vector.load %arg7[%c0_11, %c0_12] : memref<16x512xf32, #tpu.memory_space<vmem>>, vector<16x512xf32>
      tpu.vector_store %arg7[%c0_11, %c0_12], %12 {strides = array<i32>} : memref<16x512xf32, #tpu.memory_space<vmem>>, vector<16x512xf32>,
    } else {
    }
    %c0 = arith.constant 0 : index
    %c0_1 = arith.constant 0 : index
    %3 = vector.load %arg7[%c0, %c0_1] : memref<16x512xf32, #tpu.memory_space<vmem>>, vector<16x512xf32>
    %c0_2 = arith.constant 0 : index
    %c0_3 = arith.constant 0 : index
    %4 = vector.load %arg3[%c0_2, %c0_3] : memref<16x512xbf16, #tpu.memory_space<vmem>>, vector<16x512xbf16>
    %c0_4 = arith.constant 0 : index
    %c0_5 = arith.constant 0 : index
    %5 = vector.load %arg4[%c0_4, %c0_5] : memref<512x512xbf16, #tpu.memory_space<vmem>>, vector<512x512xbf16>
    %cst = arith.constant dense<0.000000e+00> : vector<16x512xf32>
    %6 = tpu.matmul %4, %5, %cst {dimension_numbers = #tpu.dot_dimension_numbers<[1], [0], [0], [1], [0, 0, 1, 1], [], []>} : vector<16x512xbf16>, vector<512x512xbf16>, vector<16x512xf32> -> vector<16x512xf32>
    %7 = arith.addf %3, %6 : vector<16x512xf32>
    %c0_6 = arith.constant 0 : index
    %c0_7 = arith.constant 0 : index
    %8 = vector.load %arg7[%c0_6, %c0_7] : memref<16x512xf32, #tpu.memory_space<vmem>>, vector<16x512xf32>
    tpu.vector_store %arg7[%c0_6, %c0_7], %7 {strides = array<i32>} : memref<16x512xf32, #tpu.memory_space<vmem>>, vector<16x512xf32>,
    %c0_i32_8 = arith.constant 0 : i32
    %9 = arith.cmpi eq, %arg2, %c0_i32_8 : i32
    %10 = arith.extui %9 : i1 to i32
    %c0_i32_9 = arith.constant 0 : i32
    %11 = arith.cmpi ne, %10, %c0_i32_9 : i32
    scf.if %11 {
      %c0_10 = arith.constant 0 : index
      %c0_11 = arith.constant 0 : index
      %12 = vector.load %arg7[%c0_10, %c0_11] : memref<16x512xf32, #tpu.memory_space<vmem>>, vector<16x512xf32>
      %c0_12 = arith.constant 0 : index
      %c0_13 = arith.constant 0 : index
      %13 = vector.load %arg5[%c0_12, %c0_13] : memref<1x512xf32, #tpu.memory_space<vmem>>, vector<1x512xf32>
      %14 = vector.broadcast %13 : vector<1x512xf32> to vector<16x512xf32>
      %15 = arith.addf %12, %14 : vector<16x512xf32>
      %cst_14 = arith.constant 0.000000e+00 : f32
      %16 = vector.broadcast %cst_14 : f32 to vector<16x512xf32>
      %17 = arith.maximumf %15, %16 : vector<16x512xf32>
      %c0_15 = arith.constant 0 : index
      %c0_16 = arith.constant 0 : index
      %18 = vector.load %arg6[%c0_15, %c0_16] : memref<16x512xf32, #tpu.memory_space<vmem>>, vector<16x512xf32>
      tpu.vector_store %arg6[%c0_15, %c0_16], %17 {strides = array<i32>} : memref<16x512xf32, #tpu.memory_space<vmem>>, vector<16x512xf32>,
    } else {
    }
    return
  }
  func.func @transform_0(%arg0: i32, %arg1: i32, %arg2: i32) -> (i32, i32) {
    %c0_i32 = arith.constant 0 : i32
    return %arg0, %arg2 : i32, i32
  }
  func.func @transform_1(%arg0: i32, %arg1: i32, %arg2: i32) -> (i32, i32) {
    %c0_i32 = arith.constant 0 : i32
    return %arg2, %arg1 : i32, i32
  }
  func.func @transform_2(%arg0: i32, %arg1: i32, %arg2: i32) -> (i32, i32) {
    %c0_i32 = arith.constant 0 : i32
    %c0_i32_0 = arith.constant 0 : i32
    return %c0_i32, %arg1 : i32, i32
  }
  func.func @transform_3(%arg0: i32, %arg1: i32, %arg2: i32) -> (i32, i32) {
    %c0_i32 = arith.constant 0 : i32
    return %arg0, %arg1 : i32, i32
  }
}

</mosaic_0001>

<bundles_post_ra>
// kernel: se_resnet18_forward.22
= control target key start
LH: loop header
LB: loop body
LE: loop exit
PB: predicated region body
PF: predicated region fallthrough
CT: control target
= control target key end

     0   :  { %s1068_s12 = smov 0   ;;  %s1070_s13 = smov 0   ;;  %s1200_s0 = inlined_call_operand.vmem [shape: bf16[128,640], index: 0, kind: input, shape index: {}]   ;;  %s1201_s1 = inlined_call_operand.vmem [shape: bf16[640,128], index: 1, kind: input, shape index: {}]   ;;  %s1202_s2 = inlined_call_operand.vmem [shape: f32[1,128], index: 2, kind: input, shape index: {}]   ;;  %s1203_s3 = inlined_call_operand.vmem [shape: bf16[128,128], index: 3, kind: output, shape index: {}]  }
   0x1   :  { %s1072_s14 = smov 0   ;;  %s1074_s15 = smov 0  }
   0x2   :  { %s1076_s16 = smov 0  }
   0x3 LB: > { %s25_s17 = sadd.s32 1, %s1041_s15  ;;  %p48_p1 = scmp.ne.s32.totalorder %s1033_s13, %s1029_s12  ;;  %s1045_s16 = sphi %s1076_s16, %s13_s16   ;;  %s1041_s15 = sphi %s1074_s15, %s1207_s15   ;;  %s1037_s14 = sphi %s1072_s14, %s1206_s14   ;;  %s1033_s13 = sphi %s1070_s13, %s1205_s13   ;;  %s1029_s12 = sphi %s1068_s12, %s1204_s12  }
   0x4   : > { %p26_p0 = scmp.ge.s32.totalorder %s25_s17, 5  ;;  %p49_p2 = scmp.eq.s32.totalorder %s1045_s16, 0 }
   0x5   : > { %s41_s19 = sadd.s32 1, %s1033_s13  ;;  %p801_p5 = scmp.ge.s32.totalorder %s1045_s16, 5 }
   0x6   : > { %s1209_s17 = smov (%p26_p0, %s25_s17), 0  ;;  %p50_p3 = por %p49_p2, %p48_p1 }
   0x7   : > { %s37_s18 = ssub.s32 %s1041_s15, %s1209_s17  ;;  %162 = sbr.rel (%p801_p5) target bundleno = 32 (0x20), region = 20 }
   0x8   : > { %p39_p4 = scmp.eq.s32.totalorder %s37_s18, 0 }
   0xa   : > { %s1103_s20 = scalar_select %p39_p4, %s1033_s13, %s41_s19  }
   0xc   : > { %165 = sbr.rel (!%p50_p3) target bundleno = 32 (0x20), region = 24  ;;  %s167_s21 = sand.u32 (%p50_p3), 1, %s1033_s13  }
   0xd   : > { %s803_s22 = sshll.u32 (%p50_p3), %s1041_s15, 2  ;;  %s802_s23 = sshll.u32 (%p50_p3), %s167_s21, 6 }
   0xe   : > { %s1111_s26 = scalar_lea.vmem (%p50_p3), %s1200_s0, %s803_s22  ;;  %s169_s27 = scalar_lea.vmem (%p50_p3), [#allocation3], %s802_s23 }
   0xf   : > { %v191_v0 = vld [vmem:[%s1111_s26] sm:$0xf] (%p50_p3)  ;;  %v193_v1 = vld [vmem:[%s1111_s26 + $0x14] sm:$0xf] (%p50_p3)  ;;  %v195_v2 = vld [vmem:[%s1111_s26 + $0x28] sm:$0xf] (%p50_p3) }
  0x10   : > { %192 = vst [vmem:[%s169_s27] sm:$0xf] (%p50_p3), %v191_v0  ;;  %v197_v3 = vld [vmem:[%s1111_s26 + $0x3c] sm:$0xf] (%p50_p3)  ;;  %v199_v4 = vld [vmem:[%s1111_s26 + $0x50] sm:$0xf] (%p50_p3) }
  0x11   : > { %194 = vst [vmem:[%s169_s27 + $0x4] sm:$0xf] %v193_v1  ;;  %v201_v5 = vld [vmem:[%s1111_s26 + $0x64] sm:$0xf]  ;;  %v203_v6 = vld [vmem:[%s1111_s26 + $0x78] sm:$0xf] }
  0x12   : > { %196 = vst [vmem:[%s169_s27 + $0x8] sm:$0xf] %v195_v2  ;;  %v205_v7 = vld [vmem:[%s1111_s26 + $0x8c] sm:$0xf]  ;;  %v207_v8 = vld [vmem:[%s1111_s26 + $0xa0] sm:$0xf] }
  0x13   : > { %198 = vst [vmem:[%s169_s27 + $0xc] sm:$0xf] %v197_v3  ;;  %v209_v9 = vld [vmem:[%s1111_s26 + $0xb4] sm:$0xf]  ;;  %v211_v10 = vld [vmem:[%s1111_s26 + $0xc8] sm:$0xf] }
  0x14   : > { %200 = vst [vmem:[%s169_s27 + $0x10] sm:$0xf] %v199_v4  ;;  %v213_v11 = vld [vmem:[%s1111_s26 + $0xdc] sm:$0xf]  ;;  %v215_v12 = vld [vmem:[%s1111_s26 + $0xf0] sm:$0xf] }
  0x15   : > { %202 = vst [vmem:[%s169_s27 + $0x14] sm:$0xf] %v201_v5  ;;  %v217_v13 = vld [vmem:[%s1111_s26 + $0x104] sm:$0xf]  ;;  %v219_v14 = vld [vmem:[%s1111_s26 + $0x118] sm:$0xf] }
  0x16   : > { %204 = vst [vmem:[%s169_s27 + $0x18] sm:$0xf] %v203_v6  ;;  %v221_v15 = vld [vmem:[%s1111_s26 + $0x12c] sm:$0xf] }
  0x17   : > { %206 = vst [vmem:[%s169_s27 + $0x1c] sm:$0xf] %v205_v7 }
  0x18   : > { %208 = vst [vmem:[%s169_s27 + $0x20] sm:$0xf] %v207_v8 }
  0x19   : > { %210 = vst [vmem:[%s169_s27 + $0x24] sm:$0xf] %v209_v9 }
  0x1a   : > { %212 = vst [vmem:[%s169_s27 + $0x28] sm:$0xf] %v211_v10 }
  0x1b   : > { %214 = vst [vmem:[%s169_s27 + $0x2c] sm:$0xf] %v213_v11 }
  0x1c   : > { %216 = vst [vmem:[%s169_s27 + $0x30] sm:$0xf] %v215_v12 }
  0x1d   : > { %218 = vst [vmem:[%s169_s27 + $0x34] sm:$0xf] %v217_v13 }
  0x1e   : > { %220 = vst [vmem:[%s169_s27 + $0x38] sm:$0xf] %v219_v14 }
  0x1f   : > { %222 = vst [vmem:[%s169_s27 + $0x3c] sm:$0xf] %v221_v15 }
  0x20 PF: > { %p804_p6 = scmp.ge.s32.totalorder %s1045_s16, 1  ;;  %p289_p7 = scmp.lt.s32.totalorder %s1045_s16, 6 }
  0x22   : > { %p290_p8 = pnand %p804_p6, %p289_p7 }
  0x23   : > { %s296_s28 = sand.u32 (!%p290_p8), 1, %s1029_s12   ;;  %s806_s29 = sshll.u32 (!%p290_p8), %s1037_s14, 4 }
  0x24   : > { %293 = sbr.rel (%p290_p8) target bundleno = 272 (0x110), region = 69  ;;  %s805_s30 = sshll.u32 (!%p290_p8), %s296_s28, 6 }
  0x25   : > { %p335_p9 = scmp.lt.s32.totalorder (!%p290_p8), %s806_s29, 79  ;;  %s1138_s8 = scalar_lea.vmem (!%p290_p8), [#allocation3], %s805_s30 }
  0x26   : > { %p808_p10 = scmp.ne.s32.totalorder (!%p290_p8), %s1037_s14, 0 }
  0x29   : > { %s1211_s29 = smov (!%p335_p9, %s806_s29), 79  ;;  %358 = sbr.rel (%p808_p10) target bundleno = 63 (0x3f), region = 77 }
  0x2a   : > { %s807_s4 = sshll.u32 %s1211_s29, 2 }
  0x2b   : > { %s1136_s7 = scalar_lea.vmem %s1201_s1, %s807_s4 }
  0x2e   : > { %v1047_v16 = vmov 0.0  }
  0x2f   : > { %359 = vst [vmem:[#allocation2 + $0x30] sm:$0xff] %v1047_v16 }
  0x30   : > { %360 = vst [vmem:[#allocation2] sm:$0xff] %v1047_v16 }
  0x31   : > { %361 = vst [vmem:[#allocation2 + $0x58] sm:$0xff] %v1047_v16 }
  0x32   : > { %362 = vst [vmem:[#allocation2 + $0x18] sm:$0xff] %v1047_v16 }
  0x33   : > { %363 = vst [vmem:[#allocation2 + $0x50] sm:$0xff] %v1047_v16 }
  0x34   : > { %364 = vst [vmem:[#allocation2 + $0x68] sm:$0xff] %v1047_v16 }
  0x35   : > { %365 = vst [vmem:[#allocation2 + $0x8] sm:$0xff] %v1047_v16 }
  0x36   : > { %366 = vst [vmem:[#allocation2 + $0x48] sm:$0xff] %v1047_v16 }
  0x37   : > { %367 = vst [vmem:[#allocation2 + $0x40] sm:$0xff] %v1047_v16 }
  0x38   : > { %368 = vst [vmem:[#allocation2 + $0x20] sm:$0xff] %v1047_v16 }
  0x39   : > { %369 = vst [vmem:[#allocation2 + $0x10] sm:$0xff] %v1047_v16 }
  0x3a   : > { %370 = vst [vmem:[#allocation2 + $0x38] sm:$0xff] %v1047_v16 }
  0x3b   : > { %371 = vst [vmem:[#allocation2 + $0x60] sm:$0xff] %v1047_v16 }
  0x3c   : > { %372 = vst [vmem:[#allocation2 + $0x70] sm:$0xff] %v1047_v16 }
  0x3d   : > { %373 = vst [vmem:[#allocation2 + $0x78] sm:$0xff] %v1047_v16 }
  0x3e   : > { %374 = vst [vmem:[#allocation2 + $0x28] sm:$0xff] %v1047_v16 }
  0x3f PF: > { %v893_v17 = vld [vmem:[%s1136_s7 + $0x38] sm:$0xff]  ;;  %v892_v18 = vld [vmem:[%s1136_s7 + $0x30] sm:$0xff]  ;;  %v891_v19 = vld [vmem:[%s1136_s7 + $0x28] sm:$0xff]  ;;  %p873_p11 = scmp.ne.s32.totalorder %s1037_s14, 4 }
  0x40   : > { %519 = vmatpush.bf16.msra.mxu0 %v893_v17  ;;  %941 = vmatpush.bf16.msra.mxu1 %v893_v17  ;;  %v890_v20 = vld [vmem:[%s1136_s7 + $0x20] sm:$0xff]  ;;  %v889_v21 = vld [vmem:[%s1136_s7 + $0x18] sm:$0xff]  ;;  %v888_v22 = vld [vmem:[%s1136_s7 + $0x10] sm:$0xff] }
  0x41   : > { %942 = vmatpush.bf16.msra.mxu2 %v893_v17  ;;  %943 = vmatpush.bf16.msra.mxu3 %v893_v17  ;;  %v887_v23 = vld [vmem:[%s1136_s7 + $0x8] sm:$0xff]  ;;  %v886_v24 = vld [vmem:[%s1136_s7] sm:$0xff]  ;;  %v880_v26 = vld [vmem:[%s1138_s8 + $0x10] sm:$0xff] }
  0x42   : > { %v878_v25 = vld [vmem:[%s1138_s8] sm:$0xff]  ;;  %v884_v28 = vld [vmem:[%s1138_s8 + $0x30] sm:$0xff]  ;;  %v879_v29 = vld [vmem:[%s1138_s8 + $0x8] sm:$0xff] }
  0x43   : > { %v882_v27 = vld [vmem:[%s1138_s8 + $0x20] sm:$0xff]  ;;  %v881_v30 = vld [vmem:[%s1138_s8 + $0x18] sm:$0xff]  ;;  %v883_v31 = vld [vmem:[%s1138_s8 + $0x28] sm:$0xff] }
  0x44   : > { %520 = vmatpush.bf16.msra.mxu0 %v892_v18  ;;  %944 = vmatpush.bf16.msra.mxu1 %v892_v18  ;;  %v885_v32 = vld [vmem:[%s1138_s8 + $0x38] sm:$0xff]  ;;  %v375_v33 = vld [vmem:[#allocation2 + $0x30] sm:$0xff]  ;;  %v383_v39 = vld [vmem:[#allocation2 + $0x40] sm:$0xff] }
  0x45   : > { %945 = vmatpush.bf16.msra.mxu2 %v892_v18  ;;  %946 = vmatpush.bf16.msra.mxu3 %v892_v18  ;;  %v379_v34 = vld [vmem:[#allocation2 + $0x50] sm:$0xff]  ;;  %v387_v40 = vld [vmem:[#allocation2 + $0x60] sm:$0xff]  ;;  %v380_v42 = vld [vmem:[#allocation2 + $0x68] sm:$0xff] }
  0x46   : > { %v376_v41 = vld [vmem:[#allocation2] sm:$0xff]  ;;  %v388_v52 = vld [vmem:[#allocation2 + $0x70] sm:$0xff]  ;;  %v377_v53 = vld [vmem:[#allocation2 + $0x58] sm:$0xff] }
  0x47   : > { %v384_v51 = vld [vmem:[#allocation2 + $0x20] sm:$0xff]  ;;  %v381_v54 = vld [vmem:[#allocation2 + $0x8] sm:$0xff]  ;;  %v385_v63 = vld [vmem:[#allocation2 + $0x10] sm:$0xff] }
  0x48   : > { %521 = vmatpush.bf16.msra.mxu0 %v891_v19  ;;  %947 = vmatpush.bf16.msra.mxu1 %v891_v19  ;;  %v389_v0 = vld [vmem:[#allocation2 + $0x78] sm:$0xff]  ;;  %v382_v2 = vld [vmem:[#allocation2 + $0x48] sm:$0xff] }
  0x49   : > { %948 = vmatpush.bf16.msra.mxu2 %v891_v19  ;;  %949 = vmatpush.bf16.msra.mxu3 %v891_v19  ;;  %v378_v1 = vld [vmem:[#allocation2 + $0x18] sm:$0xff]  ;;  %v390_v12 = vld [vmem:[#allocation2 + $0x28] sm:$0xff] }
  0x4a   : > { %v386_v11 = vld [vmem:[#allocation2 + $0x38] sm:$0xff] }
  0x4c   : > { %522 = vmatpush.bf16.msra.mxu0 %v890_v20  ;;  %950 = vmatpush.bf16.msra.mxu1 %v890_v20 }
  0x4d   : > { %951 = vmatpush.bf16.msra.mxu2 %v890_v20  ;;  %952 = vmatpush.bf16.msra.mxu3 %v890_v20 }
  0x50   : > { %523 = vmatpush.bf16.msra.mxu0 %v889_v21  ;;  %953 = vmatpush.bf16.msra.mxu1 %v889_v21 }
  0x51   : > { %954 = vmatpush.bf16.msra.mxu2 %v889_v21  ;;  %955 = vmatpush.bf16.msra.mxu3 %v889_v21 }
  0x54   : > { %524 = vmatpush.bf16.msra.mxu0 %v888_v22  ;;  %956 = vmatpush.bf16.msra.mxu1 %v888_v22 }
  0x55   : > { %957 = vmatpush.bf16.msra.mxu2 %v888_v22  ;;  %958 = vmatpush.bf16.msra.mxu3 %v888_v22 }
  0x58   : > { %525 = vmatpush.bf16.msra.mxu0 %v887_v23  ;;  %959 = vmatpush.bf16.msra.mxu1 %v887_v23 }
  0x59   : > { %960 = vmatpush.bf16.msra.mxu2 %v887_v23  ;;  %961 = vmatpush.bf16.msra.mxu3 %v887_v23 }
  0x5c   : > { %526 = vmatpush.bf16.msra.mxu0 %v886_v24  ;;  %962 = vmatpush.bf16.msra.mxu1 %v886_v24 }
  0x5d   : > { %963 = vmatpush.bf16.msra.mxu2 %v886_v24  ;;  %964 = vmatpush.bf16.msra.mxu3 %v886_v24 }
  0x5f   : > { %527 = vmatmul.bf16.vlgmr.msra.gmra.mxu0 %v878_v25  ;;  %537 = vmatmul.bf16.vlgmr.msra.gmra.mxu1 %v880_v26 }
  0x60   : > { %547 = vmatmul.bf16.vlgmr.msra.gmra.mxu2 %v882_v27  ;;  %557 = vmatmul.bf16.vlgmr.msra.gmra.mxu3 %v884_v28 }
  0x6f   : > { %532 = vmatmul.bf16.gmra.mxu0 %v879_v29  ;;  %542 = vmatmul.bf16.gmra.mxu1 %v881_v30 }
  0x70   : > { %552 = vmatmul.bf16.gmra.mxu2 %v883_v31  ;;  %562 = vmatmul.bf16.gmra.mxu3 %v885_v32 }
  0xdc   : > { %v528_v35 = vpop.f32.mrf.mxu0  ;;  %v538_v36 = vpop.f32.mrf.mxu1 }
  0xdd   : > { %v568_v37 = vadd.f32 %v528_v35, %v375_v33  ;;  %v572_v38 = vadd.f32 %v538_v36, %v379_v34 }
  0xdf   : > { %584 = vst [vmem:[#allocation2 + $0x30] sm:$0xff] %v568_v37 }
  0xe0   : > { %588 = vst [vmem:[#allocation2 + $0x50] sm:$0xff] %v572_v38 }
  0xe3   : > { %v548_v43 = vpop.f32.mrf.mxu2  ;;  %v558_v44 = vpop.f32.mrf.mxu3 }
  0xe4   : > { %v576_v45 = vadd.f32 %v548_v43, %v383_v39  ;;  %v580_v46 = vadd.f32 %v558_v44, %v387_v40  ;;  %v530_v47 = vpop.f32.mrf.mxu0  ;;  %v540_v48 = vpop.f32.mrf.mxu1 }
  0xe5   : > { %v569_v49 = vadd.f32 %v530_v47, %v376_v41  ;;  %v573_v50 = vadd.f32 %v540_v48, %v380_v42 }
  0xe6   : > { %592 = vst [vmem:[#allocation2 + $0x40] sm:$0xff] %v576_v45 }
  0xe7   : > { %596 = vst [vmem:[#allocation2 + $0x60] sm:$0xff] %v580_v46 }
  0xe8   : > { %585 = vst [vmem:[#allocation2] sm:$0xff] %v569_v49 }
  0xe9   : > { %589 = vst [vmem:[#allocation2 + $0x68] sm:$0xff] %v573_v50 }
  0xeb   : > { %v550_v55 = vpop.f32.mrf.mxu2  ;;  %v560_v56 = vpop.f32.mrf.mxu3 }
  0xec   : > { %v577_v57 = vadd.f32 %v550_v55, %v384_v51  ;;  %v581_v58 = vadd.f32 %v560_v56, %v388_v52  ;;  %v533_v59 = vpop.f32.mrf.mxu0  ;;  %v543_v60 = vpop.f32.mrf.mxu1 }
  0xed   : > { %v570_v61 = vadd.f32 %v533_v59, %v377_v53  ;;  %v574_v62 = vadd.f32 %v543_v60, %v381_v54 }
  0xee   : > { %593 = vst [vmem:[#allocation2 + $0x20] sm:$0xff] %v577_v57 }
  0xef   : > { %597 = vst [vmem:[#allocation2 + $0x70] sm:$0xff] %v581_v58 }
  0xf0   : > { %586 = vst [vmem:[#allocation2 + $0x58] sm:$0xff] %v570_v61 }
  0xf1   : > { %590 = vst [vmem:[#allocation2 + $0x8] sm:$0xff] %v574_v62 }
  0xf3   : > { %v553_v3 = vpop.f32.mrf.mxu2  ;;  %v563_v4 = vpop.f32.mrf.mxu3 }
  0xf4   : > { %v578_v5 = vadd.f32 %v553_v3, %v385_v63  ;;  %v582_v6 = vadd.f32 %v563_v4, %v389_v0  ;;  %v535_v7 = vpop.f32.mrf.mxu0  ;;  %v545_v8 = vpop.f32.mrf.mxu1 }
  0xf5   : > { %v571_v9 = vadd.f32 %v535_v7, %v378_v1  ;;  %v575_v10 = vadd.f32 %v545_v8, %v382_v2 }
  0xf6   : > { %594 = vst [vmem:[#allocation2 + $0x10] sm:$0xff] %v578_v5 }
  0xf7   : > { %598 = vst [vmem:[#allocation2 + $0x78] sm:$0xff] %v582_v6 }
  0xf8   : > { %587 = vst [vmem:[#allocation2 + $0x18] sm:$0xff] %v571_v9 }
  0xf9   : > { %591 = vst [vmem:[#allocation2 + $0x48] sm:$0xff] %v575_v10 }
  0xfb   : > { %v555_v13 = vpop.f32.mrf.mxu2  ;;  %v565_v14 = vpop.f32.mrf.mxu3  ;;  %603 = sbr.rel (%p873_p11) target bundleno = 272 (0x110), region = 81 }
  0xfc   : > { %v579_v15 = vadd.f32 %v555_v13, %v386_v11  ;;  %v583_v16 = vadd.f32 %v565_v14, %v390_v12 }
  0xfe   : > { %595 = vst [vmem:[#allocation2 + $0x38] sm:$0xff] %v579_v15 }
  0xff   : > { %599 = vst [vmem:[#allocation2 + $0x28] sm:$0xff] %v583_v16 }
 0x100   : > { %v604_v17 = vld [vmem:[#allocation2 + $0x30] sm:$0xff]  ;;  %v605_v18 = vld [vmem:[#allocation2] sm:$0xff]  ;;  %v606_v20 = vld [vmem:[#allocation2 + $0x58] sm:$0xff] }
 0x101   : > { %v1006_v19 = vld [vmem:[%s1202_s2] ss:$0 sm:$0xff]  ;;  %v607_v21 = vld [vmem:[#allocation2 + $0x18] sm:$0xff]  ;;  %v608_v22 = vld [vmem:[#allocation2 + $0x50] sm:$0xff] }
 0x102   : > { %v609_v23 = vld [vmem:[#allocation2 + $0x68] sm:$0xff]  ;;  %v624_v25 = vadd.f32 %v1006_v19, %v604_v17  ;;  %v625_v26 = vadd.f32 %v1006_v19, %v605_v18  ;;  %v626_v27 = vadd.f32 %v1006_v19, %v606_v20  ;;  %v627_v28 = vadd.f32 %v1006_v19, %v607_v21  ;;  %v612_v34 = vld [vmem:[#allocation2 + $0x40] sm:$0xff]  ;;  %v614_v40 = vld [vmem:[#allocation2 + $0x10] sm:$0xff] }
 0x103   : > { %v610_v24 = vld [vmem:[#allocation2 + $0x8] sm:$0xff]  ;;  %v628_v30 = vadd.f32 %v1006_v19, %v608_v22  ;;  %v629_v31 = vadd.f32 %v1006_v19, %v609_v23  ;;  %v613_v35 = vld [vmem:[#allocation2 + $0x20] sm:$0xff]  ;;  %v617_v47 = vld [vmem:[#allocation2 + $0x70] sm:$0xff]  ;;  %v632_v50 = vadd.f32 %v1006_v19, %v612_v34  ;;  %v634_v56 = vadd.f32 %v1006_v19, %v614_v40 }
 0x104   : > { %v611_v29 = vld [vmem:[#allocation2 + $0x48] sm:$0xff]  ;;  %v630_v32 = vadd.f32 %v1006_v19, %v610_v24  ;;  %v640_v36 = vmax.f32 %v624_v25, 0.0  ;;  %v641_v37 = vmax.f32 %v625_v26, 0.0  ;;  %v642_v38 = vmax.f32 %v626_v27, 0.0  ;;  %v616_v46 = vld [vmem:[#allocation2 + $0x60] sm:$0xff]  ;;  %v618_v52 = vld [vmem:[#allocation2 + $0x78] sm:$0xff] }
 0x105   : > { %v631_v33 = vadd.f32 %v1006_v19, %v611_v29  ;;  %v643_v39 = vmax.f32 %v627_v28, 0.0  ;;  %v615_v41 = vld [vmem:[#allocation2 + $0x38] sm:$0xff]  ;;  %v644_v42 = vmax.f32 %v628_v30, 0.0  ;;  %v645_v43 = vmax.f32 %v629_v31, 0.0 }
 0x106   : > { %v646_v44 = vmax.f32 %v630_v32, 0.0  ;;  %v897_v48 = vpack.c.bf16 %v641_v37, %v640_v36  ;;  %v633_v51 = vadd.f32 %v1006_v19, %v613_v35  ;;  %v619_v53 = vld [vmem:[#allocation2 + $0x28] sm:$0xff]  ;;  %v635_v57 = vadd.f32 %v1006_v19, %v615_v41 }
 0x107   : > { %v647_v45 = vmax.f32 %v631_v33, 0.0  ;;  %v902_v49 = vpack.c.bf16 %v643_v39, %v642_v38  ;;  %v907_v54 = vpack.c.bf16 %v645_v43, %v644_v42  ;;  %v648_v58 = vmax.f32 %v632_v50, 0.0 }
 0x108   : > { %898 = vst [vmem:[%s1203_s3] sm:$0xff] %v897_v48   ;;  %v649_v59 = vmax.f32 %v633_v51, 0.0  ;;  %v636_v60 = vadd.f32 %v1006_v19, %v616_v46  ;;  %v637_v61 = vadd.f32 %v1006_v19, %v617_v47  ;;  %v650_v62 = vmax.f32 %v634_v56, 0.0 }
 0x109   : > { %v912_v55 = vpack.c.bf16 %v647_v45, %v646_v44  ;;  %934 = vst [vmem:[%s1203_s3 + $0x8] sm:$0xff] %v902_v49   ;;  %v651_v63 = vmax.f32 %v635_v57, 0.0  ;;  %v638_v0 = vadd.f32 %v1006_v19, %v618_v52  ;;  %v639_v1 = vadd.f32 %v1006_v19, %v619_v53 }
 0x10a   : > { %935 = vst [vmem:[%s1203_s3 + $0x10] sm:$0xff] %v907_v54   ;;  %v917_v2 = vpack.c.bf16 %v649_v59, %v648_v58  ;;  %v652_v3 = vmax.f32 %v636_v60, 0.0  ;;  %v653_v4 = vmax.f32 %v637_v61, 0.0 }
 0x10b   : > { %936 = vst [vmem:[%s1203_s3 + $0x18] sm:$0xff] %v912_v55   ;;  %v922_v5 = vpack.c.bf16 %v651_v63, %v650_v62  ;;  %v654_v6 = vmax.f32 %v638_v0, 0.0  ;;  %v655_v7 = vmax.f32 %v639_v1, 0.0 }
 0x10c   : > { %937 = vst [vmem:[%s1203_s3 + $0x20] sm:$0xff] %v917_v2   ;;  %v927_v8 = vpack.c.bf16 %v653_v4, %v652_v3 }
 0x10d   : > { %938 = vst [vmem:[%s1203_s3 + $0x28] sm:$0xff] %v922_v5   ;;  %v932_v9 = vpack.c.bf16 %v655_v7, %v654_v6 }
 0x10e   : > { %939 = vst [vmem:[%s1203_s3 + $0x30] sm:$0xff] %v927_v8  }
 0x10f   : > { %940 = vst [vmem:[%s1203_s3 + $0x38] sm:$0xff] %v932_v9  }
 0x110 PF: > { %s13_s16 = sadd.s32 1, %s1045_s16   ;;  %s1204_s12 = smov %s1033_s13 }
 0x111   : > { %p10_p12 = scmp.ge.s32.totalorder %s13_s16, 7   ;;  %s1205_s13 = smov %s1103_s20 }
 0x112   : > { %s1206_s14 = smov %s1041_s15  ;;  %s1207_s15 = smov %s1209_s17 }
 0x113   :  { %12 = sbr.rel (!%p10_p12) target bundleno = 3 (0x3), region = 122 }

// kernel: se_resnet18_forward.21
= control target key start
LH: loop header
LB: loop body
LE: loop exit
PB: predicated region body
PF: predicated region fallthrough
CT: control target
= control target key end

     0   :  { %s1613_s12 = smov 0   ;;  %s1615_s13 = smov 0   ;;  %s1822_s0 = inlined_call_operand.vmem [shape: bf16[512,256], index: 0, kind: input, shape index: {}]   ;;  %s1823_s1 = inlined_call_operand.vmem [shape: bf16[256,128], index: 1, kind: input, shape index: {}]   ;;  %s1824_s2 = inlined_call_operand.vmem [shape: f32[1,128], index: 2, kind: input, shape index: {}]   ;;  %s1825_s3 = inlined_call_operand.vmem [shape: bf16[512,128], index: 3, kind: output, shape index: {}]  }
   0x1   :  { %s1617_s14 = smov 0  }
   0x2 LB: > { %s32_s15 = sadd.s32 1, %s1587_s13  ;;  %p1184_p0 = scmp.ge.s32.totalorder %s1591_s14, 1  ;;  %s1591_s14 = sphi %s1617_s14, %s13_s14   ;;  %s1587_s13 = sphi %s1615_s13, %s1827_s13   ;;  %s1583_s12 = sphi %s1613_s12, %s1826_s12  }
   0x3   : > { %p34_p1 = scmp.ge.s32.totalorder %s32_s15, 2  ;;  %p191_p2 = scmp.lt.s32.totalorder %s1591_s14, 3 }
   0x5   : > { %s1829_s15 = smov (%p34_p1, %s32_s15), 0  ;;  %p192_p3 = pnand %p1184_p0, %p191_p2 }
   0x6   : > { %s1185_s28 = sshll.u32 (!%p192_p3), %s1583_s12, 5 }
   0x7   : > { %195 = sbr.rel (%p192_p3) target bundleno = 306 (0x132), region = 32  ;;  %p236_p4 = scmp.lt.s32.totalorder (!%p192_p3), %s1185_s28, 63 }
   0xc   : > { %v1424_v0 = vld [vmem:[%s1823_s1 + $0x38] sm:$0xff]  ;;  %v1423_v2 = vld [vmem:[%s1823_s1 + $0x30] sm:$0xff]  ;;  %v1422_v4 = vld [vmem:[%s1823_s1 + $0x28] sm:$0xff]  ;;  %s1831_s28 = smov (!%p236_p4, %s1185_s28), 63 }
   0xd   : > { %v1432_v1 = vld [vmem:[%s1823_s1 + $0x78] sm:$0xff]  ;;  %655 = vmatpush.bf16.msra.mxu0 %v1424_v0  ;;  %1528 = vmatpush.bf16.msra.mxu2 %v1424_v0  ;;  %v1431_v3 = vld [vmem:[%s1823_s1 + $0x70] sm:$0xff]  ;;  %v1430_v5 = vld [vmem:[%s1823_s1 + $0x68] sm:$0xff]  ;;  %s1384_s17 = sshll.u32 %s1831_s28, 3  ;;  %s1189_s5 = sshll.u32 %s1831_s28, 2 }
   0xe   : > { %744 = vmatpush.bf16.msra.mxu1 %v1432_v1  ;;  %1536 = vmatpush.bf16.msra.mxu3 %v1432_v1  ;;  %v1421_v6 = vld [vmem:[%s1823_s1 + $0x20] sm:$0xff]  ;;  %v1420_v8 = vld [vmem:[%s1823_s1 + $0x18] sm:$0xff]  ;;  %v1419_v10 = vld [vmem:[%s1823_s1 + $0x10] sm:$0xff]  ;;  %s1679_s22 = scalar_lea.vmem %s1822_s0, %s1384_s17  ;;  %s1765_s8 = scalar_lea.vmem %s1825_s3, %s1189_s5 }
   0xf   : > { %v1429_v7 = vld [vmem:[%s1823_s1 + $0x60] sm:$0xff]  ;;  %v1428_v9 = vld [vmem:[%s1823_s1 + $0x58] sm:$0xff]  ;;  %v1427_v11 = vld [vmem:[%s1823_s1 + $0x50] sm:$0xff] }
  0x10   : > { %v1418_v12 = vld [vmem:[%s1823_s1 + $0x8] sm:$0xff]  ;;  %v1417_v14 = vld [vmem:[%s1823_s1] sm:$0xff]  ;;  %v1200_v28 = vld [vmem:[%s1679_s22 + $0x10] sm:$0xf] }
  0x11   : > { %656 = vmatpush.bf16.msra.mxu0 %v1423_v2  ;;  %1529 = vmatpush.bf16.msra.mxu2 %v1423_v2  ;;  %v1426_v13 = vld [vmem:[%s1823_s1 + $0x48] sm:$0xff]  ;;  %v1425_v15 = vld [vmem:[%s1823_s1 + $0x40] sm:$0xff]  ;;  %v1388_v29 = vld [vmem:[%s1679_s22 + $0x14] sm:$0xf0] }
  0x12   : > { %745 = vmatpush.bf16.msra.mxu1 %v1431_v3  ;;  %1537 = vmatpush.bf16.msra.mxu3 %v1431_v3  ;;  %v1192_v16 = vld [vmem:[%s1679_s22] sm:$0xf]  ;;  %v1386_v17 = vld [vmem:[%s1679_s22 + $0x4] sm:$0xf0]  ;;  %v1385_v20 = vld [vmem:[%s1679_s22 + $0x4] sm:$0xf]  ;;  %v1201_v36 = vor.u32 %v1388_v29, %v1200_v28 }
  0x13   : > { %v1256_v18 = vld [vmem:[%s1679_s22 + $0x80] sm:$0xf]  ;;  %v1402_v19 = vld [vmem:[%s1679_s22 + $0x84] sm:$0xf0]  ;;  %v1194_v21 = vld [vmem:[%s1679_s22 + $0x8] sm:$0xf0]  ;;  %v1193_v24 = vor.u32 %v1386_v17, %v1192_v16 }
  0x14   : > { %v1401_v22 = vld [vmem:[%s1679_s22 + $0x84] sm:$0xf]  ;;  %v1258_v23 = vld [vmem:[%s1679_s22 + $0x88] sm:$0xf0]  ;;  %v1257_v25 = vor.u32 %v1402_v19, %v1256_v18  ;;  %v1197_v26 = vor.u32 %v1385_v20, %v1194_v21  ;;  %v1264_v30 = vld [vmem:[%s1679_s22 + $0x90] sm:$0xf] }
  0x15   : > { %657 = vmatpush.bf16.msra.mxu0 %v1422_v4  ;;  %1530 = vmatpush.bf16.msra.mxu2 %v1422_v4  ;;  %v1261_v27 = vor.u32 %v1401_v22, %v1258_v23  ;;  %v1404_v31 = vld [vmem:[%s1679_s22 + $0x94] sm:$0xf0]  ;;  %v1387_v32 = vld [vmem:[%s1679_s22 + $0x14] sm:$0xf]  ;;  %v1202_v33 = vld [vmem:[%s1679_s22 + $0x18] sm:$0xf0] }
  0x16   : > { %746 = vmatpush.bf16.msra.mxu1 %v1430_v5  ;;  %1538 = vmatpush.bf16.msra.mxu3 %v1430_v5  ;;  %v1403_v34 = vld [vmem:[%s1679_s22 + $0x94] sm:$0xf]  ;;  %v1266_v35 = vld [vmem:[%s1679_s22 + $0x98] sm:$0xf0]  ;;  %v1265_v37 = vor.u32 %v1404_v31, %v1264_v30  ;;  %v1205_v38 = vor.u32 %v1387_v32, %v1202_v33  ;;  %v1208_v40 = vld [vmem:[%s1679_s22 + $0x20] sm:$0xf] }
  0x17   : > { %v1269_v39 = vor.u32 %v1403_v34, %v1266_v35  ;;  %v1390_v41 = vld [vmem:[%s1679_s22 + $0x24] sm:$0xf0]  ;;  %v1272_v42 = vld [vmem:[%s1679_s22 + $0xa0] sm:$0xf]  ;;  %v1389_v44 = vld [vmem:[%s1679_s22 + $0x24] sm:$0xf] }
  0x18   : > { %v1406_v43 = vld [vmem:[%s1679_s22 + $0xa4] sm:$0xf0]  ;;  %v1210_v45 = vld [vmem:[%s1679_s22 + $0x28] sm:$0xf0]  ;;  %v1405_v46 = vld [vmem:[%s1679_s22 + $0xa4] sm:$0xf]  ;;  %v1209_v48 = vor.u32 %v1390_v41, %v1208_v40 }
  0x19   : > { %658 = vmatpush.bf16.msra.mxu0 %v1421_v6  ;;  %1531 = vmatpush.bf16.msra.mxu2 %v1421_v6  ;;  %v1274_v47 = vld [vmem:[%s1679_s22 + $0xa8] sm:$0xf0]  ;;  %v1273_v49 = vor.u32 %v1406_v43, %v1272_v42  ;;  %v1213_v50 = vor.u32 %v1389_v44, %v1210_v45  ;;  %v1216_v52 = vld [vmem:[%s1679_s22 + $0x30] sm:$0xf]  ;;  %v1392_v53 = vld [vmem:[%s1679_s22 + $0x34] sm:$0xf0] }
  0x1a   : > { %747 = vmatpush.bf16.msra.mxu1 %v1429_v7  ;;  %1539 = vmatpush.bf16.msra.mxu3 %v1429_v7  ;;  %v1277_v51 = vor.u32 %v1405_v46, %v1274_v47  ;;  %v1280_v54 = vld [vmem:[%s1679_s22 + $0xb0] sm:$0xf]  ;;  %v1408_v55 = vld [vmem:[%s1679_s22 + $0xb4] sm:$0xf0]  ;;  %v1391_v56 = vld [vmem:[%s1679_s22 + $0x34] sm:$0xf]  ;;  %v1217_v60 = vor.u32 %v1392_v53, %v1216_v52 }
  0x1b   : > { %v1218_v57 = vld [vmem:[%s1679_s22 + $0x38] sm:$0xf0]  ;;  %v1407_v58 = vld [vmem:[%s1679_s22 + $0xb4] sm:$0xf]  ;;  %v1281_v61 = vor.u32 %v1408_v55, %v1280_v54  ;;  %v1224_v0 = vld [vmem:[%s1679_s22 + $0x40] sm:$0xf] }
  0x1c   : > { %v1282_v59 = vld [vmem:[%s1679_s22 + $0xb8] sm:$0xf0]  ;;  %v1221_v62 = vor.u32 %v1391_v56, %v1218_v57  ;;  %v1394_v1 = vld [vmem:[%s1679_s22 + $0x44] sm:$0xf0]  ;;  %v1288_v2 = vld [vmem:[%s1679_s22 + $0xc0] sm:$0xf] }
  0x1d   : > { %659 = vmatpush.bf16.msra.mxu0 %v1420_v8  ;;  %1532 = vmatpush.bf16.msra.mxu2 %v1420_v8  ;;  %v1285_v63 = vor.u32 %v1407_v58, %v1282_v59  ;;  %v1410_v3 = vld [vmem:[%s1679_s22 + $0xc4] sm:$0xf0]  ;;  %v1393_v4 = vld [vmem:[%s1679_s22 + $0x44] sm:$0xf]  ;;  %v1226_v5 = vld [vmem:[%s1679_s22 + $0x48] sm:$0xf0]  ;;  %v1225_v8 = vor.u32 %v1394_v1, %v1224_v0 }
  0x1e   : > { %748 = vmatpush.bf16.msra.mxu1 %v1428_v9  ;;  %1540 = vmatpush.bf16.msra.mxu3 %v1428_v9  ;;  %v1409_v6 = vld [vmem:[%s1679_s22 + $0xc4] sm:$0xf]  ;;  %v1290_v7 = vld [vmem:[%s1679_s22 + $0xc8] sm:$0xf0]  ;;  %v1289_v9 = vor.u32 %v1410_v3, %v1288_v2  ;;  %v1395_v16 = vld [vmem:[%s1679_s22 + $0x54] sm:$0xf] }
  0x1f   : > { %v1234_v17 = vld [vmem:[%s1679_s22 + $0x58] sm:$0xf0]  ;;  %v1411_v18 = vld [vmem:[%s1679_s22 + $0xd4] sm:$0xf]  ;;  %v1397_v28 = vld [vmem:[%s1679_s22 + $0x64] sm:$0xf] }
  0x20   : > { %v1298_v19 = vld [vmem:[%s1679_s22 + $0xd8] sm:$0xf0]  ;;  %v1237_v22 = vor.u32 %v1395_v16, %v1234_v17  ;;  %v1242_v29 = vld [vmem:[%s1679_s22 + $0x68] sm:$0xf0]  ;;  %v1413_v30 = vld [vmem:[%s1679_s22 + $0xe4] sm:$0xf] }
  0x21   : > { %660 = vmatpush.bf16.msra.mxu0 %v1419_v10  ;;  %1533 = vmatpush.bf16.msra.mxu2 %v1419_v10  ;;  %v1229_v10 = vor.u32 %v1393_v4, %v1226_v5  ;;  %v1301_v23 = vor.u32 %v1411_v18, %v1298_v19  ;;  %v1306_v31 = vld [vmem:[%s1679_s22 + $0xe8] sm:$0xf0]  ;;  %v1245_v34 = vor.u32 %v1397_v28, %v1242_v29  ;;  %v1399_v40 = vld [vmem:[%s1679_s22 + $0x74] sm:$0xf]  ;;  %v1250_v41 = vld [vmem:[%s1679_s22 + $0x78] sm:$0xf0] }
  0x22   : > { %749 = vmatpush.bf16.msra.mxu1 %v1427_v11  ;;  %1541 = vmatpush.bf16.msra.mxu3 %v1427_v11  ;;  %v1293_v11 = vor.u32 %v1409_v6, %v1290_v7  ;;  %v1309_v35 = vor.u32 %v1413_v30, %v1306_v31  ;;  %v1415_v42 = vld [vmem:[%s1679_s22 + $0xf4] sm:$0xf]  ;;  %v1314_v43 = vld [vmem:[%s1679_s22 + $0xf8] sm:$0xf0]  ;;  %v1253_v46 = vor.u32 %v1399_v40, %v1250_v41 }
  0x23   : > { %v1317_v47 = vor.u32 %v1415_v42, %v1314_v43 }
  0x25   : > { %661 = vmatpush.bf16.msra.mxu0 %v1418_v12  ;;  %1534 = vmatpush.bf16.msra.mxu2 %v1418_v12  ;;  %v1232_v12 = vld [vmem:[%s1679_s22 + $0x50] sm:$0xf] }
  0x26   : > { %750 = vmatpush.bf16.msra.mxu1 %v1426_v13  ;;  %1542 = vmatpush.bf16.msra.mxu3 %v1426_v13  ;;  %v1396_v13 = vld [vmem:[%s1679_s22 + $0x54] sm:$0xf0] }
  0x27   : > { %v1233_v20 = vor.u32 %v1396_v13, %v1232_v12 }
  0x29   : > { %662 = vmatpush.bf16.msra.mxu0 %v1417_v14  ;;  %1535 = vmatpush.bf16.msra.mxu2 %v1417_v14  ;;  %v1296_v14 = vld [vmem:[%s1679_s22 + $0xd0] sm:$0xf] }
  0x2a   : > { %751 = vmatpush.bf16.msra.mxu1 %v1425_v15  ;;  %1543 = vmatpush.bf16.msra.mxu3 %v1425_v15  ;;  %v1412_v15 = vld [vmem:[%s1679_s22 + $0xd4] sm:$0xf0] }
  0x2b   : > { %v1297_v21 = vor.u32 %v1412_v15, %v1296_v14 }
  0x2c   : > { %663 = vmatmul.bf16.vlgmr.msra.gmra.mxu0 %v1193_v24  ;;  %703 = vmatmul.bf16.vlgmr.msra.gmra.mxu2 %v1257_v25  ;;  %v1240_v24 = vld [vmem:[%s1679_s22 + $0x60] sm:$0xf]  ;;  %v1398_v25 = vld [vmem:[%s1679_s22 + $0x64] sm:$0xf0] }
  0x2d   : > { %752 = vmatmul.bf16.vlgmr.msra.gmra.mxu1 %v1197_v26  ;;  %792 = vmatmul.bf16.vlgmr.msra.gmra.mxu3 %v1261_v27  ;;  %v1304_v26 = vld [vmem:[%s1679_s22 + $0xe0] sm:$0xf]  ;;  %v1414_v27 = vld [vmem:[%s1679_s22 + $0xe4] sm:$0xf0]  ;;  %v1241_v32 = vor.u32 %v1398_v25, %v1240_v24 }
  0x2e   : > { %v1305_v33 = vor.u32 %v1414_v27, %v1304_v26 }
  0x3c   : > { %668 = vmatmul.bf16.gmra.mxu0 %v1201_v36  ;;  %708 = vmatmul.bf16.gmra.mxu2 %v1265_v37  ;;  %v1248_v36 = vld [vmem:[%s1679_s22 + $0x70] sm:$0xf]  ;;  %v1400_v37 = vld [vmem:[%s1679_s22 + $0x74] sm:$0xf0] }
  0x3d   : > { %757 = vmatmul.bf16.gmra.mxu1 %v1205_v38  ;;  %797 = vmatmul.bf16.gmra.mxu3 %v1269_v39  ;;  %v1312_v38 = vld [vmem:[%s1679_s22 + $0xf0] sm:$0xf]  ;;  %v1416_v39 = vld [vmem:[%s1679_s22 + $0xf4] sm:$0xf0]  ;;  %v1249_v44 = vor.u32 %v1400_v37, %v1248_v36 }
  0x3e   : > { %v1313_v45 = vor.u32 %v1416_v39, %v1312_v38 }
  0x4c   : > { %673 = vmatmul.bf16.gmra.mxu0 %v1209_v48  ;;  %713 = vmatmul.bf16.gmra.mxu2 %v1273_v49 }
  0x4d   : > { %762 = vmatmul.bf16.gmra.mxu1 %v1213_v50  ;;  %802 = vmatmul.bf16.gmra.mxu3 %v1277_v51  ;;  %v1757_v51 = vld [vmem:[%s1824_s2] ss:$0 sm:$0xff] }
  0x5c   : > { %678 = vmatmul.bf16.gmra.mxu0 %v1217_v60  ;;  %718 = vmatmul.bf16.gmra.mxu2 %v1281_v61 }
  0x5d   : > { %767 = vmatmul.bf16.gmra.mxu1 %v1221_v62  ;;  %807 = vmatmul.bf16.gmra.mxu3 %v1285_v63 }
  0x6c   : > { %683 = vmatmul.bf16.gmra.mxu0 %v1225_v8  ;;  %723 = vmatmul.bf16.gmra.mxu2 %v1289_v9 }
  0x6d   : > { %772 = vmatmul.bf16.gmra.mxu1 %v1229_v10  ;;  %812 = vmatmul.bf16.gmra.mxu3 %v1293_v11 }
  0x7c   : > { %688 = vmatmul.bf16.gmra.mxu0 %v1233_v20  ;;  %728 = vmatmul.bf16.gmra.mxu2 %v1297_v21 }
  0x7d   : > { %777 = vmatmul.bf16.gmra.mxu1 %v1237_v22  ;;  %817 = vmatmul.bf16.gmra.mxu3 %v1301_v23 }
  0x8c   : > { %693 = vmatmul.bf16.gmra.mxu0 %v1241_v32  ;;  %733 = vmatmul.bf16.gmra.mxu2 %v1305_v33 }
  0x8d   : > { %782 = vmatmul.bf16.gmra.mxu1 %v1245_v34  ;;  %822 = vmatmul.bf16.gmra.mxu3 %v1309_v35 }
  0x9c   : > { %698 = vmatmul.bf16.gmra.mxu0 %v1249_v44  ;;  %738 = vmatmul.bf16.gmra.mxu2 %v1313_v45 }
  0x9d   : > { %787 = vmatmul.bf16.gmra.mxu1 %v1253_v46  ;;  %827 = vmatmul.bf16.gmra.mxu3 %v1317_v47 }
  0xa9   : > { %v664_v48 = vpop.f32.mrf.mxu0 }
  0xaa   : > { %v753_v49 = vpop.f32.mrf.mxu1 }
  0xab   : > { %v754_v50 = vadd.f32 %v753_v49, %v664_v48 }
  0xad   : > { %v936_v56 = vadd.f32 %v1757_v51, %v754_v50 }
  0xaf   : > { %v704_v52 = vpop.f32.mrf.mxu2  ;;  %v968_v60 = vmax.f32 %v936_v56, 0.0 }
  0xb0   : > { %v793_v53 = vpop.f32.mrf.mxu3 }
  0xb1   : > { %v666_v54 = vpop.f32.mrf.mxu0  ;;  %v794_v58 = vadd.f32 %v793_v53, %v704_v52 }
  0xb2   : > { %v755_v55 = vpop.f32.mrf.mxu1 }
  0xb3   : > { %v756_v57 = vadd.f32 %v755_v55, %v666_v54  ;;  %v952_v0 = vadd.f32 %v1757_v51, %v794_v58 }
  0xb5   : > { %v937_v59 = vadd.f32 %v1757_v51, %v756_v57  ;;  %v984_v6 = vmax.f32 %v952_v0, 0.0 }
  0xb7   : > { %v969_v61 = vmax.f32 %v937_v59, 0.0  ;;  %v706_v62 = vpop.f32.mrf.mxu2 }
  0xb8   : > { %v795_v63 = vpop.f32.mrf.mxu3 }
  0xb9   : > { %v1436_v1 = vpack.c.bf16 %v969_v61, %v968_v60  ;;  %v796_v2 = vadd.f32 %v795_v63, %v706_v62  ;;  %v669_v3 = vpop.f32.mrf.mxu0 }
  0xba   : > { %v758_v4 = vpop.f32.mrf.mxu1 }
  0xbb   : > { %1437 = vst [vmem:[%s1765_s8] sm:$0xff] %v1436_v1   ;;  %v953_v5 = vadd.f32 %v1757_v51, %v796_v2  ;;  %v759_v9 = vadd.f32 %v758_v4, %v669_v3 }
  0xbd   : > { %v985_v7 = vmax.f32 %v953_v5, 0.0  ;;  %v938_v14 = vadd.f32 %v1757_v51, %v759_v9 }
  0xbf   : > { %v1476_v8 = vpack.c.bf16 %v985_v7, %v984_v6  ;;  %v709_v10 = vpop.f32.mrf.mxu2  ;;  %v970_v18 = vmax.f32 %v938_v14, 0.0 }
  0xc0   : > { %v798_v11 = vpop.f32.mrf.mxu3 }
  0xc1   : > { %1520 = vst [vmem:[%s1765_s8 + $0x40] sm:$0xff] %v1476_v8   ;;  %v671_v12 = vpop.f32.mrf.mxu0  ;;  %v799_v16 = vadd.f32 %v798_v11, %v709_v10 }
  0xc2   : > { %v760_v13 = vpop.f32.mrf.mxu1 }
  0xc3   : > { %v761_v15 = vadd.f32 %v760_v13, %v671_v12  ;;  %v954_v22 = vadd.f32 %v1757_v51, %v799_v16 }
  0xc5   : > { %v939_v17 = vadd.f32 %v1757_v51, %v761_v15  ;;  %v986_v28 = vmax.f32 %v954_v22, 0.0 }
  0xc7   : > { %v971_v19 = vmax.f32 %v939_v17, 0.0  ;;  %v711_v20 = vpop.f32.mrf.mxu2 }
  0xc8   : > { %v800_v21 = vpop.f32.mrf.mxu3 }
  0xc9   : > { %v1441_v23 = vpack.c.bf16 %v971_v19, %v970_v18  ;;  %v801_v24 = vadd.f32 %v800_v21, %v711_v20  ;;  %v674_v25 = vpop.f32.mrf.mxu0 }
  0xca   : > { %v763_v26 = vpop.f32.mrf.mxu1 }
  0xcb   : > { %1513 = vst [vmem:[%s1765_s8 + $0x8] sm:$0xff] %v1441_v23   ;;  %v955_v27 = vadd.f32 %v1757_v51, %v801_v24  ;;  %v764_v31 = vadd.f32 %v763_v26, %v674_v25 }
  0xcd   : > { %v987_v29 = vmax.f32 %v955_v27, 0.0  ;;  %v940_v36 = vadd.f32 %v1757_v51, %v764_v31 }
  0xcf   : > { %v1481_v30 = vpack.c.bf16 %v987_v29, %v986_v28  ;;  %v714_v32 = vpop.f32.mrf.mxu2  ;;  %v972_v40 = vmax.f32 %v940_v36, 0.0 }
  0xd0   : > { %v803_v33 = vpop.f32.mrf.mxu3 }
  0xd1   : > { %1521 = vst [vmem:[%s1765_s8 + $0x48] sm:$0xff] %v1481_v30   ;;  %v676_v34 = vpop.f32.mrf.mxu0  ;;  %v804_v38 = vadd.f32 %v803_v33, %v714_v32 }
  0xd2   : > { %v765_v35 = vpop.f32.mrf.mxu1 }
  0xd3   : > { %v766_v37 = vadd.f32 %v765_v35, %v676_v34  ;;  %v956_v44 = vadd.f32 %v1757_v51, %v804_v38 }
  0xd5   : > { %v941_v39 = vadd.f32 %v1757_v51, %v766_v37  ;;  %v988_v50 = vmax.f32 %v956_v44, 0.0 }
  0xd7   : > { %v973_v41 = vmax.f32 %v941_v39, 0.0  ;;  %v716_v42 = vpop.f32.mrf.mxu2 }
  0xd8   : > { %v805_v43 = vpop.f32.mrf.mxu3 }
  0xd9   : > { %v1446_v45 = vpack.c.bf16 %v973_v41, %v972_v40  ;;  %v806_v46 = vadd.f32 %v805_v43, %v716_v42  ;;  %v679_v47 = vpop.f32.mrf.mxu0 }
  0xda   : > { %v768_v48 = vpop.f32.mrf.mxu1 }
  0xdb   : > { %1514 = vst [vmem:[%s1765_s8 + $0x10] sm:$0xff] %v1446_v45   ;;  %v957_v49 = vadd.f32 %v1757_v51, %v806_v46  ;;  %v769_v54 = vadd.f32 %v768_v48, %v679_v47 }
  0xdd   : > { %v989_v52 = vmax.f32 %v957_v49, 0.0  ;;  %v942_v59 = vadd.f32 %v1757_v51, %v769_v54 }
  0xdf   : > { %v1486_v53 = vpack.c.bf16 %v989_v52, %v988_v50  ;;  %v719_v55 = vpop.f32.mrf.mxu2  ;;  %v974_v63 = vmax.f32 %v942_v59, 0.0 }
  0xe0   : > { %v808_v56 = vpop.f32.mrf.mxu3 }
  0xe1   : > { %1522 = vst [vmem:[%s1765_s8 + $0x50] sm:$0xff] %v1486_v53   ;;  %v681_v57 = vpop.f32.mrf.mxu0  ;;  %v809_v61 = vadd.f32 %v808_v56, %v719_v55 }
  0xe2   : > { %v770_v58 = vpop.f32.mrf.mxu1 }
  0xe3   : > { %v771_v60 = vadd.f32 %v770_v58, %v681_v57  ;;  %v958_v3 = vadd.f32 %v1757_v51, %v809_v61 }
  0xe5   : > { %v943_v62 = vadd.f32 %v1757_v51, %v771_v60  ;;  %v990_v9 = vmax.f32 %v958_v3, 0.0 }
  0xe7   : > { %v975_v0 = vmax.f32 %v943_v62, 0.0  ;;  %v721_v1 = vpop.f32.mrf.mxu2 }
  0xe8   : > { %v810_v2 = vpop.f32.mrf.mxu3 }
  0xe9   : > { %v1451_v4 = vpack.c.bf16 %v975_v0, %v974_v63  ;;  %v811_v5 = vadd.f32 %v810_v2, %v721_v1  ;;  %v684_v6 = vpop.f32.mrf.mxu0 }
  0xea   : > { %v773_v7 = vpop.f32.mrf.mxu1 }
  0xeb   : > { %1515 = vst [vmem:[%s1765_s8 + $0x18] sm:$0xff] %v1451_v4   ;;  %v959_v8 = vadd.f32 %v1757_v51, %v811_v5  ;;  %v774_v12 = vadd.f32 %v773_v7, %v684_v6 }
  0xed   : > { %v991_v10 = vmax.f32 %v959_v8, 0.0  ;;  %v944_v17 = vadd.f32 %v1757_v51, %v774_v12 }
  0xef   : > { %v1491_v11 = vpack.c.bf16 %v991_v10, %v990_v9  ;;  %v724_v13 = vpop.f32.mrf.mxu2  ;;  %v976_v21 = vmax.f32 %v944_v17, 0.0 }
  0xf0   : > { %v813_v14 = vpop.f32.mrf.mxu3 }
  0xf1   : > { %1523 = vst [vmem:[%s1765_s8 + $0x58] sm:$0xff] %v1491_v11   ;;  %v686_v15 = vpop.f32.mrf.mxu0  ;;  %v814_v19 = vadd.f32 %v813_v14, %v724_v13 }
  0xf2   : > { %v775_v16 = vpop.f32.mrf.mxu1 }
  0xf3   : > { %v776_v18 = vadd.f32 %v775_v16, %v686_v15  ;;  %v960_v25 = vadd.f32 %v1757_v51, %v814_v19 }
  0xf5   : > { %v945_v20 = vadd.f32 %v1757_v51, %v776_v18  ;;  %v992_v31 = vmax.f32 %v960_v25, 0.0 }
  0xf7   : > { %v977_v22 = vmax.f32 %v945_v20, 0.0  ;;  %v726_v23 = vpop.f32.mrf.mxu2 }
  0xf8   : > { %v815_v24 = vpop.f32.mrf.mxu3 }
  0xf9   : > { %v1456_v26 = vpack.c.bf16 %v977_v22, %v976_v21  ;;  %v816_v27 = vadd.f32 %v815_v24, %v726_v23  ;;  %v689_v28 = vpop.f32.mrf.mxu0 }
  0xfa   : > { %v778_v29 = vpop.f32.mrf.mxu1 }
  0xfb   : > { %1516 = vst [vmem:[%s1765_s8 + $0x20] sm:$0xff] %v1456_v26   ;;  %v961_v30 = vadd.f32 %v1757_v51, %v816_v27  ;;  %v779_v34 = vadd.f32 %v778_v29, %v689_v28 }
  0xfd   : > { %v993_v32 = vmax.f32 %v961_v30, 0.0  ;;  %v946_v39 = vadd.f32 %v1757_v51, %v779_v34 }
  0xff   : > { %v1496_v33 = vpack.c.bf16 %v993_v32, %v992_v31  ;;  %v729_v35 = vpop.f32.mrf.mxu2  ;;  %v978_v43 = vmax.f32 %v946_v39, 0.0 }
 0x100   : > { %v818_v36 = vpop.f32.mrf.mxu3 }
 0x101   : > { %1524 = vst [vmem:[%s1765_s8 + $0x60] sm:$0xff] %v1496_v33   ;;  %v691_v37 = vpop.f32.mrf.mxu0  ;;  %v819_v41 = vadd.f32 %v818_v36, %v729_v35 }
 0x102   : > { %v780_v38 = vpop.f32.mrf.mxu1 }
 0x103   : > { %v781_v40 = vadd.f32 %v780_v38, %v691_v37  ;;  %v962_v47 = vadd.f32 %v1757_v51, %v819_v41 }
 0x105   : > { %v947_v42 = vadd.f32 %v1757_v51, %v781_v40  ;;  %v994_v54 = vmax.f32 %v962_v47, 0.0 }
 0x107   : > { %v979_v44 = vmax.f32 %v947_v42, 0.0  ;;  %v731_v45 = vpop.f32.mrf.mxu2 }
 0x108   : > { %v820_v46 = vpop.f32.mrf.mxu3 }
 0x109   : > { %v1461_v48 = vpack.c.bf16 %v979_v44, %v978_v43  ;;  %v821_v49 = vadd.f32 %v820_v46, %v731_v45  ;;  %v694_v50 = vpop.f32.mrf.mxu0 }
 0x10a   : > { %v783_v52 = vpop.f32.mrf.mxu1 }
 0x10b   : > { %1517 = vst [vmem:[%s1765_s8 + $0x28] sm:$0xff] %v1461_v48   ;;  %v963_v53 = vadd.f32 %v1757_v51, %v821_v49  ;;  %v784_v57 = vadd.f32 %v783_v52, %v694_v50 }
 0x10d   : > { %v995_v55 = vmax.f32 %v963_v53, 0.0  ;;  %v948_v62 = vadd.f32 %v1757_v51, %v784_v57 }
 0x10f   : > { %v1501_v56 = vpack.c.bf16 %v995_v55, %v994_v54  ;;  %v734_v58 = vpop.f32.mrf.mxu2  ;;  %v980_v2 = vmax.f32 %v948_v62, 0.0 }
 0x110   : > { %v823_v59 = vpop.f32.mrf.mxu3 }
 0x111   : > { %1525 = vst [vmem:[%s1765_s8 + $0x68] sm:$0xff] %v1501_v56   ;;  %v696_v60 = vpop.f32.mrf.mxu0  ;;  %v824_v0 = vadd.f32 %v823_v59, %v734_v58 }
 0x112   : > { %v785_v61 = vpop.f32.mrf.mxu1 }
 0x113   : > { %v786_v63 = vadd.f32 %v785_v61, %v696_v60  ;;  %v964_v6 = vadd.f32 %v1757_v51, %v824_v0 }
 0x115   : > { %v949_v1 = vadd.f32 %v1757_v51, %v786_v63  ;;  %v996_v12 = vmax.f32 %v964_v6, 0.0 }
 0x117   : > { %v981_v3 = vmax.f32 %v949_v1, 0.0  ;;  %v736_v4 = vpop.f32.mrf.mxu2 }
 0x118   : > { %v825_v5 = vpop.f32.mrf.mxu3 }
 0x119   : > { %v1466_v7 = vpack.c.bf16 %v981_v3, %v980_v2  ;;  %v826_v8 = vadd.f32 %v825_v5, %v736_v4  ;;  %v699_v9 = vpop.f32.mrf.mxu0 }
 0x11a   : > { %v788_v10 = vpop.f32.mrf.mxu1 }
 0x11b   : > { %1518 = vst [vmem:[%s1765_s8 + $0x30] sm:$0xff] %v1466_v7   ;;  %v965_v11 = vadd.f32 %v1757_v51, %v826_v8  ;;  %v789_v15 = vadd.f32 %v788_v10, %v699_v9 }
 0x11d   : > { %v997_v13 = vmax.f32 %v965_v11, 0.0  ;;  %v950_v20 = vadd.f32 %v1757_v51, %v789_v15 }
 0x11f   : > { %v1506_v14 = vpack.c.bf16 %v997_v13, %v996_v12  ;;  %v739_v16 = vpop.f32.mrf.mxu2  ;;  %v982_v24 = vmax.f32 %v950_v20, 0.0 }
 0x120   : > { %v828_v17 = vpop.f32.mrf.mxu3 }
 0x121   : > { %1526 = vst [vmem:[%s1765_s8 + $0x70] sm:$0xff] %v1506_v14   ;;  %v701_v18 = vpop.f32.mrf.mxu0  ;;  %v829_v22 = vadd.f32 %v828_v17, %v739_v16 }
 0x122   : > { %v790_v19 = vpop.f32.mrf.mxu1 }
 0x123   : > { %v791_v21 = vadd.f32 %v790_v19, %v701_v18  ;;  %v966_v28 = vadd.f32 %v1757_v51, %v829_v22 }
 0x125   : > { %v951_v23 = vadd.f32 %v1757_v51, %v791_v21  ;;  %v998_v32 = vmax.f32 %v966_v28, 0.0 }
 0x127   : > { %v983_v25 = vmax.f32 %v951_v23, 0.0  ;;  %v741_v26 = vpop.f32.mrf.mxu2 }
 0x128   : > { %v830_v27 = vpop.f32.mrf.mxu3 }
 0x129   : > { %v1471_v29 = vpack.c.bf16 %v983_v25, %v982_v24  ;;  %v831_v30 = vadd.f32 %v830_v27, %v741_v26 }
 0x12b   : > { %1519 = vst [vmem:[%s1765_s8 + $0x38] sm:$0xff] %v1471_v29   ;;  %v967_v31 = vadd.f32 %v1757_v51, %v831_v30 }
 0x12d   : > { %v999_v33 = vmax.f32 %v967_v31, 0.0 }
 0x12f   : > { %v1511_v34 = vpack.c.bf16 %v999_v33, %v998_v32 }
 0x131   : > { %1527 = vst [vmem:[%s1765_s8 + $0x78] sm:$0xff] %v1511_v34  }
 0x132 PF: > { %s13_s14 = sadd.s32 1, %s1591_s14   ;;  %s1826_s12 = smov %s1587_s13 }
 0x133   : > { %p10_p5 = scmp.ge.s32.totalorder %s13_s14, 4   ;;  %s1827_s13 = smov %s1829_s15 }
 0x135   :  { %12 = sbr.rel (!%p10_p5) target bundleno = 2 (0x2), region = 76 }

// kernel: se_resnet18_forward.23
= control target key start
LH: loop header
LB: loop body
LE: loop exit
PB: predicated region body
PF: predicated region fallthrough
CT: control target
= control target key end

     0   :  { %s1239_s15 = smov 0   ;;  %s1241_s16 = smov 0   ;;  %s1413_s0 = inlined_call_operand.vmem [shape: bf16[128,640], index: 0, kind: input, shape index: {}]   ;;  %s1414_s1 = inlined_call_operand.vmem [shape: bf16[640,128], index: 1, kind: input, shape index: {}]   ;;  %s1415_s2 = inlined_call_operand.vmem [shape: f32[1,128], index: 2, kind: input, shape index: {}]   ;;  %s1416_s3 = inlined_call_operand.vmem [shape: bf16[128,128], index: 3, kind: input, shape index: {}]   ;;  %s1417_s4 = inlined_call_operand.vmem [shape: bf16[128,128], index: 4, kind: output, shape index: {}]  }
   0x1   :  { %s1243_s17 = smov 0   ;;  %s1245_s18 = smov 0  }
   0x2   :  { %s1247_s19 = smov 0  }
   0x3 LB: > { %s26_s20 = sadd.s32 1, %s1207_s18  ;;  %p49_p1 = scmp.ne.s32.totalorder %s1199_s16, %s1195_s15  ;;  %s1211_s19 = sphi %s1247_s19, %s14_s19   ;;  %s1207_s18 = sphi %s1245_s18, %s1421_s18   ;;  %s1203_s17 = sphi %s1243_s17, %s1420_s17   ;;  %s1199_s16 = sphi %s1241_s16, %s1419_s16   ;;  %s1195_s15 = sphi %s1239_s15, %s1418_s15  }
   0x4   : > { %p27_p0 = scmp.ge.s32.totalorder %s26_s20, 5  ;;  %p50_p2 = scmp.eq.s32.totalorder %s1211_s19, 0 }
   0x5   : > { %s42_s22 = sadd.s32 1, %s1199_s16  ;;  %p928_p5 = scmp.ge.s32.totalorder %s1211_s19, 5 }
   0x6   : > { %s1423_s20 = smov (%p27_p0, %s26_s20), 0  ;;  %p51_p3 = por %p50_p2, %p49_p1 }
   0x7   : > { %s38_s21 = ssub.s32 %s1207_s18, %s1423_s20  ;;  %203 = sbr.rel (%p928_p5) target bundleno = 32 (0x20), region = 24 }
   0x8   : > { %p40_p4 = scmp.eq.s32.totalorder %s38_s21, 0 }
   0xa   : > { %s1274_s23 = scalar_select %p40_p4, %s1199_s16, %s42_s22  }
   0xc   : > { %206 = sbr.rel (!%p51_p3) target bundleno = 32 (0x20), region = 28  ;;  %s208_s24 = sand.u32 (%p51_p3), 1, %s1199_s16  }
   0xd   : > { %s930_s25 = sshll.u32 (%p51_p3), %s1207_s18, 2  ;;  %s929_s26 = sshll.u32 (%p51_p3), %s208_s24, 6 }
   0xe   : > { %s1282_s29 = scalar_lea.vmem (%p51_p3), %s1413_s0, %s930_s25  ;;  %s210_s30 = scalar_lea.vmem (%p51_p3), [#allocation3], %s929_s26 }
   0xf   : > { %v232_v0 = vld [vmem:[%s1282_s29] sm:$0xf] (%p51_p3)  ;;  %v234_v1 = vld [vmem:[%s1282_s29 + $0x14] sm:$0xf] (%p51_p3)  ;;  %v236_v2 = vld [vmem:[%s1282_s29 + $0x28] sm:$0xf] (%p51_p3) }
  0x10   : > { %233 = vst [vmem:[%s210_s30] sm:$0xf] (%p51_p3), %v232_v0  ;;  %v238_v3 = vld [vmem:[%s1282_s29 + $0x3c] sm:$0xf] (%p51_p3)  ;;  %v240_v4 = vld [vmem:[%s1282_s29 + $0x50] sm:$0xf] (%p51_p3) }
  0x11   : > { %235 = vst [vmem:[%s210_s30 + $0x4] sm:$0xf] %v234_v1  ;;  %v242_v5 = vld [vmem:[%s1282_s29 + $0x64] sm:$0xf]  ;;  %v244_v6 = vld [vmem:[%s1282_s29 + $0x78] sm:$0xf] }
  0x12   : > { %237 = vst [vmem:[%s210_s30 + $0x8] sm:$0xf] %v236_v2  ;;  %v246_v7 = vld [vmem:[%s1282_s29 + $0x8c] sm:$0xf]  ;;  %v248_v8 = vld [vmem:[%s1282_s29 + $0xa0] sm:$0xf] }
  0x13   : > { %239 = vst [vmem:[%s210_s30 + $0xc] sm:$0xf] %v238_v3  ;;  %v250_v9 = vld [vmem:[%s1282_s29 + $0xb4] sm:$0xf]  ;;  %v252_v10 = vld [vmem:[%s1282_s29 + $0xc8] sm:$0xf] }
  0x14   : > { %241 = vst [vmem:[%s210_s30 + $0x10] sm:$0xf] %v240_v4  ;;  %v254_v11 = vld [vmem:[%s1282_s29 + $0xdc] sm:$0xf]  ;;  %v256_v12 = vld [vmem:[%s1282_s29 + $0xf0] sm:$0xf] }
  0x15   : > { %243 = vst [vmem:[%s210_s30 + $0x14] sm:$0xf] %v242_v5  ;;  %v258_v13 = vld [vmem:[%s1282_s29 + $0x104] sm:$0xf]  ;;  %v260_v14 = vld [vmem:[%s1282_s29 + $0x118] sm:$0xf] }
  0x16   : > { %245 = vst [vmem:[%s210_s30 + $0x18] sm:$0xf] %v244_v6  ;;  %v262_v15 = vld [vmem:[%s1282_s29 + $0x12c] sm:$0xf] }
  0x17   : > { %247 = vst [vmem:[%s210_s30 + $0x1c] sm:$0xf] %v246_v7 }
  0x18   : > { %249 = vst [vmem:[%s210_s30 + $0x20] sm:$0xf] %v248_v8 }
  0x19   : > { %251 = vst [vmem:[%s210_s30 + $0x24] sm:$0xf] %v250_v9 }
  0x1a   : > { %253 = vst [vmem:[%s210_s30 + $0x28] sm:$0xf] %v252_v10 }
  0x1b   : > { %255 = vst [vmem:[%s210_s30 + $0x2c] sm:$0xf] %v254_v11 }
  0x1c   : > { %257 = vst [vmem:[%s210_s30 + $0x30] sm:$0xf] %v256_v12 }
  0x1d   : > { %259 = vst [vmem:[%s210_s30 + $0x34] sm:$0xf] %v258_v13 }
  0x1e   : > { %261 = vst [vmem:[%s210_s30 + $0x38] sm:$0xf] %v260_v14 }
  0x1f   : > { %263 = vst [vmem:[%s210_s30 + $0x3c] sm:$0xf] %v262_v15 }
  0x20 PF: > { %p931_p6 = scmp.ge.s32.totalorder %s1211_s19, 1  ;;  %p330_p7 = scmp.lt.s32.totalorder %s1211_s19, 6 }
  0x22   : > { %p331_p8 = pnand %p931_p6, %p330_p7 }
  0x23   : > { %s337_s5 = sand.u32 (!%p331_p8), 1, %s1195_s15   ;;  %s933_s6 = sshll.u32 (!%p331_p8), %s1203_s17, 4 }
  0x24   : > { %334 = sbr.rel (%p331_p8) target bundleno = 282 (0x11a), region = 73  ;;  %s932_s7 = sshll.u32 (!%p331_p8), %s337_s5, 6 }
  0x25   : > { %p386_p9 = scmp.lt.s32.totalorder (!%p331_p8), %s933_s6, 79  ;;  %s1309_s12 = scalar_lea.vmem (!%p331_p8), [#allocation3], %s932_s7 }
  0x26   : > { %p935_p10 = scmp.ne.s32.totalorder (!%p331_p8), %s1203_s17, 0 }
  0x29   : > { %s1425_s6 = smov (!%p386_p9, %s933_s6), 79  ;;  %418 = sbr.rel (%p935_p10) target bundleno = 63 (0x3f), region = 81 }
  0x2a   : > { %s934_s8 = sshll.u32 %s1425_s6, 2 }
  0x2b   : > { %s1307_s11 = scalar_lea.vmem %s1414_s1, %s934_s8 }
  0x2e   : > { %v1213_v16 = vmov 0.0  }
  0x2f   : > { %419 = vst [vmem:[#allocation2 + $0x30] sm:$0xff] %v1213_v16 }
  0x30   : > { %420 = vst [vmem:[#allocation2] sm:$0xff] %v1213_v16 }
  0x31   : > { %421 = vst [vmem:[#allocation2 + $0x58] sm:$0xff] %v1213_v16 }
  0x32   : > { %422 = vst [vmem:[#allocation2 + $0x18] sm:$0xff] %v1213_v16 }
  0x33   : > { %423 = vst [vmem:[#allocation2 + $0x50] sm:$0xff] %v1213_v16 }
  0x34   : > { %424 = vst [vmem:[#allocation2 + $0x68] sm:$0xff] %v1213_v16 }
  0x35   : > { %425 = vst [vmem:[#allocation2 + $0x8] sm:$0xff] %v1213_v16 }
  0x36   : > { %426 = vst [vmem:[#allocation2 + $0x48] sm:$0xff] %v1213_v16 }
  0x37   : > { %427 = vst [vmem:[#allocation2 + $0x40] sm:$0xff] %v1213_v16 }
  0x38   : > { %428 = vst [vmem:[#allocation2 + $0x20] sm:$0xff] %v1213_v16 }
  0x39   : > { %429 = vst [vmem:[#allocation2 + $0x10] sm:$0xff] %v1213_v16 }
  0x3a   : > { %430 = vst [vmem:[#allocation2 + $0x38] sm:$0xff] %v1213_v16 }
  0x3b   : > { %431 = vst [vmem:[#allocation2 + $0x60] sm:$0xff] %v1213_v16 }
  0x3c   : > { %432 = vst [vmem:[#allocation2 + $0x70] sm:$0xff] %v1213_v16 }
  0x3d   : > { %433 = vst [vmem:[#allocation2 + $0x78] sm:$0xff] %v1213_v16 }
  0x3e   : > { %434 = vst [vmem:[#allocation2 + $0x28] sm:$0xff] %v1213_v16 }
  0x3f PF: > { %v1020_v17 = vld [vmem:[%s1307_s11 + $0x38] sm:$0xff]  ;;  %v1019_v18 = vld [vmem:[%s1307_s11 + $0x30] sm:$0xff]  ;;  %v1018_v19 = vld [vmem:[%s1307_s11 + $0x28] sm:$0xff]  ;;  %p1000_p11 = scmp.ne.s32.totalorder %s1203_s17, 4 }
  0x40   : > { %579 = vmatpush.bf16.msra.mxu0 %v1020_v17  ;;  %1107 = vmatpush.bf16.msra.mxu1 %v1020_v17  ;;  %v1017_v20 = vld [vmem:[%s1307_s11 + $0x20] sm:$0xff]  ;;  %v1016_v21 = vld [vmem:[%s1307_s11 + $0x18] sm:$0xff]  ;;  %v1015_v22 = vld [vmem:[%s1307_s11 + $0x10] sm:$0xff] }
  0x41   : > { %1108 = vmatpush.bf16.msra.mxu2 %v1020_v17  ;;  %1109 = vmatpush.bf16.msra.mxu3 %v1020_v17  ;;  %v1014_v23 = vld [vmem:[%s1307_s11 + $0x8] sm:$0xff]  ;;  %v1013_v24 = vld [vmem:[%s1307_s11] sm:$0xff]  ;;  %v1007_v26 = vld [vmem:[%s1309_s12 + $0x10] sm:$0xff] }
  0x42   : > { %v1005_v25 = vld [vmem:[%s1309_s12] sm:$0xff]  ;;  %v1011_v28 = vld [vmem:[%s1309_s12 + $0x30] sm:$0xff]  ;;  %v1006_v29 = vld [vmem:[%s1309_s12 + $0x8] sm:$0xff] }
  0x43   : > { %v1009_v27 = vld [vmem:[%s1309_s12 + $0x20] sm:$0xff]  ;;  %v1008_v30 = vld [vmem:[%s1309_s12 + $0x18] sm:$0xff]  ;;  %v1010_v31 = vld [vmem:[%s1309_s12 + $0x28] sm:$0xff] }
  0x44   : > { %580 = vmatpush.bf16.msra.mxu0 %v1019_v18  ;;  %1110 = vmatpush.bf16.msra.mxu1 %v1019_v18  ;;  %v1012_v32 = vld [vmem:[%s1309_s12 + $0x38] sm:$0xff]  ;;  %v435_v33 = vld [vmem:[#allocation2 + $0x30] sm:$0xff]  ;;  %v443_v39 = vld [vmem:[#allocation2 + $0x40] sm:$0xff] }
  0x45   : > { %1111 = vmatpush.bf16.msra.mxu2 %v1019_v18  ;;  %1112 = vmatpush.bf16.msra.mxu3 %v1019_v18  ;;  %v439_v34 = vld [vmem:[#allocation2 + $0x50] sm:$0xff]  ;;  %v447_v40 = vld [vmem:[#allocation2 + $0x60] sm:$0xff]  ;;  %v440_v42 = vld [vmem:[#allocation2 + $0x68] sm:$0xff] }
  0x46   : > { %v436_v41 = vld [vmem:[#allocation2] sm:$0xff]  ;;  %v448_v52 = vld [vmem:[#allocation2 + $0x70] sm:$0xff]  ;;  %v437_v53 = vld [vmem:[#allocation2 + $0x58] sm:$0xff] }
  0x47   : > { %v444_v51 = vld [vmem:[#allocation2 + $0x20] sm:$0xff]  ;;  %v441_v54 = vld [vmem:[#allocation2 + $0x8] sm:$0xff]  ;;  %v445_v63 = vld [vmem:[#allocation2 + $0x10] sm:$0xff] }
  0x48   : > { %581 = vmatpush.bf16.msra.mxu0 %v1018_v19  ;;  %1113 = vmatpush.bf16.msra.mxu1 %v1018_v19  ;;  %v449_v0 = vld [vmem:[#allocation2 + $0x78] sm:$0xff]  ;;  %v442_v2 = vld [vmem:[#allocation2 + $0x48] sm:$0xff] }
  0x49   : > { %1114 = vmatpush.bf16.msra.mxu2 %v1018_v19  ;;  %1115 = vmatpush.bf16.msra.mxu3 %v1018_v19  ;;  %v438_v1 = vld [vmem:[#allocation2 + $0x18] sm:$0xff]  ;;  %v450_v12 = vld [vmem:[#allocation2 + $0x28] sm:$0xff] }
  0x4a   : > { %v446_v11 = vld [vmem:[#allocation2 + $0x38] sm:$0xff] }
  0x4c   : > { %582 = vmatpush.bf16.msra.mxu0 %v1017_v20  ;;  %1116 = vmatpush.bf16.msra.mxu1 %v1017_v20 }
  0x4d   : > { %1117 = vmatpush.bf16.msra.mxu2 %v1017_v20  ;;  %1118 = vmatpush.bf16.msra.mxu3 %v1017_v20 }
  0x50   : > { %583 = vmatpush.bf16.msra.mxu0 %v1016_v21  ;;  %1119 = vmatpush.bf16.msra.mxu1 %v1016_v21 }
  0x51   : > { %1120 = vmatpush.bf16.msra.mxu2 %v1016_v21  ;;  %1121 = vmatpush.bf16.msra.mxu3 %v1016_v21 }
  0x54   : > { %584 = vmatpush.bf16.msra.mxu0 %v1015_v22  ;;  %1122 = vmatpush.bf16.msra.mxu1 %v1015_v22 }
  0x55   : > { %1123 = vmatpush.bf16.msra.mxu2 %v1015_v22  ;;  %1124 = vmatpush.bf16.msra.mxu3 %v1015_v22 }
  0x58   : > { %585 = vmatpush.bf16.msra.mxu0 %v1014_v23  ;;  %1125 = vmatpush.bf16.msra.mxu1 %v1014_v23 }
  0x59   : > { %1126 = vmatpush.bf16.msra.mxu2 %v1014_v23  ;;  %1127 = vmatpush.bf16.msra.mxu3 %v1014_v23 }
  0x5c   : > { %586 = vmatpush.bf16.msra.mxu0 %v1013_v24  ;;  %1128 = vmatpush.bf16.msra.mxu1 %v1013_v24 }
  0x5d   : > { %1129 = vmatpush.bf16.msra.mxu2 %v1013_v24  ;;  %1130 = vmatpush.bf16.msra.mxu3 %v1013_v24 }
  0x5f   : > { %587 = vmatmul.bf16.vlgmr.msra.gmra.mxu0 %v1005_v25  ;;  %597 = vmatmul.bf16.vlgmr.msra.gmra.mxu1 %v1007_v26 }
  0x60   : > { %607 = vmatmul.bf16.vlgmr.msra.gmra.mxu2 %v1009_v27  ;;  %617 = vmatmul.bf16.vlgmr.msra.gmra.mxu3 %v1011_v28 }
  0x6f   : > { %592 = vmatmul.bf16.gmra.mxu0 %v1006_v29  ;;  %602 = vmatmul.bf16.gmra.mxu1 %v1008_v30 }
  0x70   : > { %612 = vmatmul.bf16.gmra.mxu2 %v1010_v31  ;;  %622 = vmatmul.bf16.gmra.mxu3 %v1012_v32 }
  0xdc   : > { %v588_v35 = vpop.f32.mrf.mxu0  ;;  %v598_v36 = vpop.f32.mrf.mxu1 }
  0xdd   : > { %v628_v37 = vadd.f32 %v588_v35, %v435_v33  ;;  %v632_v38 = vadd.f32 %v598_v36, %v439_v34 }
  0xdf   : > { %644 = vst [vmem:[#allocation2 + $0x30] sm:$0xff] %v628_v37 }
  0xe0   : > { %648 = vst [vmem:[#allocation2 + $0x50] sm:$0xff] %v632_v38 }
  0xe3   : > { %v608_v43 = vpop.f32.mrf.mxu2  ;;  %v618_v44 = vpop.f32.mrf.mxu3 }
  0xe4   : > { %v636_v45 = vadd.f32 %v608_v43, %v443_v39  ;;  %v640_v46 = vadd.f32 %v618_v44, %v447_v40  ;;  %v590_v47 = vpop.f32.mrf.mxu0  ;;  %v600_v48 = vpop.f32.mrf.mxu1 }
  0xe5   : > { %v629_v49 = vadd.f32 %v590_v47, %v436_v41  ;;  %v633_v50 = vadd.f32 %v600_v48, %v440_v42 }
  0xe6   : > { %652 = vst [vmem:[#allocation2 + $0x40] sm:$0xff] %v636_v45 }
  0xe7   : > { %656 = vst [vmem:[#allocation2 + $0x60] sm:$0xff] %v640_v46 }
  0xe8   : > { %645 = vst [vmem:[#allocation2] sm:$0xff] %v629_v49 }
  0xe9   : > { %649 = vst [vmem:[#allocation2 + $0x68] sm:$0xff] %v633_v50 }
  0xeb   : > { %v610_v55 = vpop.f32.mrf.mxu2  ;;  %v620_v56 = vpop.f32.mrf.mxu3 }
  0xec   : > { %v637_v57 = vadd.f32 %v610_v55, %v444_v51  ;;  %v641_v58 = vadd.f32 %v620_v56, %v448_v52  ;;  %v593_v59 = vpop.f32.mrf.mxu0  ;;  %v603_v60 = vpop.f32.mrf.mxu1 }
  0xed   : > { %v630_v61 = vadd.f32 %v593_v59, %v437_v53  ;;  %v634_v62 = vadd.f32 %v603_v60, %v441_v54 }
  0xee   : > { %653 = vst [vmem:[#allocation2 + $0x20] sm:$0xff] %v637_v57 }
  0xef   : > { %657 = vst [vmem:[#allocation2 + $0x70] sm:$0xff] %v641_v58 }
  0xf0   : > { %646 = vst [vmem:[#allocation2 + $0x58] sm:$0xff] %v630_v61 }
  0xf1   : > { %650 = vst [vmem:[#allocation2 + $0x8] sm:$0xff] %v634_v62 }
  0xf3   : > { %v613_v3 = vpop.f32.mrf.mxu2  ;;  %v623_v4 = vpop.f32.mrf.mxu3 }
  0xf4   : > { %v638_v5 = vadd.f32 %v613_v3, %v445_v63  ;;  %v642_v6 = vadd.f32 %v623_v4, %v449_v0  ;;  %v595_v7 = vpop.f32.mrf.mxu0  ;;  %v605_v8 = vpop.f32.mrf.mxu1 }
  0xf5   : > { %v631_v9 = vadd.f32 %v595_v7, %v438_v1  ;;  %v635_v10 = vadd.f32 %v605_v8, %v442_v2 }
  0xf6   : > { %654 = vst [vmem:[#allocation2 + $0x10] sm:$0xff] %v638_v5 }
  0xf7   : > { %658 = vst [vmem:[#allocation2 + $0x78] sm:$0xff] %v642_v6 }
  0xf8   : > { %647 = vst [vmem:[#allocation2 + $0x18] sm:$0xff] %v631_v9 }
  0xf9   : > { %651 = vst [vmem:[#allocation2 + $0x48] sm:$0xff] %v635_v10 }
  0xfb   : > { %v615_v13 = vpop.f32.mrf.mxu2  ;;  %v625_v14 = vpop.f32.mrf.mxu3  ;;  %663 = sbr.rel (%p1000_p11) target bundleno = 282 (0x11a), region = 85 }
  0xfc   : > { %v639_v15 = vadd.f32 %v615_v13, %v446_v11  ;;  %v643_v16 = vadd.f32 %v625_v14, %v450_v12 }
  0xfe   : > { %655 = vst [vmem:[#allocation2 + $0x38] sm:$0xff] %v639_v15 }
  0xff   : > { %659 = vst [vmem:[#allocation2 + $0x28] sm:$0xff] %v643_v16 }
 0x100   : > { %v664_v17 = vld [vmem:[#allocation2 + $0x30] sm:$0xff]  ;;  %v665_v18 = vld [vmem:[#allocation2] sm:$0xff]  ;;  %v666_v21 = vld [vmem:[#allocation2 + $0x58] sm:$0xff] }
 0x101   : > { %v1332_v19 = vld [vmem:[%s1415_s2] ss:$0 sm:$0xff]  ;;  %v667_v24 = vld [vmem:[#allocation2 + $0x18] sm:$0xff]  ;;  %v1093_v25 = vld [vmem:[%s1416_s3 + $0x8] sm:$0xff]  }
 0x102   : > { %v1022_v20 = vld [vmem:[%s1416_s3] sm:$0xff]   ;;  %v668_v26 = vld [vmem:[#allocation2 + $0x50] sm:$0xff]  ;;  %v684_v27 = vadd.f32 %v1332_v19, %v664_v17  ;;  %v685_v28 = vadd.f32 %v1332_v19, %v665_v18  ;;  %v686_v29 = vadd.f32 %v1332_v19, %v666_v21  ;;  %v687_v30 = vadd.f32 %v1332_v19, %v667_v24  ;;  %v669_v31 = vld [vmem:[#allocation2 + $0x68] sm:$0xff] }
 0x103   : > { %v1023_v22 = vunpack.c.l.bf16 %v1022_v20  ;;  %v1024_v23 = vunpack.c.h.bf16 %v1022_v20  ;;  %v1094_v32 = vld [vmem:[%s1416_s3 + $0x10] sm:$0xff]   ;;  %v670_v33 = vld [vmem:[#allocation2 + $0x8] sm:$0xff]  ;;  %v1027_v34 = vunpack.c.l.bf16 %v1093_v25  ;;  %v1028_v35 = vunpack.c.h.bf16 %v1093_v25  ;;  %v1095_v43 = vld [vmem:[%s1416_s3 + $0x18] sm:$0xff]  }
 0x104   : > { %v688_v36 = vadd.f32 %v1332_v19, %v668_v26  ;;  %v689_v37 = vadd.f32 %v1332_v19, %v669_v31  ;;  %v671_v38 = vld [vmem:[#allocation2 + $0x48] sm:$0xff]  ;;  %v1031_v41 = vunpack.c.l.bf16 %v1094_v32  ;;  %v1032_v42 = vunpack.c.h.bf16 %v1094_v32  ;;  %v672_v48 = vld [vmem:[#allocation2 + $0x40] sm:$0xff]  ;;  %v674_v59 = vld [vmem:[#allocation2 + $0x10] sm:$0xff] }
 0x105   : > { %v732_v39 = vadd.f32 %v1023_v22, %v684_v27  ;;  %v733_v40 = vadd.f32 %v1024_v23, %v685_v28  ;;  %v734_v44 = vadd.f32 %v1027_v34, %v686_v29  ;;  %v735_v45 = vadd.f32 %v1028_v35, %v687_v30  ;;  %v673_v53 = vld [vmem:[#allocation2 + $0x20] sm:$0xff]  ;;  %v675_v0 = vld [vmem:[#allocation2 + $0x38] sm:$0xff]  ;;  %v1097_v1 = vld [vmem:[%s1416_s3 + $0x28] sm:$0xff]  }
 0x106   : > { %v690_v46 = vadd.f32 %v1332_v19, %v670_v33  ;;  %v691_v47 = vadd.f32 %v1332_v19, %v671_v38  ;;  %v736_v51 = vadd.f32 %v1031_v41, %v688_v36  ;;  %v737_v52 = vadd.f32 %v1032_v42, %v689_v37  ;;  %v1096_v58 = vld [vmem:[%s1416_s3 + $0x20] sm:$0xff]   ;;  %v677_v11 = vld [vmem:[#allocation2 + $0x70] sm:$0xff]  ;;  %v678_v22 = vld [vmem:[#allocation2 + $0x78] sm:$0xff] }
 0x107   : > { %v748_v49 = vmax.f32 %v732_v39, 0.0  ;;  %v749_v50 = vmax.f32 %v733_v40, 0.0  ;;  %v750_v54 = vmax.f32 %v734_v44, 0.0  ;;  %v751_v55 = vmax.f32 %v735_v45, 0.0  ;;  %v676_v6 = vld [vmem:[#allocation2 + $0x60] sm:$0xff]  ;;  %v1098_v12 = vld [vmem:[%s1416_s3 + $0x30] sm:$0xff]  }
 0x108   : > { %v1035_v56 = vunpack.c.l.bf16 %v1095_v43  ;;  %v1036_v57 = vunpack.c.h.bf16 %v1095_v43  ;;  %v752_v61 = vmax.f32 %v736_v51, 0.0  ;;  %v753_v62 = vmax.f32 %v737_v52, 0.0  ;;  %v679_v23 = vld [vmem:[#allocation2 + $0x28] sm:$0xff]  ;;  %v1099_v28 = vld [vmem:[%s1416_s3 + $0x38] sm:$0xff]  }
 0x109   : > { %v1056_v60 = vpack.c.bf16 %v749_v50, %v748_v49  ;;  %v692_v63 = vadd.f32 %v1332_v19, %v672_v48  ;;  %v1061_v2 = vpack.c.bf16 %v751_v55, %v750_v54  ;;  %v693_v5 = vadd.f32 %v1332_v19, %v673_v53 }
 0x10a   : > { %v738_v3 = vadd.f32 %v1035_v56, %v690_v46  ;;  %v739_v4 = vadd.f32 %v1036_v57, %v691_v47  ;;  %v1066_v7 = vpack.c.bf16 %v753_v62, %v752_v61  ;;  %v1039_v8 = vunpack.c.l.bf16 %v1096_v58 }
 0x10b   : > { %1057 = vst [vmem:[%s1417_s4] sm:$0xff] %v1056_v60   ;;  %v1040_v9 = vunpack.c.h.bf16 %v1096_v58  ;;  %v694_v10 = vadd.f32 %v1332_v19, %v674_v59  ;;  %v695_v15 = vadd.f32 %v1332_v19, %v675_v0  ;;  %v1043_v16 = vunpack.c.l.bf16 %v1097_v1 }
 0x10c   : > { %1100 = vst [vmem:[%s1417_s4 + $0x8] sm:$0xff] %v1061_v2   ;;  %v754_v13 = vmax.f32 %v738_v3, 0.0  ;;  %v755_v14 = vmax.f32 %v739_v4, 0.0  ;;  %v740_v17 = vadd.f32 %v1039_v8, %v692_v63  ;;  %v1044_v20 = vunpack.c.h.bf16 %v1097_v1 }
 0x10d   : > { %1101 = vst [vmem:[%s1417_s4 + $0x10] sm:$0xff] %v1066_v7   ;;  %v741_v18 = vadd.f32 %v1040_v9, %v693_v5  ;;  %v696_v21 = vadd.f32 %v1332_v19, %v676_v6  ;;  %v742_v25 = vadd.f32 %v1043_v16, %v694_v10  ;;  %v697_v26 = vadd.f32 %v1332_v19, %v677_v11 }
 0x10e   : > { %v1071_v24 = vpack.c.bf16 %v755_v14, %v754_v13  ;;  %v1047_v27 = vunpack.c.l.bf16 %v1098_v12  ;;  %v756_v29 = vmax.f32 %v740_v17, 0.0  ;;  %v743_v31 = vadd.f32 %v1044_v20, %v695_v15 }
 0x10f   : > { %v757_v30 = vmax.f32 %v741_v18, 0.0  ;;  %v1048_v32 = vunpack.c.h.bf16 %v1098_v12  ;;  %v758_v33 = vmax.f32 %v742_v25, 0.0  ;;  %v698_v35 = vadd.f32 %v1332_v19, %v678_v22 }
 0x110   : > { %1102 = vst [vmem:[%s1417_s4 + $0x18] sm:$0xff] %v1071_v24   ;;  %v744_v34 = vadd.f32 %v1047_v27, %v696_v21  ;;  %v699_v36 = vadd.f32 %v1332_v19, %v679_v23  ;;  %v759_v38 = vmax.f32 %v743_v31, 0.0  ;;  %v1051_v40 = vunpack.c.l.bf16 %v1099_v28 }
 0x111   : > { %v1076_v37 = vpack.c.bf16 %v757_v30, %v756_v29  ;;  %v745_v39 = vadd.f32 %v1048_v32, %v697_v26  ;;  %v1052_v42 = vunpack.c.h.bf16 %v1099_v28 }
 0x112   : > { %v760_v41 = vmax.f32 %v744_v34, 0.0  ;;  %v1081_v43 = vpack.c.bf16 %v759_v38, %v758_v33  ;;  %v746_v45 = vadd.f32 %v1051_v40, %v698_v35 }
 0x113   : > { %1103 = vst [vmem:[%s1417_s4 + $0x20] sm:$0xff] %v1076_v37   ;;  %v761_v44 = vmax.f32 %v745_v39, 0.0  ;;  %v747_v46 = vadd.f32 %v1052_v42, %v699_v36 }
 0x114   : > { %1104 = vst [vmem:[%s1417_s4 + $0x28] sm:$0xff] %v1081_v43   ;;  %v762_v19 = vmax.f32 %v746_v45, 0.0 }
 0x115   : > { %v1086_v47 = vpack.c.bf16 %v761_v44, %v760_v41  ;;  %v763_v48 = vmax.f32 %v747_v46, 0.0 }
 0x117   : > { %1105 = vst [vmem:[%s1417_s4 + $0x30] sm:$0xff] %v1086_v47   ;;  %v1091_v49 = vpack.c.bf16 %v763_v48, %v762_v19 }
 0x119   : > { %1106 = vst [vmem:[%s1417_s4 + $0x38] sm:$0xff] %v1091_v49  }
 0x11a PF: > { %s14_s19 = sadd.s32 1, %s1211_s19   ;;  %s1418_s15 = smov %s1199_s16 }
 0x11b   : > { %p11_p12 = scmp.ge.s32.totalorder %s14_s19, 7   ;;  %s1419_s16 = smov %s1274_s23 }
 0x11c   : > { %s1420_s17 = smov %s1207_s18  ;;  %s1421_s18 = smov %s1423_s20 }
 0x11d   :  { %13 = sbr.rel (!%p11_p12) target bundleno = 3 (0x3), region = 129 }

// kernel: se_resnet18_forward.26
= control target key start
LH: loop header
LB: loop body
LE: loop exit
PB: predicated region body
PF: predicated region fallthrough
CT: control target
= control target key end

     0   :  { %s289_s1 = inlined_call_operand.vmem [shape: bf16[128,128], index: 1, kind: input, shape index: {}]   ;;  %s290_s2 = inlined_call_operand.vmem [shape: f32[1,128], index: 2, kind: input, shape index: {}]   ;;  %s291_s0 = inlined_call_operand.vmem [shape: bf16[32,128], index: 0, kind: input, shape index: {}]   ;;  %s292_s3 = inlined_call_operand.vmem [shape: bf16[32,128], index: 3, kind: output, shape index: {}]  }
   0x1   :  { %v209_v0 = vld [vmem:[%s289_s1 + $0x38] sm:$0xff]  ;;  %v208_v1 = vld [vmem:[%s289_s1 + $0x30] sm:$0xff]  ;;  %v207_v2 = vld [vmem:[%s289_s1 + $0x28] sm:$0xff] }
   0x2   :  { %106 = vmatpush.bf16.msra.mxu0 %v209_v0  ;;  %221 = vmatpush.bf16.msra.mxu1 %v209_v0  ;;  %v206_v3 = vld [vmem:[%s289_s1 + $0x20] sm:$0xff]  ;;  %v205_v4 = vld [vmem:[%s289_s1 + $0x18] sm:$0xff]  ;;  %v204_v5 = vld [vmem:[%s289_s1 + $0x10] sm:$0xff] }
   0x3   :  { %v203_v6 = vld [vmem:[%s289_s1 + $0x8] sm:$0xff]  ;;  %v202_v7 = vld [vmem:[%s289_s1] sm:$0xff] }
   0x4   :  { %v200_v8 = vld [vmem:[%s291_s0] sm:$0xff]  ;;  %v201_v9 = vld [vmem:[%s291_s0 + $0x8] sm:$0xff] }
   0x5   :  { %v229_v12 = vld [vmem:[%s290_s2] ss:$0 sm:$0xff] }
   0x6   :  { %107 = vmatpush.bf16.msra.mxu0 %v208_v1  ;;  %222 = vmatpush.bf16.msra.mxu1 %v208_v1 }
   0xa   :  { %108 = vmatpush.bf16.msra.mxu0 %v207_v2  ;;  %223 = vmatpush.bf16.msra.mxu1 %v207_v2 }
   0xe   :  { %109 = vmatpush.bf16.msra.mxu0 %v206_v3  ;;  %224 = vmatpush.bf16.msra.mxu1 %v206_v3 }
  0x12   :  { %110 = vmatpush.bf16.msra.mxu0 %v205_v4  ;;  %225 = vmatpush.bf16.msra.mxu1 %v205_v4 }
  0x16   :  { %111 = vmatpush.bf16.msra.mxu0 %v204_v5  ;;  %226 = vmatpush.bf16.msra.mxu1 %v204_v5 }
  0x1a   :  { %112 = vmatpush.bf16.msra.mxu0 %v203_v6  ;;  %227 = vmatpush.bf16.msra.mxu1 %v203_v6 }
  0x1e   :  { %113 = vmatpush.bf16.msra.mxu0 %v202_v7  ;;  %228 = vmatpush.bf16.msra.mxu1 %v202_v7 }
  0x21   :  { %114 = vmatmul.bf16.vlgmr.msra.gmra.mxu0 %v200_v8  ;;  %119 = vmatmul.bf16.vlgmr.msra.gmra.mxu1 %v201_v9 }
  0x9e   :  { %v115_v10 = vpop.f32.mrf.mxu0  ;;  %v120_v11 = vpop.f32.mrf.mxu1 }
  0x9f   :  { %v144_v15 = vadd.f32 %v229_v12, %v115_v10  ;;  %v146_v16 = vadd.f32 %v229_v12, %v120_v11 }
  0xa6   :  { %v117_v13 = vpop.f32.mrf.mxu0  ;;  %v122_v14 = vpop.f32.mrf.mxu1 }
  0xa7   :  { %v145_v17 = vadd.f32 %v229_v12, %v117_v13  ;;  %v147_v18 = vadd.f32 %v229_v12, %v122_v14 }
  0xa9   :  { %v213_v19 = vpack.c.bf16 %v145_v17, %v144_v15  ;;  %v218_v20 = vpack.c.bf16 %v147_v18, %v146_v16 }
  0xab   :  { %214 = vst [vmem:[%s292_s3] sm:$0xff] %v213_v19  }
  0xac   :  { %220 = vst [vmem:[%s292_s3 + $0x8] sm:$0xff] %v218_v20  }

// kernel: se_resnet18_forward.27
= control target key start
LH: loop header
LB: loop body
LE: loop exit
PB: predicated region body
PF: predicated region fallthrough
CT: control target
= control target key end

     0   :  { %s752_s12 = smov 0   ;;  %s754_s13 = smov 0   ;;  %s845_s0 = inlined_call_operand.vmem [shape: bf16[32,640], index: 0, kind: input, shape index: {}]   ;;  %s846_s1 = inlined_call_operand.vmem [shape: bf16[640,128], index: 1, kind: input, shape index: {}]   ;;  %s847_s2 = inlined_call_operand.vmem [shape: f32[1,128], index: 2, kind: input, shape index: {}]   ;;  %s848_s3 = inlined_call_operand.vmem [shape: bf16[32,128], index: 3, kind: output, shape index: {}]  }
   0x1   :  { %s756_s14 = smov 0   ;;  %s758_s15 = smov 0  }
   0x2   :  { %s760_s16 = smov 0  }
   0x3 LB: > { %s25_s17 = sadd.s32 1, %s725_s15  ;;  %p48_p1 = scmp.ne.s32.totalorder %s717_s13, %s713_s12  ;;  %s729_s16 = sphi %s760_s16, %s13_s16   ;;  %s725_s15 = sphi %s758_s15, %s852_s15   ;;  %s721_s14 = sphi %s756_s14, %s851_s14   ;;  %s717_s13 = sphi %s754_s13, %s850_s13   ;;  %s713_s12 = sphi %s752_s12, %s849_s12  }
   0x4   : > { %p26_p0 = scmp.ge.s32.totalorder %s25_s17, 5  ;;  %p49_p2 = scmp.eq.s32.totalorder %s729_s16, 0 }
   0x5   : > { %s41_s19 = sadd.s32 1, %s717_s13  ;;  %p567_p5 = scmp.ge.s32.totalorder %s729_s16, 5 }
   0x6   : > { %s854_s17 = smov (%p26_p0, %s25_s17), 0  ;;  %p50_p3 = por %p49_p2, %p48_p1 }
   0x7   : > { %s37_s18 = ssub.s32 %s725_s15, %s854_s17  ;;  %162 = sbr.rel (%p567_p5) target bundleno = 20 (0x14), region = 20 }
   0x8   : > { %p39_p4 = scmp.eq.s32.totalorder %s37_s18, 0 }
   0xa   : > { %s787_s20 = scalar_select %p39_p4, %s717_s13, %s41_s19  }
   0xc   : > { %165 = sbr.rel (!%p50_p3) target bundleno = 20 (0x14), region = 24  ;;  %s167_s21 = sand.u32 (%p50_p3), 1, %s717_s13  }
   0xd   : > { %s569_s22 = sshll.u32 (%p50_p3), %s725_s15, 2  ;;  %s568_s23 = sshll.u32 (%p50_p3), %s167_s21, 4 }
   0xe   : > { %s174_s26 = scalar_lea.vmem (%p50_p3), %s845_s0, %s569_s22  ;;  %s169_s27 = scalar_lea.vmem (%p50_p3), [#allocation3], %s568_s23 }
   0xf   : > { %v191_v0 = vld [vmem:[%s174_s26] sm:$0xf] (%p50_p3)  ;;  %v193_v1 = vld [vmem:[%s174_s26 + $0x14] sm:$0xf] (%p50_p3)  ;;  %v195_v2 = vld [vmem:[%s174_s26 + $0x28] sm:$0xf] (%p50_p3) }
  0x10   : > { %192 = vst [vmem:[%s169_s27] sm:$0xf] (%p50_p3), %v191_v0  ;;  %v197_v3 = vld [vmem:[%s174_s26 + $0x3c] sm:$0xf] (%p50_p3) }
  0x11   : > { %194 = vst [vmem:[%s169_s27 + $0x4] sm:$0xf] %v193_v1 }
  0x12   : > { %196 = vst [vmem:[%s169_s27 + $0x8] sm:$0xf] %v195_v2 }
  0x13   : > { %198 = vst [vmem:[%s169_s27 + $0xc] sm:$0xf] %v197_v3 }
  0x14 PF: > { %p570_p6 = scmp.ge.s32.totalorder %s729_s16, 1  ;;  %p241_p7 = scmp.lt.s32.totalorder %s729_s16, 6 }
  0x16   : > { %p242_p8 = pnand %p570_p6, %p241_p7 }
  0x17   : > { %s248_s28 = sand.u32 (!%p242_p8), 1, %s713_s12   ;;  %s572_s29 = sshll.u32 (!%p242_p8), %s721_s14, 4 }
  0x18   : > { %245 = sbr.rel (%p242_p8) target bundleno = 223 (0xdf), region = 69  ;;  %s799_s30 = sshll.u32 (!%p242_p8), %s248_s28, 4 }
  0x19   : > { %p287_p9 = scmp.lt.s32.totalorder (!%p242_p8), %s572_s29, 79  ;;  %s250_s8 = scalar_lea.vmem (!%p242_p8), [#allocation3], %s799_s30 }
  0x1a   : > { %p574_p10 = scmp.ne.s32.totalorder (!%p242_p8), %s721_s14, 0 }
  0x1d   : > { %s856_s29 = smov (!%p287_p9, %s572_s29), 79  ;;  %310 = sbr.rel (%p574_p10) target bundleno = 39 (0x27), region = 77 }
  0x1e   : > { %s573_s4 = sshll.u32 %s856_s29, 2 }
  0x1f   : > { %s804_s7 = scalar_lea.vmem %s846_s1, %s573_s4 }
  0x22   : > { %v731_v4 = vmov 0.0  }
  0x23   : > { %311 = vst [vmem:[#allocation2 + $0x10] sm:$0xff] %v731_v4 }
  0x24   : > { %312 = vst [vmem:[#allocation2] sm:$0xff] %v731_v4 }
  0x25   : > { %313 = vst [vmem:[#allocation2 + $0x18] sm:$0xff] %v731_v4 }
  0x26   : > { %314 = vst [vmem:[#allocation2 + $0x8] sm:$0xff] %v731_v4 }
  0x27 PF: > { %v629_v5 = vld [vmem:[%s804_s7 + $0x38] sm:$0xff]  ;;  %v628_v6 = vld [vmem:[%s804_s7 + $0x30] sm:$0xff]  ;;  %v627_v7 = vld [vmem:[%s804_s7 + $0x28] sm:$0xff]  ;;  %p615_p11 = scmp.ne.s32.totalorder %s721_s14, 4 }
  0x28   : > { %399 = vmatpush.bf16.msra.mxu0 %v629_v5  ;;  %641 = vmatpush.bf16.msra.mxu1 %v629_v5  ;;  %v626_v8 = vld [vmem:[%s804_s7 + $0x20] sm:$0xff]  ;;  %v625_v9 = vld [vmem:[%s804_s7 + $0x18] sm:$0xff]  ;;  %v624_v10 = vld [vmem:[%s804_s7 + $0x10] sm:$0xff] }
  0x29   : > { %v623_v11 = vld [vmem:[%s804_s7 + $0x8] sm:$0xff]  ;;  %v622_v12 = vld [vmem:[%s804_s7] sm:$0xff] }
  0x2a   : > { %v620_v13 = vld [vmem:[%s250_s8] sm:$0xff]  ;;  %v621_v14 = vld [vmem:[%s250_s8 + $0x8] sm:$0xff] }
  0x2b   : > { %v315_v15 = vld [vmem:[#allocation2 + $0x10] sm:$0xff]  ;;  %v316_v21 = vld [vmem:[#allocation2] sm:$0xff] }
  0x2c   : > { %400 = vmatpush.bf16.msra.mxu0 %v628_v6  ;;  %642 = vmatpush.bf16.msra.mxu1 %v628_v6  ;;  %v317_v16 = vld [vmem:[#allocation2 + $0x18] sm:$0xff] }
  0x2d   : > { %v318_v22 = vld [vmem:[#allocation2 + $0x8] sm:$0xff] }
  0x30   : > { %401 = vmatpush.bf16.msra.mxu0 %v627_v7  ;;  %643 = vmatpush.bf16.msra.mxu1 %v627_v7 }
  0x34   : > { %402 = vmatpush.bf16.msra.mxu0 %v626_v8  ;;  %644 = vmatpush.bf16.msra.mxu1 %v626_v8 }
  0x38   : > { %403 = vmatpush.bf16.msra.mxu0 %v625_v9  ;;  %645 = vmatpush.bf16.msra.mxu1 %v625_v9 }
  0x3c   : > { %404 = vmatpush.bf16.msra.mxu0 %v624_v10  ;;  %646 = vmatpush.bf16.msra.mxu1 %v624_v10 }
  0x40   : > { %405 = vmatpush.bf16.msra.mxu0 %v623_v11  ;;  %647 = vmatpush.bf16.msra.mxu1 %v623_v11 }
  0x44   : > { %406 = vmatpush.bf16.msra.mxu0 %v622_v12  ;;  %648 = vmatpush.bf16.msra.mxu1 %v622_v12 }
  0x47   : > { %407 = vmatmul.bf16.vlgmr.msra.gmra.mxu0 %v620_v13  ;;  %412 = vmatmul.bf16.vlgmr.msra.gmra.mxu1 %v621_v14 }
  0xc4   : > { %v408_v17 = vpop.f32.mrf.mxu0  ;;  %v413_v18 = vpop.f32.mrf.mxu1 }
  0xc5   : > { %v418_v19 = vadd.f32 %v408_v17, %v315_v15  ;;  %v420_v20 = vadd.f32 %v413_v18, %v317_v16 }
  0xc7   : > { %422 = vst [vmem:[#allocation2 + $0x10] sm:$0xff] %v418_v19 }
  0xc8   : > { %424 = vst [vmem:[#allocation2 + $0x18] sm:$0xff] %v420_v20 }
  0xcc   : > { %v410_v23 = vpop.f32.mrf.mxu0  ;;  %v415_v24 = vpop.f32.mrf.mxu1  ;;  %429 = sbr.rel (%p615_p11) target bundleno = 223 (0xdf), region = 81 }
  0xcd   : > { %v419_v25 = vadd.f32 %v410_v23, %v316_v21  ;;  %v421_v26 = vadd.f32 %v415_v24, %v318_v22 }
  0xcf   : > { %423 = vst [vmem:[#allocation2] sm:$0xff] %v419_v25 }
  0xd0   : > { %425 = vst [vmem:[#allocation2 + $0x8] sm:$0xff] %v421_v26 }
  0xd1   : > { %v430_v27 = vld [vmem:[#allocation2 + $0x10] sm:$0xff]  ;;  %v690_v29 = vld [vmem:[%s847_s2] ss:$0 sm:$0xff]  ;;  %v432_v30 = vld [vmem:[#allocation2 + $0x18] sm:$0xff] }
  0xd2   : > { %v438_v32 = vadd.f32 %v690_v29, %v430_v27  ;;  %v440_v34 = vadd.f32 %v690_v29, %v432_v30 }
  0xd4   : > { %v442_v36 = vmax.f32 %v438_v32, 0.0  ;;  %v444_v38 = vmax.f32 %v440_v34, 0.0 }
  0xd6   : > { %v431_v28 = vld [vmem:[#allocation2] sm:$0xff] }
  0xd7   : > { %v433_v31 = vld [vmem:[#allocation2 + $0x8] sm:$0xff]  ;;  %v439_v33 = vadd.f32 %v690_v29, %v431_v28 }
  0xd8   : > { %v441_v35 = vadd.f32 %v690_v29, %v433_v31 }
  0xd9   : > { %v443_v37 = vmax.f32 %v439_v33, 0.0 }
  0xda   : > { %v445_v39 = vmax.f32 %v441_v35, 0.0 }
  0xdb   : > { %v633_v40 = vpack.c.bf16 %v443_v37, %v442_v36 }
  0xdc   : > { %v638_v41 = vpack.c.bf16 %v445_v39, %v444_v38 }
  0xdd   : > { %634 = vst [vmem:[%s848_s3] sm:$0xff] %v633_v40  }
  0xde   : > { %640 = vst [vmem:[%s848_s3 + $0x8] sm:$0xff] %v638_v41  }
  0xdf PF: > { %s13_s16 = sadd.s32 1, %s729_s16   ;;  %s849_s12 = smov %s717_s13 }
  0xe0   : > { %p10_p12 = scmp.ge.s32.totalorder %s13_s16, 7   ;;  %s850_s13 = smov %s787_s20 }
  0xe1   : > { %s851_s14 = smov %s725_s15  ;;  %s852_s15 = smov %s854_s17 }
  0xe2   :  { %12 = sbr.rel (!%p10_p12) target bundleno = 3 (0x3), region = 122 }

// kernel: se_resnet18_forward.28
= control target key start
LH: loop header
LB: loop body
LE: loop exit
PB: predicated region body
PF: predicated region fallthrough
CT: control target
= control target key end

     0   :  { %s1150_s15 = smov 0   ;;  %s1152_s16 = smov 0   ;;  %s1272_s0 = inlined_call_operand.vmem [shape: bf16[32,1152], index: 0, kind: input, shape index: {}]   ;;  %s1273_s1 = inlined_call_operand.vmem [shape: bf16[1152,128], index: 1, kind: input, shape index: {}]   ;;  %s1274_s2 = inlined_call_operand.vmem [shape: f32[1,128], index: 2, kind: input, shape index: {}]   ;;  %s1275_s3 = inlined_call_operand.vmem [shape: bf16[32,128], index: 3, kind: input, shape index: {}]   ;;  %s1276_s4 = inlined_call_operand.vmem [shape: bf16[32,128], index: 4, kind: output, shape index: {}]  }
   0x1   :  { %s1154_s17 = smov 0   ;;  %s1156_s18 = smov 0  }
   0x2   :  { %s1158_s19 = smov 0  }
   0x3 LB: > { %s26_s20 = sadd.s32 1, %s1118_s18  ;;  %p49_p1 = scmp.ne.s32.totalorder %s1110_s16, %s1106_s15  ;;  %s1122_s19 = sphi %s1158_s19, %s14_s19   ;;  %s1118_s18 = sphi %s1156_s18, %s1280_s18   ;;  %s1114_s17 = sphi %s1154_s17, %s1279_s17   ;;  %s1110_s16 = sphi %s1152_s16, %s1278_s16   ;;  %s1106_s15 = sphi %s1150_s15, %s1277_s15  }
   0x4   : > { %p27_p0 = scmp.ge.s32.totalorder %s26_s20, 3  ;;  %p50_p2 = scmp.eq.s32.totalorder %s1122_s19, 0 }
   0x5   : > { %s42_s22 = sadd.s32 1, %s1110_s16  ;;  %p843_p5 = scmp.ge.s32.totalorder %s1122_s19, 3 }
   0x6   : > { %s1282_s20 = smov (%p27_p0, %s26_s20), 0  ;;  %p51_p3 = por %p50_p2, %p49_p1 }
   0x7   : > { %s38_s21 = ssub.s32 %s1118_s18, %s1282_s20  ;;  %203 = sbr.rel (%p843_p5) target bundleno = 25 (0x19), region = 24 }
   0x8   : > { %p40_p4 = scmp.eq.s32.totalorder %s38_s21, 0 }
   0xa   : > { %s1185_s23 = scalar_select %p40_p4, %s1110_s16, %s42_s22  }
   0xc   : > { %206 = sbr.rel (!%p51_p3) target bundleno = 25 (0x19), region = 28  ;;  %s208_s24 = sand.u32 (%p51_p3), 1, %s1110_s16  }
   0xd   : > { %s981_s25 = smul.u32 (%p51_p3), 12, %s1118_s18 }
   0xe   : > { %s1040_s26 = smul.u32 (%p51_p3), 48, %s208_s24 }
   0xf   : > { %s216_s29 = scalar_lea.vmem (%p51_p3), %s1272_s0, %s981_s25 }
  0x10   : > { %v231_v0 = vld [vmem:[%s216_s29] sm:$0xff] (%p51_p3)  ;;  %v235_v2 = vld [vmem:[%s216_s29 + $0x48] sm:$0xff] (%p51_p3)  ;;  %s210_s30 = scalar_lea.vmem (%p51_p3), [#allocation3], %s1040_s26  ;;  %v849_v6 = vld [vmem:[%s216_s29 + $0x50] sm:$0xf] (%p51_p3) }
  0x11   : > { %v233_v1 = vld [vmem:[%s216_s29 + $0x24] sm:$0xff]  ;;  %232 = vst [vmem:[%s210_s30] sm:$0xff] %v231_v0  ;;  %v237_v3 = vld [vmem:[%s216_s29 + $0x6c] sm:$0xff]  ;;  %v851_v7 = vld [vmem:[%s216_s29 + $0x74] sm:$0xf] }
  0x12   : > { %234 = vst [vmem:[%s210_s30 + $0xc] sm:$0xff] %v233_v1  ;;  %v845_v4 = vld [vmem:[%s216_s29 + $0x8] sm:$0xf]  ;;  %v847_v5 = vld [vmem:[%s216_s29 + $0x2c] sm:$0xf] }
  0x13   : > { %236 = vst [vmem:[%s210_s30 + $0x18] sm:$0xff] %v235_v2 }
  0x14   : > { %238 = vst [vmem:[%s210_s30 + $0x24] sm:$0xff] %v237_v3 }
  0x15   : > { %846 = vst [vmem:[%s210_s30 + $0x8] sm:$0xf] %v845_v4 }
  0x16   : > { %848 = vst [vmem:[%s210_s30 + $0x14] sm:$0xf] %v847_v5 }
  0x17   : > { %850 = vst [vmem:[%s210_s30 + $0x20] sm:$0xf] %v849_v6 }
  0x18   : > { %852 = vst [vmem:[%s210_s30 + $0x2c] sm:$0xf] %v851_v7 }
  0x19 PF: > { %p853_p6 = scmp.ge.s32.totalorder %s1122_s19, 1  ;;  %p271_p7 = scmp.lt.s32.totalorder %s1122_s19, 4 }
  0x1b   : > { %p272_p8 = pnand %p853_p6, %p271_p7 }
  0x1c   : > { %s278_s5 = sand.u32 (!%p272_p8), 1, %s1106_s15   ;;  %s327_s6 = smul.u32 (!%p272_p8), 48, %s1114_s17 }
  0x1d   : > { %275 = sbr.rel (%p272_p8) target bundleno = 255 (0xff), region = 58  ;;  %p855_p10 = scmp.ne.s32.totalorder (!%p272_p8), %s1114_s17, 0 }
  0x1e   : > { %s1041_s7 = smul.u32 (!%p272_p8), 48, %s278_s5  ;;  %p328_p9 = scmp.lt.s32.totalorder (!%p272_p8), %s327_s6, 143 }
  0x20   : > { %s1202_s12 = scalar_lea.vmem (!%p272_p8), [#allocation3], %s1041_s7 }
  0x22   : > { %s1284_s6 = smov (!%p328_p9, %s327_s6), 143  ;;  %360 = sbr.rel (%p855_p10) target bundleno = 44 (0x2c), region = 66 }
  0x23   : > { %s854_s8 = sshll.u32 %s1284_s6, 2 }
  0x24   : > { %s1200_s11 = scalar_lea.vmem %s1273_s1, %s854_s8 }
  0x27   : > { %v1124_v8 = vmov 0.0  }
  0x28   : > { %361 = vst [vmem:[#allocation2 + $0x10] sm:$0xff] %v1124_v8 }
  0x29   : > { %362 = vst [vmem:[#allocation2] sm:$0xff] %v1124_v8 }
  0x2a   : > { %363 = vst [vmem:[#allocation2 + $0x18] sm:$0xff] %v1124_v8 }
  0x2b   : > { %364 = vst [vmem:[#allocation2 + $0x8] sm:$0xff] %v1124_v8 }
  0x2c PF: > { %v995_v9 = vld [vmem:[%s1200_s11 + $0x38] sm:$0xff]  ;;  %v994_v12 = vld [vmem:[%s1200_s11 + $0x30] sm:$0xff]  ;;  %v993_v15 = vld [vmem:[%s1200_s11 + $0x28] sm:$0xff]  ;;  %p976_p11 = scmp.ne.s32.totalorder %s1114_s17, 2 }
  0x2d   : > { %v1003_v10 = vld [vmem:[%s1200_s11 + $0x78] sm:$0xff]  ;;  %601 = vmatpush.bf16.msra.mxu0 %v995_v9  ;;  %v1002_v13 = vld [vmem:[%s1200_s11 + $0x70] sm:$0xff]  ;;  %1032 = vmatpush.bf16.msra.mxu3 %v995_v9  ;;  %v1001_v16 = vld [vmem:[%s1200_s11 + $0x68] sm:$0xff] }
  0x2e   : > { %v1011_v11 = vld [vmem:[%s1200_s11 + $0xb8] sm:$0xff]  ;;  %620 = vmatpush.bf16.msra.mxu1 %v1003_v10  ;;  %v1010_v14 = vld [vmem:[%s1200_s11 + $0xb0] sm:$0xff]  ;;  %v1009_v17 = vld [vmem:[%s1200_s11 + $0xa8] sm:$0xff] }
  0x2f   : > { %639 = vmatpush.bf16.msra.mxu2 %v1011_v11  ;;  %v992_v18 = vld [vmem:[%s1200_s11 + $0x20] sm:$0xff]  ;;  %v991_v21 = vld [vmem:[%s1200_s11 + $0x18] sm:$0xff]  ;;  %v990_v24 = vld [vmem:[%s1200_s11 + $0x10] sm:$0xff] }
  0x30   : > { %v1000_v19 = vld [vmem:[%s1200_s11 + $0x60] sm:$0xff]  ;;  %v999_v22 = vld [vmem:[%s1200_s11 + $0x58] sm:$0xff]  ;;  %v998_v25 = vld [vmem:[%s1200_s11 + $0x50] sm:$0xff] }
  0x31   : > { %602 = vmatpush.bf16.msra.mxu0 %v994_v12  ;;  %1033 = vmatpush.bf16.msra.mxu3 %v994_v12  ;;  %v1008_v20 = vld [vmem:[%s1200_s11 + $0xa0] sm:$0xff]  ;;  %v1007_v23 = vld [vmem:[%s1200_s11 + $0x98] sm:$0xff]  ;;  %v1006_v26 = vld [vmem:[%s1200_s11 + $0x90] sm:$0xff] }
  0x32   : > { %621 = vmatpush.bf16.msra.mxu1 %v1002_v13  ;;  %v989_v27 = vld [vmem:[%s1200_s11 + $0x8] sm:$0xff]  ;;  %v988_v30 = vld [vmem:[%s1200_s11] sm:$0xff]  ;;  %v365_v54 = vld [vmem:[#allocation2 + $0x10] sm:$0xff] }
  0x33   : > { %640 = vmatpush.bf16.msra.mxu2 %v1010_v14  ;;  %v997_v28 = vld [vmem:[%s1200_s11 + $0x48] sm:$0xff]  ;;  %v996_v31 = vld [vmem:[%s1200_s11 + $0x40] sm:$0xff]  ;;  %v367_v4 = vld [vmem:[#allocation2 + $0x18] sm:$0xff] }
  0x34   : > { %v1005_v29 = vld [vmem:[%s1200_s11 + $0x88] sm:$0xff]  ;;  %v1004_v32 = vld [vmem:[%s1200_s11 + $0x80] sm:$0xff] }
  0x35   : > { %603 = vmatpush.bf16.msra.mxu0 %v993_v15  ;;  %1034 = vmatpush.bf16.msra.mxu3 %v993_v15  ;;  %v858_v33 = vld [vmem:[%s1202_s12] sm:$0xf]  ;;  %v983_v34 = vld [vmem:[%s1202_s12 + $0x8] sm:$0xf0]  ;;  %v982_v35 = vld [vmem:[%s1202_s12 + $0x4] sm:$0xf] }
  0x36   : > { %622 = vmatpush.bf16.msra.mxu1 %v1001_v16  ;;  %v860_v36 = vld [vmem:[%s1202_s12 + $0xc] sm:$0xf0]  ;;  %v866_v37 = vld [vmem:[%s1202_s12 + $0x8] sm:$0xf]  ;;  %v984_v38 = vld [vmem:[%s1202_s12 + $0x10] sm:$0xf0]  ;;  %v859_v41 = vor.u32 %v983_v34, %v858_v33 }
  0x37   : > { %641 = vmatpush.bf16.msra.mxu2 %v1009_v17  ;;  %v870_v39 = vld [vmem:[%s1202_s12 + $0x18] sm:$0xf]  ;;  %v986_v40 = vld [vmem:[%s1202_s12 + $0x20] sm:$0xf0]  ;;  %v863_v42 = vor.u32 %v982_v35, %v860_v36  ;;  %v867_v43 = vor.u32 %v984_v38, %v866_v37  ;;  %v985_v45 = vld [vmem:[%s1202_s12 + $0x1c] sm:$0xf] }
  0x38   : > { %v871_v44 = vor.u32 %v986_v40, %v870_v39  ;;  %v872_v46 = vld [vmem:[%s1202_s12 + $0x24] sm:$0xf0]  ;;  %v878_v47 = vld [vmem:[%s1202_s12 + $0x20] sm:$0xf]  ;;  %v987_v48 = vld [vmem:[%s1202_s12 + $0x28] sm:$0xf0] }
  0x39   : > { %604 = vmatpush.bf16.msra.mxu0 %v992_v18  ;;  %1035 = vmatpush.bf16.msra.mxu3 %v992_v18  ;;  %v875_v49 = vor.u32 %v985_v45, %v872_v46  ;;  %v879_v50 = vor.u32 %v987_v48, %v878_v47  ;;  %v366_v61 = vld [vmem:[#allocation2] sm:$0xff]  ;;  %v368_v11 = vld [vmem:[#allocation2 + $0x8] sm:$0xff] }
  0x3a   : > { %623 = vmatpush.bf16.msra.mxu1 %v1000_v19 }
  0x3b   : > { %642 = vmatpush.bf16.msra.mxu2 %v1008_v20 }
  0x3d   : > { %605 = vmatpush.bf16.msra.mxu0 %v991_v21  ;;  %1036 = vmatpush.bf16.msra.mxu3 %v991_v21 }
  0x3e   : > { %624 = vmatpush.bf16.msra.mxu1 %v999_v22 }
  0x3f   : > { %643 = vmatpush.bf16.msra.mxu2 %v1007_v23 }
  0x41   : > { %606 = vmatpush.bf16.msra.mxu0 %v990_v24  ;;  %1037 = vmatpush.bf16.msra.mxu3 %v990_v24 }
  0x42   : > { %625 = vmatpush.bf16.msra.mxu1 %v998_v25 }
  0x43   : > { %644 = vmatpush.bf16.msra.mxu2 %v1006_v26 }
  0x45   : > { %607 = vmatpush.bf16.msra.mxu0 %v989_v27  ;;  %1038 = vmatpush.bf16.msra.mxu3 %v989_v27 }
  0x46   : > { %626 = vmatpush.bf16.msra.mxu1 %v997_v28 }
  0x47   : > { %645 = vmatpush.bf16.msra.mxu2 %v1005_v29 }
  0x49   : > { %608 = vmatpush.bf16.msra.mxu0 %v988_v30  ;;  %1039 = vmatpush.bf16.msra.mxu3 %v988_v30 }
  0x4a   : > { %627 = vmatpush.bf16.msra.mxu1 %v996_v31 }
  0x4b   : > { %646 = vmatpush.bf16.msra.mxu2 %v1004_v32 }
  0x4c   : > { %609 = vmatmul.bf16.vlgmr.msra.gmra.mxu0 %v859_v41  ;;  %614 = vmatmul.bf16.vlgmr.msra.gmra.mxu3 %v871_v44 }
  0x4d   : > { %628 = vmatmul.bf16.vlgmr.msra.gmra.mxu1 %v863_v42 }
  0x4e   : > { %647 = vmatmul.bf16.vlgmr.msra.gmra.mxu2 %v867_v43 }
  0x5d   : > { %633 = vmatmul.bf16.gmra.mxu1 %v875_v49 }
  0x5e   : > { %652 = vmatmul.bf16.gmra.mxu2 %v879_v50 }
  0xc9   : > { %v610_v52 = vpop.f32.mrf.mxu0 }
  0xca   : > { %v629_v51 = vpop.f32.mrf.mxu1 }
  0xcb   : > { %v630_v53 = vadd.f32 %v629_v51, %v610_v52 }
  0xcf   : > { %v615_v2 = vpop.f32.mrf.mxu3 }
  0xd1   : > { %v648_v55 = vpop.f32.mrf.mxu2  ;;  %v612_v59 = vpop.f32.mrf.mxu0 }
  0xd2   : > { %v649_v56 = vadd.f32 %v648_v55, %v630_v53  ;;  %v631_v57 = vpop.f32.mrf.mxu1 }
  0xd3   : > { %v632_v60 = vadd.f32 %v631_v57, %v612_v59 }
  0xd4   : > { %v658_v58 = vadd.f32 %v649_v56, %v365_v54 }
  0xd6   : > { %662 = vst [vmem:[#allocation2 + $0x10] sm:$0xff] %v658_v58 }
  0xd7   : > { %v617_v9 = vpop.f32.mrf.mxu3 }
  0xd9   : > { %v650_v62 = vpop.f32.mrf.mxu2 }
  0xda   : > { %v651_v63 = vadd.f32 %v650_v62, %v632_v60  ;;  %v634_v0 = vpop.f32.mrf.mxu1 }
  0xdb   : > { %v635_v3 = vadd.f32 %v634_v0, %v615_v2 }
  0xdc   : > { %v659_v1 = vadd.f32 %v651_v63, %v366_v61 }
  0xde   : > { %663 = vst [vmem:[#allocation2] sm:$0xff] %v659_v1 }
  0xe1   : > { %v653_v5 = vpop.f32.mrf.mxu2 }
  0xe2   : > { %v654_v6 = vadd.f32 %v653_v5, %v635_v3  ;;  %v636_v8 = vpop.f32.mrf.mxu1 }
  0xe3   : > { %v637_v10 = vadd.f32 %v636_v8, %v617_v9 }
  0xe4   : > { %v660_v7 = vadd.f32 %v654_v6, %v367_v4 }
  0xe6   : > { %664 = vst [vmem:[#allocation2 + $0x18] sm:$0xff] %v660_v7 }
  0xe9   : > { %v655_v12 = vpop.f32.mrf.mxu2 }
  0xea   : > { %v656_v13 = vadd.f32 %v655_v12, %v637_v10  ;;  %669 = sbr.rel (%p976_p11) target bundleno = 255 (0xff), region = 70 }
  0xec   : > { %v661_v14 = vadd.f32 %v656_v13, %v368_v11 }
  0xee   : > { %665 = vst [vmem:[#allocation2 + $0x8] sm:$0xff] %v661_v14 }
  0xef   : > { %v670_v15 = vld [vmem:[#allocation2 + $0x10] sm:$0xff]  ;;  %v671_v16 = vld [vmem:[#allocation2] sm:$0xff]  ;;  %v672_v19 = vld [vmem:[#allocation2 + $0x18] sm:$0xff] }
  0xf0   : > { %v1083_v17 = vld [vmem:[%s1274_s2] ss:$0 sm:$0xff]  ;;  %v1030_v23 = vld [vmem:[%s1275_s3 + $0x8] sm:$0xff]  }
  0xf1   : > { %v1013_v18 = vld [vmem:[%s1275_s3] sm:$0xff]   ;;  %v678_v24 = vadd.f32 %v1083_v17, %v670_v15  ;;  %v679_v25 = vadd.f32 %v1083_v17, %v671_v16  ;;  %v680_v26 = vadd.f32 %v1083_v17, %v672_v19  ;;  %v1018_v28 = vunpack.c.l.bf16 %v1030_v23 }
  0xf2   : > { %v1014_v20 = vunpack.c.l.bf16 %v1013_v18  ;;  %v1015_v21 = vunpack.c.h.bf16 %v1013_v18  ;;  %v1019_v29 = vunpack.c.h.bf16 %v1030_v23 }
  0xf3   : > { %v692_v32 = vadd.f32 %v1018_v28, %v680_v26 }
  0xf4   : > { %v690_v30 = vadd.f32 %v1014_v20, %v678_v24  ;;  %v691_v31 = vadd.f32 %v1015_v21, %v679_v25 }
  0xf5   : > { %v673_v22 = vld [vmem:[#allocation2 + $0x8] sm:$0xff]  ;;  %v696_v36 = vmax.f32 %v692_v32, 0.0 }
  0xf6   : > { %v681_v27 = vadd.f32 %v1083_v17, %v673_v22  ;;  %v694_v34 = vmax.f32 %v690_v30, 0.0  ;;  %v695_v35 = vmax.f32 %v691_v31, 0.0 }
  0xf8   : > { %v693_v33 = vadd.f32 %v1019_v29, %v681_v27  ;;  %v1023_v38 = vpack.c.bf16 %v695_v35, %v694_v34 }
  0xfa   : > { %v697_v37 = vmax.f32 %v693_v33, 0.0  ;;  %1024 = vst [vmem:[%s1276_s4] sm:$0xff] %v1023_v38  }
  0xfc   : > { %v1028_v39 = vpack.c.bf16 %v697_v37, %v696_v36 }
  0xfe   : > { %1031 = vst [vmem:[%s1276_s4 + $0x8] sm:$0xff] %v1028_v39  }
  0xff PF: > { %s14_s19 = sadd.s32 1, %s1122_s19   ;;  %s1277_s15 = smov %s1110_s16 }
 0x100   : > { %p11_p12 = scmp.ge.s32.totalorder %s14_s19, 5   ;;  %s1278_s16 = smov %s1185_s23 }
 0x101   : > { %s1279_s17 = smov %s1118_s18  ;;  %s1280_s18 = smov %s1282_s20 }
 0x102   :  { %13 = sbr.rel (!%p11_p12) target bundleno = 3 (0x3), region = 120 }

// kernel: se_resnet18_forward.29
= control target key start
LH: loop header
LB: loop body
LE: loop exit
PB: predicated region body
PF: predicated region fallthrough
CT: control target
= control target key end

     0   :  { %s1045_s12 = smov 0   ;;  %s1047_s13 = smov 0   ;;  %s1161_s0 = inlined_call_operand.vmem [shape: bf16[32,1152], index: 0, kind: input, shape index: {}]   ;;  %s1162_s1 = inlined_call_operand.vmem [shape: bf16[1152,128], index: 1, kind: input, shape index: {}]   ;;  %s1163_s2 = inlined_call_operand.vmem [shape: f32[1,128], index: 2, kind: input, shape index: {}]   ;;  %s1164_s3 = inlined_call_operand.vmem [shape: bf16[32,128], index: 3, kind: output, shape index: {}]  }
   0x1   :  { %s1049_s14 = smov 0   ;;  %s1051_s15 = smov 0  }
   0x2   :  { %s1053_s16 = smov 0  }
   0x3 LB: > { %s25_s17 = sadd.s32 1, %s1018_s15  ;;  %p48_p1 = scmp.ne.s32.totalorder %s1010_s13, %s1006_s12  ;;  %s1022_s16 = sphi %s1053_s16, %s13_s16   ;;  %s1018_s15 = sphi %s1051_s15, %s1168_s15   ;;  %s1014_s14 = sphi %s1049_s14, %s1167_s14   ;;  %s1010_s13 = sphi %s1047_s13, %s1166_s13   ;;  %s1006_s12 = sphi %s1045_s12, %s1165_s12  }
   0x4   : > { %p26_p0 = scmp.ge.s32.totalorder %s25_s17, 3  ;;  %p49_p2 = scmp.eq.s32.totalorder %s1022_s16, 0 }
   0x5   : > { %s41_s19 = sadd.s32 1, %s1010_s13  ;;  %p752_p5 = scmp.ge.s32.totalorder %s1022_s16, 3 }
   0x6   : > { %s1170_s17 = smov (%p26_p0, %s25_s17), 0  ;;  %p50_p3 = por %p49_p2, %p48_p1 }
   0x7   : > { %s37_s18 = ssub.s32 %s1018_s15, %s1170_s17  ;;  %162 = sbr.rel (%p752_p5) target bundleno = 25 (0x19), region = 20 }
   0x8   : > { %p39_p4 = scmp.eq.s32.totalorder %s37_s18, 0 }
   0xa   : > { %s1080_s20 = scalar_select %p39_p4, %s1010_s13, %s41_s19  }
   0xc   : > { %165 = sbr.rel (!%p50_p3) target bundleno = 25 (0x19), region = 24  ;;  %s167_s21 = sand.u32 (%p50_p3), 1, %s1010_s13  }
   0xd   : > { %s890_s22 = smul.u32 (%p50_p3), 12, %s1018_s15 }
   0xe   : > { %s940_s23 = smul.u32 (%p50_p3), 48, %s167_s21 }
   0xf   : > { %s175_s26 = scalar_lea.vmem (%p50_p3), %s1161_s0, %s890_s22 }
  0x10   : > { %v190_v0 = vld [vmem:[%s175_s26] sm:$0xff] (%p50_p3)  ;;  %v194_v2 = vld [vmem:[%s175_s26 + $0x48] sm:$0xff] (%p50_p3)  ;;  %s169_s27 = scalar_lea.vmem (%p50_p3), [#allocation3], %s940_s23  ;;  %v758_v6 = vld [vmem:[%s175_s26 + $0x50] sm:$0xf] (%p50_p3) }
  0x11   : > { %v192_v1 = vld [vmem:[%s175_s26 + $0x24] sm:$0xff]  ;;  %191 = vst [vmem:[%s169_s27] sm:$0xff] %v190_v0  ;;  %v196_v3 = vld [vmem:[%s175_s26 + $0x6c] sm:$0xff]  ;;  %v760_v7 = vld [vmem:[%s175_s26 + $0x74] sm:$0xf] }
  0x12   : > { %193 = vst [vmem:[%s169_s27 + $0xc] sm:$0xff] %v192_v1  ;;  %v754_v4 = vld [vmem:[%s175_s26 + $0x8] sm:$0xf]  ;;  %v756_v5 = vld [vmem:[%s175_s26 + $0x2c] sm:$0xf] }
  0x13   : > { %195 = vst [vmem:[%s169_s27 + $0x18] sm:$0xff] %v194_v2 }
  0x14   : > { %197 = vst [vmem:[%s169_s27 + $0x24] sm:$0xff] %v196_v3 }
  0x15   : > { %755 = vst [vmem:[%s169_s27 + $0x8] sm:$0xf] %v754_v4 }
  0x16   : > { %757 = vst [vmem:[%s169_s27 + $0x14] sm:$0xf] %v756_v5 }
  0x17   : > { %759 = vst [vmem:[%s169_s27 + $0x20] sm:$0xf] %v758_v6 }
  0x18   : > { %761 = vst [vmem:[%s169_s27 + $0x2c] sm:$0xf] %v760_v7 }
  0x19 PF: > { %p762_p6 = scmp.ge.s32.totalorder %s1022_s16, 1  ;;  %p230_p7 = scmp.lt.s32.totalorder %s1022_s16, 4 }
  0x1b   : > { %p231_p8 = pnand %p762_p6, %p230_p7 }
  0x1c   : > { %s237_s28 = sand.u32 (!%p231_p8), 1, %s1006_s12   ;;  %s276_s29 = smul.u32 (!%p231_p8), 48, %s1014_s14 }
  0x1d   : > { %234 = sbr.rel (%p231_p8) target bundleno = 253 (0xfd), region = 54  ;;  %p764_p10 = scmp.ne.s32.totalorder (!%p231_p8), %s1014_s14, 0 }
  0x1e   : > { %s941_s30 = smul.u32 (!%p231_p8), 48, %s237_s28  ;;  %p277_p9 = scmp.lt.s32.totalorder (!%p231_p8), %s276_s29, 143 }
  0x20   : > { %s1097_s8 = scalar_lea.vmem (!%p231_p8), [#allocation3], %s941_s30 }
  0x22   : > { %s1172_s29 = smov (!%p277_p9, %s276_s29), 143  ;;  %300 = sbr.rel (%p764_p10) target bundleno = 44 (0x2c), region = 62 }
  0x23   : > { %s763_s4 = sshll.u32 %s1172_s29, 2 }
  0x24   : > { %s1095_s7 = scalar_lea.vmem %s1162_s1, %s763_s4 }
  0x27   : > { %v1024_v8 = vmov 0.0  }
  0x28   : > { %301 = vst [vmem:[#allocation2 + $0x10] sm:$0xff] %v1024_v8 }
  0x29   : > { %302 = vst [vmem:[#allocation2] sm:$0xff] %v1024_v8 }
  0x2a   : > { %303 = vst [vmem:[#allocation2 + $0x18] sm:$0xff] %v1024_v8 }
  0x2b   : > { %304 = vst [vmem:[#allocation2 + $0x8] sm:$0xff] %v1024_v8 }
  0x2c PF: > { %v904_v9 = vld [vmem:[%s1095_s7 + $0x38] sm:$0xff]  ;;  %v903_v12 = vld [vmem:[%s1095_s7 + $0x30] sm:$0xff]  ;;  %v902_v15 = vld [vmem:[%s1095_s7 + $0x28] sm:$0xff]  ;;  %p885_p11 = scmp.ne.s32.totalorder %s1014_s14, 2 }
  0x2d   : > { %v912_v10 = vld [vmem:[%s1095_s7 + $0x78] sm:$0xff]  ;;  %541 = vmatpush.bf16.msra.mxu0 %v904_v9  ;;  %v911_v13 = vld [vmem:[%s1095_s7 + $0x70] sm:$0xff]  ;;  %932 = vmatpush.bf16.msra.mxu3 %v904_v9  ;;  %v910_v16 = vld [vmem:[%s1095_s7 + $0x68] sm:$0xff] }
  0x2e   : > { %v920_v11 = vld [vmem:[%s1095_s7 + $0xb8] sm:$0xff]  ;;  %560 = vmatpush.bf16.msra.mxu1 %v912_v10  ;;  %v919_v14 = vld [vmem:[%s1095_s7 + $0xb0] sm:$0xff]  ;;  %v918_v17 = vld [vmem:[%s1095_s7 + $0xa8] sm:$0xff] }
  0x2f   : > { %579 = vmatpush.bf16.msra.mxu2 %v920_v11  ;;  %v901_v18 = vld [vmem:[%s1095_s7 + $0x20] sm:$0xff]  ;;  %v900_v21 = vld [vmem:[%s1095_s7 + $0x18] sm:$0xff]  ;;  %v899_v24 = vld [vmem:[%s1095_s7 + $0x10] sm:$0xff] }
  0x30   : > { %v909_v19 = vld [vmem:[%s1095_s7 + $0x60] sm:$0xff]  ;;  %v908_v22 = vld [vmem:[%s1095_s7 + $0x58] sm:$0xff]  ;;  %v907_v25 = vld [vmem:[%s1095_s7 + $0x50] sm:$0xff] }
  0x31   : > { %542 = vmatpush.bf16.msra.mxu0 %v903_v12  ;;  %933 = vmatpush.bf16.msra.mxu3 %v903_v12  ;;  %v917_v20 = vld [vmem:[%s1095_s7 + $0xa0] sm:$0xff]  ;;  %v916_v23 = vld [vmem:[%s1095_s7 + $0x98] sm:$0xff]  ;;  %v915_v26 = vld [vmem:[%s1095_s7 + $0x90] sm:$0xff] }
  0x32   : > { %561 = vmatpush.bf16.msra.mxu1 %v911_v13  ;;  %v898_v27 = vld [vmem:[%s1095_s7 + $0x8] sm:$0xff]  ;;  %v897_v30 = vld [vmem:[%s1095_s7] sm:$0xff]  ;;  %v305_v54 = vld [vmem:[#allocation2 + $0x10] sm:$0xff] }
  0x33   : > { %580 = vmatpush.bf16.msra.mxu2 %v919_v14  ;;  %v906_v28 = vld [vmem:[%s1095_s7 + $0x48] sm:$0xff]  ;;  %v905_v31 = vld [vmem:[%s1095_s7 + $0x40] sm:$0xff]  ;;  %v307_v4 = vld [vmem:[#allocation2 + $0x18] sm:$0xff] }
  0x34   : > { %v914_v29 = vld [vmem:[%s1095_s7 + $0x88] sm:$0xff]  ;;  %v913_v32 = vld [vmem:[%s1095_s7 + $0x80] sm:$0xff] }
  0x35   : > { %543 = vmatpush.bf16.msra.mxu0 %v902_v15  ;;  %934 = vmatpush.bf16.msra.mxu3 %v902_v15  ;;  %v767_v33 = vld [vmem:[%s1097_s8] sm:$0xf]  ;;  %v892_v34 = vld [vmem:[%s1097_s8 + $0x8] sm:$0xf0]  ;;  %v891_v35 = vld [vmem:[%s1097_s8 + $0x4] sm:$0xf] }
  0x36   : > { %562 = vmatpush.bf16.msra.mxu1 %v910_v16  ;;  %v769_v36 = vld [vmem:[%s1097_s8 + $0xc] sm:$0xf0]  ;;  %v775_v37 = vld [vmem:[%s1097_s8 + $0x8] sm:$0xf]  ;;  %v893_v38 = vld [vmem:[%s1097_s8 + $0x10] sm:$0xf0]  ;;  %v768_v41 = vor.u32 %v892_v34, %v767_v33 }
  0x37   : > { %581 = vmatpush.bf16.msra.mxu2 %v918_v17  ;;  %v779_v39 = vld [vmem:[%s1097_s8 + $0x18] sm:$0xf]  ;;  %v895_v40 = vld [vmem:[%s1097_s8 + $0x20] sm:$0xf0]  ;;  %v772_v42 = vor.u32 %v891_v35, %v769_v36  ;;  %v776_v43 = vor.u32 %v893_v38, %v775_v37  ;;  %v894_v45 = vld [vmem:[%s1097_s8 + $0x1c] sm:$0xf] }
  0x38   : > { %v780_v44 = vor.u32 %v895_v40, %v779_v39  ;;  %v781_v46 = vld [vmem:[%s1097_s8 + $0x24] sm:$0xf0]  ;;  %v787_v47 = vld [vmem:[%s1097_s8 + $0x20] sm:$0xf]  ;;  %v896_v48 = vld [vmem:[%s1097_s8 + $0x28] sm:$0xf0] }
  0x39   : > { %544 = vmatpush.bf16.msra.mxu0 %v901_v18  ;;  %935 = vmatpush.bf16.msra.mxu3 %v901_v18  ;;  %v784_v49 = vor.u32 %v894_v45, %v781_v46  ;;  %v788_v50 = vor.u32 %v896_v48, %v787_v47  ;;  %v306_v61 = vld [vmem:[#allocation2] sm:$0xff]  ;;  %v308_v11 = vld [vmem:[#allocation2 + $0x8] sm:$0xff] }
  0x3a   : > { %563 = vmatpush.bf16.msra.mxu1 %v909_v19 }
  0x3b   : > { %582 = vmatpush.bf16.msra.mxu2 %v917_v20 }
  0x3d   : > { %545 = vmatpush.bf16.msra.mxu0 %v900_v21  ;;  %936 = vmatpush.bf16.msra.mxu3 %v900_v21 }
  0x3e   : > { %564 = vmatpush.bf16.msra.mxu1 %v908_v22 }
  0x3f   : > { %583 = vmatpush.bf16.msra.mxu2 %v916_v23 }
  0x41   : > { %546 = vmatpush.bf16.msra.mxu0 %v899_v24  ;;  %937 = vmatpush.bf16.msra.mxu3 %v899_v24 }
  0x42   : > { %565 = vmatpush.bf16.msra.mxu1 %v907_v25 }
  0x43   : > { %584 = vmatpush.bf16.msra.mxu2 %v915_v26 }
  0x45   : > { %547 = vmatpush.bf16.msra.mxu0 %v898_v27  ;;  %938 = vmatpush.bf16.msra.mxu3 %v898_v27 }
  0x46   : > { %566 = vmatpush.bf16.msra.mxu1 %v906_v28 }
  0x47   : > { %585 = vmatpush.bf16.msra.mxu2 %v914_v29 }
  0x49   : > { %548 = vmatpush.bf16.msra.mxu0 %v897_v30  ;;  %939 = vmatpush.bf16.msra.mxu3 %v897_v30 }
  0x4a   : > { %567 = vmatpush.bf16.msra.mxu1 %v905_v31 }
  0x4b   : > { %586 = vmatpush.bf16.msra.mxu2 %v913_v32 }
  0x4c   : > { %549 = vmatmul.bf16.vlgmr.msra.gmra.mxu0 %v768_v41  ;;  %554 = vmatmul.bf16.vlgmr.msra.gmra.mxu3 %v780_v44 }
  0x4d   : > { %568 = vmatmul.bf16.vlgmr.msra.gmra.mxu1 %v772_v42 }
  0x4e   : > { %587 = vmatmul.bf16.vlgmr.msra.gmra.mxu2 %v776_v43 }
  0x5d   : > { %573 = vmatmul.bf16.gmra.mxu1 %v784_v49 }
  0x5e   : > { %592 = vmatmul.bf16.gmra.mxu2 %v788_v50 }
  0xc9   : > { %v550_v52 = vpop.f32.mrf.mxu0 }
  0xca   : > { %v569_v51 = vpop.f32.mrf.mxu1 }
  0xcb   : > { %v570_v53 = vadd.f32 %v569_v51, %v550_v52 }
  0xcf   : > { %v555_v2 = vpop.f32.mrf.mxu3 }
  0xd1   : > { %v588_v55 = vpop.f32.mrf.mxu2  ;;  %v552_v59 = vpop.f32.mrf.mxu0 }
  0xd2   : > { %v589_v56 = vadd.f32 %v588_v55, %v570_v53  ;;  %v571_v57 = vpop.f32.mrf.mxu1 }
  0xd3   : > { %v572_v60 = vadd.f32 %v571_v57, %v552_v59 }
  0xd4   : > { %v598_v58 = vadd.f32 %v589_v56, %v305_v54 }
  0xd6   : > { %602 = vst [vmem:[#allocation2 + $0x10] sm:$0xff] %v598_v58 }
  0xd7   : > { %v557_v9 = vpop.f32.mrf.mxu3 }
  0xd9   : > { %v590_v62 = vpop.f32.mrf.mxu2 }
  0xda   : > { %v591_v63 = vadd.f32 %v590_v62, %v572_v60  ;;  %v574_v0 = vpop.f32.mrf.mxu1 }
  0xdb   : > { %v575_v3 = vadd.f32 %v574_v0, %v555_v2 }
  0xdc   : > { %v599_v1 = vadd.f32 %v591_v63, %v306_v61 }
  0xde   : > { %603 = vst [vmem:[#allocation2] sm:$0xff] %v599_v1 }
  0xe1   : > { %v593_v5 = vpop.f32.mrf.mxu2 }
  0xe2   : > { %v594_v6 = vadd.f32 %v593_v5, %v575_v3  ;;  %v576_v8 = vpop.f32.mrf.mxu1 }
  0xe3   : > { %v577_v10 = vadd.f32 %v576_v8, %v557_v9 }
  0xe4   : > { %v600_v7 = vadd.f32 %v594_v6, %v307_v4 }
  0xe6   : > { %604 = vst [vmem:[#allocation2 + $0x18] sm:$0xff] %v600_v7 }
  0xe9   : > { %v595_v12 = vpop.f32.mrf.mxu2 }
  0xea   : > { %v596_v13 = vadd.f32 %v595_v12, %v577_v10  ;;  %609 = sbr.rel (%p885_p11) target bundleno = 253 (0xfd), region = 66 }
  0xec   : > { %v601_v14 = vadd.f32 %v596_v13, %v308_v11 }
  0xee   : > { %605 = vst [vmem:[#allocation2 + $0x8] sm:$0xff] %v601_v14 }
  0xef   : > { %v610_v15 = vld [vmem:[#allocation2 + $0x10] sm:$0xff]  ;;  %v611_v16 = vld [vmem:[#allocation2] sm:$0xff]  ;;  %v612_v18 = vld [vmem:[#allocation2 + $0x18] sm:$0xff] }
  0xf0   : > { %v983_v17 = vld [vmem:[%s1163_s2] ss:$0 sm:$0xff] }
  0xf1   : > { %v618_v20 = vadd.f32 %v983_v17, %v610_v15  ;;  %v619_v21 = vadd.f32 %v983_v17, %v611_v16  ;;  %v620_v22 = vadd.f32 %v983_v17, %v612_v18 }
  0xf3   : > { %v622_v24 = vmax.f32 %v618_v20, 0.0  ;;  %v623_v25 = vmax.f32 %v619_v21, 0.0  ;;  %v624_v26 = vmax.f32 %v620_v22, 0.0 }
  0xf5   : > { %v613_v19 = vld [vmem:[#allocation2 + $0x8] sm:$0xff]  ;;  %v924_v28 = vpack.c.bf16 %v623_v25, %v622_v24 }
  0xf6   : > { %v621_v23 = vadd.f32 %v983_v17, %v613_v19 }
  0xf7   : > { %925 = vst [vmem:[%s1164_s3] sm:$0xff] %v924_v28  }
  0xf8   : > { %v625_v27 = vmax.f32 %v621_v23, 0.0 }
  0xfa   : > { %v929_v29 = vpack.c.bf16 %v625_v27, %v624_v26 }
  0xfc   : > { %931 = vst [vmem:[%s1164_s3 + $0x8] sm:$0xff] %v929_v29  }
  0xfd PF: > { %s13_s16 = sadd.s32 1, %s1022_s16   ;;  %s1165_s12 = smov %s1010_s13 }
  0xfe   : > { %p10_p12 = scmp.ge.s32.totalorder %s13_s16, 5   ;;  %s1166_s13 = smov %s1080_s20 }
  0xff   : > { %s1167_s14 = smov %s1018_s15  ;;  %s1168_s15 = smov %s1170_s17 }
 0x100   :  { %12 = sbr.rel (!%p10_p12) target bundleno = 3 (0x3), region = 113 }

// kernel: se_resnet18_forward.32
= control target key start
LH: loop header
LB: loop body
LE: loop exit
PB: predicated region body
PF: predicated region fallthrough
CT: control target
= control target key end

     0   :  { %s1251_s12 = smov 0   ;;  %s1253_s13 = smov 0   ;;  %s1441_s0 = inlined_call_operand.vmem [shape: bf16[16,1152], index: 0, kind: input, shape index: {}]   ;;  %s1442_s1 = inlined_call_operand.vmem [shape: bf16[1152,256], index: 1, kind: input, shape index: {}]   ;;  %s1443_s2 = inlined_call_operand.vmem [shape: f32[1,256], index: 2, kind: input, shape index: {}]   ;;  %s1444_s3 = inlined_call_operand.vmem [shape: bf16[16,256], index: 3, kind: output, shape index: {}]  }
   0x1   :  { %s1255_s14 = smov 0   ;;  %s1257_s15 = smov 0  }
   0x2   :  { %s1259_s16 = smov 0  }
   0x3 LB: > { %s25_s17 = sadd.s32 1, %s1224_s15  ;;  %p48_p1 = scmp.ne.s32.totalorder %s1216_s13, %s1212_s12  ;;  %s1228_s16 = sphi %s1259_s16, %s13_s16   ;;  %s1224_s15 = sphi %s1257_s15, %s1448_s15   ;;  %s1220_s14 = sphi %s1255_s14, %s1447_s14   ;;  %s1216_s13 = sphi %s1253_s13, %s1446_s13   ;;  %s1212_s12 = sphi %s1251_s12, %s1445_s12  }
   0x4   : > { %p26_p0 = scmp.ge.s32.totalorder %s25_s17, 3  ;;  %p49_p2 = scmp.eq.s32.totalorder %s1228_s16, 0 }
   0x5   : > { %s41_s19 = sadd.s32 1, %s1216_s13  ;;  %p875_p5 = scmp.ge.s32.totalorder %s1228_s16, 3 }
   0x6   : > { %s1450_s17 = smov (%p26_p0, %s25_s17), 0  ;;  %p50_p3 = por %p49_p2, %p48_p1 }
   0x7   : > { %s37_s18 = ssub.s32 %s1224_s15, %s1450_s17  ;;  %164 = sbr.rel (%p875_p5) target bundleno = 21 (0x15), region = 20 }
   0x8   : > { %p39_p4 = scmp.eq.s32.totalorder %s37_s18, 0 }
   0xa   : > { %s1286_s20 = scalar_select %p39_p4, %s1216_s13, %s41_s19  }
   0xc   : > { %167 = sbr.rel (!%p50_p3) target bundleno = 21 (0x15), region = 24  ;;  %s169_s21 = sand.u32 (%p50_p3), 1, %s1216_s13  }
   0xd   : > { %s1094_s22 = smul.u32 (%p50_p3), 12, %s1224_s15 }
   0xe   : > { %s1147_s23 = smul.u32 (%p50_p3), 24, %s169_s21 }
   0xf   : > { %s177_s26 = scalar_lea.vmem (%p50_p3), %s1441_s0, %s1094_s22 }
  0x10   : > { %v192_v0 = vld [vmem:[%s177_s26] sm:$0xff] (%p50_p3)  ;;  %v877_v2 = vld [vmem:[%s177_s26 + $0x8] sm:$0xf] (%p50_p3)  ;;  %s171_s27 = scalar_lea.vmem (%p50_p3), [#allocation3], %s1147_s23  ;;  %v879_v3 = vld [vmem:[%s177_s26 + $0x2c] sm:$0xf] (%p50_p3) }
  0x11   : > { %v194_v1 = vld [vmem:[%s177_s26 + $0x24] sm:$0xff]  ;;  %193 = vst [vmem:[%s171_s27] sm:$0xff] %v192_v0 }
  0x12   : > { %195 = vst [vmem:[%s171_s27 + $0xc] sm:$0xff] %v194_v1 }
  0x13   : > { %878 = vst [vmem:[%s171_s27 + $0x8] sm:$0xf] %v877_v2 }
  0x14   : > { %880 = vst [vmem:[%s171_s27 + $0x14] sm:$0xf] %v879_v3 }
  0x15 PF: > { %p881_p6 = scmp.ge.s32.totalorder %s1228_s16, 1  ;;  %p227_p7 = scmp.lt.s32.totalorder %s1228_s16, 4 }
  0x17   : > { %p228_p8 = pnand %p881_p6, %p227_p7 }
  0x18   : > { %s234_s28 = sand.u32 (!%p228_p8), 1, %s1212_s12   ;;  %s278_s29 = smul.u32 (!%p228_p8), 48, %s1220_s14 }
  0x19   : > { %231 = sbr.rel (%p228_p8) target bundleno = 261 (0x105), region = 54  ;;  %p884_p10 = scmp.ne.s32.totalorder (!%p228_p8), %s1220_s14, 0 }
  0x1a   : > { %s1148_s30 = smul.u32 (!%p228_p8), 24, %s234_s28  ;;  %p280_p9 = scmp.lt.s32.totalorder (!%p228_p8), %s278_s29, 143 }
  0x1c   : > { %s1303_s8 = scalar_lea.vmem (!%p228_p8), [#allocation3], %s1148_s30 }
  0x1e   : > { %s1452_s29 = smov (!%p280_p9, %s278_s29), 143  ;;  %310 = sbr.rel (%p884_p10) target bundleno = 40 (0x28), region = 62 }
  0x1f   : > { %s1095_s4 = sshll.u32 %s1452_s29, 3 }
  0x20   : > { %s1301_s7 = scalar_lea.vmem %s1442_s1, %s1095_s4 }
  0x23   : > { %v1230_v4 = vmov 0.0  }
  0x24   : > { %311 = vst [vmem:[#allocation2 + $0x10] sm:$0xff] %v1230_v4 }
  0x25   : > { %312 = vst [vmem:[#allocation2] sm:$0xff] %v1230_v4 }
  0x26   : > { %313 = vst [vmem:[#allocation2 + $0x18] sm:$0xff] %v1230_v4 }
  0x27   : > { %314 = vst [vmem:[#allocation2 + $0x8] sm:$0xff] %v1230_v4 }
  0x28 PF: > { %v955_v5 = vld [vmem:[%s1301_s7 + $0x70] sm:$0xf]  ;;  %v1114_v6 = vld [vmem:[%s1301_s7 + $0x74] sm:$0xf0]  ;;  %v947_v14 = vld [vmem:[%s1301_s7 + $0x60] sm:$0xf] }
  0x29   : > { %v1019_v7 = vld [vmem:[%s1301_s7 + $0xf0] sm:$0xf]  ;;  %v956_v8 = vor.u32 %v1114_v6, %v955_v5  ;;  %v1130_v9 = vld [vmem:[%s1301_s7 + $0xf4] sm:$0xf0]  ;;  %v1112_v15 = vld [vmem:[%s1301_s7 + $0x64] sm:$0xf0] }
  0x2a   : > { %v1083_v10 = vld [vmem:[%s1301_s7 + $0x170] sm:$0xf]  ;;  %v1146_v11 = vld [vmem:[%s1301_s7 + $0x174] sm:$0xf0]  ;;  %v1020_v12 = vor.u32 %v1130_v9, %v1019_v7  ;;  %v1011_v16 = vld [vmem:[%s1301_s7 + $0xe0] sm:$0xf]  ;;  %v948_v17 = vor.u32 %v1112_v15, %v947_v14 }
  0x2b   : > { %v1084_v13 = vor.u32 %v1146_v11, %v1083_v10  ;;  %627 = vmatpush.bf16.msra.mxu0 %v956_v8  ;;  %v1128_v18 = vld [vmem:[%s1301_s7 + $0xe4] sm:$0xf0]  ;;  %v1075_v19 = vld [vmem:[%s1301_s7 + $0x160] sm:$0xf]  ;;  %v939_v23 = vld [vmem:[%s1301_s7 + $0x50] sm:$0xf] }
  0x2c   : > { %v1144_v20 = vld [vmem:[%s1301_s7 + $0x164] sm:$0xf0]  ;;  %641 = vmatpush.bf16.msra.mxu1 %v1020_v12  ;;  %v1012_v21 = vor.u32 %v1128_v18, %v1011_v16  ;;  %v1110_v24 = vld [vmem:[%s1301_s7 + $0x54] sm:$0xf0]  ;;  %v1003_v25 = vld [vmem:[%s1301_s7 + $0xd0] sm:$0xf] }
  0x2d   : > { %655 = vmatpush.bf16.msra.mxu2 %v1084_v13  ;;  %v1076_v22 = vor.u32 %v1144_v20, %v1075_v19  ;;  %v1126_v26 = vld [vmem:[%s1301_s7 + $0xd4] sm:$0xf0]  ;;  %v1067_v27 = vld [vmem:[%s1301_s7 + $0x150] sm:$0xf]  ;;  %v940_v29 = vor.u32 %v1110_v24, %v939_v23  ;;  %v931_v30 = vld [vmem:[%s1301_s7 + $0x40] sm:$0xf] }
  0x2e   : > { %v1142_v28 = vld [vmem:[%s1301_s7 + $0x154] sm:$0xf0]  ;;  %v1108_v31 = vld [vmem:[%s1301_s7 + $0x44] sm:$0xf0]  ;;  %v1004_v32 = vor.u32 %v1126_v26, %v1003_v25  ;;  %v995_v34 = vld [vmem:[%s1301_s7 + $0xc0] sm:$0xf] }
  0x2f   : > { %628 = vmatpush.bf16.msra.mxu0 %v948_v17  ;;  %v1068_v33 = vor.u32 %v1142_v28, %v1067_v27  ;;  %v1113_v35 = vld [vmem:[%s1301_s7 + $0x74] sm:$0xf]  ;;  %v957_v36 = vld [vmem:[%s1301_s7 + $0x78] sm:$0xf0]  ;;  %v1124_v37 = vld [vmem:[%s1301_s7 + $0xc4] sm:$0xf0]  ;;  %v932_v42 = vor.u32 %v1108_v31, %v931_v30 }
  0x30   : > { %642 = vmatpush.bf16.msra.mxu1 %v1012_v21  ;;  %v1059_v38 = vld [vmem:[%s1301_s7 + $0x140] sm:$0xf]  ;;  %v1140_v39 = vld [vmem:[%s1301_s7 + $0x144] sm:$0xf0]  ;;  %v960_v40 = vor.u32 %v1113_v35, %v957_v36  ;;  %v1111_v41 = vld [vmem:[%s1301_s7 + $0x64] sm:$0xf]  ;;  %v996_v46 = vor.u32 %v1124_v37, %v995_v34 }
  0x31   : > { %656 = vmatpush.bf16.msra.mxu2 %v1076_v22  ;;  %v923_v43 = vld [vmem:[%s1301_s7 + $0x30] sm:$0xf]  ;;  %v1106_v44 = vld [vmem:[%s1301_s7 + $0x34] sm:$0xf0]  ;;  %v949_v45 = vld [vmem:[%s1301_s7 + $0x68] sm:$0xf0]  ;;  %v1060_v47 = vor.u32 %v1140_v39, %v1059_v38 }
  0x32   : > { %669 = vmatpush.bf16.msra.mxu3 %v960_v40  ;;  %v987_v48 = vld [vmem:[%s1301_s7 + $0xb0] sm:$0xf]  ;;  %v1122_v49 = vld [vmem:[%s1301_s7 + $0xb4] sm:$0xf0]  ;;  %v952_v51 = vor.u32 %v1111_v41, %v949_v45  ;;  %v1109_v53 = vld [vmem:[%s1301_s7 + $0x54] sm:$0xf]  ;;  %v924_v55 = vor.u32 %v1106_v44, %v923_v43 }
  0x33   : > { %629 = vmatpush.bf16.msra.mxu0 %v940_v29  ;;  %v1051_v50 = vld [vmem:[%s1301_s7 + $0x130] sm:$0xf]  ;;  %v1138_v52 = vld [vmem:[%s1301_s7 + $0x134] sm:$0xf0]  ;;  %v941_v54 = vld [vmem:[%s1301_s7 + $0x58] sm:$0xf0]  ;;  %v988_v59 = vor.u32 %v1122_v49, %v987_v48 }
  0x34   : > { %643 = vmatpush.bf16.msra.mxu1 %v1004_v32  ;;  %v915_v56 = vld [vmem:[%s1301_s7 + $0x20] sm:$0xf]  ;;  %v1104_v57 = vld [vmem:[%s1301_s7 + $0x24] sm:$0xf0]  ;;  %v944_v58 = vor.u32 %v1109_v53, %v941_v54  ;;  %v1052_v60 = vor.u32 %v1138_v52, %v1051_v50  ;;  %v1107_v62 = vld [vmem:[%s1301_s7 + $0x44] sm:$0xf] }
  0x35   : > { %657 = vmatpush.bf16.msra.mxu2 %v1068_v33  ;;  %v979_v61 = vld [vmem:[%s1301_s7 + $0xa0] sm:$0xf]  ;;  %v933_v63 = vld [vmem:[%s1301_s7 + $0x48] sm:$0xf0]  ;;  %v1120_v0 = vld [vmem:[%s1301_s7 + $0xa4] sm:$0xf0]  ;;  %v916_v3 = vor.u32 %v1104_v57, %v915_v56 }
  0x36   : > { %670 = vmatpush.bf16.msra.mxu3 %v952_v51  ;;  %v1043_v1 = vld [vmem:[%s1301_s7 + $0x120] sm:$0xf]  ;;  %v1136_v2 = vld [vmem:[%s1301_s7 + $0x124] sm:$0xf0]  ;;  %v907_v4 = vld [vmem:[%s1301_s7 + $0x10] sm:$0xf]  ;;  %v936_v6 = vor.u32 %v1107_v62, %v933_v63  ;;  %v980_v7 = vor.u32 %v1120_v0, %v979_v61 }
  0x37   : > { %630 = vmatpush.bf16.msra.mxu0 %v932_v42  ;;  %v1102_v5 = vld [vmem:[%s1301_s7 + $0x14] sm:$0xf0]  ;;  %v1044_v8 = vor.u32 %v1136_v2, %v1043_v1  ;;  %v971_v9 = vld [vmem:[%s1301_s7 + $0x90] sm:$0xf]  ;;  %v1105_v10 = vld [vmem:[%s1301_s7 + $0x34] sm:$0xf] }
  0x38   : > { %644 = vmatpush.bf16.msra.mxu1 %v996_v46  ;;  %v925_v11 = vld [vmem:[%s1301_s7 + $0x38] sm:$0xf0]  ;;  %v1118_v12 = vld [vmem:[%s1301_s7 + $0x94] sm:$0xf0]  ;;  %v1035_v13 = vld [vmem:[%s1301_s7 + $0x110] sm:$0xf]  ;;  %v908_v15 = vor.u32 %v1102_v5, %v907_v4 }
  0x39   : > { %658 = vmatpush.bf16.msra.mxu2 %v1060_v47  ;;  %v1134_v14 = vld [vmem:[%s1301_s7 + $0x114] sm:$0xf0]  ;;  %v899_v16 = vld [vmem:[%s1301_s7] sm:$0xf]  ;;  %v1100_v17 = vld [vmem:[%s1301_s7 + $0x4] sm:$0xf0]  ;;  %v928_v19 = vor.u32 %v1105_v10, %v925_v11  ;;  %v972_v20 = vor.u32 %v1118_v12, %v971_v9 }
  0x3a   : > { %671 = vmatpush.bf16.msra.mxu3 %v944_v58  ;;  %v963_v18 = vld [vmem:[%s1301_s7 + $0x80] sm:$0xf]  ;;  %v1036_v21 = vor.u32 %v1134_v14, %v1035_v13  ;;  %v1116_v22 = vld [vmem:[%s1301_s7 + $0x84] sm:$0xf0]  ;;  %v1103_v23 = vld [vmem:[%s1301_s7 + $0x24] sm:$0xf]  ;;  %v900_v31 = vor.u32 %v1100_v17, %v899_v16 }
  0x3b   : > { %631 = vmatpush.bf16.msra.mxu0 %v924_v55  ;;  %v917_v24 = vld [vmem:[%s1301_s7 + $0x28] sm:$0xf0]  ;;  %v1027_v25 = vld [vmem:[%s1301_s7 + $0x100] sm:$0xf]  ;;  %v1132_v26 = vld [vmem:[%s1301_s7 + $0x104] sm:$0xf0]  ;;  %v964_v36 = vor.u32 %v1116_v22, %v963_v18 }
  0x3c   : > { %645 = vmatpush.bf16.msra.mxu1 %v988_v59  ;;  %v1129_v27 = vld [vmem:[%s1301_s7 + $0xf4] sm:$0xf]  ;;  %v1021_v28 = vld [vmem:[%s1301_s7 + $0xf8] sm:$0xf0]  ;;  %v895_v32 = vld [vmem:[%s1303_s8 + $0x8] sm:$0xf]  ;;  %v920_v33 = vor.u32 %v1103_v23, %v917_v24  ;;  %v1028_v37 = vor.u32 %v1132_v26, %v1027_v25 }
  0x3d   : > { %659 = vmatpush.bf16.msra.mxu2 %v1052_v60  ;;  %v1145_v29 = vld [vmem:[%s1301_s7 + $0x174] sm:$0xf]  ;;  %v1085_v30 = vld [vmem:[%s1301_s7 + $0x178] sm:$0xf0]  ;;  %v887_v34 = vld [vmem:[%s1303_s8] sm:$0xf]  ;;  %v1024_v41 = vor.u32 %v1129_v27, %v1021_v28 }
  0x3e   : > { %672 = vmatpush.bf16.msra.mxu3 %v936_v6  ;;  %v1097_v35 = vld [vmem:[%s1303_s8 + $0x8] sm:$0xf0]  ;;  %v1098_v38 = vld [vmem:[%s1303_s8 + $0x10] sm:$0xf0]  ;;  %v1096_v39 = vld [vmem:[%s1303_s8 + $0x4] sm:$0xf]  ;;  %v1088_v42 = vor.u32 %v1145_v29, %v1085_v30 }
  0x3f   : > { %632 = vmatpush.bf16.msra.mxu0 %v916_v3  ;;  %v889_v40 = vld [vmem:[%s1303_s8 + $0xc] sm:$0xf0]  ;;  %v1127_v43 = vld [vmem:[%s1301_s7 + $0xe4] sm:$0xf]  ;;  %v1101_v44 = vld [vmem:[%s1301_s7 + $0x14] sm:$0xf]  ;;  %v888_v49 = vor.u32 %v1097_v35, %v887_v34  ;;  %v1382_v50 = vor.u32 %v1098_v38, %v895_v32 }
  0x40   : > { %646 = vmatpush.bf16.msra.mxu1 %v980_v7  ;;  %v909_v45 = vld [vmem:[%s1301_s7 + $0x18] sm:$0xf0]  ;;  %v1013_v46 = vld [vmem:[%s1301_s7 + $0xe8] sm:$0xf0]  ;;  %v1143_v47 = vld [vmem:[%s1301_s7 + $0x164] sm:$0xf]  ;;  %v1384_v51 = vor.u32 %v1096_v39, %v889_v40 }
  0x41   : > { %660 = vmatpush.bf16.msra.mxu2 %v1044_v8  ;;  %v1077_v48 = vld [vmem:[%s1301_s7 + $0x168] sm:$0xf0]  ;;  %v912_v52 = vor.u32 %v1101_v44, %v909_v45  ;;  %v1016_v53 = vor.u32 %v1127_v43, %v1013_v46  ;;  %v1125_v55 = vld [vmem:[%s1301_s7 + $0xd4] sm:$0xf]  ;;  %v1099_v56 = vld [vmem:[%s1301_s7 + $0x4] sm:$0xf] }
  0x42   : > { %673 = vmatpush.bf16.msra.mxu3 %v928_v19  ;;  %v1080_v54 = vor.u32 %v1143_v47, %v1077_v48  ;;  %v901_v57 = vld [vmem:[%s1301_s7 + $0x8] sm:$0xf0]  ;;  %v1005_v58 = vld [vmem:[%s1301_s7 + $0xd8] sm:$0xf0]  ;;  %v1141_v59 = vld [vmem:[%s1301_s7 + $0x154] sm:$0xf] }
  0x43   : > { %633 = vmatpush.bf16.msra.mxu0 %v908_v15  ;;  %v1069_v60 = vld [vmem:[%s1301_s7 + $0x158] sm:$0xf0]  ;;  %v904_v61 = vor.u32 %v1099_v56, %v901_v57  ;;  %v1008_v62 = vor.u32 %v1125_v55, %v1005_v58  ;;  %v1123_v0 = vld [vmem:[%s1301_s7 + $0xc4] sm:$0xf]  ;;  %v997_v1 = vld [vmem:[%s1301_s7 + $0xc8] sm:$0xf0] }
  0x44   : > { %647 = vmatpush.bf16.msra.mxu1 %v972_v20  ;;  %v1072_v63 = vor.u32 %v1141_v59, %v1069_v60  ;;  %v1139_v2 = vld [vmem:[%s1301_s7 + $0x144] sm:$0xf]  ;;  %v1061_v3 = vld [vmem:[%s1301_s7 + $0x148] sm:$0xf0]  ;;  %v1000_v4 = vor.u32 %v1123_v0, %v997_v1  ;;  %v1121_v6 = vld [vmem:[%s1301_s7 + $0xb4] sm:$0xf] }
  0x45   : > { %661 = vmatpush.bf16.msra.mxu2 %v1036_v21  ;;  %v1064_v5 = vor.u32 %v1139_v2, %v1061_v3  ;;  %v989_v7 = vld [vmem:[%s1301_s7 + $0xb8] sm:$0xf0]  ;;  %v1137_v8 = vld [vmem:[%s1301_s7 + $0x134] sm:$0xf]  ;;  %v1119_v12 = vld [vmem:[%s1301_s7 + $0xa4] sm:$0xf] }
  0x46   : > { %674 = vmatpush.bf16.msra.mxu3 %v920_v33  ;;  %v1053_v9 = vld [vmem:[%s1301_s7 + $0x138] sm:$0xf0]  ;;  %v992_v10 = vor.u32 %v1121_v6, %v989_v7  ;;  %v981_v13 = vld [vmem:[%s1301_s7 + $0xa8] sm:$0xf0]  ;;  %v1135_v14 = vld [vmem:[%s1301_s7 + $0x124] sm:$0xf] }
  0x47   : > { %634 = vmatpush.bf16.msra.mxu0 %v900_v31  ;;  %v1056_v11 = vor.u32 %v1137_v8, %v1053_v9  ;;  %v1045_v15 = vld [vmem:[%s1301_s7 + $0x128] sm:$0xf0]  ;;  %v984_v16 = vor.u32 %v1119_v12, %v981_v13  ;;  %v1117_v18 = vld [vmem:[%s1301_s7 + $0x94] sm:$0xf]  ;;  %v973_v19 = vld [vmem:[%s1301_s7 + $0x98] sm:$0xf0] }
  0x48   : > { %648 = vmatpush.bf16.msra.mxu1 %v964_v36  ;;  %v1048_v17 = vor.u32 %v1135_v14, %v1045_v15  ;;  %v1133_v20 = vld [vmem:[%s1301_s7 + $0x114] sm:$0xf]  ;;  %v1037_v21 = vld [vmem:[%s1301_s7 + $0x118] sm:$0xf0]  ;;  %v976_v22 = vor.u32 %v1117_v18, %v973_v19  ;;  %v1115_v24 = vld [vmem:[%s1301_s7 + $0x84] sm:$0xf] }
  0x49   : > { %662 = vmatpush.bf16.msra.mxu2 %v1028_v37  ;;  %v1040_v23 = vor.u32 %v1133_v20, %v1037_v21  ;;  %v965_v25 = vld [vmem:[%s1301_s7 + $0x88] sm:$0xf0]  ;;  %v1131_v26 = vld [vmem:[%s1301_s7 + $0x104] sm:$0xf]  ;;  %v315_v33 = vld [vmem:[#allocation2 + $0x10] sm:$0xff]  ;;  %p1089_p11 = scmp.ne.s32.totalorder %s1220_s14, 2 }
  0x4a   : > { %635 = vmatmul.bf16.vlgmr.msra.gmra.mxu0 %v888_v49  ;;  %675 = vmatpush.bf16.msra.mxu3 %v912_v52  ;;  %v1029_v27 = vld [vmem:[%s1301_s7 + $0x108] sm:$0xf0]  ;;  %v968_v28 = vor.u32 %v1115_v24, %v965_v25  ;;  %v317_v40 = vld [vmem:[#allocation2 + $0x18] sm:$0xff]  ;;  %v316_v48 = vld [vmem:[#allocation2] sm:$0xff] }
  0x4b   : > { %683 = vmatpush.bf16.msrb.mxu0 %v1024_v41  ;;  %649 = vmatmul.bf16.vlgmr.msra.gmra.mxu1 %v1384_v51  ;;  %v1032_v29 = vor.u32 %v1131_v26, %v1029_v27 }
  0x4c   : > { %697 = vmatpush.bf16.msrb.mxu1 %v1088_v42  ;;  %663 = vmatmul.bf16.vlgmr.msra.gmra.mxu2 %v1382_v50 }
  0x4e   : > { %676 = vmatpush.bf16.msra.mxu3 %v904_v61 }
  0x4f   : > { %684 = vmatpush.bf16.msrb.mxu0 %v1016_v53 }
  0x50   : > { %698 = vmatpush.bf16.msrb.mxu1 %v1080_v54  ;;  %v318_v54 = vld [vmem:[#allocation2 + $0x8] sm:$0xff] }
  0x51   : > { %677 = vmatmul.bf16.vlgmr.msra.gmra.mxu3 %v888_v49 }
  0x53   : > { %685 = vmatpush.bf16.msrb.mxu0 %v1008_v62 }
  0x54   : > { %699 = vmatpush.bf16.msrb.mxu1 %v1072_v63 }
  0x57   : > { %686 = vmatpush.bf16.msrb.mxu0 %v1000_v4 }
  0x58   : > { %700 = vmatpush.bf16.msrb.mxu1 %v1064_v5 }
  0x5b   : > { %687 = vmatpush.bf16.msrb.mxu0 %v992_v10 }
  0x5c   : > { %701 = vmatpush.bf16.msrb.mxu1 %v1056_v11 }
  0x5f   : > { %688 = vmatpush.bf16.msrb.mxu0 %v984_v16 }
  0x60   : > { %702 = vmatpush.bf16.msrb.mxu1 %v1048_v17 }
  0x63   : > { %689 = vmatpush.bf16.msrb.mxu0 %v976_v22 }
  0x64   : > { %703 = vmatpush.bf16.msrb.mxu1 %v1040_v23 }
  0x67   : > { %690 = vmatpush.bf16.msrb.mxu0 %v968_v28 }
  0x68   : > { %704 = vmatpush.bf16.msrb.mxu1 %v1032_v29 }
  0x6a   : > { %691 = vmatmul.bf16.vlgmr.msrb.gmra.mxu0 %v1384_v51 }
  0x6b   : > { %705 = vmatmul.bf16.vlgmr.msrb.gmra.mxu1 %v1382_v50 }
  0xc7   : > { %v636_v30 = vpop.f32.mrf.mxu0 }
  0xc8   : > { %v650_v31 = vpop.f32.mrf.mxu1 }
  0xc9   : > { %v651_v32 = vadd.f32 %v650_v31, %v636_v30 }
  0xcf   : > { %v664_v34 = vpop.f32.mrf.mxu2  ;;  %v638_v36 = vpop.f32.mrf.mxu0 }
  0xd0   : > { %v665_v35 = vadd.f32 %v664_v34, %v651_v32  ;;  %v652_v37 = vpop.f32.mrf.mxu1 }
  0xd1   : > { %v653_v39 = vadd.f32 %v652_v37, %v638_v36 }
  0xd2   : > { %v711_v38 = vadd.f32 %v665_v35, %v315_v33 }
  0xd4   : > { %715 = vst [vmem:[#allocation2 + $0x10] sm:$0xff] %v711_v38  ;;  %v678_v44 = vpop.f32.mrf.mxu3 }
  0xd7   : > { %v666_v41 = vpop.f32.mrf.mxu2 }
  0xd8   : > { %v667_v42 = vadd.f32 %v666_v41, %v653_v39 }
  0xda   : > { %v713_v43 = vadd.f32 %v667_v42, %v317_v40 }
  0xdc   : > { %717 = vst [vmem:[#allocation2 + $0x18] sm:$0xff] %v713_v43  ;;  %v680_v51 = vpop.f32.mrf.mxu3 }
  0xe7   : > { %v692_v45 = vpop.f32.mrf.mxu0 }
  0xe8   : > { %v706_v46 = vpop.f32.mrf.mxu1  ;;  %v693_v47 = vadd.f32 %v692_v45, %v678_v44 }
  0xea   : > { %v707_v49 = vadd.f32 %v706_v46, %v693_v47 }
  0xec   : > { %v712_v50 = vadd.f32 %v707_v49, %v316_v48 }
  0xee   : > { %716 = vst [vmem:[#allocation2] sm:$0xff] %v712_v50 }
  0xef   : > { %v694_v52 = vpop.f32.mrf.mxu0 }
  0xf0   : > { %v695_v53 = vadd.f32 %v694_v52, %v680_v51  ;;  %v708_v55 = vpop.f32.mrf.mxu1 }
  0xf2   : > { %v709_v56 = vadd.f32 %v708_v55, %v695_v53  ;;  %722 = sbr.rel (%p1089_p11) target bundleno = 261 (0x105), region = 66 }
  0xf4   : > { %v714_v57 = vadd.f32 %v709_v56, %v318_v54 }
  0xf6   : > { %718 = vst [vmem:[#allocation2 + $0x8] sm:$0xff] %v714_v57 }
  0xf7   : > { %v723_v58 = vld [vmem:[#allocation2 + $0x10] sm:$0xff]  ;;  %v724_v59 = vld [vmem:[#allocation2] sm:$0xff]  ;;  %v725_v63 = vld [vmem:[#allocation2 + $0x18] sm:$0xff] }
  0xf8   : > { %v727_v60 = vld [vmem:[%s1443_s2] sm:$0x3] }
  0xf9   : > { %v729_v61 = vperm.slane %v727_v60, 0  ;;  %v730_v62 = vperm.slane %v727_v60, 1 }
  0xfb   : > { %v733_v1 = vadd.f32 %v729_v61, %v723_v58  ;;  %v734_v2 = vadd.f32 %v730_v62, %v724_v59  ;;  %v735_v3 = vadd.f32 %v729_v61, %v725_v63 }
  0xfd   : > { %v726_v0 = vld [vmem:[#allocation2 + $0x8] sm:$0xff]  ;;  %v737_v5 = vmax.f32 %v733_v1, 0.0  ;;  %v738_v6 = vmax.f32 %v734_v2, 0.0  ;;  %v739_v7 = vmax.f32 %v735_v3, 0.0 }
  0xfe   : > { %v736_v4 = vadd.f32 %v730_v62, %v726_v0 }
  0xff   : > { %v741_v9 = vpack.c.bf16 %v738_v6, %v737_v5 }
 0x100   : > { %v740_v8 = vmax.f32 %v736_v4, 0.0 }
 0x101   : > { %743 = vst [vmem:[%s1444_s3] sm:$0xff] %v741_v9 }
 0x102   : > { %v742_v10 = vpack.c.bf16 %v740_v8, %v739_v7 }
 0x104   : > { %744 = vst [vmem:[%s1444_s3 + $0x8] sm:$0xff] %v742_v10 }
 0x105 PF: > { %s13_s16 = sadd.s32 1, %s1228_s16   ;;  %s1445_s12 = smov %s1216_s13 }
 0x106   : > { %p10_p12 = scmp.ge.s32.totalorder %s13_s16, 5   ;;  %s1446_s13 = smov %s1286_s20 }
 0x107   : > { %s1447_s14 = smov %s1224_s15  ;;  %s1448_s15 = smov %s1450_s17 }
 0x108   :  { %12 = sbr.rel (!%p10_p12) target bundleno = 3 (0x3), region = 113 }

// kernel: se_resnet18_forward.31
= control target key start
LH: loop header
LB: loop body
LE: loop exit
PB: predicated region body
PF: predicated region fallthrough
CT: control target
= control target key end

     0   :  { %s404_s1 = inlined_call_operand.vmem [shape: bf16[128,256], index: 1, kind: input, shape index: {}]   ;;  %s405_s0 = inlined_call_operand.vmem [shape: bf16[16,128], index: 0, kind: input, shape index: {}]   ;;  %s406_s2 = inlined_call_operand.vmem [shape: f32[1,256], index: 2, kind: input, shape index: {}]   ;;  %s407_s3 = inlined_call_operand.vmem [shape: bf16[16,256], index: 3, kind: output, shape index: {}]  }
   0x1   :  { %v253_v0 = vld [vmem:[%s404_s1 + $0x70] sm:$0xf]  ;;  %v275_v1 = vld [vmem:[%s404_s1 + $0x74] sm:$0xf0]  ;;  %v274_v2 = vld [vmem:[%s404_s1 + $0x74] sm:$0xf] }
   0x2   :  { %v254_v3 = vor.u32 %v275_v1, %v253_v0  ;;  %v255_v4 = vld [vmem:[%s404_s1 + $0x78] sm:$0xf0]  ;;  %v245_v5 = vld [vmem:[%s404_s1 + $0x60] sm:$0xf]  ;;  %v273_v6 = vld [vmem:[%s404_s1 + $0x64] sm:$0xf0] }
   0x3   :  { %v258_v7 = vor.u32 %v274_v2, %v255_v4  ;;  %v272_v8 = vld [vmem:[%s404_s1 + $0x64] sm:$0xf]  ;;  %v247_v9 = vld [vmem:[%s404_s1 + $0x68] sm:$0xf0]  ;;  %v246_v10 = vor.u32 %v273_v6, %v245_v5  ;;  %v237_v12 = vld [vmem:[%s404_s1 + $0x50] sm:$0xf] }
   0x4   :  { %130 = vmatpush.bf16.msra.mxu0 %v254_v3  ;;  %v250_v11 = vor.u32 %v272_v8, %v247_v9  ;;  %v271_v13 = vld [vmem:[%s404_s1 + $0x54] sm:$0xf0]  ;;  %v270_v14 = vld [vmem:[%s404_s1 + $0x54] sm:$0xf]  ;;  %v239_v15 = vld [vmem:[%s404_s1 + $0x58] sm:$0xf0] }
   0x5   :  { %144 = vmatpush.bf16.msra.mxu1 %v258_v7  ;;  %v238_v16 = vor.u32 %v271_v13, %v237_v12  ;;  %v242_v17 = vor.u32 %v270_v14, %v239_v15  ;;  %v229_v18 = vld [vmem:[%s404_s1 + $0x40] sm:$0xf]  ;;  %v269_v19 = vld [vmem:[%s404_s1 + $0x44] sm:$0xf0]  ;;  %v268_v20 = vld [vmem:[%s404_s1 + $0x44] sm:$0xf] }
   0x6   :  { %v231_v21 = vld [vmem:[%s404_s1 + $0x48] sm:$0xf0]  ;;  %v230_v22 = vor.u32 %v269_v19, %v229_v18  ;;  %v221_v24 = vld [vmem:[%s404_s1 + $0x30] sm:$0xf]  ;;  %v267_v25 = vld [vmem:[%s404_s1 + $0x34] sm:$0xf0] }
   0x7   :  { %v234_v23 = vor.u32 %v268_v20, %v231_v21  ;;  %v266_v26 = vld [vmem:[%s404_s1 + $0x34] sm:$0xf]  ;;  %v223_v27 = vld [vmem:[%s404_s1 + $0x38] sm:$0xf0]  ;;  %v222_v28 = vor.u32 %v267_v25, %v221_v24  ;;  %v213_v30 = vld [vmem:[%s404_s1 + $0x20] sm:$0xf] }
   0x8   :  { %131 = vmatpush.bf16.msra.mxu0 %v246_v10  ;;  %v226_v29 = vor.u32 %v266_v26, %v223_v27  ;;  %v265_v31 = vld [vmem:[%s404_s1 + $0x24] sm:$0xf0]  ;;  %v264_v32 = vld [vmem:[%s404_s1 + $0x24] sm:$0xf]  ;;  %v215_v33 = vld [vmem:[%s404_s1 + $0x28] sm:$0xf0] }
   0x9   :  { %145 = vmatpush.bf16.msra.mxu1 %v250_v11  ;;  %v214_v34 = vor.u32 %v265_v31, %v213_v30  ;;  %v218_v35 = vor.u32 %v264_v32, %v215_v33  ;;  %v205_v36 = vld [vmem:[%s404_s1 + $0x10] sm:$0xf]  ;;  %v263_v37 = vld [vmem:[%s404_s1 + $0x14] sm:$0xf0]  ;;  %v262_v38 = vld [vmem:[%s404_s1 + $0x14] sm:$0xf] }
   0xa   :  { %v207_v39 = vld [vmem:[%s404_s1 + $0x18] sm:$0xf0]  ;;  %v206_v40 = vor.u32 %v263_v37, %v205_v36  ;;  %v197_v42 = vld [vmem:[%s404_s1] sm:$0xf]  ;;  %v261_v43 = vld [vmem:[%s404_s1 + $0x4] sm:$0xf0] }
   0xb   :  { %v210_v41 = vor.u32 %v262_v38, %v207_v39  ;;  %v260_v44 = vld [vmem:[%s404_s1 + $0x4] sm:$0xf]  ;;  %v199_v45 = vld [vmem:[%s404_s1 + $0x8] sm:$0xf0]  ;;  %v198_v46 = vor.u32 %v261_v43, %v197_v42  ;;  %v173_v49 = vld [vmem:[%s406_s2] sm:$0x3] }
   0xc   :  { %132 = vmatpush.bf16.msra.mxu0 %v238_v16  ;;  %v202_v47 = vor.u32 %v260_v44, %v199_v45  ;;  %v259_v48 = vld [vmem:[%s405_s0] sm:$0xff]  ;;  %v175_v50 = vperm.slane %v173_v49, 0  ;;  %v176_v51 = vperm.slane %v173_v49, 1 }
   0xd   :  { %146 = vmatpush.bf16.msra.mxu1 %v242_v17 }
  0x10   :  { %133 = vmatpush.bf16.msra.mxu0 %v230_v22 }
  0x11   :  { %147 = vmatpush.bf16.msra.mxu1 %v234_v23 }
  0x14   :  { %134 = vmatpush.bf16.msra.mxu0 %v222_v28 }
  0x15   :  { %148 = vmatpush.bf16.msra.mxu1 %v226_v29 }
  0x18   :  { %135 = vmatpush.bf16.msra.mxu0 %v214_v34 }
  0x19   :  { %149 = vmatpush.bf16.msra.mxu1 %v218_v35 }
  0x1c   :  { %136 = vmatpush.bf16.msra.mxu0 %v206_v40 }
  0x1d   :  { %150 = vmatpush.bf16.msra.mxu1 %v210_v41 }
  0x20   :  { %137 = vmatpush.bf16.msra.mxu0 %v198_v46 }
  0x21   :  { %151 = vmatpush.bf16.msra.mxu1 %v202_v47 }
  0x23   :  { %138 = vmatmul.bf16.vlgmr.msra.gmra.mxu0 %v259_v48 }
  0x24   :  { %152 = vmatmul.bf16.vlgmr.msra.gmra.mxu1 %v259_v48 }
  0xa0   :  { %v139_v52 = vpop.f32.mrf.mxu0 }
  0xa1   :  { %v179_v53 = vadd.f32 %v175_v50, %v139_v52  ;;  %v153_v54 = vpop.f32.mrf.mxu1 }
  0xa2   :  { %v180_v55 = vadd.f32 %v176_v51, %v153_v54 }
  0xa4   :  { %v183_v56 = vpack.c.bf16 %v180_v55, %v179_v53 }
  0xa6   :  { %185 = vst [vmem:[%s407_s3] sm:$0xff] %v183_v56 }
  0xa8   :  { %v141_v57 = vpop.f32.mrf.mxu0 }
  0xa9   :  { %v181_v58 = vadd.f32 %v175_v50, %v141_v57  ;;  %v155_v59 = vpop.f32.mrf.mxu1 }
  0xaa   :  { %v182_v60 = vadd.f32 %v176_v51, %v155_v59 }
  0xac   :  { %v184_v61 = vpack.c.bf16 %v182_v60, %v181_v58 }
  0xae   :  { %186 = vst [vmem:[%s407_s3 + $0x8] sm:$0xff] %v184_v61 }

// kernel: se_resnet18_forward.33
= control target key start
LH: loop header
LB: loop body
LE: loop exit
PB: predicated region body
PF: predicated region fallthrough
CT: control target
= control target key end

     0   :  { %s1356_s15 = smov 0   ;;  %s1358_s16 = smov 0   ;;  %s1552_s0 = inlined_call_operand.vmem [shape: bf16[16,2304], index: 0, kind: input, shape index: {}]   ;;  %s1553_s1 = inlined_call_operand.vmem [shape: bf16[2304,256], index: 1, kind: input, shape index: {}]   ;;  %s1554_s2 = inlined_call_operand.vmem [shape: f32[1,256], index: 2, kind: input, shape index: {}]   ;;  %s1555_s3 = inlined_call_operand.vmem [shape: bf16[16,256], index: 3, kind: input, shape index: {}]   ;;  %s1556_s4 = inlined_call_operand.vmem [shape: bf16[16,256], index: 4, kind: output, shape index: {}]  }
   0x1   :  { %s1360_s17 = smov 0   ;;  %s1362_s18 = smov 0  }
   0x2   :  { %s1364_s19 = smov 0  }
   0x3 LB: > { %s26_s20 = sadd.s32 1, %s1324_s18  ;;  %p49_p1 = scmp.ne.s32.totalorder %s1316_s16, %s1312_s15  ;;  %s1328_s19 = sphi %s1364_s19, %s14_s19   ;;  %s1324_s18 = sphi %s1362_s18, %s1560_s18   ;;  %s1320_s17 = sphi %s1360_s17, %s1559_s17   ;;  %s1316_s16 = sphi %s1358_s16, %s1558_s16   ;;  %s1312_s15 = sphi %s1356_s15, %s1557_s15  }
   0x4   : > { %p27_p0 = scmp.ge.s32.totalorder %s26_s20, 6  ;;  %p50_p2 = scmp.eq.s32.totalorder %s1328_s19, 0 }
   0x5   : > { %s42_s22 = sadd.s32 1, %s1316_s16  ;;  %p975_p5 = scmp.ge.s32.totalorder %s1328_s19, 6 }
   0x6   : > { %s1562_s20 = smov (%p27_p0, %s26_s20), 0  ;;  %p51_p3 = por %p50_p2, %p49_p1 }
   0x7   : > { %s38_s21 = ssub.s32 %s1324_s18, %s1562_s20  ;;  %208 = sbr.rel (%p975_p5) target bundleno = 21 (0x15), region = 24 }
   0x8   : > { %p40_p4 = scmp.eq.s32.totalorder %s38_s21, 0 }
   0xa   : > { %s1391_s23 = scalar_select %p40_p4, %s1316_s16, %s42_s22  }
   0xc   : > { %211 = sbr.rel (!%p51_p3) target bundleno = 21 (0x15), region = 28  ;;  %s213_s24 = sand.u32 (%p51_p3), 1, %s1316_s16  }
   0xd   : > { %s1194_s25 = smul.u32 (%p51_p3), 12, %s1324_s18 }
   0xe   : > { %s1247_s26 = smul.u32 (%p51_p3), 24, %s213_s24 }
   0xf   : > { %s221_s29 = scalar_lea.vmem (%p51_p3), %s1552_s0, %s1194_s25 }
  0x10   : > { %v236_v0 = vld [vmem:[%s221_s29] sm:$0xff] (%p51_p3)  ;;  %v238_v1 = vld [vmem:[%s221_s29 + $0x48] sm:$0xff] (%p51_p3)  ;;  %s215_s30 = scalar_lea.vmem (%p51_p3), [#allocation3], %s1247_s26  ;;  %v979_v3 = vld [vmem:[%s221_s29 + $0x50] sm:$0xf] (%p51_p3) }
  0x11   : > { %v977_v2 = vld [vmem:[%s221_s29 + $0x8] sm:$0xf]  ;;  %237 = vst [vmem:[%s215_s30] sm:$0xff] %v236_v0 }
  0x12   : > { %239 = vst [vmem:[%s215_s30 + $0xc] sm:$0xff] %v238_v1 }
  0x13   : > { %978 = vst [vmem:[%s215_s30 + $0x8] sm:$0xf] %v977_v2 }
  0x14   : > { %980 = vst [vmem:[%s215_s30 + $0x14] sm:$0xf] %v979_v3 }
  0x15 PF: > { %p981_p6 = scmp.ge.s32.totalorder %s1328_s19, 1  ;;  %p271_p7 = scmp.lt.s32.totalorder %s1328_s19, 7 }
  0x17   : > { %p272_p8 = pnand %p981_p6, %p271_p7 }
  0x18   : > { %s278_s5 = sand.u32 (!%p272_p8), 1, %s1312_s15   ;;  %s334_s6 = smul.u32 (!%p272_p8), 48, %s1320_s17 }
  0x19   : > { %275 = sbr.rel (%p272_p8) target bundleno = 263 (0x107), region = 58  ;;  %p984_p10 = scmp.ne.s32.totalorder (!%p272_p8), %s1320_s17, 0 }
  0x1a   : > { %s1248_s7 = smul.u32 (!%p272_p8), 24, %s278_s5  ;;  %p336_p9 = scmp.lt.s32.totalorder (!%p272_p8), %s334_s6, 287 }
  0x1c   : > { %s1408_s12 = scalar_lea.vmem (!%p272_p8), [#allocation3], %s1248_s7 }
  0x1e   : > { %s1564_s6 = smov (!%p336_p9, %s334_s6), 287  ;;  %378 = sbr.rel (%p984_p10) target bundleno = 40 (0x28), region = 66 }
  0x1f   : > { %s1195_s8 = sshll.u32 %s1564_s6, 3 }
  0x20   : > { %s1406_s11 = scalar_lea.vmem %s1553_s1, %s1195_s8 }
  0x23   : > { %v1330_v4 = vmov 0.0  }
  0x24   : > { %379 = vst [vmem:[#allocation2 + $0x10] sm:$0xff] %v1330_v4 }
  0x25   : > { %380 = vst [vmem:[#allocation2] sm:$0xff] %v1330_v4 }
  0x26   : > { %381 = vst [vmem:[#allocation2 + $0x18] sm:$0xff] %v1330_v4 }
  0x27   : > { %382 = vst [vmem:[#allocation2 + $0x8] sm:$0xff] %v1330_v4 }
  0x28 PF: > { %v1055_v5 = vld [vmem:[%s1406_s11 + $0x70] sm:$0xf]  ;;  %v1214_v6 = vld [vmem:[%s1406_s11 + $0x74] sm:$0xf0]  ;;  %v1047_v14 = vld [vmem:[%s1406_s11 + $0x60] sm:$0xf] }
  0x29   : > { %v1119_v7 = vld [vmem:[%s1406_s11 + $0xf0] sm:$0xf]  ;;  %v1056_v8 = vor.u32 %v1214_v6, %v1055_v5  ;;  %v1230_v9 = vld [vmem:[%s1406_s11 + $0xf4] sm:$0xf0]  ;;  %v1212_v15 = vld [vmem:[%s1406_s11 + $0x64] sm:$0xf0] }
  0x2a   : > { %v1183_v10 = vld [vmem:[%s1406_s11 + $0x170] sm:$0xf]  ;;  %v1246_v11 = vld [vmem:[%s1406_s11 + $0x174] sm:$0xf0]  ;;  %v1120_v12 = vor.u32 %v1230_v9, %v1119_v7  ;;  %v1111_v16 = vld [vmem:[%s1406_s11 + $0xe0] sm:$0xf]  ;;  %v1048_v17 = vor.u32 %v1212_v15, %v1047_v14 }
  0x2b   : > { %v1184_v13 = vor.u32 %v1246_v11, %v1183_v10  ;;  %695 = vmatpush.bf16.msra.mxu0 %v1056_v8  ;;  %v1228_v18 = vld [vmem:[%s1406_s11 + $0xe4] sm:$0xf0]  ;;  %v1175_v19 = vld [vmem:[%s1406_s11 + $0x160] sm:$0xf]  ;;  %v1039_v23 = vld [vmem:[%s1406_s11 + $0x50] sm:$0xf] }
  0x2c   : > { %v1244_v20 = vld [vmem:[%s1406_s11 + $0x164] sm:$0xf0]  ;;  %709 = vmatpush.bf16.msra.mxu1 %v1120_v12  ;;  %v1112_v21 = vor.u32 %v1228_v18, %v1111_v16  ;;  %v1210_v24 = vld [vmem:[%s1406_s11 + $0x54] sm:$0xf0]  ;;  %v1103_v25 = vld [vmem:[%s1406_s11 + $0xd0] sm:$0xf] }
  0x2d   : > { %723 = vmatpush.bf16.msra.mxu2 %v1184_v13  ;;  %v1176_v22 = vor.u32 %v1244_v20, %v1175_v19  ;;  %v1226_v26 = vld [vmem:[%s1406_s11 + $0xd4] sm:$0xf0]  ;;  %v1167_v27 = vld [vmem:[%s1406_s11 + $0x150] sm:$0xf]  ;;  %v1040_v29 = vor.u32 %v1210_v24, %v1039_v23  ;;  %v1031_v30 = vld [vmem:[%s1406_s11 + $0x40] sm:$0xf] }
  0x2e   : > { %v1242_v28 = vld [vmem:[%s1406_s11 + $0x154] sm:$0xf0]  ;;  %v1208_v31 = vld [vmem:[%s1406_s11 + $0x44] sm:$0xf0]  ;;  %v1104_v32 = vor.u32 %v1226_v26, %v1103_v25  ;;  %v1095_v34 = vld [vmem:[%s1406_s11 + $0xc0] sm:$0xf] }
  0x2f   : > { %696 = vmatpush.bf16.msra.mxu0 %v1048_v17  ;;  %v1168_v33 = vor.u32 %v1242_v28, %v1167_v27  ;;  %v1213_v35 = vld [vmem:[%s1406_s11 + $0x74] sm:$0xf]  ;;  %v1057_v36 = vld [vmem:[%s1406_s11 + $0x78] sm:$0xf0]  ;;  %v1224_v37 = vld [vmem:[%s1406_s11 + $0xc4] sm:$0xf0]  ;;  %v1032_v42 = vor.u32 %v1208_v31, %v1031_v30 }
  0x30   : > { %710 = vmatpush.bf16.msra.mxu1 %v1112_v21  ;;  %v1159_v38 = vld [vmem:[%s1406_s11 + $0x140] sm:$0xf]  ;;  %v1240_v39 = vld [vmem:[%s1406_s11 + $0x144] sm:$0xf0]  ;;  %v1060_v40 = vor.u32 %v1213_v35, %v1057_v36  ;;  %v1211_v41 = vld [vmem:[%s1406_s11 + $0x64] sm:$0xf]  ;;  %v1096_v46 = vor.u32 %v1224_v37, %v1095_v34 }
  0x31   : > { %724 = vmatpush.bf16.msra.mxu2 %v1176_v22  ;;  %v1023_v43 = vld [vmem:[%s1406_s11 + $0x30] sm:$0xf]  ;;  %v1206_v44 = vld [vmem:[%s1406_s11 + $0x34] sm:$0xf0]  ;;  %v1049_v45 = vld [vmem:[%s1406_s11 + $0x68] sm:$0xf0]  ;;  %v1160_v47 = vor.u32 %v1240_v39, %v1159_v38 }
  0x32   : > { %737 = vmatpush.bf16.msra.mxu3 %v1060_v40  ;;  %v1087_v48 = vld [vmem:[%s1406_s11 + $0xb0] sm:$0xf]  ;;  %v1222_v49 = vld [vmem:[%s1406_s11 + $0xb4] sm:$0xf0]  ;;  %v1052_v51 = vor.u32 %v1211_v41, %v1049_v45  ;;  %v1209_v53 = vld [vmem:[%s1406_s11 + $0x54] sm:$0xf]  ;;  %v1024_v55 = vor.u32 %v1206_v44, %v1023_v43 }
  0x33   : > { %697 = vmatpush.bf16.msra.mxu0 %v1040_v29  ;;  %v1151_v50 = vld [vmem:[%s1406_s11 + $0x130] sm:$0xf]  ;;  %v1238_v52 = vld [vmem:[%s1406_s11 + $0x134] sm:$0xf0]  ;;  %v1041_v54 = vld [vmem:[%s1406_s11 + $0x58] sm:$0xf0]  ;;  %v1088_v59 = vor.u32 %v1222_v49, %v1087_v48 }
  0x34   : > { %711 = vmatpush.bf16.msra.mxu1 %v1104_v32  ;;  %v1015_v56 = vld [vmem:[%s1406_s11 + $0x20] sm:$0xf]  ;;  %v1204_v57 = vld [vmem:[%s1406_s11 + $0x24] sm:$0xf0]  ;;  %v1044_v58 = vor.u32 %v1209_v53, %v1041_v54  ;;  %v1152_v60 = vor.u32 %v1238_v52, %v1151_v50  ;;  %v1207_v62 = vld [vmem:[%s1406_s11 + $0x44] sm:$0xf] }
  0x35   : > { %725 = vmatpush.bf16.msra.mxu2 %v1168_v33  ;;  %v1079_v61 = vld [vmem:[%s1406_s11 + $0xa0] sm:$0xf]  ;;  %v1033_v63 = vld [vmem:[%s1406_s11 + $0x48] sm:$0xf0]  ;;  %v1220_v0 = vld [vmem:[%s1406_s11 + $0xa4] sm:$0xf0]  ;;  %v1016_v3 = vor.u32 %v1204_v57, %v1015_v56 }
  0x36   : > { %738 = vmatpush.bf16.msra.mxu3 %v1052_v51  ;;  %v1143_v1 = vld [vmem:[%s1406_s11 + $0x120] sm:$0xf]  ;;  %v1236_v2 = vld [vmem:[%s1406_s11 + $0x124] sm:$0xf0]  ;;  %v1007_v4 = vld [vmem:[%s1406_s11 + $0x10] sm:$0xf]  ;;  %v1036_v6 = vor.u32 %v1207_v62, %v1033_v63  ;;  %v1080_v7 = vor.u32 %v1220_v0, %v1079_v61 }
  0x37   : > { %698 = vmatpush.bf16.msra.mxu0 %v1032_v42  ;;  %v1202_v5 = vld [vmem:[%s1406_s11 + $0x14] sm:$0xf0]  ;;  %v1144_v8 = vor.u32 %v1236_v2, %v1143_v1  ;;  %v1071_v9 = vld [vmem:[%s1406_s11 + $0x90] sm:$0xf]  ;;  %v1205_v10 = vld [vmem:[%s1406_s11 + $0x34] sm:$0xf] }
  0x38   : > { %712 = vmatpush.bf16.msra.mxu1 %v1096_v46  ;;  %v1025_v11 = vld [vmem:[%s1406_s11 + $0x38] sm:$0xf0]  ;;  %v1218_v12 = vld [vmem:[%s1406_s11 + $0x94] sm:$0xf0]  ;;  %v1135_v13 = vld [vmem:[%s1406_s11 + $0x110] sm:$0xf]  ;;  %v1008_v15 = vor.u32 %v1202_v5, %v1007_v4 }
  0x39   : > { %726 = vmatpush.bf16.msra.mxu2 %v1160_v47  ;;  %v1234_v14 = vld [vmem:[%s1406_s11 + $0x114] sm:$0xf0]  ;;  %v999_v16 = vld [vmem:[%s1406_s11] sm:$0xf]  ;;  %v1200_v17 = vld [vmem:[%s1406_s11 + $0x4] sm:$0xf0]  ;;  %v1028_v19 = vor.u32 %v1205_v10, %v1025_v11  ;;  %v1072_v20 = vor.u32 %v1218_v12, %v1071_v9 }
  0x3a   : > { %739 = vmatpush.bf16.msra.mxu3 %v1044_v58  ;;  %v1063_v18 = vld [vmem:[%s1406_s11 + $0x80] sm:$0xf]  ;;  %v1136_v21 = vor.u32 %v1234_v14, %v1135_v13  ;;  %v1216_v22 = vld [vmem:[%s1406_s11 + $0x84] sm:$0xf0]  ;;  %v1203_v23 = vld [vmem:[%s1406_s11 + $0x24] sm:$0xf]  ;;  %v1000_v31 = vor.u32 %v1200_v17, %v999_v16 }
  0x3b   : > { %699 = vmatpush.bf16.msra.mxu0 %v1024_v55  ;;  %v1017_v24 = vld [vmem:[%s1406_s11 + $0x28] sm:$0xf0]  ;;  %v1127_v25 = vld [vmem:[%s1406_s11 + $0x100] sm:$0xf]  ;;  %v1232_v26 = vld [vmem:[%s1406_s11 + $0x104] sm:$0xf0]  ;;  %v1064_v36 = vor.u32 %v1216_v22, %v1063_v18 }
  0x3c   : > { %713 = vmatpush.bf16.msra.mxu1 %v1088_v59  ;;  %v1229_v27 = vld [vmem:[%s1406_s11 + $0xf4] sm:$0xf]  ;;  %v1121_v28 = vld [vmem:[%s1406_s11 + $0xf8] sm:$0xf0]  ;;  %v995_v32 = vld [vmem:[%s1408_s12 + $0x8] sm:$0xf]  ;;  %v1020_v33 = vor.u32 %v1203_v23, %v1017_v24  ;;  %v1128_v37 = vor.u32 %v1232_v26, %v1127_v25 }
  0x3d   : > { %727 = vmatpush.bf16.msra.mxu2 %v1152_v60  ;;  %v1245_v29 = vld [vmem:[%s1406_s11 + $0x174] sm:$0xf]  ;;  %v1185_v30 = vld [vmem:[%s1406_s11 + $0x178] sm:$0xf0]  ;;  %v987_v34 = vld [vmem:[%s1408_s12] sm:$0xf]  ;;  %v1124_v41 = vor.u32 %v1229_v27, %v1121_v28 }
  0x3e   : > { %740 = vmatpush.bf16.msra.mxu3 %v1036_v6  ;;  %v1197_v35 = vld [vmem:[%s1408_s12 + $0x8] sm:$0xf0]  ;;  %v1198_v38 = vld [vmem:[%s1408_s12 + $0x10] sm:$0xf0]  ;;  %v1196_v39 = vld [vmem:[%s1408_s12 + $0x4] sm:$0xf]  ;;  %v1188_v42 = vor.u32 %v1245_v29, %v1185_v30 }
  0x3f   : > { %700 = vmatpush.bf16.msra.mxu0 %v1016_v3  ;;  %v989_v40 = vld [vmem:[%s1408_s12 + $0xc] sm:$0xf0]  ;;  %v1227_v43 = vld [vmem:[%s1406_s11 + $0xe4] sm:$0xf]  ;;  %v1201_v44 = vld [vmem:[%s1406_s11 + $0x14] sm:$0xf]  ;;  %v988_v49 = vor.u32 %v1197_v35, %v987_v34  ;;  %v1487_v50 = vor.u32 %v1198_v38, %v995_v32 }
  0x40   : > { %714 = vmatpush.bf16.msra.mxu1 %v1080_v7  ;;  %v1009_v45 = vld [vmem:[%s1406_s11 + $0x18] sm:$0xf0]  ;;  %v1113_v46 = vld [vmem:[%s1406_s11 + $0xe8] sm:$0xf0]  ;;  %v1243_v47 = vld [vmem:[%s1406_s11 + $0x164] sm:$0xf]  ;;  %v1489_v51 = vor.u32 %v1196_v39, %v989_v40 }
  0x41   : > { %728 = vmatpush.bf16.msra.mxu2 %v1144_v8  ;;  %v1177_v48 = vld [vmem:[%s1406_s11 + $0x168] sm:$0xf0]  ;;  %v1012_v52 = vor.u32 %v1201_v44, %v1009_v45  ;;  %v1116_v53 = vor.u32 %v1227_v43, %v1113_v46  ;;  %v1225_v55 = vld [vmem:[%s1406_s11 + $0xd4] sm:$0xf]  ;;  %v1199_v56 = vld [vmem:[%s1406_s11 + $0x4] sm:$0xf] }
  0x42   : > { %741 = vmatpush.bf16.msra.mxu3 %v1028_v19  ;;  %v1180_v54 = vor.u32 %v1243_v47, %v1177_v48  ;;  %v1001_v57 = vld [vmem:[%s1406_s11 + $0x8] sm:$0xf0]  ;;  %v1105_v58 = vld [vmem:[%s1406_s11 + $0xd8] sm:$0xf0]  ;;  %v1241_v59 = vld [vmem:[%s1406_s11 + $0x154] sm:$0xf] }
  0x43   : > { %701 = vmatpush.bf16.msra.mxu0 %v1008_v15  ;;  %v1169_v60 = vld [vmem:[%s1406_s11 + $0x158] sm:$0xf0]  ;;  %v1004_v61 = vor.u32 %v1199_v56, %v1001_v57  ;;  %v1108_v62 = vor.u32 %v1225_v55, %v1105_v58  ;;  %v1223_v0 = vld [vmem:[%s1406_s11 + $0xc4] sm:$0xf]  ;;  %v1097_v1 = vld [vmem:[%s1406_s11 + $0xc8] sm:$0xf0] }
  0x44   : > { %715 = vmatpush.bf16.msra.mxu1 %v1072_v20  ;;  %v1172_v63 = vor.u32 %v1241_v59, %v1169_v60  ;;  %v1239_v2 = vld [vmem:[%s1406_s11 + $0x144] sm:$0xf]  ;;  %v1161_v3 = vld [vmem:[%s1406_s11 + $0x148] sm:$0xf0]  ;;  %v1100_v4 = vor.u32 %v1223_v0, %v1097_v1  ;;  %v1221_v6 = vld [vmem:[%s1406_s11 + $0xb4] sm:$0xf] }
  0x45   : > { %729 = vmatpush.bf16.msra.mxu2 %v1136_v21  ;;  %v1164_v5 = vor.u32 %v1239_v2, %v1161_v3  ;;  %v1089_v7 = vld [vmem:[%s1406_s11 + $0xb8] sm:$0xf0]  ;;  %v1237_v8 = vld [vmem:[%s1406_s11 + $0x134] sm:$0xf]  ;;  %v1219_v12 = vld [vmem:[%s1406_s11 + $0xa4] sm:$0xf] }
  0x46   : > { %742 = vmatpush.bf16.msra.mxu3 %v1020_v33  ;;  %v1153_v9 = vld [vmem:[%s1406_s11 + $0x138] sm:$0xf0]  ;;  %v1092_v10 = vor.u32 %v1221_v6, %v1089_v7  ;;  %v1081_v13 = vld [vmem:[%s1406_s11 + $0xa8] sm:$0xf0]  ;;  %v1235_v14 = vld [vmem:[%s1406_s11 + $0x124] sm:$0xf] }
  0x47   : > { %702 = vmatpush.bf16.msra.mxu0 %v1000_v31  ;;  %v1156_v11 = vor.u32 %v1237_v8, %v1153_v9  ;;  %v1145_v15 = vld [vmem:[%s1406_s11 + $0x128] sm:$0xf0]  ;;  %v1084_v16 = vor.u32 %v1219_v12, %v1081_v13  ;;  %v1217_v18 = vld [vmem:[%s1406_s11 + $0x94] sm:$0xf]  ;;  %v1073_v19 = vld [vmem:[%s1406_s11 + $0x98] sm:$0xf0] }
  0x48   : > { %716 = vmatpush.bf16.msra.mxu1 %v1064_v36  ;;  %v1148_v17 = vor.u32 %v1235_v14, %v1145_v15  ;;  %v1233_v20 = vld [vmem:[%s1406_s11 + $0x114] sm:$0xf]  ;;  %v1137_v21 = vld [vmem:[%s1406_s11 + $0x118] sm:$0xf0]  ;;  %v1076_v22 = vor.u32 %v1217_v18, %v1073_v19  ;;  %v1215_v24 = vld [vmem:[%s1406_s11 + $0x84] sm:$0xf] }
  0x49   : > { %730 = vmatpush.bf16.msra.mxu2 %v1128_v37  ;;  %v1140_v23 = vor.u32 %v1233_v20, %v1137_v21  ;;  %v1065_v25 = vld [vmem:[%s1406_s11 + $0x88] sm:$0xf0]  ;;  %v1231_v26 = vld [vmem:[%s1406_s11 + $0x104] sm:$0xf]  ;;  %v383_v33 = vld [vmem:[#allocation2 + $0x10] sm:$0xff]  ;;  %p1189_p11 = scmp.ne.s32.totalorder %s1320_s17, 5 }
  0x4a   : > { %703 = vmatmul.bf16.vlgmr.msra.gmra.mxu0 %v988_v49  ;;  %743 = vmatpush.bf16.msra.mxu3 %v1012_v52  ;;  %v1129_v27 = vld [vmem:[%s1406_s11 + $0x108] sm:$0xf0]  ;;  %v1068_v28 = vor.u32 %v1215_v24, %v1065_v25  ;;  %v385_v40 = vld [vmem:[#allocation2 + $0x18] sm:$0xff]  ;;  %v384_v48 = vld [vmem:[#allocation2] sm:$0xff] }
  0x4b   : > { %751 = vmatpush.bf16.msrb.mxu0 %v1124_v41  ;;  %717 = vmatmul.bf16.vlgmr.msra.gmra.mxu1 %v1489_v51  ;;  %v1132_v29 = vor.u32 %v1231_v26, %v1129_v27 }
  0x4c   : > { %765 = vmatpush.bf16.msrb.mxu1 %v1188_v42  ;;  %731 = vmatmul.bf16.vlgmr.msra.gmra.mxu2 %v1487_v50 }
  0x4e   : > { %744 = vmatpush.bf16.msra.mxu3 %v1004_v61 }
  0x4f   : > { %752 = vmatpush.bf16.msrb.mxu0 %v1116_v53 }
  0x50   : > { %766 = vmatpush.bf16.msrb.mxu1 %v1180_v54  ;;  %v386_v54 = vld [vmem:[#allocation2 + $0x8] sm:$0xff] }
  0x51   : > { %745 = vmatmul.bf16.vlgmr.msra.gmra.mxu3 %v988_v49 }
  0x53   : > { %753 = vmatpush.bf16.msrb.mxu0 %v1108_v62 }
  0x54   : > { %767 = vmatpush.bf16.msrb.mxu1 %v1172_v63 }
  0x57   : > { %754 = vmatpush.bf16.msrb.mxu0 %v1100_v4 }
  0x58   : > { %768 = vmatpush.bf16.msrb.mxu1 %v1164_v5 }
  0x5b   : > { %755 = vmatpush.bf16.msrb.mxu0 %v1092_v10 }
  0x5c   : > { %769 = vmatpush.bf16.msrb.mxu1 %v1156_v11 }
  0x5f   : > { %756 = vmatpush.bf16.msrb.mxu0 %v1084_v16 }
  0x60   : > { %770 = vmatpush.bf16.msrb.mxu1 %v1148_v17 }
  0x63   : > { %757 = vmatpush.bf16.msrb.mxu0 %v1076_v22 }
  0x64   : > { %771 = vmatpush.bf16.msrb.mxu1 %v1140_v23 }
  0x67   : > { %758 = vmatpush.bf16.msrb.mxu0 %v1068_v28 }
  0x68   : > { %772 = vmatpush.bf16.msrb.mxu1 %v1132_v29 }
  0x6a   : > { %759 = vmatmul.bf16.vlgmr.msrb.gmra.mxu0 %v1489_v51 }
  0x6b   : > { %773 = vmatmul.bf16.vlgmr.msrb.gmra.mxu1 %v1487_v50 }
  0xc7   : > { %v704_v30 = vpop.f32.mrf.mxu0 }
  0xc8   : > { %v718_v31 = vpop.f32.mrf.mxu1 }
  0xc9   : > { %v719_v32 = vadd.f32 %v718_v31, %v704_v30 }
  0xcf   : > { %v732_v34 = vpop.f32.mrf.mxu2  ;;  %v706_v36 = vpop.f32.mrf.mxu0 }
  0xd0   : > { %v733_v35 = vadd.f32 %v732_v34, %v719_v32  ;;  %v720_v37 = vpop.f32.mrf.mxu1 }
  0xd1   : > { %v721_v39 = vadd.f32 %v720_v37, %v706_v36 }
  0xd2   : > { %v779_v38 = vadd.f32 %v733_v35, %v383_v33 }
  0xd4   : > { %783 = vst [vmem:[#allocation2 + $0x10] sm:$0xff] %v779_v38  ;;  %v746_v44 = vpop.f32.mrf.mxu3 }
  0xd7   : > { %v734_v41 = vpop.f32.mrf.mxu2 }
  0xd8   : > { %v735_v42 = vadd.f32 %v734_v41, %v721_v39 }
  0xda   : > { %v781_v43 = vadd.f32 %v735_v42, %v385_v40 }
  0xdc   : > { %785 = vst [vmem:[#allocation2 + $0x18] sm:$0xff] %v781_v43  ;;  %v748_v51 = vpop.f32.mrf.mxu3 }
  0xe7   : > { %v760_v45 = vpop.f32.mrf.mxu0 }
  0xe8   : > { %v774_v46 = vpop.f32.mrf.mxu1  ;;  %v761_v47 = vadd.f32 %v760_v45, %v746_v44 }
  0xea   : > { %v775_v49 = vadd.f32 %v774_v46, %v761_v47 }
  0xec   : > { %v780_v50 = vadd.f32 %v775_v49, %v384_v48 }
  0xee   : > { %784 = vst [vmem:[#allocation2] sm:$0xff] %v780_v50 }
  0xef   : > { %v762_v52 = vpop.f32.mrf.mxu0 }
  0xf0   : > { %v763_v53 = vadd.f32 %v762_v52, %v748_v51  ;;  %v776_v55 = vpop.f32.mrf.mxu1 }
  0xf2   : > { %v777_v56 = vadd.f32 %v776_v55, %v763_v53  ;;  %790 = sbr.rel (%p1189_p11) target bundleno = 263 (0x107), region = 70 }
  0xf4   : > { %v782_v57 = vadd.f32 %v777_v56, %v386_v54 }
  0xf6   : > { %786 = vst [vmem:[#allocation2 + $0x8] sm:$0xff] %v782_v57 }
  0xf7   : > { %v791_v58 = vld [vmem:[#allocation2 + $0x10] sm:$0xff]  ;;  %v792_v59 = vld [vmem:[#allocation2] sm:$0xff]  ;;  %v793_v0 = vld [vmem:[#allocation2 + $0x18] sm:$0xff] }
  0xf8   : > { %v795_v60 = vld [vmem:[%s1554_s2] sm:$0x3]  ;;  %v806_v4 = vld [vmem:[%s1555_s3 + $0x8] sm:$0xff] }
  0xf9   : > { %v797_v61 = vperm.slane %v795_v60, 0  ;;  %v798_v62 = vperm.slane %v795_v60, 1  ;;  %v805_v63 = vld [vmem:[%s1555_s3] sm:$0xff]  ;;  %v809_v9 = vunpack.c.l.bf16 %v806_v4  ;;  %v810_v10 = vunpack.c.h.bf16 %v806_v4 }
  0xfa   : > { %v807_v2 = vunpack.c.l.bf16 %v805_v63  ;;  %v808_v3 = vunpack.c.h.bf16 %v805_v63 }
  0xfb   : > { %v801_v5 = vadd.f32 %v797_v61, %v791_v58  ;;  %v802_v6 = vadd.f32 %v798_v62, %v792_v59  ;;  %v803_v7 = vadd.f32 %v797_v61, %v793_v0 }
  0xfd   : > { %v794_v1 = vld [vmem:[#allocation2 + $0x8] sm:$0xff]  ;;  %v811_v11 = vadd.f32 %v807_v2, %v801_v5  ;;  %v812_v12 = vadd.f32 %v808_v3, %v802_v6  ;;  %v813_v13 = vadd.f32 %v809_v9, %v803_v7 }
  0xfe   : > { %v804_v8 = vadd.f32 %v798_v62, %v794_v1 }
  0xff   : > { %v815_v15 = vmax.f32 %v811_v11, 0.0  ;;  %v816_v16 = vmax.f32 %v812_v12, 0.0  ;;  %v817_v17 = vmax.f32 %v813_v13, 0.0 }
 0x100   : > { %v814_v14 = vadd.f32 %v810_v10, %v804_v8 }
 0x101   : > { %v819_v19 = vpack.c.bf16 %v816_v16, %v815_v15 }
 0x102   : > { %v818_v18 = vmax.f32 %v814_v14, 0.0 }
 0x103   : > { %821 = vst [vmem:[%s1556_s4] sm:$0xff] %v819_v19 }
 0x104   : > { %v820_v20 = vpack.c.bf16 %v818_v18, %v817_v17 }
 0x106   : > { %822 = vst [vmem:[%s1556_s4 + $0x8] sm:$0xff] %v820_v20 }
 0x107 PF: > { %s14_s19 = sadd.s32 1, %s1328_s19   ;;  %s1557_s15 = smov %s1316_s16 }
 0x108   : > { %p11_p12 = scmp.ge.s32.totalorder %s14_s19, 8   ;;  %s1558_s16 = smov %s1391_s23 }
 0x109   : > { %s1559_s17 = smov %s1324_s18  ;;  %s1560_s18 = smov %s1562_s20 }
 0x10a   :  { %13 = sbr.rel (!%p11_p12) target bundleno = 3 (0x3), region = 120 }

// kernel: se_resnet18_forward.34
= control target key start
LH: loop header
LB: loop body
LE: loop exit
PB: predicated region body
PF: predicated region fallthrough
CT: control target
= control target key end

     0   :  { %s1251_s12 = smov 0   ;;  %s1253_s13 = smov 0   ;;  %s1441_s0 = inlined_call_operand.vmem [shape: bf16[16,2304], index: 0, kind: input, shape index: {}]   ;;  %s1442_s1 = inlined_call_operand.vmem [shape: bf16[2304,256], index: 1, kind: input, shape index: {}]   ;;  %s1443_s2 = inlined_call_operand.vmem [shape: f32[1,256], index: 2, kind: input, shape index: {}]   ;;  %s1444_s3 = inlined_call_operand.vmem [shape: bf16[16,256], index: 3, kind: output, shape index: {}]  }
   0x1   :  { %s1255_s14 = smov 0   ;;  %s1257_s15 = smov 0  }
   0x2   :  { %s1259_s16 = smov 0  }
   0x3 LB: > { %s25_s17 = sadd.s32 1, %s1224_s15  ;;  %p48_p1 = scmp.ne.s32.totalorder %s1216_s13, %s1212_s12  ;;  %s1228_s16 = sphi %s1259_s16, %s13_s16   ;;  %s1224_s15 = sphi %s1257_s15, %s1448_s15   ;;  %s1220_s14 = sphi %s1255_s14, %s1447_s14   ;;  %s1216_s13 = sphi %s1253_s13, %s1446_s13   ;;  %s1212_s12 = sphi %s1251_s12, %s1445_s12  }
   0x4   : > { %p26_p0 = scmp.ge.s32.totalorder %s25_s17, 6  ;;  %p49_p2 = scmp.eq.s32.totalorder %s1228_s16, 0 }
   0x5   : > { %s41_s19 = sadd.s32 1, %s1216_s13  ;;  %p875_p5 = scmp.ge.s32.totalorder %s1228_s16, 6 }
   0x6   : > { %s1450_s17 = smov (%p26_p0, %s25_s17), 0  ;;  %p50_p3 = por %p49_p2, %p48_p1 }
   0x7   : > { %s37_s18 = ssub.s32 %s1224_s15, %s1450_s17  ;;  %164 = sbr.rel (%p875_p5) target bundleno = 21 (0x15), region = 20 }
   0x8   : > { %p39_p4 = scmp.eq.s32.totalorder %s37_s18, 0 }
   0xa   : > { %s1286_s20 = scalar_select %p39_p4, %s1216_s13, %s41_s19  }
   0xc   : > { %167 = sbr.rel (!%p50_p3) target bundleno = 21 (0x15), region = 24  ;;  %s169_s21 = sand.u32 (%p50_p3), 1, %s1216_s13  }
   0xd   : > { %s1094_s22 = smul.u32 (%p50_p3), 12, %s1224_s15 }
   0xe   : > { %s1147_s23 = smul.u32 (%p50_p3), 24, %s169_s21 }
   0xf   : > { %s177_s26 = scalar_lea.vmem (%p50_p3), %s1441_s0, %s1094_s22 }
  0x10   : > { %v192_v0 = vld [vmem:[%s177_s26] sm:$0xff] (%p50_p3)  ;;  %v194_v1 = vld [vmem:[%s177_s26 + $0x48] sm:$0xff] (%p50_p3)  ;;  %s171_s27 = scalar_lea.vmem (%p50_p3), [#allocation3], %s1147_s23  ;;  %v879_v3 = vld [vmem:[%s177_s26 + $0x50] sm:$0xf] (%p50_p3) }
  0x11   : > { %v877_v2 = vld [vmem:[%s177_s26 + $0x8] sm:$0xf]  ;;  %193 = vst [vmem:[%s171_s27] sm:$0xff] %v192_v0 }
  0x12   : > { %195 = vst [vmem:[%s171_s27 + $0xc] sm:$0xff] %v194_v1 }
  0x13   : > { %878 = vst [vmem:[%s171_s27 + $0x8] sm:$0xf] %v877_v2 }
  0x14   : > { %880 = vst [vmem:[%s171_s27 + $0x14] sm:$0xf] %v879_v3 }
  0x15 PF: > { %p881_p6 = scmp.ge.s32.totalorder %s1228_s16, 1  ;;  %p227_p7 = scmp.lt.s32.totalorder %s1228_s16, 7 }
  0x17   : > { %p228_p8 = pnand %p881_p6, %p227_p7 }
  0x18   : > { %s234_s28 = sand.u32 (!%p228_p8), 1, %s1212_s12   ;;  %s278_s29 = smul.u32 (!%p228_p8), 48, %s1220_s14 }
  0x19   : > { %231 = sbr.rel (%p228_p8) target bundleno = 261 (0x105), region = 54  ;;  %p884_p10 = scmp.ne.s32.totalorder (!%p228_p8), %s1220_s14, 0 }
  0x1a   : > { %s1148_s30 = smul.u32 (!%p228_p8), 24, %s234_s28  ;;  %p280_p9 = scmp.lt.s32.totalorder (!%p228_p8), %s278_s29, 287 }
  0x1c   : > { %s1303_s8 = scalar_lea.vmem (!%p228_p8), [#allocation3], %s1148_s30 }
  0x1e   : > { %s1452_s29 = smov (!%p280_p9, %s278_s29), 287  ;;  %310 = sbr.rel (%p884_p10) target bundleno = 40 (0x28), region = 62 }
  0x1f   : > { %s1095_s4 = sshll.u32 %s1452_s29, 3 }
  0x20   : > { %s1301_s7 = scalar_lea.vmem %s1442_s1, %s1095_s4 }
  0x23   : > { %v1230_v4 = vmov 0.0  }
  0x24   : > { %311 = vst [vmem:[#allocation2 + $0x10] sm:$0xff] %v1230_v4 }
  0x25   : > { %312 = vst [vmem:[#allocation2] sm:$0xff] %v1230_v4 }
  0x26   : > { %313 = vst [vmem:[#allocation2 + $0x18] sm:$0xff] %v1230_v4 }
  0x27   : > { %314 = vst [vmem:[#allocation2 + $0x8] sm:$0xff] %v1230_v4 }
  0x28 PF: > { %v955_v5 = vld [vmem:[%s1301_s7 + $0x70] sm:$0xf]  ;;  %v1114_v6 = vld [vmem:[%s1301_s7 + $0x74] sm:$0xf0]  ;;  %v947_v14 = vld [vmem:[%s1301_s7 + $0x60] sm:$0xf] }
  0x29   : > { %v1019_v7 = vld [vmem:[%s1301_s7 + $0xf0] sm:$0xf]  ;;  %v956_v8 = vor.u32 %v1114_v6, %v955_v5  ;;  %v1130_v9 = vld [vmem:[%s1301_s7 + $0xf4] sm:$0xf0]  ;;  %v1112_v15 = vld [vmem:[%s1301_s7 + $0x64] sm:$0xf0] }
  0x2a   : > { %v1083_v10 = vld [vmem:[%s1301_s7 + $0x170] sm:$0xf]  ;;  %v1146_v11 = vld [vmem:[%s1301_s7 + $0x174] sm:$0xf0]  ;;  %v1020_v12 = vor.u32 %v1130_v9, %v1019_v7  ;;  %v1011_v16 = vld [vmem:[%s1301_s7 + $0xe0] sm:$0xf]  ;;  %v948_v17 = vor.u32 %v1112_v15, %v947_v14 }
  0x2b   : > { %v1084_v13 = vor.u32 %v1146_v11, %v1083_v10  ;;  %627 = vmatpush.bf16.msra.mxu0 %v956_v8  ;;  %v1128_v18 = vld [vmem:[%s1301_s7 + $0xe4] sm:$0xf0]  ;;  %v1075_v19 = vld [vmem:[%s1301_s7 + $0x160] sm:$0xf]  ;;  %v939_v23 = vld [vmem:[%s1301_s7 + $0x50] sm:$0xf] }
  0x2c   : > { %v1144_v20 = vld [vmem:[%s1301_s7 + $0x164] sm:$0xf0]  ;;  %641 = vmatpush.bf16.msra.mxu1 %v1020_v12  ;;  %v1012_v21 = vor.u32 %v1128_v18, %v1011_v16  ;;  %v1110_v24 = vld [vmem:[%s1301_s7 + $0x54] sm:$0xf0]  ;;  %v1003_v25 = vld [vmem:[%s1301_s7 + $0xd0] sm:$0xf] }
  0x2d   : > { %655 = vmatpush.bf16.msra.mxu2 %v1084_v13  ;;  %v1076_v22 = vor.u32 %v1144_v20, %v1075_v19  ;;  %v1126_v26 = vld [vmem:[%s1301_s7 + $0xd4] sm:$0xf0]  ;;  %v1067_v27 = vld [vmem:[%s1301_s7 + $0x150] sm:$0xf]  ;;  %v940_v29 = vor.u32 %v1110_v24, %v939_v23  ;;  %v931_v30 = vld [vmem:[%s1301_s7 + $0x40] sm:$0xf] }
  0x2e   : > { %v1142_v28 = vld [vmem:[%s1301_s7 + $0x154] sm:$0xf0]  ;;  %v1108_v31 = vld [vmem:[%s1301_s7 + $0x44] sm:$0xf0]  ;;  %v1004_v32 = vor.u32 %v1126_v26, %v1003_v25  ;;  %v995_v34 = vld [vmem:[%s1301_s7 + $0xc0] sm:$0xf] }
  0x2f   : > { %628 = vmatpush.bf16.msra.mxu0 %v948_v17  ;;  %v1068_v33 = vor.u32 %v1142_v28, %v1067_v27  ;;  %v1113_v35 = vld [vmem:[%s1301_s7 + $0x74] sm:$0xf]  ;;  %v957_v36 = vld [vmem:[%s1301_s7 + $0x78] sm:$0xf0]  ;;  %v1124_v37 = vld [vmem:[%s1301_s7 + $0xc4] sm:$0xf0]  ;;  %v932_v42 = vor.u32 %v1108_v31, %v931_v30 }
  0x30   : > { %642 = vmatpush.bf16.msra.mxu1 %v1012_v21  ;;  %v1059_v38 = vld [vmem:[%s1301_s7 + $0x140] sm:$0xf]  ;;  %v1140_v39 = vld [vmem:[%s1301_s7 + $0x144] sm:$0xf0]  ;;  %v960_v40 = vor.u32 %v1113_v35, %v957_v36  ;;  %v1111_v41 = vld [vmem:[%s1301_s7 + $0x64] sm:$0xf]  ;;  %v996_v46 = vor.u32 %v1124_v37, %v995_v34 }
  0x31   : > { %656 = vmatpush.bf16.msra.mxu2 %v1076_v22  ;;  %v923_v43 = vld [vmem:[%s1301_s7 + $0x30] sm:$0xf]  ;;  %v1106_v44 = vld [vmem:[%s1301_s7 + $0x34] sm:$0xf0]  ;;  %v949_v45 = vld [vmem:[%s1301_s7 + $0x68] sm:$0xf0]  ;;  %v1060_v47 = vor.u32 %v1140_v39, %v1059_v38 }
  0x32   : > { %669 = vmatpush.bf16.msra.mxu3 %v960_v40  ;;  %v987_v48 = vld [vmem:[%s1301_s7 + $0xb0] sm:$0xf]  ;;  %v1122_v49 = vld [vmem:[%s1301_s7 + $0xb4] sm:$0xf0]  ;;  %v952_v51 = vor.u32 %v1111_v41, %v949_v45  ;;  %v1109_v53 = vld [vmem:[%s1301_s7 + $0x54] sm:$0xf]  ;;  %v924_v55 = vor.u32 %v1106_v44, %v923_v43 }
  0x33   : > { %629 = vmatpush.bf16.msra.mxu0 %v940_v29  ;;  %v1051_v50 = vld [vmem:[%s1301_s7 + $0x130] sm:$0xf]  ;;  %v1138_v52 = vld [vmem:[%s1301_s7 + $0x134] sm:$0xf0]  ;;  %v941_v54 = vld [vmem:[%s1301_s7 + $0x58] sm:$0xf0]  ;;  %v988_v59 = vor.u32 %v1122_v49, %v987_v48 }
  0x34   : > { %643 = vmatpush.bf16.msra.mxu1 %v1004_v32  ;;  %v915_v56 = vld [vmem:[%s1301_s7 + $0x20] sm:$0xf]  ;;  %v1104_v57 = vld [vmem:[%s1301_s7 + $0x24] sm:$0xf0]  ;;  %v944_v58 = vor.u32 %v1109_v53, %v941_v54  ;;  %v1052_v60 = vor.u32 %v1138_v52, %v1051_v50  ;;  %v1107_v62 = vld [vmem:[%s1301_s7 + $0x44] sm:$0xf] }
  0x35   : > { %657 = vmatpush.bf16.msra.mxu2 %v1068_v33  ;;  %v979_v61 = vld [vmem:[%s1301_s7 + $0xa0] sm:$0xf]  ;;  %v933_v63 = vld [vmem:[%s1301_s7 + $0x48] sm:$0xf0]  ;;  %v1120_v0 = vld [vmem:[%s1301_s7 + $0xa4] sm:$0xf0]  ;;  %v916_v3 = vor.u32 %v1104_v57, %v915_v56 }
  0x36   : > { %670 = vmatpush.bf16.msra.mxu3 %v952_v51  ;;  %v1043_v1 = vld [vmem:[%s1301_s7 + $0x120] sm:$0xf]  ;;  %v1136_v2 = vld [vmem:[%s1301_s7 + $0x124] sm:$0xf0]  ;;  %v907_v4 = vld [vmem:[%s1301_s7 + $0x10] sm:$0xf]  ;;  %v936_v6 = vor.u32 %v1107_v62, %v933_v63  ;;  %v980_v7 = vor.u32 %v1120_v0, %v979_v61 }
  0x37   : > { %630 = vmatpush.bf16.msra.mxu0 %v932_v42  ;;  %v1102_v5 = vld [vmem:[%s1301_s7 + $0x14] sm:$0xf0]  ;;  %v1044_v8 = vor.u32 %v1136_v2, %v1043_v1  ;;  %v971_v9 = vld [vmem:[%s1301_s7 + $0x90] sm:$0xf]  ;;  %v1105_v10 = vld [vmem:[%s1301_s7 + $0x34] sm:$0xf] }
  0x38   : > { %644 = vmatpush.bf16.msra.mxu1 %v996_v46  ;;  %v925_v11 = vld [vmem:[%s1301_s7 + $0x38] sm:$0xf0]  ;;  %v1118_v12 = vld [vmem:[%s1301_s7 + $0x94] sm:$0xf0]  ;;  %v1035_v13 = vld [vmem:[%s1301_s7 + $0x110] sm:$0xf]  ;;  %v908_v15 = vor.u32 %v1102_v5, %v907_v4 }
  0x39   : > { %658 = vmatpush.bf16.msra.mxu2 %v1060_v47  ;;  %v1134_v14 = vld [vmem:[%s1301_s7 + $0x114] sm:$0xf0]  ;;  %v899_v16 = vld [vmem:[%s1301_s7] sm:$0xf]  ;;  %v1100_v17 = vld [vmem:[%s1301_s7 + $0x4] sm:$0xf0]  ;;  %v928_v19 = vor.u32 %v1105_v10, %v925_v11  ;;  %v972_v20 = vor.u32 %v1118_v12, %v971_v9 }
  0x3a   : > { %671 = vmatpush.bf16.msra.mxu3 %v944_v58  ;;  %v963_v18 = vld [vmem:[%s1301_s7 + $0x80] sm:$0xf]  ;;  %v1036_v21 = vor.u32 %v1134_v14, %v1035_v13  ;;  %v1116_v22 = vld [vmem:[%s1301_s7 + $0x84] sm:$0xf0]  ;;  %v1103_v23 = vld [vmem:[%s1301_s7 + $0x24] sm:$0xf]  ;;  %v900_v31 = vor.u32 %v1100_v17, %v899_v16 }
  0x3b   : > { %631 = vmatpush.bf16.msra.mxu0 %v924_v55  ;;  %v917_v24 = vld [vmem:[%s1301_s7 + $0x28] sm:$0xf0]  ;;  %v1027_v25 = vld [vmem:[%s1301_s7 + $0x100] sm:$0xf]  ;;  %v1132_v26 = vld [vmem:[%s1301_s7 + $0x104] sm:$0xf0]  ;;  %v964_v36 = vor.u32 %v1116_v22, %v963_v18 }
  0x3c   : > { %645 = vmatpush.bf16.msra.mxu1 %v988_v59  ;;  %v1129_v27 = vld [vmem:[%s1301_s7 + $0xf4] sm:$0xf]  ;;  %v1021_v28 = vld [vmem:[%s1301_s7 + $0xf8] sm:$0xf0]  ;;  %v895_v32 = vld [vmem:[%s1303_s8 + $0x8] sm:$0xf]  ;;  %v920_v33 = vor.u32 %v1103_v23, %v917_v24  ;;  %v1028_v37 = vor.u32 %v1132_v26, %v1027_v25 }
  0x3d   : > { %659 = vmatpush.bf16.msra.mxu2 %v1052_v60  ;;  %v1145_v29 = vld [vmem:[%s1301_s7 + $0x174] sm:$0xf]  ;;  %v1085_v30 = vld [vmem:[%s1301_s7 + $0x178] sm:$0xf0]  ;;  %v887_v34 = vld [vmem:[%s1303_s8] sm:$0xf]  ;;  %v1024_v41 = vor.u32 %v1129_v27, %v1021_v28 }
  0x3e   : > { %672 = vmatpush.bf16.msra.mxu3 %v936_v6  ;;  %v1097_v35 = vld [vmem:[%s1303_s8 + $0x8] sm:$0xf0]  ;;  %v1098_v38 = vld [vmem:[%s1303_s8 + $0x10] sm:$0xf0]  ;;  %v1096_v39 = vld [vmem:[%s1303_s8 + $0x4] sm:$0xf]  ;;  %v1088_v42 = vor.u32 %v1145_v29, %v1085_v30 }
  0x3f   : > { %632 = vmatpush.bf16.msra.mxu0 %v916_v3  ;;  %v889_v40 = vld [vmem:[%s1303_s8 + $0xc] sm:$0xf0]  ;;  %v1127_v43 = vld [vmem:[%s1301_s7 + $0xe4] sm:$0xf]  ;;  %v1101_v44 = vld [vmem:[%s1301_s7 + $0x14] sm:$0xf]  ;;  %v888_v49 = vor.u32 %v1097_v35, %v887_v34  ;;  %v1382_v50 = vor.u32 %v1098_v38, %v895_v32 }
  0x40   : > { %646 = vmatpush.bf16.msra.mxu1 %v980_v7  ;;  %v909_v45 = vld [vmem:[%s1301_s7 + $0x18] sm:$0xf0]  ;;  %v1013_v46 = vld [vmem:[%s1301_s7 + $0xe8] sm:$0xf0]  ;;  %v1143_v47 = vld [vmem:[%s1301_s7 + $0x164] sm:$0xf]  ;;  %v1384_v51 = vor.u32 %v1096_v39, %v889_v40 }
  0x41   : > { %660 = vmatpush.bf16.msra.mxu2 %v1044_v8  ;;  %v1077_v48 = vld [vmem:[%s1301_s7 + $0x168] sm:$0xf0]  ;;  %v912_v52 = vor.u32 %v1101_v44, %v909_v45  ;;  %v1016_v53 = vor.u32 %v1127_v43, %v1013_v46  ;;  %v1125_v55 = vld [vmem:[%s1301_s7 + $0xd4] sm:$0xf]  ;;  %v1099_v56 = vld [vmem:[%s1301_s7 + $0x4] sm:$0xf] }
  0x42   : > { %673 = vmatpush.bf16.msra.mxu3 %v928_v19  ;;  %v1080_v54 = vor.u32 %v1143_v47, %v1077_v48  ;;  %v901_v57 = vld [vmem:[%s1301_s7 + $0x8] sm:$0xf0]  ;;  %v1005_v58 = vld [vmem:[%s1301_s7 + $0xd8] sm:$0xf0]  ;;  %v1141_v59 = vld [vmem:[%s1301_s7 + $0x154] sm:$0xf] }
  0x43   : > { %633 = vmatpush.bf16.msra.mxu0 %v908_v15  ;;  %v1069_v60 = vld [vmem:[%s1301_s7 + $0x158] sm:$0xf0]  ;;  %v904_v61 = vor.u32 %v1099_v56, %v901_v57  ;;  %v1008_v62 = vor.u32 %v1125_v55, %v1005_v58  ;;  %v1123_v0 = vld [vmem:[%s1301_s7 + $0xc4] sm:$0xf]  ;;  %v997_v1 = vld [vmem:[%s1301_s7 + $0xc8] sm:$0xf0] }
  0x44   : > { %647 = vmatpush.bf16.msra.mxu1 %v972_v20  ;;  %v1072_v63 = vor.u32 %v1141_v59, %v1069_v60  ;;  %v1139_v2 = vld [vmem:[%s1301_s7 + $0x144] sm:$0xf]  ;;  %v1061_v3 = vld [vmem:[%s1301_s7 + $0x148] sm:$0xf0]  ;;  %v1000_v4 = vor.u32 %v1123_v0, %v997_v1  ;;  %v1121_v6 = vld [vmem:[%s1301_s7 + $0xb4] sm:$0xf] }
  0x45   : > { %661 = vmatpush.bf16.msra.mxu2 %v1036_v21  ;;  %v1064_v5 = vor.u32 %v1139_v2, %v1061_v3  ;;  %v989_v7 = vld [vmem:[%s1301_s7 + $0xb8] sm:$0xf0]  ;;  %v1137_v8 = vld [vmem:[%s1301_s7 + $0x134] sm:$0xf]  ;;  %v1119_v12 = vld [vmem:[%s1301_s7 + $0xa4] sm:$0xf] }
  0x46   : > { %674 = vmatpush.bf16.msra.mxu3 %v920_v33  ;;  %v1053_v9 = vld [vmem:[%s1301_s7 + $0x138] sm:$0xf0]  ;;  %v992_v10 = vor.u32 %v1121_v6, %v989_v7  ;;  %v981_v13 = vld [vmem:[%s1301_s7 + $0xa8] sm:$0xf0]  ;;  %v1135_v14 = vld [vmem:[%s1301_s7 + $0x124] sm:$0xf] }
  0x47   : > { %634 = vmatpush.bf16.msra.mxu0 %v900_v31  ;;  %v1056_v11 = vor.u32 %v1137_v8, %v1053_v9  ;;  %v1045_v15 = vld [vmem:[%s1301_s7 + $0x128] sm:$0xf0]  ;;  %v984_v16 = vor.u32 %v1119_v12, %v981_v13  ;;  %v1117_v18 = vld [vmem:[%s1301_s7 + $0x94] sm:$0xf]  ;;  %v973_v19 = vld [vmem:[%s1301_s7 + $0x98] sm:$0xf0] }
  0x48   : > { %648 = vmatpush.bf16.msra.mxu1 %v964_v36  ;;  %v1048_v17 = vor.u32 %v1135_v14, %v1045_v15  ;;  %v1133_v20 = vld [vmem:[%s1301_s7 + $0x114] sm:$0xf]  ;;  %v1037_v21 = vld [vmem:[%s1301_s7 + $0x118] sm:$0xf0]  ;;  %v976_v22 = vor.u32 %v1117_v18, %v973_v19  ;;  %v1115_v24 = vld [vmem:[%s1301_s7 + $0x84] sm:$0xf] }
  0x49   : > { %662 = vmatpush.bf16.msra.mxu2 %v1028_v37  ;;  %v1040_v23 = vor.u32 %v1133_v20, %v1037_v21  ;;  %v965_v25 = vld [vmem:[%s1301_s7 + $0x88] sm:$0xf0]  ;;  %v1131_v26 = vld [vmem:[%s1301_s7 + $0x104] sm:$0xf]  ;;  %v315_v33 = vld [vmem:[#allocation2 + $0x10] sm:$0xff]  ;;  %p1089_p11 = scmp.ne.s32.totalorder %s1220_s14, 5 }
  0x4a   : > { %635 = vmatmul.bf16.vlgmr.msra.gmra.mxu0 %v888_v49  ;;  %675 = vmatpush.bf16.msra.mxu3 %v912_v52  ;;  %v1029_v27 = vld [vmem:[%s1301_s7 + $0x108] sm:$0xf0]  ;;  %v968_v28 = vor.u32 %v1115_v24, %v965_v25  ;;  %v317_v40 = vld [vmem:[#allocation2 + $0x18] sm:$0xff]  ;;  %v316_v48 = vld [vmem:[#allocation2] sm:$0xff] }
  0x4b   : > { %683 = vmatpush.bf16.msrb.mxu0 %v1024_v41  ;;  %649 = vmatmul.bf16.vlgmr.msra.gmra.mxu1 %v1384_v51  ;;  %v1032_v29 = vor.u32 %v1131_v26, %v1029_v27 }
  0x4c   : > { %697 = vmatpush.bf16.msrb.mxu1 %v1088_v42  ;;  %663 = vmatmul.bf16.vlgmr.msra.gmra.mxu2 %v1382_v50 }
  0x4e   : > { %676 = vmatpush.bf16.msra.mxu3 %v904_v61 }
  0x4f   : > { %684 = vmatpush.bf16.msrb.mxu0 %v1016_v53 }
  0x50   : > { %698 = vmatpush.bf16.msrb.mxu1 %v1080_v54  ;;  %v318_v54 = vld [vmem:[#allocation2 + $0x8] sm:$0xff] }
  0x51   : > { %677 = vmatmul.bf16.vlgmr.msra.gmra.mxu3 %v888_v49 }
  0x53   : > { %685 = vmatpush.bf16.msrb.mxu0 %v1008_v62 }
  0x54   : > { %699 = vmatpush.bf16.msrb.mxu1 %v1072_v63 }
  0x57   : > { %686 = vmatpush.bf16.msrb.mxu0 %v1000_v4 }
  0x58   : > { %700 = vmatpush.bf16.msrb.mxu1 %v1064_v5 }
  0x5b   : > { %687 = vmatpush.bf16.msrb.mxu0 %v992_v10 }
  0x5c   : > { %701 = vmatpush.bf16.msrb.mxu1 %v1056_v11 }
  0x5f   : > { %688 = vmatpush.bf16.msrb.mxu0 %v984_v16 }
  0x60   : > { %702 = vmatpush.bf16.msrb.mxu1 %v1048_v17 }
  0x63   : > { %689 = vmatpush.bf16.msrb.mxu0 %v976_v22 }
  0x64   : > { %703 = vmatpush.bf16.msrb.mxu1 %v1040_v23 }
  0x67   : > { %690 = vmatpush.bf16.msrb.mxu0 %v968_v28 }
  0x68   : > { %704 = vmatpush.bf16.msrb.mxu1 %v1032_v29 }
  0x6a   : > { %691 = vmatmul.bf16.vlgmr.msrb.gmra.mxu0 %v1384_v51 }
  0x6b   : > { %705 = vmatmul.bf16.vlgmr.msrb.gmra.mxu1 %v1382_v50 }
  0xc7   : > { %v636_v30 = vpop.f32.mrf.mxu0 }
  0xc8   : > { %v650_v31 = vpop.f32.mrf.mxu1 }
  0xc9   : > { %v651_v32 = vadd.f32 %v650_v31, %v636_v30 }
  0xcf   : > { %v664_v34 = vpop.f32.mrf.mxu2  ;;  %v638_v36 = vpop.f32.mrf.mxu0 }
  0xd0   : > { %v665_v35 = vadd.f32 %v664_v34, %v651_v32  ;;  %v652_v37 = vpop.f32.mrf.mxu1 }
  0xd1   : > { %v653_v39 = vadd.f32 %v652_v37, %v638_v36 }
  0xd2   : > { %v711_v38 = vadd.f32 %v665_v35, %v315_v33 }
  0xd4   : > { %715 = vst [vmem:[#allocation2 + $0x10] sm:$0xff] %v711_v38  ;;  %v678_v44 = vpop.f32.mrf.mxu3 }
  0xd7   : > { %v666_v41 = vpop.f32.mrf.mxu2 }
  0xd8   : > { %v667_v42 = vadd.f32 %v666_v41, %v653_v39 }
  0xda   : > { %v713_v43 = vadd.f32 %v667_v42, %v317_v40 }
  0xdc   : > { %717 = vst [vmem:[#allocation2 + $0x18] sm:$0xff] %v713_v43  ;;  %v680_v51 = vpop.f32.mrf.mxu3 }
  0xe7   : > { %v692_v45 = vpop.f32.mrf.mxu0 }
  0xe8   : > { %v706_v46 = vpop.f32.mrf.mxu1  ;;  %v693_v47 = vadd.f32 %v692_v45, %v678_v44 }
  0xea   : > { %v707_v49 = vadd.f32 %v706_v46, %v693_v47 }
  0xec   : > { %v712_v50 = vadd.f32 %v707_v49, %v316_v48 }
  0xee   : > { %716 = vst [vmem:[#allocation2] sm:$0xff] %v712_v50 }
  0xef   : > { %v694_v52 = vpop.f32.mrf.mxu0 }
  0xf0   : > { %v695_v53 = vadd.f32 %v694_v52, %v680_v51  ;;  %v708_v55 = vpop.f32.mrf.mxu1 }
  0xf2   : > { %v709_v56 = vadd.f32 %v708_v55, %v695_v53  ;;  %722 = sbr.rel (%p1089_p11) target bundleno = 261 (0x105), region = 66 }
  0xf4   : > { %v714_v57 = vadd.f32 %v709_v56, %v318_v54 }
  0xf6   : > { %718 = vst [vmem:[#allocation2 + $0x8] sm:$0xff] %v714_v57 }
  0xf7   : > { %v723_v58 = vld [vmem:[#allocation2 + $0x10] sm:$0xff]  ;;  %v724_v59 = vld [vmem:[#allocation2] sm:$0xff]  ;;  %v725_v63 = vld [vmem:[#allocation2 + $0x18] sm:$0xff] }
  0xf8   : > { %v727_v60 = vld [vmem:[%s1443_s2] sm:$0x3] }
  0xf9   : > { %v729_v61 = vperm.slane %v727_v60, 0  ;;  %v730_v62 = vperm.slane %v727_v60, 1 }
  0xfb   : > { %v733_v1 = vadd.f32 %v729_v61, %v723_v58  ;;  %v734_v2 = vadd.f32 %v730_v62, %v724_v59  ;;  %v735_v3 = vadd.f32 %v729_v61, %v725_v63 }
  0xfd   : > { %v726_v0 = vld [vmem:[#allocation2 + $0x8] sm:$0xff]  ;;  %v737_v5 = vmax.f32 %v733_v1, 0.0  ;;  %v738_v6 = vmax.f32 %v734_v2, 0.0  ;;  %v739_v7 = vmax.f32 %v735_v3, 0.0 }
  0xfe   : > { %v736_v4 = vadd.f32 %v730_v62, %v726_v0 }
  0xff   : > { %v741_v9 = vpack.c.bf16 %v738_v6, %v737_v5 }
 0x100   : > { %v740_v8 = vmax.f32 %v736_v4, 0.0 }
 0x101   : > { %743 = vst [vmem:[%s1444_s3] sm:$0xff] %v741_v9 }
 0x102   : > { %v742_v10 = vpack.c.bf16 %v740_v8, %v739_v7 }
 0x104   : > { %744 = vst [vmem:[%s1444_s3 + $0x8] sm:$0xff] %v742_v10 }
 0x105 PF: > { %s13_s16 = sadd.s32 1, %s1228_s16   ;;  %s1445_s12 = smov %s1216_s13 }
 0x106   : > { %p10_p12 = scmp.ge.s32.totalorder %s13_s16, 8   ;;  %s1446_s13 = smov %s1286_s20 }
 0x107   : > { %s1447_s14 = smov %s1224_s15  ;;  %s1448_s15 = smov %s1450_s17 }
 0x108   :  { %12 = sbr.rel (!%p10_p12) target bundleno = 3 (0x3), region = 113 }

// kernel: se_resnet18_forward.37
= control target key start
LH: loop header
LB: loop body
LE: loop exit
PB: predicated region body
PF: predicated region fallthrough
CT: control target
= control target key end

     0   :  { %s1899_s12 = smov 0   ;;  %s1901_s13 = smov 0   ;;  %s2201_s0 = inlined_call_operand.vmem [shape: bf16[16,2304], index: 0, kind: input, shape index: {}]   ;;  %s2202_s1 = inlined_call_operand.vmem [shape: bf16[2304,512], index: 1, kind: input, shape index: {}]   ;;  %s2203_s2 = inlined_call_operand.vmem [shape: f32[1,512], index: 2, kind: input, shape index: {}]   ;;  %s2204_s3 = inlined_call_operand.vmem [shape: bf16[16,512], index: 3, kind: output, shape index: {}]  }
   0x1   :  { %s1903_s14 = smov 0   ;;  %s1905_s15 = smov 0  }
   0x2   :  { %s1907_s16 = smov 0  }
   0x3 LB: > { %s25_s17 = sadd.s32 1, %s1872_s15  ;;  %p48_p1 = scmp.ne.s32.totalorder %s1864_s13, %s1860_s12  ;;  %s1876_s16 = sphi %s1907_s16, %s13_s16   ;;  %s1872_s15 = sphi %s1905_s15, %s2208_s15   ;;  %s1868_s14 = sphi %s1903_s14, %s2207_s14   ;;  %s1864_s13 = sphi %s1901_s13, %s2206_s13   ;;  %s1860_s12 = sphi %s1899_s12, %s2205_s12  }
   0x4   : > { %p26_p0 = scmp.ge.s32.totalorder %s25_s17, 6  ;;  %p49_p2 = scmp.eq.s32.totalorder %s1876_s16, 0 }
   0x5   : > { %s41_s19 = sadd.s32 1, %s1864_s13  ;;  %p1283_p5 = scmp.ge.s32.totalorder %s1876_s16, 6 }
   0x6   : > { %s2210_s17 = smov (%p26_p0, %s25_s17), 0  ;;  %p50_p3 = por %p49_p2, %p48_p1 }
   0x7   : > { %s37_s18 = ssub.s32 %s1872_s15, %s2210_s17  ;;  %164 = sbr.rel (%p1283_p5) target bundleno = 21 (0x15), region = 20 }
   0x8   : > { %p39_p4 = scmp.eq.s32.totalorder %s37_s18, 0 }
   0xa   : > { %s1934_s20 = scalar_select %p39_p4, %s1864_s13, %s41_s19  }
   0xc   : > { %167 = sbr.rel (!%p50_p3) target bundleno = 21 (0x15), region = 24  ;;  %s169_s21 = sand.u32 (%p50_p3), 1, %s1864_s13  }
   0xd   : > { %s1694_s22 = smul.u32 (%p50_p3), 12, %s1872_s15 }
   0xe   : > { %s1795_s23 = smul.u32 (%p50_p3), 24, %s169_s21 }
   0xf   : > { %s177_s26 = scalar_lea.vmem (%p50_p3), %s2201_s0, %s1694_s22 }
  0x10   : > { %v192_v0 = vld [vmem:[%s177_s26] sm:$0xff] (%p50_p3)  ;;  %v194_v1 = vld [vmem:[%s177_s26 + $0x48] sm:$0xff] (%p50_p3)  ;;  %s171_s27 = scalar_lea.vmem (%p50_p3), [#allocation3], %s1795_s23  ;;  %v1287_v3 = vld [vmem:[%s177_s26 + $0x50] sm:$0xf] (%p50_p3) }
  0x11   : > { %v1285_v2 = vld [vmem:[%s177_s26 + $0x8] sm:$0xf]  ;;  %193 = vst [vmem:[%s171_s27] sm:$0xff] %v192_v0 }
  0x12   : > { %195 = vst [vmem:[%s171_s27 + $0xc] sm:$0xff] %v194_v1 }
  0x13   : > { %1286 = vst [vmem:[%s171_s27 + $0x8] sm:$0xf] %v1285_v2 }
  0x14   : > { %1288 = vst [vmem:[%s171_s27 + $0x14] sm:$0xf] %v1287_v3 }
  0x15 PF: > { %p1289_p6 = scmp.ge.s32.totalorder %s1876_s16, 1  ;;  %p227_p7 = scmp.lt.s32.totalorder %s1876_s16, 7 }
  0x17   : > { %p228_p8 = pnand %p1289_p6, %p227_p7 }
  0x18   : > { %s234_s28 = sand.u32 (!%p228_p8), 1, %s1860_s12   ;;  %s278_s29 = smul.u32 (!%p228_p8), 48, %s1868_s14 }
  0x19   : > { %231 = sbr.rel (%p228_p8) target bundleno = 305 (0x131), region = 54  ;;  %p1292_p10 = scmp.ne.s32.totalorder (!%p228_p8), %s1868_s14, 0 }
  0x1a   : > { %s1796_s30 = smul.u32 (!%p228_p8), 24, %s234_s28  ;;  %p280_p9 = scmp.lt.s32.totalorder (!%p228_p8), %s278_s29, 287 }
  0x1c   : > { %s1951_s8 = scalar_lea.vmem (!%p228_p8), [#allocation3], %s1796_s30 }
  0x1e   : > { %s2212_s29 = smov (!%p280_p9, %s278_s29), 287  ;;  %310 = sbr.rel (%p1292_p10) target bundleno = 44 (0x2c), region = 62 }
  0x1f   : > { %s1695_s4 = sshll.u32 %s2212_s29, 4 }
  0x20   : > { %s1949_s7 = scalar_lea.vmem %s2202_s1, %s1695_s4 }
  0x23   : > { %v1878_v4 = vmov 0.0  }
  0x24   : > { %311 = vst [vmem:[#allocation2 + $0x30] sm:$0xff] %v1878_v4 }
  0x25   : > { %312 = vst [vmem:[#allocation2] sm:$0xff] %v1878_v4 }
  0x26   : > { %313 = vst [vmem:[#allocation2 + $0x18] sm:$0xff] %v1878_v4 }
  0x27   : > { %314 = vst [vmem:[#allocation2 + $0x10] sm:$0xff] %v1878_v4 }
  0x28   : > { %315 = vst [vmem:[#allocation2 + $0x8] sm:$0xff] %v1878_v4 }
  0x29   : > { %316 = vst [vmem:[#allocation2 + $0x20] sm:$0xff] %v1878_v4 }
  0x2a   : > { %317 = vst [vmem:[#allocation2 + $0x28] sm:$0xff] %v1878_v4 }
  0x2b   : > { %318 = vst [vmem:[#allocation2 + $0x38] sm:$0xff] %v1878_v4 }
  0x2c PF: > { %v1419_v5 = vld [vmem:[%s1949_s7 + $0xe0] sm:$0xf]  ;;  %v1729_v6 = vld [vmem:[%s1949_s7 + $0xec] sm:$0xf0]  ;;  %v1727_v14 = vld [vmem:[%s1949_s7 + $0xe4] sm:$0xf] }
  0x2d   : > { %v1547_v7 = vld [vmem:[%s1949_s7 + $0x1e0] sm:$0xf]  ;;  %v1420_v8 = vor.u32 %v1729_v6, %v1419_v5  ;;  %v1761_v9 = vld [vmem:[%s1949_s7 + $0x1ec] sm:$0xf0]  ;;  %v1421_v15 = vld [vmem:[%s1949_s7 + $0xf0] sm:$0xf0] }
  0x2e   : > { %v1675_v10 = vld [vmem:[%s1949_s7 + $0x2e0] sm:$0xf]  ;;  %v1793_v11 = vld [vmem:[%s1949_s7 + $0x2ec] sm:$0xf0]  ;;  %v1548_v12 = vor.u32 %v1761_v9, %v1547_v7  ;;  %v1424_v17 = vor.u32 %v1727_v14, %v1421_v15  ;;  %v1723_v25 = vld [vmem:[%s1949_s7 + $0xc4] sm:$0xf] }
  0x2f   : > { %v1676_v13 = vor.u32 %v1793_v11, %v1675_v10  ;;  %v1403_v16 = vld [vmem:[%s1949_s7 + $0xc0] sm:$0xf]  ;;  %923 = vmatpush.bf16.msra.mxu0 %v1420_v8  ;;  %v1725_v18 = vld [vmem:[%s1949_s7 + $0xcc] sm:$0xf0]  ;;  %v1405_v27 = vld [vmem:[%s1949_s7 + $0xd0] sm:$0xf0] }
  0x30   : > { %v1531_v19 = vld [vmem:[%s1949_s7 + $0x1c0] sm:$0xf]  ;;  %v1757_v20 = vld [vmem:[%s1949_s7 + $0x1cc] sm:$0xf0]  ;;  %937 = vmatpush.bf16.msra.mxu1 %v1548_v12  ;;  %v1404_v21 = vor.u32 %v1725_v18, %v1403_v16  ;;  %965 = vmatpush.bf16.msra.mxu3 %v1424_v17  ;;  %v1408_v30 = vor.u32 %v1723_v25, %v1405_v27  ;;  %v1719_v36 = vld [vmem:[%s1949_s7 + $0xa4] sm:$0xf] }
  0x31   : > { %951 = vmatpush.bf16.msra.mxu2 %v1676_v13  ;;  %v1532_v22 = vor.u32 %v1757_v20, %v1531_v19  ;;  %v1659_v23 = vld [vmem:[%s1949_s7 + $0x2c0] sm:$0xf]  ;;  %v1789_v24 = vld [vmem:[%s1949_s7 + $0x2cc] sm:$0xf0]  ;;  %v1389_v37 = vld [vmem:[%s1949_s7 + $0xb0] sm:$0xf0] }
  0x32   : > { %v1660_v26 = vor.u32 %v1789_v24, %v1659_v23  ;;  %v1387_v28 = vld [vmem:[%s1949_s7 + $0xa0] sm:$0xf]  ;;  %v1721_v29 = vld [vmem:[%s1949_s7 + $0xac] sm:$0xf0]  ;;  %v1392_v43 = vor.u32 %v1719_v36, %v1389_v37  ;;  %v1715_v47 = vld [vmem:[%s1949_s7 + $0x84] sm:$0xf] }
  0x33   : > { %v1515_v31 = vld [vmem:[%s1949_s7 + $0x1a0] sm:$0xf]  ;;  %v1753_v32 = vld [vmem:[%s1949_s7 + $0x1ac] sm:$0xf0]  ;;  %924 = vmatpush.bf16.msra.mxu0 %v1404_v21  ;;  %v1388_v34 = vor.u32 %v1721_v29, %v1387_v28  ;;  %v1373_v48 = vld [vmem:[%s1949_s7 + $0x90] sm:$0xf0] }
  0x34   : > { %v1643_v33 = vld [vmem:[%s1949_s7 + $0x2a0] sm:$0xf]  ;;  %v1785_v35 = vld [vmem:[%s1949_s7 + $0x2ac] sm:$0xf0]  ;;  %938 = vmatpush.bf16.msra.mxu1 %v1532_v22  ;;  %v1516_v38 = vor.u32 %v1753_v32, %v1515_v31  ;;  %966 = vmatpush.bf16.msra.mxu3 %v1408_v30  ;;  %v1376_v55 = vor.u32 %v1715_v47, %v1373_v48  ;;  %v1711_v59 = vld [vmem:[%s1949_s7 + $0x64] sm:$0xf] }
  0x35   : > { %952 = vmatpush.bf16.msra.mxu2 %v1660_v26  ;;  %v1644_v39 = vor.u32 %v1785_v35, %v1643_v33  ;;  %v1371_v40 = vld [vmem:[%s1949_s7 + $0x80] sm:$0xf]  ;;  %v1717_v41 = vld [vmem:[%s1949_s7 + $0x8c] sm:$0xf0]  ;;  %v1357_v60 = vld [vmem:[%s1949_s7 + $0x70] sm:$0xf0] }
  0x36   : > { %v1499_v42 = vld [vmem:[%s1949_s7 + $0x180] sm:$0xf]  ;;  %v1749_v44 = vld [vmem:[%s1949_s7 + $0x18c] sm:$0xf0]  ;;  %v1372_v49 = vor.u32 %v1717_v41, %v1371_v40  ;;  %v1360_v3 = vor.u32 %v1711_v59, %v1357_v60  ;;  %v1707_v7 = vld [vmem:[%s1949_s7 + $0x44] sm:$0xf] }
  0x37   : > { %v1627_v45 = vld [vmem:[%s1949_s7 + $0x280] sm:$0xf]  ;;  %v1781_v46 = vld [vmem:[%s1949_s7 + $0x28c] sm:$0xf0]  ;;  %925 = vmatpush.bf16.msra.mxu0 %v1388_v34  ;;  %v1500_v50 = vor.u32 %v1749_v44, %v1499_v42  ;;  %v1341_v8 = vld [vmem:[%s1949_s7 + $0x50] sm:$0xf0] }
  0x38   : > { %939 = vmatpush.bf16.msra.mxu1 %v1516_v38  ;;  %v1628_v51 = vor.u32 %v1781_v46, %v1627_v45  ;;  %v1355_v52 = vld [vmem:[%s1949_s7 + $0x60] sm:$0xf]  ;;  %v1713_v53 = vld [vmem:[%s1949_s7 + $0x6c] sm:$0xf0]  ;;  %967 = vmatpush.bf16.msra.mxu3 %v1392_v43  ;;  %v1344_v15 = vor.u32 %v1707_v7, %v1341_v8  ;;  %v1703_v19 = vld [vmem:[%s1949_s7 + $0x24] sm:$0xf] }
  0x39   : > { %953 = vmatpush.bf16.msra.mxu2 %v1644_v39  ;;  %v1483_v54 = vld [vmem:[%s1949_s7 + $0x160] sm:$0xf]  ;;  %v1745_v56 = vld [vmem:[%s1949_s7 + $0x16c] sm:$0xf0]  ;;  %v1356_v61 = vor.u32 %v1713_v53, %v1355_v52  ;;  %v1325_v20 = vld [vmem:[%s1949_s7 + $0x30] sm:$0xf0] }
  0x3a   : > { %v1611_v57 = vld [vmem:[%s1949_s7 + $0x260] sm:$0xf]  ;;  %v1777_v58 = vld [vmem:[%s1949_s7 + $0x26c] sm:$0xf0]  ;;  %v1484_v62 = vor.u32 %v1745_v56, %v1483_v54  ;;  %v1328_v29 = vor.u32 %v1703_v19, %v1325_v20  ;;  %v1699_v31 = vld [vmem:[%s1949_s7 + $0x4] sm:$0xf] }
  0x3b   : > { %926 = vmatpush.bf16.msra.mxu0 %v1372_v49  ;;  %v1612_v63 = vor.u32 %v1777_v58, %v1611_v57  ;;  %v1339_v0 = vld [vmem:[%s1949_s7 + $0x40] sm:$0xf]  ;;  %v1709_v1 = vld [vmem:[%s1949_s7 + $0x4c] sm:$0xf0]  ;;  %v1309_v32 = vld [vmem:[%s1949_s7 + $0x10] sm:$0xf0] }
  0x3c   : > { %940 = vmatpush.bf16.msra.mxu1 %v1500_v50  ;;  %v1467_v2 = vld [vmem:[%s1949_s7 + $0x140] sm:$0xf]  ;;  %968 = vmatpush.bf16.msra.mxu3 %v1376_v55  ;;  %v1741_v4 = vld [vmem:[%s1949_s7 + $0x14c] sm:$0xf0]  ;;  %v1340_v9 = vor.u32 %v1709_v1, %v1339_v0  ;;  %v1759_v33 = vld [vmem:[%s1949_s7 + $0x1e4] sm:$0xf]  ;;  %v1312_v44 = vor.u32 %v1699_v31, %v1309_v32 }
  0x3d   : > { %954 = vmatpush.bf16.msra.mxu2 %v1628_v51  ;;  %v1595_v5 = vld [vmem:[%s1949_s7 + $0x240] sm:$0xf]  ;;  %v1773_v6 = vld [vmem:[%s1949_s7 + $0x24c] sm:$0xf0]  ;;  %v1468_v10 = vor.u32 %v1741_v4, %v1467_v2  ;;  %v1549_v34 = vld [vmem:[%s1949_s7 + $0x1f0] sm:$0xf0] }
  0x3e   : > { %v1596_v11 = vor.u32 %v1773_v6, %v1595_v5  ;;  %v1323_v12 = vld [vmem:[%s1949_s7 + $0x20] sm:$0xf]  ;;  %v1705_v13 = vld [vmem:[%s1949_s7 + $0x2c] sm:$0xf0]  ;;  %v1791_v35 = vld [vmem:[%s1949_s7 + $0x2e4] sm:$0xf]  ;;  %v1552_v45 = vor.u32 %v1759_v33, %v1549_v34 }
  0x3f   : > { %927 = vmatpush.bf16.msra.mxu0 %v1356_v61  ;;  %v1451_v14 = vld [vmem:[%s1949_s7 + $0x120] sm:$0xf]  ;;  %v1737_v16 = vld [vmem:[%s1949_s7 + $0x12c] sm:$0xf0]  ;;  %v1324_v21 = vor.u32 %v1705_v13, %v1323_v12  ;;  %v1677_v37 = vld [vmem:[%s1949_s7 + $0x2f0] sm:$0xf0] }
  0x40   : > { %941 = vmatpush.bf16.msra.mxu1 %v1484_v62  ;;  %969 = vmatpush.bf16.msra.mxu3 %v1360_v3  ;;  %v1579_v17 = vld [vmem:[%s1949_s7 + $0x220] sm:$0xf]  ;;  %v1769_v18 = vld [vmem:[%s1949_s7 + $0x22c] sm:$0xf0]  ;;  %v1452_v24 = vor.u32 %v1737_v16, %v1451_v14  ;;  %v1427_v38 = vld [vmem:[%s1949_s7 + $0xe8] sm:$0xf]  ;;  %v1680_v47 = vor.u32 %v1791_v35, %v1677_v37 }
  0x41   : > { %955 = vmatpush.bf16.msra.mxu2 %v1612_v63  ;;  %v1307_v22 = vld [vmem:[%s1949_s7] sm:$0xf]  ;;  %v1701_v23 = vld [vmem:[%s1949_s7 + $0xc] sm:$0xf0]  ;;  %v1580_v25 = vor.u32 %v1769_v18, %v1579_v17  ;;  %v1730_v39 = vld [vmem:[%s1949_s7 + $0xf4] sm:$0xf0] }
  0x42   : > { %v1435_v26 = vld [vmem:[%s1949_s7 + $0x100] sm:$0xf]  ;;  %v1733_v27 = vld [vmem:[%s1949_s7 + $0x10c] sm:$0xf0]  ;;  %v1308_v36 = vor.u32 %v1701_v23, %v1307_v22  ;;  %v1555_v42 = vld [vmem:[%s1949_s7 + $0x1e8] sm:$0xf]  ;;  %v1428_v48 = vor.u32 %v1730_v39, %v1427_v38 }
  0x43   : > { %928 = vmatpush.bf16.msra.mxu0 %v1340_v9  ;;  %v1563_v28 = vld [vmem:[%s1949_s7 + $0x200] sm:$0xf]  ;;  %v1765_v30 = vld [vmem:[%s1949_s7 + $0x20c] sm:$0xf0]  ;;  %v1436_v40 = vor.u32 %v1733_v27, %v1435_v26  ;;  %v1762_v43 = vld [vmem:[%s1949_s7 + $0x1f4] sm:$0xf0] }
  0x44   : > { %942 = vmatpush.bf16.msra.mxu1 %v1468_v10  ;;  %970 = vmatpush.bf16.msra.mxu3 %v1344_v15  ;;  %v1564_v41 = vor.u32 %v1765_v30, %v1563_v28  ;;  %v1755_v46 = vld [vmem:[%s1949_s7 + $0x1c4] sm:$0xf]  ;;  %v1533_v49 = vld [vmem:[%s1949_s7 + $0x1d0] sm:$0xf0]  ;;  %v1556_v52 = vor.u32 %v1762_v43, %v1555_v42  ;;  %v1411_v53 = vld [vmem:[%s1949_s7 + $0xc8] sm:$0xf] }
  0x45   : > { %956 = vmatpush.bf16.msra.mxu2 %v1596_v11  ;;  %v1787_v50 = vld [vmem:[%s1949_s7 + $0x2c4] sm:$0xf]  ;;  %v1661_v51 = vld [vmem:[%s1949_s7 + $0x2d0] sm:$0xf0]  ;;  %v1726_v54 = vld [vmem:[%s1949_s7 + $0xd4] sm:$0xf0]  ;;  %v1536_v59 = vor.u32 %v1755_v46, %v1533_v49 }
  0x46   : > { %v1539_v55 = vld [vmem:[%s1949_s7 + $0x1c8] sm:$0xf]  ;;  %v1758_v56 = vld [vmem:[%s1949_s7 + $0x1d4] sm:$0xf0]  ;;  %v1697_v58 = vld [vmem:[%s1951_s8 + $0x8] sm:$0xf0]  ;;  %v1664_v0 = vor.u32 %v1787_v50, %v1661_v51  ;;  %v1412_v1 = vor.u32 %v1726_v54, %v1411_v53 }
  0x47   : > { %929 = vmatpush.bf16.msra.mxu0 %v1324_v21  ;;  %v1295_v57 = vld [vmem:[%s1951_s8] sm:$0xf]  ;;  %v1751_v60 = vld [vmem:[%s1949_s7 + $0x1a4] sm:$0xf]  ;;  %v1517_v61 = vld [vmem:[%s1949_s7 + $0x1b0] sm:$0xf0]  ;;  %v1540_v5 = vor.u32 %v1758_v56, %v1539_v55 }
  0x48   : > { %943 = vmatpush.bf16.msra.mxu1 %v1452_v24  ;;  %971 = vmatpush.bf16.msra.mxu3 %v1328_v29  ;;  %v1783_v62 = vld [vmem:[%s1949_s7 + $0x2a4] sm:$0xf]  ;;  %v2039_v63 = vor.u32 %v1697_v58, %v1295_v57  ;;  %v1645_v2 = vld [vmem:[%s1949_s7 + $0x2b0] sm:$0xf0]  ;;  %v1395_v3 = vld [vmem:[%s1949_s7 + $0xa8] sm:$0xf]  ;;  %v1520_v13 = vor.u32 %v1751_v60, %v1517_v61 }
  0x49   : > { %957 = vmatpush.bf16.msra.mxu2 %v1580_v25  ;;  %v1722_v4 = vld [vmem:[%s1949_s7 + $0xb4] sm:$0xf0]  ;;  %v1523_v6 = vld [vmem:[%s1949_s7 + $0x1a8] sm:$0xf]  ;;  %v1696_v7 = vld [vmem:[%s1951_s8 + $0x4] sm:$0xf]  ;;  %v1648_v15 = vor.u32 %v1783_v62, %v1645_v2 }
  0x4a   : > { %v1297_v8 = vld [vmem:[%s1951_s8 + $0xc] sm:$0xf0]  ;;  %v1754_v9 = vld [vmem:[%s1949_s7 + $0x1b4] sm:$0xf0]  ;;  %v1303_v11 = vld [vmem:[%s1951_s8 + $0x8] sm:$0xf]  ;;  %v1396_v16 = vor.u32 %v1722_v4, %v1395_v3 }
  0x4b   : > { %930 = vmatpush.bf16.msra.mxu0 %v1308_v36  ;;  %v2049_v10 = vor.u32 %v1696_v7, %v1297_v8  ;;  %v1698_v12 = vld [vmem:[%s1951_s8 + $0x10] sm:$0xf0]  ;;  %v1747_v17 = vld [vmem:[%s1949_s7 + $0x184] sm:$0xf]  ;;  %v1524_v20 = vor.u32 %v1754_v9, %v1523_v6  ;;  %v1379_v22 = vld [vmem:[%s1949_s7 + $0x88] sm:$0xf] }
  0x4c   : > { %944 = vmatpush.bf16.msra.mxu1 %v1436_v40  ;;  %972 = vmatpush.bf16.msra.mxu3 %v1312_v44  ;;  %v2054_v14 = vor.u32 %v1698_v12, %v1303_v11  ;;  %v1501_v18 = vld [vmem:[%s1949_s7 + $0x190] sm:$0xf0]  ;;  %v1779_v19 = vld [vmem:[%s1949_s7 + $0x284] sm:$0xf]  ;;  %v1718_v23 = vld [vmem:[%s1949_s7 + $0x94] sm:$0xf0] }
  0x4d   : > { %958 = vmatpush.bf16.msra.mxu2 %v1564_v41  ;;  %v1629_v21 = vld [vmem:[%s1949_s7 + $0x290] sm:$0xf0]  ;;  %v1507_v24 = vld [vmem:[%s1949_s7 + $0x188] sm:$0xf]  ;;  %v1750_v25 = vld [vmem:[%s1949_s7 + $0x194] sm:$0xf0]  ;;  %v1504_v26 = vor.u32 %v1747_v17, %v1501_v18  ;;  %v1380_v28 = vor.u32 %v1718_v23, %v1379_v22 }
  0x4e   : > { %931 = vmatmul.bf16.vlgmr.msra.gmra.mxu0 %v2039_v63  ;;  %v1632_v27 = vor.u32 %v1779_v19, %v1629_v21  ;;  %v1743_v29 = vld [vmem:[%s1949_s7 + $0x164] sm:$0xf]  ;;  %v1485_v30 = vld [vmem:[%s1949_s7 + $0x170] sm:$0xf0]  ;;  %v1508_v32 = vor.u32 %v1750_v25, %v1507_v24  ;;  %v1363_v34 = vld [vmem:[%s1949_s7 + $0x68] sm:$0xf] }
  0x4f   : > { %979 = vmatpush.bf16.msrb.mxu0 %v1552_v45  ;;  %973 = vmatmul.bf16.vlgmr.msra.gmra.mxu3 %v2039_v63  ;;  %v1775_v31 = vld [vmem:[%s1949_s7 + $0x264] sm:$0xf]  ;;  %v1613_v33 = vld [vmem:[%s1949_s7 + $0x270] sm:$0xf0]  ;;  %v1714_v35 = vld [vmem:[%s1949_s7 + $0x74] sm:$0xf0]  ;;  %v1488_v38 = vor.u32 %v1743_v29, %v1485_v30 }
  0x50   : > { %993 = vmatpush.bf16.msrb.mxu1 %v1680_v47  ;;  %1021 = vmatpush.bf16.msrb.mxu3 %v1556_v52  ;;  %v1491_v36 = vld [vmem:[%s1949_s7 + $0x168] sm:$0xf]  ;;  %v1746_v37 = vld [vmem:[%s1949_s7 + $0x174] sm:$0xf0]  ;;  %v1616_v39 = vor.u32 %v1775_v31, %v1613_v33  ;;  %v1364_v40 = vor.u32 %v1714_v35, %v1363_v34  ;;  %v1739_v41 = vld [vmem:[%s1949_s7 + $0x144] sm:$0xf] }
  0x51   : > { %1007 = vmatpush.bf16.msrb.mxu2 %v1428_v48  ;;  %945 = vmatmul.bf16.vlgmr.msra.gmra.mxu1 %v2049_v10  ;;  %v1469_v42 = vld [vmem:[%s1949_s7 + $0x150] sm:$0xf0]  ;;  %v1771_v43 = vld [vmem:[%s1949_s7 + $0x244] sm:$0xf]  ;;  %v1492_v44 = vor.u32 %v1746_v37, %v1491_v36  ;;  %v1347_v46 = vld [vmem:[%s1949_s7 + $0x48] sm:$0xf] }
  0x52   : > { %959 = vmatmul.bf16.vlgmr.msra.gmra.mxu2 %v2054_v14  ;;  %v1597_v45 = vld [vmem:[%s1949_s7 + $0x250] sm:$0xf0]  ;;  %v1710_v47 = vld [vmem:[%s1949_s7 + $0x54] sm:$0xf0]  ;;  %v1475_v48 = vld [vmem:[%s1949_s7 + $0x148] sm:$0xf]  ;;  %v1472_v50 = vor.u32 %v1739_v41, %v1469_v42 }
  0x53   : > { %980 = vmatpush.bf16.msrb.mxu0 %v1536_v59  ;;  %v1742_v49 = vld [vmem:[%s1949_s7 + $0x154] sm:$0xf0]  ;;  %v1600_v51 = vor.u32 %v1771_v43, %v1597_v45  ;;  %v1348_v52 = vor.u32 %v1710_v47, %v1347_v46  ;;  %v1735_v53 = vld [vmem:[%s1949_s7 + $0x124] sm:$0xf]  ;;  %v1453_v54 = vld [vmem:[%s1949_s7 + $0x130] sm:$0xf0] }
  0x54   : > { %994 = vmatpush.bf16.msrb.mxu1 %v1664_v0  ;;  %1022 = vmatpush.bf16.msrb.mxu3 %v1540_v5  ;;  %v1767_v55 = vld [vmem:[%s1949_s7 + $0x224] sm:$0xf]  ;;  %v1476_v56 = vor.u32 %v1742_v49, %v1475_v48  ;;  %v1581_v57 = vld [vmem:[%s1949_s7 + $0x230] sm:$0xf0]  ;;  %v1331_v58 = vld [vmem:[%s1949_s7 + $0x28] sm:$0xf]  ;;  %v1456_v62 = vor.u32 %v1735_v53, %v1453_v54 }
  0x55   : > { %1008 = vmatpush.bf16.msrb.mxu2 %v1412_v1  ;;  %v1706_v59 = vld [vmem:[%s1949_s7 + $0x34] sm:$0xf0]  ;;  %v1459_v60 = vld [vmem:[%s1949_s7 + $0x128] sm:$0xf]  ;;  %v1731_v0 = vld [vmem:[%s1949_s7 + $0x104] sm:$0xf]  ;;  %v1584_v2 = vor.u32 %v1767_v55, %v1581_v57 }
  0x56   : > { %v1738_v61 = vld [vmem:[%s1949_s7 + $0x134] sm:$0xf0]  ;;  %v1437_v1 = vld [vmem:[%s1949_s7 + $0x110] sm:$0xf0]  ;;  %v1332_v3 = vor.u32 %v1706_v59, %v1331_v58  ;;  %v1763_v4 = vld [vmem:[%s1949_s7 + $0x204] sm:$0xf] }
  0x57   : > { %981 = vmatpush.bf16.msrb.mxu0 %v1520_v13  ;;  %v1565_v5 = vld [vmem:[%s1949_s7 + $0x210] sm:$0xf0]  ;;  %v1315_v6 = vld [vmem:[%s1949_s7 + $0x8] sm:$0xf]  ;;  %v1460_v7 = vor.u32 %v1738_v61, %v1459_v60  ;;  %v1702_v8 = vld [vmem:[%s1949_s7 + $0x14] sm:$0xf0] }
  0x58   : > { %995 = vmatpush.bf16.msrb.mxu1 %v1648_v15  ;;  %1023 = vmatpush.bf16.msrb.mxu3 %v1524_v20  ;;  %v1443_v9 = vld [vmem:[%s1949_s7 + $0x108] sm:$0xf]  ;;  %v1734_v11 = vld [vmem:[%s1949_s7 + $0x114] sm:$0xf0]  ;;  %v1728_v15 = vld [vmem:[%s1949_s7 + $0xec] sm:$0xf]  ;;  %v1568_v20 = vor.u32 %v1763_v4, %v1565_v5  ;;  %v1316_v21 = vor.u32 %v1702_v8, %v1315_v6 }
  0x59   : > { %1009 = vmatpush.bf16.msrb.mxu2 %v1396_v16  ;;  %v1683_v12 = vld [vmem:[%s1949_s7 + $0x2e8] sm:$0xf]  ;;  %v1794_v13 = vld [vmem:[%s1949_s7 + $0x2f4] sm:$0xf0]  ;;  %v1440_v16 = vor.u32 %v1731_v0, %v1437_v1  ;;  %v1429_v17 = vld [vmem:[%s1949_s7 + $0xf8] sm:$0xf0]  ;;  %v1444_v24 = vor.u32 %v1734_v11, %v1443_v9 }
  0x5a   : > { %v1760_v18 = vld [vmem:[%s1949_s7 + $0x1ec] sm:$0xf]  ;;  %v1557_v19 = vld [vmem:[%s1949_s7 + $0x1f8] sm:$0xf0]  ;;  %v1684_v25 = vor.u32 %v1794_v13, %v1683_v12  ;;  %v1790_v29 = vld [vmem:[%s1949_s7 + $0x2d4] sm:$0xf0] }
  0x5b   : > { %982 = vmatpush.bf16.msrb.mxu0 %v1504_v26  ;;  %v1792_v22 = vld [vmem:[%s1949_s7 + $0x2ec] sm:$0xf]  ;;  %v1685_v23 = vld [vmem:[%s1949_s7 + $0x2f8] sm:$0xf0]  ;;  %v1432_v26 = vor.u32 %v1728_v15, %v1429_v17  ;;  %v1786_v41 = vld [vmem:[%s1949_s7 + $0x2b4] sm:$0xf0] }
  0x5c   : > { %996 = vmatpush.bf16.msrb.mxu1 %v1632_v27  ;;  %1024 = vmatpush.bf16.msrb.mxu3 %v1508_v32  ;;  %v1560_v27 = vor.u32 %v1760_v18, %v1557_v19  ;;  %v1724_v30 = vld [vmem:[%s1949_s7 + $0xcc] sm:$0xf]  ;;  %v1688_v31 = vor.u32 %v1792_v22, %v1685_v23  ;;  %v1413_v32 = vld [vmem:[%s1949_s7 + $0xd8] sm:$0xf0]  ;;  %v1782_v53 = vld [vmem:[%s1949_s7 + $0x294] sm:$0xf0] }
  0x5d   : > { %1010 = vmatpush.bf16.msrb.mxu2 %v1380_v28  ;;  %v1667_v28 = vld [vmem:[%s1949_s7 + $0x2c8] sm:$0xf]  ;;  %v1756_v33 = vld [vmem:[%s1949_s7 + $0x1cc] sm:$0xf]  ;;  %v1541_v34 = vld [vmem:[%s1949_s7 + $0x1d8] sm:$0xf0] }
  0x5e   : > { %v1788_v35 = vld [vmem:[%s1949_s7 + $0x2cc] sm:$0xf]  ;;  %v1669_v36 = vld [vmem:[%s1949_s7 + $0x2d8] sm:$0xf0]  ;;  %v1668_v37 = vor.u32 %v1790_v29, %v1667_v28  ;;  %v1619_v1 = vld [vmem:[%s1949_s7 + $0x268] sm:$0xf] }
  0x5f   : > { %983 = vmatpush.bf16.msrb.mxu0 %v1488_v38  ;;  %v1416_v38 = vor.u32 %v1724_v30, %v1413_v32  ;;  %v1720_v42 = vld [vmem:[%s1949_s7 + $0xac] sm:$0xf]  ;;  %v1672_v43 = vor.u32 %v1788_v35, %v1669_v36  ;;  %v1525_v46 = vld [vmem:[%s1949_s7 + $0x1b8] sm:$0xf0]  ;;  %v1603_v15 = vld [vmem:[%s1949_s7 + $0x248] sm:$0xf] }
  0x60   : > { %997 = vmatpush.bf16.msrb.mxu1 %v1616_v39  ;;  %1025 = vmatpush.bf16.msrb.mxu3 %v1492_v44  ;;  %v1544_v39 = vor.u32 %v1756_v33, %v1541_v34  ;;  %v1397_v44 = vld [vmem:[%s1949_s7 + $0xb8] sm:$0xf0]  ;;  %v1752_v45 = vld [vmem:[%s1949_s7 + $0x1ac] sm:$0xf]  ;;  %v1770_v28 = vld [vmem:[%s1949_s7 + $0x234] sm:$0xf0] }
  0x61   : > { %1011 = vmatpush.bf16.msrb.mxu2 %v1364_v40  ;;  %v1651_v40 = vld [vmem:[%s1949_s7 + $0x2a8] sm:$0xf]  ;;  %v1784_v47 = vld [vmem:[%s1949_s7 + $0x2ac] sm:$0xf]  ;;  %v1653_v48 = vld [vmem:[%s1949_s7 + $0x2b8] sm:$0xf0] }
  0x62   : > { %v1652_v49 = vor.u32 %v1786_v41, %v1651_v40  ;;  %v1716_v54 = vld [vmem:[%s1949_s7 + $0x8c] sm:$0xf]  ;;  %v1656_v55 = vor.u32 %v1784_v47, %v1653_v48  ;;  %v1509_v58 = vld [vmem:[%s1949_s7 + $0x198] sm:$0xf0]  ;;  %v1766_v40 = vld [vmem:[%s1949_s7 + $0x214] sm:$0xf0] }
  0x63   : > { %984 = vmatpush.bf16.msrb.mxu0 %v1472_v50  ;;  %v1400_v50 = vor.u32 %v1720_v42, %v1397_v44  ;;  %v1748_v57 = vld [vmem:[%s1949_s7 + $0x18c] sm:$0xf]  ;;  %v1637_v60 = vld [vmem:[%s1949_s7 + $0x298] sm:$0xf0]  ;;  %p1689_p11 = scmp.ne.s32.totalorder %s1868_s14, 5 }
  0x64   : > { %998 = vmatpush.bf16.msrb.mxu1 %v1600_v51  ;;  %1026 = vmatpush.bf16.msrb.mxu3 %v1476_v56  ;;  %v1528_v51 = vor.u32 %v1752_v45, %v1525_v46  ;;  %v1381_v56 = vld [vmem:[%s1949_s7 + $0x98] sm:$0xf0]  ;;  %v1780_v59 = vld [vmem:[%s1949_s7 + $0x28c] sm:$0xf]  ;;  %v1512_v0 = vor.u32 %v1748_v57, %v1509_v58 }
  0x65   : > { %1012 = vmatpush.bf16.msrb.mxu2 %v1348_v52  ;;  %v1635_v52 = vld [vmem:[%s1949_s7 + $0x288] sm:$0xf]  ;;  %v1640_v4 = vor.u32 %v1780_v59, %v1637_v60  ;;  %v1365_v5 = vld [vmem:[%s1949_s7 + $0x78] sm:$0xf0]  ;;  %v1744_v6 = vld [vmem:[%s1949_s7 + $0x16c] sm:$0xf] }
  0x66   : > { %v1636_v61 = vor.u32 %v1782_v53, %v1635_v52  ;;  %v1776_v8 = vld [vmem:[%s1949_s7 + $0x26c] sm:$0xf]  ;;  %v1621_v9 = vld [vmem:[%s1949_s7 + $0x278] sm:$0xf0] }
  0x67   : > { %985 = vmatpush.bf16.msrb.mxu0 %v1456_v62  ;;  %v1384_v62 = vor.u32 %v1716_v54, %v1381_v56  ;;  %v1708_v17 = vld [vmem:[%s1949_s7 + $0x4c] sm:$0xf]  ;;  %v1624_v18 = vor.u32 %v1776_v8, %v1621_v9  ;;  %v1349_v19 = vld [vmem:[%s1949_s7 + $0x58] sm:$0xf0] }
  0x68   : > { %999 = vmatpush.bf16.msrb.mxu1 %v1584_v2  ;;  %1027 = vmatpush.bf16.msrb.mxu3 %v1460_v7  ;;  %v1778_v2 = vld [vmem:[%s1949_s7 + $0x274] sm:$0xf0]  ;;  %v1493_v7 = vld [vmem:[%s1949_s7 + $0x178] sm:$0xf0]  ;;  %v1772_v22 = vld [vmem:[%s1949_s7 + $0x24c] sm:$0xf] }
  0x69   : > { %1013 = vmatpush.bf16.msrb.mxu2 %v1332_v3  ;;  %v1712_v3 = vld [vmem:[%s1949_s7 + $0x6c] sm:$0xf]  ;;  %v1620_v11 = vor.u32 %v1778_v2, %v1619_v1  ;;  %v1496_v13 = vor.u32 %v1744_v6, %v1493_v7  ;;  %v1605_v23 = vld [vmem:[%s1949_s7 + $0x258] sm:$0xf0] }
  0x6a   : > { %v1368_v12 = vor.u32 %v1712_v3, %v1365_v5  ;;  %v1704_v29 = vld [vmem:[%s1949_s7 + $0x2c] sm:$0xf]  ;;  %v1608_v30 = vor.u32 %v1772_v22, %v1605_v23  ;;  %v1461_v33 = vld [vmem:[%s1949_s7 + $0x138] sm:$0xf0] }
  0x6b   : > { %986 = vmatpush.bf16.msrb.mxu0 %v1440_v16  ;;  %v1774_v16 = vld [vmem:[%s1949_s7 + $0x254] sm:$0xf0]  ;;  %v1736_v32 = vld [vmem:[%s1949_s7 + $0x12c] sm:$0xf]  ;;  %v1589_v35 = vld [vmem:[%s1949_s7 + $0x238] sm:$0xf0] }
  0x6c   : > { %1000 = vmatpush.bf16.msrb.mxu1 %v1568_v20  ;;  %1028 = vmatpush.bf16.msrb.mxu3 %v1444_v24  ;;  %v1740_v20 = vld [vmem:[%s1949_s7 + $0x14c] sm:$0xf]  ;;  %v1604_v24 = vor.u32 %v1774_v16, %v1603_v15  ;;  %v1445_v45 = vld [vmem:[%s1949_s7 + $0x118] sm:$0xf0] }
  0x6d   : > { %1014 = vmatpush.bf16.msrb.mxu2 %v1316_v21  ;;  %v1477_v21 = vld [vmem:[%s1949_s7 + $0x158] sm:$0xf0]  ;;  %v1768_v34 = vld [vmem:[%s1949_s7 + $0x22c] sm:$0xf] }
  0x6e   : > { %987 = vmatmul.bf16.vlgmr.msrb.gmra.mxu0 %v2049_v10  ;;  %v1700_v41 = vld [vmem:[%s1949_s7 + $0xc] sm:$0xf]  ;;  %v1592_v42 = vor.u32 %v1768_v34, %v1589_v35  ;;  %v1573_v47 = vld [vmem:[%s1949_s7 + $0x218] sm:$0xf0] }
  0x6f   : > { %1035 = vmatpush.bf16.msra.mxu0 %v1684_v25  ;;  %1001 = vmatmul.bf16.vlgmr.msrb.gmra.mxu1 %v2054_v14  ;;  %v1352_v25 = vor.u32 %v1708_v17, %v1349_v19  ;;  %v1732_v44 = vld [vmem:[%s1949_s7 + $0x10c] sm:$0xf] }
  0x70   : > { %1049 = vmatpush.bf16.msra.mxu1 %v1432_v26  ;;  %1077 = vmatpush.bf16.msra.mxu3 %v1688_v31  ;;  %v1480_v26 = vor.u32 %v1740_v20, %v1477_v21  ;;  %v1333_v31 = vld [vmem:[%s1949_s7 + $0x38] sm:$0xf0]  ;;  %v1764_v46 = vld [vmem:[%s1949_s7 + $0x20c] sm:$0xf] }
  0x71   : > { %1063 = vmatpush.bf16.msra.mxu2 %v1560_v27  ;;  %1029 = vmatmul.bf16.vlgmr.msrb.gmra.mxu3 %v2049_v10  ;;  %v1587_v27 = vld [vmem:[%s1949_s7 + $0x228] sm:$0xf]  ;;  %v321_v21 = vld [vmem:[#allocation2 + $0x18] sm:$0xff] }
  0x72   : > { %1015 = vmatmul.bf16.vlgmr.msrb.gmra.mxu2 %v2039_v63  ;;  %v1588_v36 = vor.u32 %v1770_v28, %v1587_v27 }
  0x73   : > { %1036 = vmatpush.bf16.msra.mxu0 %v1668_v37  ;;  %v1336_v37 = vor.u32 %v1704_v29, %v1333_v31 }
  0x74   : > { %1050 = vmatpush.bf16.msra.mxu1 %v1416_v38  ;;  %1078 = vmatpush.bf16.msra.mxu3 %v1672_v43  ;;  %v1464_v38 = vor.u32 %v1736_v32, %v1461_v33  ;;  %v1317_v43 = vld [vmem:[%s1949_s7 + $0x18] sm:$0xf0]  ;;  %v322_v32 = vld [vmem:[#allocation2 + $0x10] sm:$0xff] }
  0x75   : > { %1064 = vmatpush.bf16.msra.mxu2 %v1544_v39  ;;  %v1571_v39 = vld [vmem:[%s1949_s7 + $0x208] sm:$0xf] }
  0x76   : > { %v1572_v48 = vor.u32 %v1766_v40, %v1571_v39  ;;  %v326_v40 = vld [vmem:[#allocation2 + $0x38] sm:$0xff] }
  0x77   : > { %1037 = vmatpush.bf16.msra.mxu0 %v1652_v49  ;;  %v1320_v49 = vor.u32 %v1700_v41, %v1317_v43 }
  0x78   : > { %1051 = vmatpush.bf16.msra.mxu1 %v1400_v50  ;;  %1079 = vmatpush.bf16.msra.mxu3 %v1656_v55  ;;  %v1448_v50 = vor.u32 %v1732_v44, %v1445_v45  ;;  %v319_v55 = vld [vmem:[#allocation2 + $0x30] sm:$0xff] }
  0x79   : > { %1065 = vmatpush.bf16.msra.mxu2 %v1528_v51  ;;  %v1576_v51 = vor.u32 %v1764_v46, %v1573_v47 }
  0x7b   : > { %1038 = vmatpush.bf16.msra.mxu0 %v1636_v61 }
  0x7c   : > { %1052 = vmatpush.bf16.msra.mxu1 %v1384_v62  ;;  %1080 = vmatpush.bf16.msra.mxu3 %v1640_v4  ;;  %v323_v62 = vld [vmem:[#allocation2 + $0x8] sm:$0xff]  ;;  %v320_v4 = vld [vmem:[#allocation2] sm:$0xff] }
  0x7d   : > { %1066 = vmatpush.bf16.msra.mxu2 %v1512_v0 }
  0x7f   : > { %1039 = vmatpush.bf16.msra.mxu0 %v1620_v11 }
  0x80   : > { %1053 = vmatpush.bf16.msra.mxu1 %v1368_v12  ;;  %1081 = vmatpush.bf16.msra.mxu3 %v1624_v18  ;;  %v324_v12 = vld [vmem:[#allocation2 + $0x20] sm:$0xff] }
  0x81   : > { %1067 = vmatpush.bf16.msra.mxu2 %v1496_v13 }
  0x83   : > { %1040 = vmatpush.bf16.msra.mxu0 %v1604_v24 }
  0x84   : > { %1054 = vmatpush.bf16.msra.mxu1 %v1352_v25  ;;  %1082 = vmatpush.bf16.msra.mxu3 %v1608_v30  ;;  %v325_v30 = vld [vmem:[#allocation2 + $0x28] sm:$0xff] }
  0x85   : > { %1068 = vmatpush.bf16.msra.mxu2 %v1480_v26 }
  0x87   : > { %1041 = vmatpush.bf16.msra.mxu0 %v1588_v36 }
  0x88   : > { %1055 = vmatpush.bf16.msra.mxu1 %v1336_v37  ;;  %1083 = vmatpush.bf16.msra.mxu3 %v1592_v42 }
  0x89   : > { %1069 = vmatpush.bf16.msra.mxu2 %v1464_v38 }
  0x8b   : > { %1042 = vmatpush.bf16.msra.mxu0 %v1572_v48 }
  0x8c   : > { %1056 = vmatpush.bf16.msra.mxu1 %v1320_v49  ;;  %1084 = vmatpush.bf16.msra.mxu3 %v1576_v51 }
  0x8d   : > { %1070 = vmatpush.bf16.msra.mxu2 %v1448_v50 }
  0x8e   : > { %1043 = vmatmul.bf16.vlgmr.msra.gmra.mxu0 %v2054_v14 }
  0x8f   : > { %1057 = vmatmul.bf16.vlgmr.msra.gmra.mxu1 %v2039_v63  ;;  %1085 = vmatmul.bf16.vlgmr.msra.gmra.mxu3 %v2054_v14 }
  0x90   : > { %1071 = vmatmul.bf16.vlgmr.msra.gmra.mxu2 %v2049_v10 }
  0xcb   : > { %v932_v52 = vpop.f32.mrf.mxu0 }
  0xce   : > { %v946_v53 = vpop.f32.mrf.mxu1 }
  0xcf   : > { %v947_v54 = vadd.f32 %v946_v53, %v932_v52 }
  0xd2   : > { %v974_v63 = vpop.f32.mrf.mxu3 }
  0xd3   : > { %v934_v59 = vpop.f32.mrf.mxu0 }
  0xd5   : > { %v960_v56 = vpop.f32.mrf.mxu2 }
  0xd6   : > { %v961_v57 = vadd.f32 %v960_v56, %v947_v54  ;;  %v948_v60 = vpop.f32.mrf.mxu1 }
  0xd7   : > { %v949_v61 = vadd.f32 %v948_v60, %v934_v59 }
  0xd8   : > { %v1091_v58 = vadd.f32 %v961_v57, %v319_v55 }
  0xda   : > { %1099 = vst [vmem:[#allocation2 + $0x30] sm:$0xff] %v1091_v58  ;;  %v976_v7 = vpop.f32.mrf.mxu3 }
  0xdd   : > { %v962_v0 = vpop.f32.mrf.mxu2 }
  0xde   : > { %v963_v1 = vadd.f32 %v962_v0, %v949_v61 }
  0xe0   : > { %v1095_v2 = vadd.f32 %v963_v1, %v323_v62 }
  0xe2   : > { %1103 = vst [vmem:[#allocation2 + $0x8] sm:$0xff] %v1095_v2 }
  0xeb   : > { %v988_v10 = vpop.f32.mrf.mxu0 }
  0xec   : > { %v989_v3 = vadd.f32 %v988_v10, %v974_v63  ;;  %v1002_v14 = vpop.f32.mrf.mxu1 }
  0xee   : > { %v1003_v5 = vadd.f32 %v1002_v14, %v989_v3 }
  0xf0   : > { %v1092_v6 = vadd.f32 %v1003_v5, %v320_v4 }
  0xf2   : > { %1100 = vst [vmem:[#allocation2] sm:$0xff] %v1092_v6 }
  0xf3   : > { %v990_v8 = vpop.f32.mrf.mxu0 }
  0xf4   : > { %v991_v9 = vadd.f32 %v990_v8, %v976_v7  ;;  %v1004_v11 = vpop.f32.mrf.mxu1  ;;  %v1030_v17 = vpop.f32.mrf.mxu3 }
  0xf5   : > { %v1016_v16 = vpop.f32.mrf.mxu2 }
  0xf6   : > { %v1005_v13 = vadd.f32 %v1004_v11, %v991_v9  ;;  %v1031_v18 = vadd.f32 %v1030_v17, %v1016_v16 }
  0xf8   : > { %v1096_v15 = vadd.f32 %v1005_v13, %v324_v12 }
  0xfa   : > { %1104 = vst [vmem:[#allocation2 + $0x20] sm:$0xff] %v1096_v15 }
  0xfc   : > { %v1032_v20 = vpop.f32.mrf.mxu3 }
  0xfd   : > { %v1018_v19 = vpop.f32.mrf.mxu2 }
  0xfe   : > { %v1033_v26 = vadd.f32 %v1032_v20, %v1018_v19 }
 0x10b   : > { %v1044_v22 = vpop.f32.mrf.mxu0 }
 0x10c   : > { %v1045_v23 = vadd.f32 %v1044_v22, %v1031_v18  ;;  %v1058_v25 = vpop.f32.mrf.mxu1 }
 0x10e   : > { %v1093_v24 = vadd.f32 %v1045_v23, %v321_v21 }
 0x110   : > { %1101 = vst [vmem:[#allocation2 + $0x18] sm:$0xff] %v1093_v24 }
 0x112   : > { %v1086_v29 = vpop.f32.mrf.mxu3 }
 0x113   : > { %v1072_v27 = vpop.f32.mrf.mxu2  ;;  %v1046_v31 = vpop.f32.mrf.mxu0 }
 0x114   : > { %v1073_v28 = vadd.f32 %v1072_v27, %v1058_v25  ;;  %v1047_v33 = vadd.f32 %v1046_v31, %v1033_v26  ;;  %v1060_v37 = vpop.f32.mrf.mxu1 }
 0x116   : > { %v1087_v34 = vadd.f32 %v1086_v29, %v1073_v28  ;;  %v1097_v35 = vadd.f32 %v1047_v33, %v325_v30 }
 0x118   : > { %v1094_v36 = vadd.f32 %v1087_v34, %v322_v32  ;;  %1105 = vst [vmem:[#allocation2 + $0x28] sm:$0xff] %v1097_v35 }
 0x11a   : > { %1102 = vst [vmem:[#allocation2 + $0x10] sm:$0xff] %v1094_v36  ;;  %v1088_v41 = vpop.f32.mrf.mxu3 }
 0x11b   : > { %v1074_v38 = vpop.f32.mrf.mxu2 }
 0x11c   : > { %v1075_v39 = vadd.f32 %v1074_v38, %v1060_v37 }
 0x11e   : > { %v1089_v42 = vadd.f32 %v1088_v41, %v1075_v39  ;;  %1110 = sbr.rel (%p1689_p11) target bundleno = 305 (0x131), region = 66 }
 0x120   : > { %v1098_v43 = vadd.f32 %v1089_v42, %v326_v40 }
 0x122   : > { %1106 = vst [vmem:[#allocation2 + $0x38] sm:$0xff] %v1098_v43 }
 0x123   : > { %v1111_v44 = vld [vmem:[#allocation2 + $0x30] sm:$0xff]  ;;  %v1112_v45 = vld [vmem:[#allocation2] sm:$0xff]  ;;  %v1113_v49 = vld [vmem:[#allocation2 + $0x18] sm:$0xff] }
 0x124   : > { %v1119_v46 = vld [vmem:[%s2203_s2] sm:$0xf]  ;;  %v1114_v50 = vld [vmem:[#allocation2 + $0x10] sm:$0xff]  ;;  %v1115_v53 = vld [vmem:[#allocation2 + $0x8] sm:$0xff] }
 0x125   : > { %v1121_v47 = vperm.slane %v1119_v46, 0  ;;  %v1122_v48 = vperm.slane %v1119_v46, 1  ;;  %v1123_v51 = vperm.slane %v1119_v46, 2  ;;  %v1124_v52 = vperm.slane %v1119_v46, 3  ;;  %v1116_v54 = vld [vmem:[#allocation2 + $0x20] sm:$0xff]  ;;  %v1117_v55 = vld [vmem:[#allocation2 + $0x28] sm:$0xff] }
 0x127   : > { %v1129_v56 = vadd.f32 %v1121_v47, %v1111_v44  ;;  %v1130_v57 = vadd.f32 %v1122_v48, %v1112_v45  ;;  %v1131_v58 = vadd.f32 %v1123_v51, %v1113_v49  ;;  %v1132_v59 = vadd.f32 %v1124_v52, %v1114_v50 }
 0x128   : > { %v1133_v61 = vadd.f32 %v1121_v47, %v1115_v53  ;;  %v1134_v62 = vadd.f32 %v1122_v48, %v1116_v54  ;;  %v1135_v0 = vadd.f32 %v1123_v51, %v1117_v55 }
 0x129   : > { %v1118_v60 = vld [vmem:[#allocation2 + $0x38] sm:$0xff]  ;;  %v1137_v2 = vmax.f32 %v1129_v56, 0.0  ;;  %v1138_v63 = vmax.f32 %v1130_v57, 0.0  ;;  %v1139_v10 = vmax.f32 %v1131_v58, 0.0  ;;  %v1140_v3 = vmax.f32 %v1132_v59, 0.0 }
 0x12a   : > { %v1136_v1 = vadd.f32 %v1124_v52, %v1118_v60  ;;  %v1141_v14 = vmax.f32 %v1133_v61, 0.0  ;;  %v1142_v4 = vmax.f32 %v1134_v62, 0.0  ;;  %v1143_v5 = vmax.f32 %v1135_v0, 0.0 }
 0x12b   : > { %v1145_v7 = vpack.c.bf16 %v1138_v63, %v1137_v2  ;;  %v1146_v8 = vpack.c.bf16 %v1140_v3, %v1139_v10 }
 0x12c   : > { %v1144_v6 = vmax.f32 %v1136_v1, 0.0  ;;  %v1147_v9 = vpack.c.bf16 %v1142_v4, %v1141_v14 }
 0x12d   : > { %1149 = vst [vmem:[%s2204_s3] sm:$0xff] %v1145_v7 }
 0x12e   : > { %v1148_v11 = vpack.c.bf16 %v1144_v6, %v1143_v5  ;;  %1150 = vst [vmem:[%s2204_s3 + $0x8] sm:$0xff] %v1146_v8 }
 0x12f   : > { %1151 = vst [vmem:[%s2204_s3 + $0x10] sm:$0xff] %v1147_v9 }
 0x130   : > { %1152 = vst [vmem:[%s2204_s3 + $0x18] sm:$0xff] %v1148_v11 }
 0x131 PF: > { %s13_s16 = sadd.s32 1, %s1876_s16   ;;  %s2205_s12 = smov %s1864_s13 }
 0x132   : > { %p10_p12 = scmp.ge.s32.totalorder %s13_s16, 8   ;;  %s2206_s13 = smov %s1934_s20 }
 0x133   : > { %s2207_s14 = smov %s1872_s15  ;;  %s2208_s15 = smov %s2210_s17 }
 0x134   :  { %12 = sbr.rel (!%p10_p12) target bundleno = 3 (0x3), region = 113 }

// kernel: se_resnet18_forward.36
= control target key start
LH: loop header
LB: loop body
LE: loop exit
PB: predicated region body
PF: predicated region fallthrough
CT: control target
= control target key end

     0   :  { %s1372_s1 = inlined_call_operand.vmem [shape: bf16[256,512], index: 1, kind: input, shape index: {}]   ;;  %s1373_s0 = inlined_call_operand.vmem [shape: bf16[16,256], index: 0, kind: input, shape index: {}]   ;;  %s1374_s2 = inlined_call_operand.vmem [shape: f32[1,512], index: 2, kind: input, shape index: {}]   ;;  %s1375_s3 = inlined_call_operand.vmem [shape: bf16[16,512], index: 3, kind: output, shape index: {}]  }
   0x1   :  { %v721_v0 = vld [vmem:[%s1372_s1 + $0xe0] sm:$0xf]  ;;  %v895_v1 = vld [vmem:[%s1372_s1 + $0xec] sm:$0xf0]  ;;  %v893_v5 = vld [vmem:[%s1372_s1 + $0xe4] sm:$0xf] }
   0x2   :  { %v849_v2 = vld [vmem:[%s1372_s1 + $0x1e0] sm:$0xf]  ;;  %v722_v3 = vor.u32 %v895_v1, %v721_v0  ;;  %v927_v4 = vld [vmem:[%s1372_s1 + $0x1ec] sm:$0xf0]  ;;  %v723_v6 = vld [vmem:[%s1372_s1 + $0xf0] sm:$0xf0] }
   0x3   :  { %v850_v7 = vor.u32 %v927_v4, %v849_v2  ;;  %v726_v8 = vor.u32 %v893_v5, %v723_v6  ;;  %v925_v9 = vld [vmem:[%s1372_s1 + $0x1e4] sm:$0xf]  ;;  %v851_v10 = vld [vmem:[%s1372_s1 + $0x1f0] sm:$0xf0]  ;;  %v705_v11 = vld [vmem:[%s1372_s1 + $0xc0] sm:$0xf] }
   0x4   :  { %430 = vmatpush.bf16.msra.mxu0 %v722_v3  ;;  %v854_v12 = vor.u32 %v925_v9, %v851_v10  ;;  %v891_v13 = vld [vmem:[%s1372_s1 + $0xcc] sm:$0xf0]  ;;  %v833_v14 = vld [vmem:[%s1372_s1 + $0x1c0] sm:$0xf]  ;;  %v889_v18 = vld [vmem:[%s1372_s1 + $0xc4] sm:$0xf] }
   0x5   :  { %v923_v15 = vld [vmem:[%s1372_s1 + $0x1cc] sm:$0xf0]  ;;  %444 = vmatpush.bf16.msra.mxu1 %v850_v7  ;;  %458 = vmatpush.bf16.msra.mxu2 %v726_v8  ;;  %v706_v16 = vor.u32 %v891_v13, %v705_v11  ;;  %v707_v19 = vld [vmem:[%s1372_s1 + $0xd0] sm:$0xf0]  ;;  %v921_v20 = vld [vmem:[%s1372_s1 + $0x1c4] sm:$0xf] }
   0x6   :  { %v834_v17 = vor.u32 %v923_v15, %v833_v14  ;;  %472 = vmatpush.bf16.msra.mxu3 %v854_v12  ;;  %v710_v21 = vor.u32 %v889_v18, %v707_v19  ;;  %v835_v22 = vld [vmem:[%s1372_s1 + $0x1d0] sm:$0xf0]  ;;  %v689_v23 = vld [vmem:[%s1372_s1 + $0xa0] sm:$0xf]  ;;  %v887_v24 = vld [vmem:[%s1372_s1 + $0xac] sm:$0xf0] }
   0x7   :  { %v838_v25 = vor.u32 %v921_v20, %v835_v22  ;;  %v817_v26 = vld [vmem:[%s1372_s1 + $0x1a0] sm:$0xf]  ;;  %v919_v27 = vld [vmem:[%s1372_s1 + $0x1ac] sm:$0xf0]  ;;  %v885_v28 = vld [vmem:[%s1372_s1 + $0xa4] sm:$0xf]  ;;  %v690_v29 = vor.u32 %v887_v24, %v689_v23 }
   0x8   :  { %431 = vmatpush.bf16.msra.mxu0 %v706_v16  ;;  %v691_v30 = vld [vmem:[%s1372_s1 + $0xb0] sm:$0xf0]  ;;  %v917_v31 = vld [vmem:[%s1372_s1 + $0x1a4] sm:$0xf]  ;;  %v818_v33 = vor.u32 %v919_v27, %v817_v26  ;;  %v673_v35 = vld [vmem:[%s1372_s1 + $0x80] sm:$0xf] }
   0x9   :  { %v819_v32 = vld [vmem:[%s1372_s1 + $0x1b0] sm:$0xf0]  ;;  %445 = vmatpush.bf16.msra.mxu1 %v834_v17  ;;  %459 = vmatpush.bf16.msra.mxu2 %v710_v21  ;;  %v694_v34 = vor.u32 %v885_v28, %v691_v30  ;;  %v883_v36 = vld [vmem:[%s1372_s1 + $0x8c] sm:$0xf0]  ;;  %v801_v37 = vld [vmem:[%s1372_s1 + $0x180] sm:$0xf] }
   0xa   :  { %473 = vmatpush.bf16.msra.mxu3 %v838_v25  ;;  %v822_v38 = vor.u32 %v917_v31, %v819_v32  ;;  %v915_v39 = vld [vmem:[%s1372_s1 + $0x18c] sm:$0xf0]  ;;  %v881_v40 = vld [vmem:[%s1372_s1 + $0x84] sm:$0xf]  ;;  %v675_v41 = vld [vmem:[%s1372_s1 + $0x90] sm:$0xf0]  ;;  %v674_v44 = vor.u32 %v883_v36, %v673_v35 }
   0xb   :  { %v913_v42 = vld [vmem:[%s1372_s1 + $0x184] sm:$0xf]  ;;  %v803_v43 = vld [vmem:[%s1372_s1 + $0x190] sm:$0xf0]  ;;  %v802_v45 = vor.u32 %v915_v39, %v801_v37  ;;  %v678_v46 = vor.u32 %v881_v40, %v675_v41  ;;  %v657_v47 = vld [vmem:[%s1372_s1 + $0x60] sm:$0xf] }
   0xc   :  { %432 = vmatpush.bf16.msra.mxu0 %v690_v29  ;;  %v879_v48 = vld [vmem:[%s1372_s1 + $0x6c] sm:$0xf0]  ;;  %v785_v49 = vld [vmem:[%s1372_s1 + $0x160] sm:$0xf]  ;;  %v806_v50 = vor.u32 %v913_v42, %v803_v43  ;;  %v877_v52 = vld [vmem:[%s1372_s1 + $0x64] sm:$0xf] }
   0xd   :  { %446 = vmatpush.bf16.msra.mxu1 %v818_v33  ;;  %460 = vmatpush.bf16.msra.mxu2 %v694_v34  ;;  %v911_v51 = vld [vmem:[%s1372_s1 + $0x16c] sm:$0xf0]  ;;  %v659_v53 = vld [vmem:[%s1372_s1 + $0x70] sm:$0xf0]  ;;  %v909_v54 = vld [vmem:[%s1372_s1 + $0x164] sm:$0xf]  ;;  %v658_v56 = vor.u32 %v879_v48, %v657_v47 }
   0xe   :  { %474 = vmatpush.bf16.msra.mxu3 %v822_v38  ;;  %v787_v55 = vld [vmem:[%s1372_s1 + $0x170] sm:$0xf0]  ;;  %v786_v57 = vor.u32 %v911_v51, %v785_v49  ;;  %v662_v58 = vor.u32 %v877_v52, %v659_v53  ;;  %v641_v59 = vld [vmem:[%s1372_s1 + $0x40] sm:$0xf]  ;;  %v875_v60 = vld [vmem:[%s1372_s1 + $0x4c] sm:$0xf0] }
   0xf   :  { %v769_v61 = vld [vmem:[%s1372_s1 + $0x140] sm:$0xf]  ;;  %v790_v62 = vor.u32 %v909_v54, %v787_v55  ;;  %v907_v63 = vld [vmem:[%s1372_s1 + $0x14c] sm:$0xf0]  ;;  %v873_v0 = vld [vmem:[%s1372_s1 + $0x44] sm:$0xf]  ;;  %v642_v4 = vor.u32 %v875_v60, %v641_v59 }
  0x10   :  { %433 = vmatpush.bf16.msra.mxu0 %v674_v44  ;;  %v643_v1 = vld [vmem:[%s1372_s1 + $0x50] sm:$0xf0]  ;;  %v905_v2 = vld [vmem:[%s1372_s1 + $0x144] sm:$0xf]  ;;  %v770_v5 = vor.u32 %v907_v63, %v769_v61  ;;  %v625_v7 = vld [vmem:[%s1372_s1 + $0x20] sm:$0xf] }
  0x11   :  { %447 = vmatpush.bf16.msra.mxu1 %v802_v45  ;;  %461 = vmatpush.bf16.msra.mxu2 %v678_v46  ;;  %v771_v3 = vld [vmem:[%s1372_s1 + $0x150] sm:$0xf0]  ;;  %v646_v6 = vor.u32 %v873_v0, %v643_v1  ;;  %v871_v8 = vld [vmem:[%s1372_s1 + $0x2c] sm:$0xf0]  ;;  %v753_v9 = vld [vmem:[%s1372_s1 + $0x120] sm:$0xf] }
  0x12   :  { %475 = vmatpush.bf16.msra.mxu3 %v806_v50  ;;  %v774_v10 = vor.u32 %v905_v2, %v771_v3  ;;  %v903_v11 = vld [vmem:[%s1372_s1 + $0x12c] sm:$0xf0]  ;;  %v869_v12 = vld [vmem:[%s1372_s1 + $0x24] sm:$0xf]  ;;  %v627_v13 = vld [vmem:[%s1372_s1 + $0x30] sm:$0xf0]  ;;  %v626_v16 = vor.u32 %v871_v8, %v625_v7 }
  0x13   :  { %v901_v14 = vld [vmem:[%s1372_s1 + $0x124] sm:$0xf]  ;;  %v755_v15 = vld [vmem:[%s1372_s1 + $0x130] sm:$0xf0]  ;;  %v609_v17 = vld [vmem:[%s1372_s1] sm:$0xf]  ;;  %v754_v20 = vor.u32 %v903_v11, %v753_v9  ;;  %v630_v21 = vor.u32 %v869_v12, %v627_v13 }
  0x14   :  { %434 = vmatpush.bf16.msra.mxu0 %v658_v56  ;;  %v867_v18 = vld [vmem:[%s1372_s1 + $0xc] sm:$0xf0]  ;;  %v737_v19 = vld [vmem:[%s1372_s1 + $0x100] sm:$0xf]  ;;  %v865_v23 = vld [vmem:[%s1372_s1 + $0x4] sm:$0xf]  ;;  %v758_v25 = vor.u32 %v901_v14, %v755_v15 }
  0x15   :  { %448 = vmatpush.bf16.msra.mxu1 %v786_v57  ;;  %462 = vmatpush.bf16.msra.mxu2 %v662_v58  ;;  %v899_v22 = vld [vmem:[%s1372_s1 + $0x10c] sm:$0xf0]  ;;  %v611_v24 = vld [vmem:[%s1372_s1 + $0x10] sm:$0xf0]  ;;  %v897_v26 = vld [vmem:[%s1372_s1 + $0x104] sm:$0xf]  ;;  %v610_v32 = vor.u32 %v867_v18, %v609_v17 }
  0x16   :  { %476 = vmatpush.bf16.msra.mxu3 %v790_v62  ;;  %v739_v27 = vld [vmem:[%s1372_s1 + $0x110] sm:$0xf0]  ;;  %v729_v28 = vld [vmem:[%s1372_s1 + $0xe8] sm:$0xf]  ;;  %v896_v29 = vld [vmem:[%s1372_s1 + $0xf4] sm:$0xf0]  ;;  %v738_v36 = vor.u32 %v899_v22, %v737_v19  ;;  %v614_v37 = vor.u32 %v865_v23, %v611_v24 }
  0x17   :  { %v857_v30 = vld [vmem:[%s1372_s1 + $0x1e8] sm:$0xf]  ;;  %v928_v31 = vld [vmem:[%s1372_s1 + $0x1f4] sm:$0xf0]  ;;  %v894_v33 = vld [vmem:[%s1372_s1 + $0xec] sm:$0xf]  ;;  %v742_v41 = vor.u32 %v897_v26, %v739_v27  ;;  %v730_v42 = vor.u32 %v896_v29, %v729_v28 }
  0x18   :  { %435 = vmatpush.bf16.msra.mxu0 %v642_v4  ;;  %v731_v34 = vld [vmem:[%s1372_s1 + $0xf8] sm:$0xf0]  ;;  %v926_v35 = vld [vmem:[%s1372_s1 + $0x1ec] sm:$0xf]  ;;  %v601_v39 = vld [vmem:[%s1373_s0] sm:$0xf]  ;;  %v858_v45 = vor.u32 %v928_v31, %v857_v30 }
  0x19   :  { %449 = vmatpush.bf16.msra.mxu1 %v770_v5  ;;  %463 = vmatpush.bf16.msra.mxu2 %v646_v6  ;;  %v859_v38 = vld [vmem:[%s1372_s1 + $0x1f8] sm:$0xf0]  ;;  %v864_v40 = vld [vmem:[%s1373_s0 + $0x4] sm:$0xf0]  ;;  %v863_v43 = vld [vmem:[%s1373_s0 + $0x4] sm:$0xf]  ;;  %v734_v46 = vor.u32 %v894_v33, %v731_v34 }
  0x1a   :  { %477 = vmatpush.bf16.msra.mxu3 %v774_v10  ;;  %v603_v44 = vld [vmem:[%s1373_s0 + $0x8] sm:$0xf0]  ;;  %v713_v47 = vld [vmem:[%s1372_s1 + $0xc8] sm:$0xf]  ;;  %v892_v48 = vld [vmem:[%s1372_s1 + $0xd4] sm:$0xf0]  ;;  %v862_v50 = vor.u32 %v926_v35, %v859_v38  ;;  %v1195_v54 = vor.u32 %v864_v40, %v601_v39 }
  0x1b   :  { %v841_v49 = vld [vmem:[%s1372_s1 + $0x1c8] sm:$0xf]  ;;  %v924_v51 = vld [vmem:[%s1372_s1 + $0x1d4] sm:$0xf0]  ;;  %v890_v52 = vld [vmem:[%s1372_s1 + $0xcc] sm:$0xf]  ;;  %v1203_v57 = vor.u32 %v863_v43, %v603_v44  ;;  %v714_v58 = vor.u32 %v892_v48, %v713_v47 }
  0x1c   :  { %436 = vmatpush.bf16.msra.mxu0 %v626_v16  ;;  %v715_v53 = vld [vmem:[%s1372_s1 + $0xd8] sm:$0xf0]  ;;  %v922_v55 = vld [vmem:[%s1372_s1 + $0x1cc] sm:$0xf]  ;;  %v842_v59 = vor.u32 %v924_v51, %v841_v49  ;;  %v697_v61 = vld [vmem:[%s1372_s1 + $0xa8] sm:$0xf] }
  0x1d   :  { %450 = vmatpush.bf16.msra.mxu1 %v754_v20  ;;  %464 = vmatpush.bf16.msra.mxu2 %v630_v21  ;;  %v843_v56 = vld [vmem:[%s1372_s1 + $0x1d8] sm:$0xf0]  ;;  %v718_v60 = vor.u32 %v890_v52, %v715_v53  ;;  %v888_v62 = vld [vmem:[%s1372_s1 + $0xb4] sm:$0xf0]  ;;  %v825_v63 = vld [vmem:[%s1372_s1 + $0x1a8] sm:$0xf] }
  0x1e   :  { %478 = vmatpush.bf16.msra.mxu3 %v758_v25  ;;  %v846_v0 = vor.u32 %v922_v55, %v843_v56  ;;  %v920_v1 = vld [vmem:[%s1372_s1 + $0x1b4] sm:$0xf0]  ;;  %v886_v2 = vld [vmem:[%s1372_s1 + $0xac] sm:$0xf]  ;;  %v699_v3 = vld [vmem:[%s1372_s1 + $0xb8] sm:$0xf0]  ;;  %v698_v6 = vor.u32 %v888_v62, %v697_v61 }
  0x1f   :  { %v918_v4 = vld [vmem:[%s1372_s1 + $0x1ac] sm:$0xf]  ;;  %v827_v5 = vld [vmem:[%s1372_s1 + $0x1b8] sm:$0xf0]  ;;  %v826_v7 = vor.u32 %v920_v1, %v825_v63  ;;  %v702_v8 = vor.u32 %v886_v2, %v699_v3  ;;  %v681_v9 = vld [vmem:[%s1372_s1 + $0x88] sm:$0xf] }
  0x20   :  { %437 = vmatpush.bf16.msra.mxu0 %v610_v32  ;;  %v884_v10 = vld [vmem:[%s1372_s1 + $0x94] sm:$0xf0]  ;;  %v809_v11 = vld [vmem:[%s1372_s1 + $0x188] sm:$0xf]  ;;  %v830_v12 = vor.u32 %v918_v4, %v827_v5  ;;  %v882_v14 = vld [vmem:[%s1372_s1 + $0x8c] sm:$0xf] }
  0x21   :  { %451 = vmatpush.bf16.msra.mxu1 %v738_v36  ;;  %465 = vmatpush.bf16.msra.mxu2 %v614_v37  ;;  %v916_v13 = vld [vmem:[%s1372_s1 + $0x194] sm:$0xf0]  ;;  %v683_v15 = vld [vmem:[%s1372_s1 + $0x98] sm:$0xf0]  ;;  %v914_v16 = vld [vmem:[%s1372_s1 + $0x18c] sm:$0xf]  ;;  %v682_v18 = vor.u32 %v884_v10, %v681_v9 }
  0x22   :  { %479 = vmatpush.bf16.msra.mxu3 %v742_v41  ;;  %v811_v17 = vld [vmem:[%s1372_s1 + $0x198] sm:$0xf0]  ;;  %v810_v19 = vor.u32 %v916_v13, %v809_v11  ;;  %v686_v20 = vor.u32 %v882_v14, %v683_v15  ;;  %v665_v21 = vld [vmem:[%s1372_s1 + $0x68] sm:$0xf]  ;;  %v880_v22 = vld [vmem:[%s1372_s1 + $0x74] sm:$0xf0] }
  0x23   :  { %438 = vmatmul.bf16.vlgmr.msra.gmra.mxu0 %v1195_v54  ;;  %v793_v23 = vld [vmem:[%s1372_s1 + $0x168] sm:$0xf]  ;;  %v814_v24 = vor.u32 %v914_v16, %v811_v17  ;;  %v912_v25 = vld [vmem:[%s1372_s1 + $0x174] sm:$0xf0]  ;;  %v878_v26 = vld [vmem:[%s1372_s1 + $0x6c] sm:$0xf]  ;;  %v666_v30 = vor.u32 %v880_v22, %v665_v21 }
  0x24   :  { %486 = vmatpush.bf16.msrb.mxu0 %v730_v42  ;;  %466 = vmatmul.bf16.vlgmr.msra.gmra.mxu2 %v1195_v54  ;;  %v667_v27 = vld [vmem:[%s1372_s1 + $0x78] sm:$0xf0]  ;;  %v910_v28 = vld [vmem:[%s1372_s1 + $0x16c] sm:$0xf]  ;;  %v794_v31 = vor.u32 %v912_v25, %v793_v23  ;;  %v649_v33 = vld [vmem:[%s1372_s1 + $0x48] sm:$0xf] }
  0x25   :  { %500 = vmatpush.bf16.msrb.mxu1 %v858_v45  ;;  %514 = vmatpush.bf16.msrb.mxu2 %v734_v46  ;;  %v795_v29 = vld [vmem:[%s1372_s1 + $0x178] sm:$0xf0]  ;;  %v670_v32 = vor.u32 %v878_v26, %v667_v27  ;;  %v876_v34 = vld [vmem:[%s1372_s1 + $0x54] sm:$0xf0]  ;;  %v777_v35 = vld [vmem:[%s1372_s1 + $0x148] sm:$0xf] }
  0x26   :  { %528 = vmatpush.bf16.msrb.mxu3 %v862_v50  ;;  %452 = vmatmul.bf16.vlgmr.msra.gmra.mxu1 %v1203_v57  ;;  %v798_v36 = vor.u32 %v910_v28, %v795_v29  ;;  %v908_v37 = vld [vmem:[%s1372_s1 + $0x154] sm:$0xf0]  ;;  %v874_v38 = vld [vmem:[%s1372_s1 + $0x4c] sm:$0xf]  ;;  %v651_v39 = vld [vmem:[%s1372_s1 + $0x58] sm:$0xf0]  ;;  %v650_v42 = vor.u32 %v876_v34, %v649_v33 }
  0x27   :  { %480 = vmatmul.bf16.vlgmr.msra.gmra.mxu3 %v1203_v57  ;;  %v906_v40 = vld [vmem:[%s1372_s1 + $0x14c] sm:$0xf]  ;;  %v779_v41 = vld [vmem:[%s1372_s1 + $0x158] sm:$0xf0]  ;;  %v778_v43 = vor.u32 %v908_v37, %v777_v35  ;;  %v654_v44 = vor.u32 %v874_v38, %v651_v39  ;;  %v633_v45 = vld [vmem:[%s1372_s1 + $0x28] sm:$0xf] }
  0x28   :  { %487 = vmatpush.bf16.msrb.mxu0 %v714_v58  ;;  %v872_v46 = vld [vmem:[%s1372_s1 + $0x34] sm:$0xf0]  ;;  %v761_v47 = vld [vmem:[%s1372_s1 + $0x128] sm:$0xf]  ;;  %v782_v48 = vor.u32 %v906_v40, %v779_v41  ;;  %v870_v50 = vld [vmem:[%s1372_s1 + $0x2c] sm:$0xf] }
  0x29   :  { %501 = vmatpush.bf16.msrb.mxu1 %v842_v59  ;;  %515 = vmatpush.bf16.msrb.mxu2 %v718_v60  ;;  %v904_v49 = vld [vmem:[%s1372_s1 + $0x134] sm:$0xf0]  ;;  %v635_v51 = vld [vmem:[%s1372_s1 + $0x38] sm:$0xf0]  ;;  %v902_v52 = vld [vmem:[%s1372_s1 + $0x12c] sm:$0xf]  ;;  %v634_v55 = vor.u32 %v872_v46, %v633_v45 }
  0x2a   :  { %529 = vmatpush.bf16.msrb.mxu3 %v846_v0  ;;  %v763_v53 = vld [vmem:[%s1372_s1 + $0x138] sm:$0xf0]  ;;  %v762_v56 = vor.u32 %v904_v49, %v761_v47  ;;  %v638_v58 = vor.u32 %v870_v50, %v635_v51  ;;  %v617_v59 = vld [vmem:[%s1372_s1 + $0x8] sm:$0xf]  ;;  %v868_v60 = vld [vmem:[%s1372_s1 + $0x14] sm:$0xf0] }
  0x2b   :  { %v745_v61 = vld [vmem:[%s1372_s1 + $0x108] sm:$0xf]  ;;  %v766_v62 = vor.u32 %v902_v52, %v763_v53  ;;  %v900_v63 = vld [vmem:[%s1372_s1 + $0x114] sm:$0xf0]  ;;  %v866_v0 = vld [vmem:[%s1372_s1 + $0xc] sm:$0xf]  ;;  %v618_v4 = vor.u32 %v868_v60, %v617_v59 }
  0x2c   :  { %488 = vmatpush.bf16.msrb.mxu0 %v698_v6  ;;  %v619_v1 = vld [vmem:[%s1372_s1 + $0x18] sm:$0xf0]  ;;  %v898_v2 = vld [vmem:[%s1372_s1 + $0x10c] sm:$0xf]  ;;  %v746_v5 = vor.u32 %v900_v63, %v745_v61  ;;  %v569_v9 = vld [vmem:[%s1374_s2] sm:$0xf] }
  0x2d   :  { %502 = vmatpush.bf16.msrb.mxu1 %v826_v7  ;;  %516 = vmatpush.bf16.msrb.mxu2 %v702_v8  ;;  %v747_v3 = vld [vmem:[%s1372_s1 + $0x118] sm:$0xf0]  ;;  %v622_v6 = vor.u32 %v866_v0, %v619_v1  ;;  %v572_v14 = vperm.slane %v569_v9, 1 }
  0x2e   :  { %530 = vmatpush.bf16.msrb.mxu3 %v830_v12  ;;  %v750_v7 = vor.u32 %v898_v2, %v747_v3  ;;  %v571_v12 = vperm.slane %v569_v9, 0 }
  0x30   :  { %489 = vmatpush.bf16.msrb.mxu0 %v682_v18 }
  0x31   :  { %503 = vmatpush.bf16.msrb.mxu1 %v810_v19  ;;  %517 = vmatpush.bf16.msrb.mxu2 %v686_v20 }
  0x32   :  { %531 = vmatpush.bf16.msrb.mxu3 %v814_v24 }
  0x34   :  { %490 = vmatpush.bf16.msrb.mxu0 %v666_v30  ;;  %v573_v30 = vperm.slane %v569_v9, 2 }
  0x35   :  { %504 = vmatpush.bf16.msrb.mxu1 %v794_v31  ;;  %518 = vmatpush.bf16.msrb.mxu2 %v670_v32  ;;  %v574_v32 = vperm.slane %v569_v9, 3 }
  0x36   :  { %532 = vmatpush.bf16.msrb.mxu3 %v798_v36 }
  0x38   :  { %491 = vmatpush.bf16.msrb.mxu0 %v650_v42 }
  0x39   :  { %505 = vmatpush.bf16.msrb.mxu1 %v778_v43  ;;  %519 = vmatpush.bf16.msrb.mxu2 %v654_v44 }
  0x3a   :  { %533 = vmatpush.bf16.msrb.mxu3 %v782_v48 }
  0x3c   :  { %492 = vmatpush.bf16.msrb.mxu0 %v634_v55 }
  0x3d   :  { %506 = vmatpush.bf16.msrb.mxu1 %v762_v56  ;;  %520 = vmatpush.bf16.msrb.mxu2 %v638_v58 }
  0x3e   :  { %534 = vmatpush.bf16.msrb.mxu3 %v766_v62 }
  0x40   :  { %493 = vmatpush.bf16.msrb.mxu0 %v618_v4 }
  0x41   :  { %507 = vmatpush.bf16.msrb.mxu1 %v746_v5  ;;  %521 = vmatpush.bf16.msrb.mxu2 %v622_v6 }
  0x42   :  { %535 = vmatpush.bf16.msrb.mxu3 %v750_v7 }
  0x43   :  { %494 = vmatmul.bf16.vlgmr.msrb.gmra.mxu0 %v1195_v54 }
  0x44   :  { %508 = vmatmul.bf16.vlgmr.msrb.gmra.mxu1 %v1203_v57  ;;  %522 = vmatmul.bf16.vlgmr.msrb.gmra.mxu2 %v1195_v54 }
  0x45   :  { %536 = vmatmul.bf16.vlgmr.msrb.gmra.mxu3 %v1203_v57 }
  0xa0   :  { %v439_v8 = vpop.f32.mrf.mxu0 }
  0xa3   :  { %v453_v10 = vpop.f32.mrf.mxu1 }
  0xa4   :  { %v454_v11 = vadd.f32 %v453_v10, %v439_v8 }
  0xa6   :  { %v579_v16 = vadd.f32 %v571_v12, %v454_v11 }
  0xa7   :  { %v467_v13 = vpop.f32.mrf.mxu2 }
  0xa8   :  { %v441_v18 = vpop.f32.mrf.mxu0 }
  0xaa   :  { %v481_v15 = vpop.f32.mrf.mxu3 }
  0xab   :  { %v482_v17 = vadd.f32 %v481_v15, %v467_v13  ;;  %v455_v20 = vpop.f32.mrf.mxu1 }
  0xac   :  { %v456_v54 = vadd.f32 %v455_v20, %v441_v18 }
  0xad   :  { %v580_v19 = vadd.f32 %v572_v14, %v482_v17 }
  0xae   :  { %v583_v23 = vadd.f32 %v571_v12, %v456_v54 }
  0xaf   :  { %v587_v21 = vpack.c.bf16 %v580_v19, %v579_v16  ;;  %v469_v57 = vpop.f32.mrf.mxu2 }
  0xb1   :  { %591 = vst [vmem:[%s1375_s3] sm:$0xff] %v587_v21 }
  0xb2   :  { %v483_v22 = vpop.f32.mrf.mxu3 }
  0xb3   :  { %v484_v24 = vadd.f32 %v483_v22, %v469_v57 }
  0xb5   :  { %v584_v25 = vadd.f32 %v572_v14, %v484_v24 }
  0xb7   :  { %v589_v26 = vpack.c.bf16 %v584_v25, %v583_v23 }
  0xb9   :  { %593 = vst [vmem:[%s1375_s3 + $0x10] sm:$0xff] %v589_v26 }
  0xc0   :  { %v495_v27 = vpop.f32.mrf.mxu0 }
  0xc1   :  { %v509_v28 = vpop.f32.mrf.mxu1 }
  0xc2   :  { %v510_v29 = vadd.f32 %v509_v28, %v495_v27 }
  0xc4   :  { %v581_v34 = vadd.f32 %v573_v30, %v510_v29 }
  0xc7   :  { %v523_v31 = vpop.f32.mrf.mxu2 }
  0xc8   :  { %v537_v33 = vpop.f32.mrf.mxu3  ;;  %v497_v37 = vpop.f32.mrf.mxu0 }
  0xc9   :  { %v538_v35 = vadd.f32 %v537_v33, %v523_v31  ;;  %v511_v38 = vpop.f32.mrf.mxu1 }
  0xca   :  { %v512_v40 = vadd.f32 %v511_v38, %v497_v37 }
  0xcb   :  { %v582_v36 = vadd.f32 %v574_v32, %v538_v35 }
  0xcc   :  { %v585_v44 = vadd.f32 %v573_v30, %v512_v40 }
  0xcd   :  { %v588_v39 = vpack.c.bf16 %v582_v36, %v581_v34 }
  0xcf   :  { %592 = vst [vmem:[%s1375_s3 + $0x8] sm:$0xff] %v588_v39  ;;  %v525_v41 = vpop.f32.mrf.mxu2 }
  0xd0   :  { %v539_v42 = vpop.f32.mrf.mxu3 }
  0xd1   :  { %v540_v43 = vadd.f32 %v539_v42, %v525_v41 }
  0xd3   :  { %v586_v45 = vadd.f32 %v574_v32, %v540_v43 }
  0xd5   :  { %v590_v46 = vpack.c.bf16 %v586_v45, %v585_v44 }
  0xd7   :  { %594 = vst [vmem:[%s1375_s3 + $0x18] sm:$0xff] %v590_v46 }

// kernel: se_resnet18_forward.38
= control target key start
LH: loop header
LB: loop body
LE: loop exit
PB: predicated region body
PF: predicated region fallthrough
CT: control target
= control target key end

     0   :  { %s2415_s15 = smov 0   ;;  %s2417_s16 = smov 0   ;;  %s2801_s0 = inlined_call_operand.vmem [shape: bf16[16,4608], index: 0, kind: input, shape index: {}]   ;;  %s2802_s1 = inlined_call_operand.vmem [shape: bf16[4608,512], index: 1, kind: input, shape index: {}]   ;;  %s2803_s2 = inlined_call_operand.vmem [shape: f32[1,512], index: 2, kind: input, shape index: {}]   ;;  %s2804_s3 = inlined_call_operand.vmem [shape: bf16[16,512], index: 3, kind: input, shape index: {}]   ;;  %s2805_s4 = inlined_call_operand.vmem [shape: bf16[16,512], index: 4, kind: output, shape index: {}]  }
   0x1   :  { %s2419_s17 = smov 0   ;;  %s2421_s18 = smov 0  }
   0x2   :  { %s2423_s19 = smov 0  }
   0x3 LB: > { %s26_s20 = sadd.s32 1, %s2383_s18  ;;  %p49_p1 = scmp.ne.s32.totalorder %s2375_s16, %s2371_s15  ;;  %s2387_s19 = sphi %s2423_s19, %s14_s19   ;;  %s2383_s18 = sphi %s2421_s18, %s2809_s18   ;;  %s2379_s17 = sphi %s2419_s17, %s2808_s17   ;;  %s2375_s16 = sphi %s2417_s16, %s2807_s16   ;;  %s2371_s15 = sphi %s2415_s15, %s2806_s15  }
   0x4   : > { %p27_p0 = scmp.ge.s32.totalorder %s26_s20, 9  ;;  %p50_p2 = scmp.eq.s32.totalorder %s2387_s19, 0 }
   0x5   : > { %s42_s22 = sadd.s32 1, %s2375_s16  ;;  %p1631_p5 = scmp.ge.s32.totalorder %s2387_s19, 9 }
   0x6   : > { %s2811_s20 = smov (%p27_p0, %s26_s20), 0  ;;  %p51_p3 = por %p50_p2, %p49_p1 }
   0x7   : > { %s38_s21 = ssub.s32 %s2383_s18, %s2811_s20  ;;  %208 = sbr.rel (%p1631_p5) target bundleno = 20 (0x14), region = 24 }
   0x8   : > { %p40_p4 = scmp.eq.s32.totalorder %s38_s21, 0 }
   0xa   : > { %s2450_s23 = scalar_select %p40_p4, %s2375_s16, %s42_s22  }
   0xc   : > { %211 = sbr.rel (!%p51_p3) target bundleno = 20 (0x14), region = 28  ;;  %s213_s24 = sand.u32 (%p51_p3), 1, %s2375_s16  }
   0xd   : > { %s2174_s25 = sshll.u32 (%p51_p3), %s2383_s18, 4  ;;  %s1632_s26 = sshll.u32 (%p51_p3), %s213_s24, 5 }
   0xe   : > { %s221_s29 = scalar_lea.vmem (%p51_p3), %s2801_s0, %s2174_s25  ;;  %s215_s30 = scalar_lea.vmem (%p51_p3), [#allocation3], %s1632_s26 }
   0xf   : > { %v234_v0 = vld [vmem:[%s221_s29] sm:$0xff] (%p51_p3)  ;;  %v236_v1 = vld [vmem:[%s221_s29 + $0x8] sm:$0xff] (%p51_p3)  ;;  %v238_v2 = vld [vmem:[%s221_s29 + $0x90] sm:$0xff] (%p51_p3) }
  0x10   : > { %235 = vst [vmem:[%s215_s30] sm:$0xff] (%p51_p3), %v234_v0  ;;  %v240_v3 = vld [vmem:[%s221_s29 + $0x98] sm:$0xff] (%p51_p3) }
  0x11   : > { %237 = vst [vmem:[%s215_s30 + $0x8] sm:$0xff] %v236_v1 }
  0x12   : > { %239 = vst [vmem:[%s215_s30 + $0x10] sm:$0xff] %v238_v2 }
  0x13   : > { %241 = vst [vmem:[%s215_s30 + $0x18] sm:$0xff] %v240_v3 }
  0x14 PF: > { %p1635_p6 = scmp.ge.s32.totalorder %s2387_s19, 1  ;;  %p261_p7 = scmp.lt.s32.totalorder %s2387_s19, 10 }
  0x16   : > { %p262_p8 = pnand %p1635_p6, %p261_p7 }
  0x17   : > { %s268_s5 = sand.u32 (!%p262_p8), 1, %s2371_s15   ;;  %s1637_s6 = sshll.u32 (!%p262_p8), %s2379_s17, 6 }
  0x18   : > { %265 = sbr.rel (%p262_p8) target bundleno = 340 (0x154), region = 55  ;;  %s1636_s7 = sshll.u32 (!%p262_p8), %s268_s5, 5 }
  0x19   : > { %p326_p9 = scmp.lt.s32.totalorder (!%p262_p8), %s1637_s6, 575  ;;  %s2467_s12 = scalar_lea.vmem (!%p262_p8), [#allocation3], %s1636_s7 }
  0x1a   : > { %p1640_p10 = scmp.ne.s32.totalorder (!%p262_p8), %s2379_s17, 0 }
  0x1d   : > { %s2813_s6 = smov (!%p326_p9, %s1637_s6), 575  ;;  %368 = sbr.rel (%p1640_p10) target bundleno = 43 (0x2b), region = 63 }
  0x1e   : > { %s2175_s8 = sshll.u32 %s2813_s6, 4 }
  0x1f   : > { %s2465_s11 = scalar_lea.vmem %s2802_s1, %s2175_s8 }
  0x22   : > { %v2389_v4 = vmov 0.0  }
  0x23   : > { %369 = vst [vmem:[#allocation2 + $0x30] sm:$0xff] %v2389_v4 }
  0x24   : > { %370 = vst [vmem:[#allocation2] sm:$0xff] %v2389_v4 }
  0x25   : > { %371 = vst [vmem:[#allocation2 + $0x18] sm:$0xff] %v2389_v4 }
  0x26   : > { %372 = vst [vmem:[#allocation2 + $0x10] sm:$0xff] %v2389_v4 }
  0x27   : > { %373 = vst [vmem:[#allocation2 + $0x8] sm:$0xff] %v2389_v4 }
  0x28   : > { %374 = vst [vmem:[#allocation2 + $0x20] sm:$0xff] %v2389_v4 }
  0x29   : > { %375 = vst [vmem:[#allocation2 + $0x28] sm:$0xff] %v2389_v4 }
  0x2a   : > { %376 = vst [vmem:[#allocation2 + $0x38] sm:$0xff] %v2389_v4 }
  0x2b PF: > { %v1771_v5 = vld [vmem:[%s2465_s11 + $0xe0] sm:$0xf]  ;;  %v2210_v6 = vld [vmem:[%s2465_s11 + $0xec] sm:$0xf0]  ;;  %p2169_p11 = scmp.ne.s32.totalorder %s2379_s17, 8 }
  0x2c   : > { %v1899_v7 = vld [vmem:[%s2465_s11 + $0x1e0] sm:$0xf]  ;;  %v1772_v8 = vor.u32 %v2210_v6, %v1771_v5  ;;  %v2242_v9 = vld [vmem:[%s2465_s11 + $0x1ec] sm:$0xf0] }
  0x2d   : > { %v2027_v10 = vld [vmem:[%s2465_s11 + $0x2e0] sm:$0xf]  ;;  %v2274_v11 = vld [vmem:[%s2465_s11 + $0x2ec] sm:$0xf0]  ;;  %v1900_v12 = vor.u32 %v2242_v9, %v1899_v7 }
  0x2e   : > { %v2028_v13 = vor.u32 %v2274_v11, %v2027_v10  ;;  %v2155_v14 = vld [vmem:[%s2465_s11 + $0x3e0] sm:$0xf]  ;;  %v2306_v15 = vld [vmem:[%s2465_s11 + $0x3ec] sm:$0xf0]  ;;  %1177 = vmatpush.bf16.msra.mxu0 %v1772_v8 }
  0x2f   : > { %v1755_v16 = vld [vmem:[%s2465_s11 + $0xc0] sm:$0xf]  ;;  %v2156_v17 = vor.u32 %v2306_v15, %v2155_v14  ;;  %v2206_v18 = vld [vmem:[%s2465_s11 + $0xcc] sm:$0xf0]  ;;  %1191 = vmatpush.bf16.msra.mxu1 %v1900_v12 }
  0x30   : > { %v1883_v19 = vld [vmem:[%s2465_s11 + $0x1c0] sm:$0xf]  ;;  %v2238_v20 = vld [vmem:[%s2465_s11 + $0x1cc] sm:$0xf0]  ;;  %1205 = vmatpush.bf16.msra.mxu2 %v2028_v13  ;;  %v1756_v21 = vor.u32 %v2206_v18, %v1755_v16 }
  0x31   : > { %v1884_v22 = vor.u32 %v2238_v20, %v1883_v19  ;;  %v2011_v23 = vld [vmem:[%s2465_s11 + $0x2c0] sm:$0xf]  ;;  %v2270_v24 = vld [vmem:[%s2465_s11 + $0x2cc] sm:$0xf0]  ;;  %1219 = vmatpush.bf16.msra.mxu3 %v2156_v17 }
  0x32   : > { %v2139_v25 = vld [vmem:[%s2465_s11 + $0x3c0] sm:$0xf]  ;;  %v2012_v26 = vor.u32 %v2270_v24, %v2011_v23  ;;  %v2302_v27 = vld [vmem:[%s2465_s11 + $0x3cc] sm:$0xf0]  ;;  %1178 = vmatpush.bf16.msra.mxu0 %v1756_v21 }
  0x33   : > { %v1739_v28 = vld [vmem:[%s2465_s11 + $0xa0] sm:$0xf]  ;;  %v2202_v29 = vld [vmem:[%s2465_s11 + $0xac] sm:$0xf0]  ;;  %v2140_v30 = vor.u32 %v2302_v27, %v2139_v25  ;;  %1192 = vmatpush.bf16.msra.mxu1 %v1884_v22 }
  0x34   : > { %v1867_v31 = vld [vmem:[%s2465_s11 + $0x1a0] sm:$0xf]  ;;  %v2234_v32 = vld [vmem:[%s2465_s11 + $0x1ac] sm:$0xf0]  ;;  %v1740_v34 = vor.u32 %v2202_v29, %v1739_v28  ;;  %1206 = vmatpush.bf16.msra.mxu2 %v2012_v26 }
  0x35   : > { %v1995_v33 = vld [vmem:[%s2465_s11 + $0x2a0] sm:$0xf]  ;;  %v2266_v35 = vld [vmem:[%s2465_s11 + $0x2ac] sm:$0xf0]  ;;  %v1868_v38 = vor.u32 %v2234_v32, %v1867_v31  ;;  %1220 = vmatpush.bf16.msra.mxu3 %v2140_v30 }
  0x36   : > { %v2123_v36 = vld [vmem:[%s2465_s11 + $0x3a0] sm:$0xf]  ;;  %v2298_v37 = vld [vmem:[%s2465_s11 + $0x3ac] sm:$0xf0]  ;;  %v1996_v39 = vor.u32 %v2266_v35, %v1995_v33  ;;  %1179 = vmatpush.bf16.msra.mxu0 %v1740_v34  ;;  %v2208_v33 = vld [vmem:[%s2465_s11 + $0xe4] sm:$0xf] }
  0x37   : > { %v1723_v40 = vld [vmem:[%s2465_s11 + $0x80] sm:$0xf]  ;;  %v2198_v41 = vld [vmem:[%s2465_s11 + $0x8c] sm:$0xf0]  ;;  %v2124_v43 = vor.u32 %v2298_v37, %v2123_v36  ;;  %1193 = vmatpush.bf16.msra.mxu1 %v1868_v38  ;;  %v1773_v34 = vld [vmem:[%s2465_s11 + $0xf0] sm:$0xf0] }
  0x38   : > { %v1851_v42 = vld [vmem:[%s2465_s11 + $0x180] sm:$0xf]  ;;  %v2230_v44 = vld [vmem:[%s2465_s11 + $0x18c] sm:$0xf0]  ;;  %v1724_v49 = vor.u32 %v2198_v41, %v1723_v40  ;;  %1207 = vmatpush.bf16.msra.mxu2 %v1996_v39  ;;  %v2240_v35 = vld [vmem:[%s2465_s11 + $0x1e4] sm:$0xf] }
  0x39   : > { %v1979_v45 = vld [vmem:[%s2465_s11 + $0x280] sm:$0xf]  ;;  %v2262_v46 = vld [vmem:[%s2465_s11 + $0x28c] sm:$0xf0]  ;;  %v1852_v50 = vor.u32 %v2230_v44, %v1851_v42  ;;  %1221 = vmatpush.bf16.msra.mxu3 %v2124_v43  ;;  %v1901_v37 = vld [vmem:[%s2465_s11 + $0x1f0] sm:$0xf0] }
  0x3a   : > { %v2107_v47 = vld [vmem:[%s2465_s11 + $0x380] sm:$0xf]  ;;  %v2294_v48 = vld [vmem:[%s2465_s11 + $0x38c] sm:$0xf0]  ;;  %v1980_v51 = vor.u32 %v2262_v46, %v1979_v45  ;;  %1180 = vmatpush.bf16.msra.mxu0 %v1724_v49  ;;  %v2272_v38 = vld [vmem:[%s2465_s11 + $0x2e4] sm:$0xf]  ;;  %v1776_v45 = vor.u32 %v2208_v33, %v1773_v34  ;;  %v1904_v46 = vor.u32 %v2240_v35, %v1901_v37 }
  0x3b   : > { %v1707_v52 = vld [vmem:[%s2465_s11 + $0x60] sm:$0xf]  ;;  %v2194_v53 = vld [vmem:[%s2465_s11 + $0x6c] sm:$0xf0]  ;;  %v2108_v55 = vor.u32 %v2294_v48, %v2107_v47  ;;  %1194 = vmatpush.bf16.msra.mxu1 %v1852_v50  ;;  %v2029_v39 = vld [vmem:[%s2465_s11 + $0x2f0] sm:$0xf0] }
  0x3c   : > { %v1835_v54 = vld [vmem:[%s2465_s11 + $0x160] sm:$0xf]  ;;  %v2226_v56 = vld [vmem:[%s2465_s11 + $0x16c] sm:$0xf0]  ;;  %v1708_v61 = vor.u32 %v2194_v53, %v1707_v52  ;;  %1208 = vmatpush.bf16.msra.mxu2 %v1980_v51  ;;  %v2304_v42 = vld [vmem:[%s2465_s11 + $0x3e4] sm:$0xf]  ;;  %v2032_v47 = vor.u32 %v2272_v38, %v2029_v39 }
  0x3d   : > { %v1963_v57 = vld [vmem:[%s2465_s11 + $0x260] sm:$0xf]  ;;  %v2258_v58 = vld [vmem:[%s2465_s11 + $0x26c] sm:$0xf0]  ;;  %v1836_v62 = vor.u32 %v2226_v56, %v1835_v54  ;;  %1222 = vmatpush.bf16.msra.mxu3 %v2108_v55  ;;  %v2157_v43 = vld [vmem:[%s2465_s11 + $0x3f0] sm:$0xf0] }
  0x3e   : > { %v2091_v59 = vld [vmem:[%s2465_s11 + $0x360] sm:$0xf]  ;;  %v2290_v60 = vld [vmem:[%s2465_s11 + $0x36c] sm:$0xf0]  ;;  %v1964_v63 = vor.u32 %v2258_v58, %v1963_v57  ;;  %1181 = vmatpush.bf16.msra.mxu0 %v1708_v61  ;;  %v2204_v48 = vld [vmem:[%s2465_s11 + $0xc4] sm:$0xf]  ;;  %v2160_v51 = vor.u32 %v2304_v42, %v2157_v43 }
  0x3f   : > { %v1691_v0 = vld [vmem:[%s2465_s11 + $0x40] sm:$0xf]  ;;  %v2190_v1 = vld [vmem:[%s2465_s11 + $0x4c] sm:$0xf0]  ;;  %v2092_v3 = vor.u32 %v2290_v60, %v2091_v59  ;;  %1195 = vmatpush.bf16.msra.mxu1 %v1836_v62  ;;  %v1757_v49 = vld [vmem:[%s2465_s11 + $0xd0] sm:$0xf0] }
  0x40   : > { %v1819_v2 = vld [vmem:[%s2465_s11 + $0x140] sm:$0xf]  ;;  %v2222_v4 = vld [vmem:[%s2465_s11 + $0x14c] sm:$0xf0]  ;;  %v1692_v9 = vor.u32 %v2190_v1, %v1691_v0  ;;  %1209 = vmatpush.bf16.msra.mxu2 %v1964_v63  ;;  %v2236_v50 = vld [vmem:[%s2465_s11 + $0x1c4] sm:$0xf]  ;;  %v1760_v57 = vor.u32 %v2204_v48, %v1757_v49 }
  0x41   : > { %v1947_v5 = vld [vmem:[%s2465_s11 + $0x240] sm:$0xf]  ;;  %v2254_v6 = vld [vmem:[%s2465_s11 + $0x24c] sm:$0xf0]  ;;  %v1820_v10 = vor.u32 %v2222_v4, %v1819_v2  ;;  %1223 = vmatpush.bf16.msra.mxu3 %v2092_v3  ;;  %v1885_v52 = vld [vmem:[%s2465_s11 + $0x1d0] sm:$0xf0] }
  0x42   : > { %v2075_v7 = vld [vmem:[%s2465_s11 + $0x340] sm:$0xf]  ;;  %v2286_v8 = vld [vmem:[%s2465_s11 + $0x34c] sm:$0xf0]  ;;  %v1948_v11 = vor.u32 %v2254_v6, %v1947_v5  ;;  %1182 = vmatpush.bf16.msra.mxu0 %v1692_v9  ;;  %v2268_v53 = vld [vmem:[%s2465_s11 + $0x2c4] sm:$0xf]  ;;  %v1888_v58 = vor.u32 %v2236_v50, %v1885_v52 }
  0x43   : > { %v1675_v12 = vld [vmem:[%s2465_s11 + $0x20] sm:$0xf]  ;;  %v2186_v13 = vld [vmem:[%s2465_s11 + $0x2c] sm:$0xf0]  ;;  %v2076_v15 = vor.u32 %v2286_v8, %v2075_v7  ;;  %1196 = vmatpush.bf16.msra.mxu1 %v1820_v10  ;;  %v2013_v54 = vld [vmem:[%s2465_s11 + $0x2d0] sm:$0xf0] }
  0x44   : > { %v1803_v14 = vld [vmem:[%s2465_s11 + $0x120] sm:$0xf]  ;;  %v2218_v16 = vld [vmem:[%s2465_s11 + $0x12c] sm:$0xf0]  ;;  %v1676_v21 = vor.u32 %v2186_v13, %v1675_v12  ;;  %1210 = vmatpush.bf16.msra.mxu2 %v1948_v11  ;;  %v2300_v55 = vld [vmem:[%s2465_s11 + $0x3c4] sm:$0xf]  ;;  %v2016_v59 = vor.u32 %v2268_v53, %v2013_v54 }
  0x45   : > { %v1931_v17 = vld [vmem:[%s2465_s11 + $0x220] sm:$0xf]  ;;  %v2250_v18 = vld [vmem:[%s2465_s11 + $0x22c] sm:$0xf0]  ;;  %v1804_v24 = vor.u32 %v2218_v16, %v1803_v14  ;;  %1224 = vmatpush.bf16.msra.mxu3 %v2076_v15  ;;  %v2141_v56 = vld [vmem:[%s2465_s11 + $0x3d0] sm:$0xf0] }
  0x46   : > { %v2059_v19 = vld [vmem:[%s2465_s11 + $0x320] sm:$0xf]  ;;  %v2282_v20 = vld [vmem:[%s2465_s11 + $0x32c] sm:$0xf0]  ;;  %v1932_v25 = vor.u32 %v2250_v18, %v1931_v17  ;;  %1183 = vmatpush.bf16.msra.mxu0 %v1676_v21  ;;  %v2200_v60 = vld [vmem:[%s2465_s11 + $0xa4] sm:$0xf]  ;;  %v2144_v63 = vor.u32 %v2300_v55, %v2141_v56 }
  0x47   : > { %v1659_v22 = vld [vmem:[%s2465_s11] sm:$0xf]  ;;  %v2182_v23 = vld [vmem:[%s2465_s11 + $0xc] sm:$0xf0]  ;;  %v2060_v29 = vor.u32 %v2282_v20, %v2059_v19  ;;  %1197 = vmatpush.bf16.msra.mxu1 %v1804_v24  ;;  %v1741_v61 = vld [vmem:[%s2465_s11 + $0xb0] sm:$0xf0] }
  0x48   : > { %v1787_v26 = vld [vmem:[%s2465_s11 + $0x100] sm:$0xf]  ;;  %v2214_v27 = vld [vmem:[%s2465_s11 + $0x10c] sm:$0xf0]  ;;  %v1660_v36 = vor.u32 %v2182_v23, %v1659_v22  ;;  %1211 = vmatpush.bf16.msra.mxu2 %v1932_v25  ;;  %v2232_v62 = vld [vmem:[%s2465_s11 + $0x1a4] sm:$0xf]  ;;  %v1744_v6 = vor.u32 %v2200_v60, %v1741_v61 }
  0x49   : > { %v1915_v28 = vld [vmem:[%s2465_s11 + $0x200] sm:$0xf]  ;;  %v2246_v30 = vld [vmem:[%s2465_s11 + $0x20c] sm:$0xf0]  ;;  %v1788_v40 = vor.u32 %v2214_v27, %v1787_v26  ;;  %1225 = vmatpush.bf16.msra.mxu3 %v2060_v29  ;;  %v1869_v0 = vld [vmem:[%s2465_s11 + $0x1b0] sm:$0xf0] }
  0x4a   : > { %v2043_v31 = vld [vmem:[%s2465_s11 + $0x300] sm:$0xf]  ;;  %v2278_v32 = vld [vmem:[%s2465_s11 + $0x30c] sm:$0xf0]  ;;  %v1916_v41 = vor.u32 %v2246_v30, %v1915_v28  ;;  %1184 = vmatpush.bf16.msra.mxu0 %v1660_v36  ;;  %v2264_v1 = vld [vmem:[%s2465_s11 + $0x2a4] sm:$0xf]  ;;  %v1872_v10 = vor.u32 %v2232_v62, %v1869_v0 }
  0x4b   : > { %v2044_v44 = vor.u32 %v2278_v32, %v2043_v31  ;;  %1198 = vmatpush.bf16.msra.mxu1 %v1788_v40  ;;  %v1997_v2 = vld [vmem:[%s2465_s11 + $0x2b0] sm:$0xf0]  ;;  %v2296_v3 = vld [vmem:[%s2465_s11 + $0x3a4] sm:$0xf]  ;;  %v1651_v8 = vld [vmem:[%s2467_s12 + $0x8] sm:$0xf] }
  0x4c   : > { %1212 = vmatpush.bf16.msra.mxu2 %v1916_v41  ;;  %v2125_v4 = vld [vmem:[%s2465_s11 + $0x3b0] sm:$0xf0]  ;;  %v2196_v5 = vld [vmem:[%s2465_s11 + $0x84] sm:$0xf]  ;;  %v2179_v9 = vld [vmem:[%s2467_s12 + $0x14] sm:$0xf0]  ;;  %v2000_v11 = vor.u32 %v2264_v1, %v1997_v2 }
  0x4d   : > { %1226 = vmatpush.bf16.msra.mxu3 %v2044_v44  ;;  %v1725_v7 = vld [vmem:[%s2465_s11 + $0x90] sm:$0xf0]  ;;  %v2228_v12 = vld [vmem:[%s2465_s11 + $0x184] sm:$0xf]  ;;  %v2563_v13 = vor.u32 %v2179_v9, %v1651_v8  ;;  %v2177_v14 = vld [vmem:[%s2467_s12 + $0xc] sm:$0xf]  ;;  %v2128_v16 = vor.u32 %v2296_v3, %v2125_v4 }
  0x4e   : > { %1233 = vmatpush.bf16.msrb.mxu0 %v1776_v45  ;;  %v1653_v15 = vld [vmem:[%s2467_s12 + $0x18] sm:$0xf0]  ;;  %v1853_v17 = vld [vmem:[%s2465_s11 + $0x190] sm:$0xf0]  ;;  %v2260_v18 = vld [vmem:[%s2465_s11 + $0x284] sm:$0xf]  ;;  %v1728_v24 = vor.u32 %v2196_v5, %v1725_v7 }
  0x4f   : > { %1247 = vmatpush.bf16.msrb.mxu1 %v1904_v46  ;;  %v1981_v19 = vld [vmem:[%s2465_s11 + $0x290] sm:$0xf0]  ;;  %v2570_v20 = vor.u32 %v2177_v14, %v1653_v15  ;;  %v2292_v21 = vld [vmem:[%s2465_s11 + $0x384] sm:$0xf]  ;;  %1213 = vmatmul.bf16.vlgmr.msra.gmra.mxu2 %v2563_v13  ;;  %v1643_v26 = vld [vmem:[%s2467_s12] sm:$0xf]  ;;  %v1856_v28 = vor.u32 %v2228_v12, %v1853_v17 }
  0x50   : > { %1261 = vmatpush.bf16.msrb.mxu2 %v2032_v47  ;;  %v2109_v22 = vld [vmem:[%s2465_s11 + $0x390] sm:$0xf0]  ;;  %v2192_v23 = vld [vmem:[%s2465_s11 + $0x64] sm:$0xf]  ;;  %v2178_v27 = vld [vmem:[%s2467_s12 + $0xc] sm:$0xf0]  ;;  %v1984_v29 = vor.u32 %v2260_v18, %v1981_v19 }
  0x51   : > { %1275 = vmatpush.bf16.msrb.mxu3 %v2160_v51  ;;  %v1709_v25 = vld [vmem:[%s2465_s11 + $0x70] sm:$0xf0]  ;;  %v2224_v30 = vld [vmem:[%s2465_s11 + $0x164] sm:$0xf]  ;;  %v2581_v31 = vor.u32 %v2178_v27, %v1643_v26  ;;  %v2112_v34 = vor.u32 %v2292_v21, %v2109_v22  ;;  %v1779_v14 = vld [vmem:[%s2465_s11 + $0xe8] sm:$0xf] }
  0x52   : > { %1234 = vmatpush.bf16.msrb.mxu0 %v1760_v57  ;;  %1227 = vmatmul.bf16.vlgmr.msra.gmra.mxu3 %v2570_v20  ;;  %v2176_v32 = vld [vmem:[%s2467_s12 + $0x4] sm:$0xf]  ;;  %v1645_v33 = vld [vmem:[%s2467_s12 + $0x10] sm:$0xf0]  ;;  %v1712_v41 = vor.u32 %v2192_v23, %v1709_v25  ;;  %v2211_v15 = vld [vmem:[%s2465_s11 + $0xf4] sm:$0xf0] }
  0x53   : > { %1248 = vmatpush.bf16.msrb.mxu1 %v1888_v58  ;;  %v1837_v35 = vld [vmem:[%s2465_s11 + $0x170] sm:$0xf0]  ;;  %v2256_v36 = vld [vmem:[%s2465_s11 + $0x264] sm:$0xf]  ;;  %v2588_v38 = vor.u32 %v2176_v32, %v1645_v33  ;;  %1185 = vmatmul.bf16.vlgmr.msra.gmra.mxu0 %v2581_v31  ;;  %v2243_v18 = vld [vmem:[%s2465_s11 + $0x1f4] sm:$0xf0]  ;;  %v1780_v27 = vor.u32 %v2211_v15, %v1779_v14 }
  0x54   : > { %1262 = vmatpush.bf16.msrb.mxu2 %v2016_v59  ;;  %v1965_v37 = vld [vmem:[%s2465_s11 + $0x270] sm:$0xf0]  ;;  %v2288_v39 = vld [vmem:[%s2465_s11 + $0x364] sm:$0xf]  ;;  %v1840_v42 = vor.u32 %v2224_v30, %v1837_v35  ;;  %v2035_v19 = vld [vmem:[%s2465_s11 + $0x2e8] sm:$0xf] }
  0x55   : > { %1276 = vmatpush.bf16.msrb.mxu3 %v2144_v63  ;;  %v2093_v40 = vld [vmem:[%s2465_s11 + $0x370] sm:$0xf0]  ;;  %1199 = vmatmul.bf16.vlgmr.msra.gmra.mxu1 %v2588_v38  ;;  %v1968_v43 = vor.u32 %v2256_v36, %v1965_v37  ;;  %v2188_v44 = vld [vmem:[%s2465_s11 + $0x44] sm:$0xf]  ;;  %v2275_v21 = vld [vmem:[%s2465_s11 + $0x2f4] sm:$0xf0] }
  0x56   : > { %1235 = vmatpush.bf16.msrb.mxu0 %v1744_v6  ;;  %v1693_v45 = vld [vmem:[%s2465_s11 + $0x50] sm:$0xf0]  ;;  %v2220_v46 = vld [vmem:[%s2465_s11 + $0x144] sm:$0xf]  ;;  %v2096_v47 = vor.u32 %v2288_v39, %v2093_v40  ;;  %v2307_v25 = vld [vmem:[%s2465_s11 + $0x3f4] sm:$0xf0] }
  0x57   : > { %1249 = vmatpush.bf16.msrb.mxu1 %v1872_v10  ;;  %v1821_v48 = vld [vmem:[%s2465_s11 + $0x150] sm:$0xf0]  ;;  %v2252_v49 = vld [vmem:[%s2465_s11 + $0x244] sm:$0xf]  ;;  %v1696_v53 = vor.u32 %v2188_v44, %v1693_v45  ;;  %v1763_v30 = vld [vmem:[%s2465_s11 + $0xc8] sm:$0xf] }
  0x58   : > { %1263 = vmatpush.bf16.msrb.mxu2 %v2000_v11  ;;  %v1949_v50 = vld [vmem:[%s2465_s11 + $0x250] sm:$0xf0]  ;;  %v2284_v51 = vld [vmem:[%s2465_s11 + $0x344] sm:$0xf]  ;;  %v1824_v54 = vor.u32 %v2220_v46, %v1821_v48  ;;  %v2207_v32 = vld [vmem:[%s2465_s11 + $0xd4] sm:$0xf0] }
  0x59   : > { %1277 = vmatpush.bf16.msrb.mxu3 %v2128_v16  ;;  %v2077_v52 = vld [vmem:[%s2465_s11 + $0x350] sm:$0xf0]  ;;  %v1952_v55 = vor.u32 %v2252_v49, %v1949_v50  ;;  %v2184_v56 = vld [vmem:[%s2465_s11 + $0x24] sm:$0xf]  ;;  %v1907_v16 = vld [vmem:[%s2465_s11 + $0x1e8] sm:$0xf] }
  0x5a   : > { %1236 = vmatpush.bf16.msrb.mxu0 %v1728_v24  ;;  %v1677_v57 = vld [vmem:[%s2465_s11 + $0x30] sm:$0xf0]  ;;  %v2216_v58 = vld [vmem:[%s2465_s11 + $0x124] sm:$0xf]  ;;  %v2080_v59 = vor.u32 %v2284_v51, %v2077_v52  ;;  %v2163_v24 = vld [vmem:[%s2465_s11 + $0x3e8] sm:$0xf] }
  0x5b   : > { %1250 = vmatpush.bf16.msrb.mxu1 %v1856_v28  ;;  %v1805_v60 = vld [vmem:[%s2465_s11 + $0x130] sm:$0xf0]  ;;  %v2248_v61 = vld [vmem:[%s2465_s11 + $0x224] sm:$0xf]  ;;  %v1680_v1 = vor.u32 %v2184_v56, %v1677_v57  ;;  %v1908_v28 = vor.u32 %v2243_v18, %v1907_v16  ;;  %v1891_v33 = vld [vmem:[%s2465_s11 + $0x1c8] sm:$0xf] }
  0x5c   : > { %1264 = vmatpush.bf16.msrb.mxu2 %v1984_v29  ;;  %v1933_v62 = vld [vmem:[%s2465_s11 + $0x230] sm:$0xf0]  ;;  %v2280_v63 = vld [vmem:[%s2465_s11 + $0x324] sm:$0xf]  ;;  %v1808_v4 = vor.u32 %v2216_v58, %v1805_v60  ;;  %v2036_v29 = vor.u32 %v2275_v21, %v2035_v19  ;;  %v2239_v35 = vld [vmem:[%s2465_s11 + $0x1d4] sm:$0xf0] }
  0x5d   : > { %1278 = vmatpush.bf16.msrb.mxu3 %v2112_v34  ;;  %v2061_v0 = vld [vmem:[%s2465_s11 + $0x330] sm:$0xf0]  ;;  %v2180_v2 = vld [vmem:[%s2465_s11 + $0x4] sm:$0xf]  ;;  %v1936_v5 = vor.u32 %v2248_v61, %v1933_v62  ;;  %v2164_v34 = vor.u32 %v2307_v25, %v2163_v24  ;;  %v2019_v36 = vld [vmem:[%s2465_s11 + $0x2c8] sm:$0xf] }
  0x5e   : > { %1237 = vmatpush.bf16.msrb.mxu0 %v1712_v41  ;;  %v1661_v3 = vld [vmem:[%s2465_s11 + $0x10] sm:$0xf0]  ;;  %v2212_v6 = vld [vmem:[%s2465_s11 + $0x104] sm:$0xf]  ;;  %v2064_v9 = vor.u32 %v2280_v63, %v2061_v0  ;;  %v2271_v37 = vld [vmem:[%s2465_s11 + $0x2d4] sm:$0xf0]  ;;  %v1764_v41 = vor.u32 %v2207_v32, %v1763_v30 }
  0x5f   : > { %1251 = vmatpush.bf16.msrb.mxu1 %v1840_v42  ;;  %v1789_v7 = vld [vmem:[%s2465_s11 + $0x110] sm:$0xf0]  ;;  %v2244_v8 = vld [vmem:[%s2465_s11 + $0x204] sm:$0xf]  ;;  %v1664_v17 = vor.u32 %v2180_v2, %v1661_v3  ;;  %v2147_v39 = vld [vmem:[%s2465_s11 + $0x3c8] sm:$0xf]  ;;  %v1892_v42 = vor.u32 %v2239_v35, %v1891_v33 }
  0x60   : > { %1265 = vmatpush.bf16.msrb.mxu2 %v1968_v43  ;;  %v1917_v10 = vld [vmem:[%s2465_s11 + $0x210] sm:$0xf0]  ;;  %v2276_v11 = vld [vmem:[%s2465_s11 + $0x304] sm:$0xf]  ;;  %v1792_v22 = vor.u32 %v2212_v6, %v1789_v7  ;;  %v2303_v40 = vld [vmem:[%s2465_s11 + $0x3d4] sm:$0xf0]  ;;  %v2020_v43 = vor.u32 %v2271_v37, %v2019_v36 }
  0x61   : > { %1279 = vmatpush.bf16.msrb.mxu3 %v2096_v47  ;;  %v2045_v12 = vld [vmem:[%s2465_s11 + $0x310] sm:$0xf0]  ;;  %v1920_v23 = vor.u32 %v2244_v8, %v1917_v10  ;;  %v1747_v44 = vld [vmem:[%s2465_s11 + $0xa8] sm:$0xf]  ;;  %v2203_v45 = vld [vmem:[%s2465_s11 + $0xb4] sm:$0xf0]  ;;  %v2148_v47 = vor.u32 %v2303_v40, %v2147_v39 }
  0x62   : > { %1238 = vmatpush.bf16.msrb.mxu0 %v1696_v53  ;;  %v2048_v26 = vor.u32 %v2276_v11, %v2045_v12  ;;  %v1875_v46 = vld [vmem:[%s2465_s11 + $0x1a8] sm:$0xf]  ;;  %v2235_v48 = vld [vmem:[%s2465_s11 + $0x1b4] sm:$0xf0]  ;;  %v1748_v53 = vor.u32 %v2203_v45, %v1747_v44 }
  0x63   : > { %1252 = vmatpush.bf16.msrb.mxu1 %v1824_v54  ;;  %v2003_v49 = vld [vmem:[%s2465_s11 + $0x2a8] sm:$0xf]  ;;  %v2267_v50 = vld [vmem:[%s2465_s11 + $0x2b4] sm:$0xf0]  ;;  %v1876_v54 = vor.u32 %v2235_v48, %v1875_v46 }
  0x64   : > { %1266 = vmatpush.bf16.msrb.mxu2 %v1952_v55  ;;  %v2131_v51 = vld [vmem:[%s2465_s11 + $0x3a8] sm:$0xf]  ;;  %v2299_v52 = vld [vmem:[%s2465_s11 + $0x3b4] sm:$0xf0]  ;;  %v2004_v55 = vor.u32 %v2267_v50, %v2003_v49 }
  0x65   : > { %1280 = vmatpush.bf16.msrb.mxu3 %v2080_v59  ;;  %v1731_v56 = vld [vmem:[%s2465_s11 + $0x88] sm:$0xf]  ;;  %v2199_v57 = vld [vmem:[%s2465_s11 + $0x94] sm:$0xf0]  ;;  %v2132_v59 = vor.u32 %v2299_v52, %v2131_v51 }
  0x66   : > { %1239 = vmatpush.bf16.msrb.mxu0 %v1680_v1  ;;  %v1859_v58 = vld [vmem:[%s2465_s11 + $0x188] sm:$0xf]  ;;  %v2231_v60 = vld [vmem:[%s2465_s11 + $0x194] sm:$0xf0]  ;;  %v1732_v1 = vor.u32 %v2199_v57, %v1731_v56  ;;  %v1909_v57 = vld [vmem:[%s2465_s11 + $0x1f8] sm:$0xf0] }
  0x67   : > { %1253 = vmatpush.bf16.msrb.mxu1 %v1808_v4  ;;  %v1987_v61 = vld [vmem:[%s2465_s11 + $0x288] sm:$0xf]  ;;  %v2263_v62 = vld [vmem:[%s2465_s11 + $0x294] sm:$0xf0]  ;;  %v1860_v2 = vor.u32 %v2231_v60, %v1859_v58  ;;  %v2273_v58 = vld [vmem:[%s2465_s11 + $0x2ec] sm:$0xf] }
  0x68   : > { %1267 = vmatpush.bf16.msrb.mxu2 %v1936_v5  ;;  %v2115_v63 = vld [vmem:[%s2465_s11 + $0x388] sm:$0xf]  ;;  %v2295_v0 = vld [vmem:[%s2465_s11 + $0x394] sm:$0xf0]  ;;  %v1988_v3 = vor.u32 %v2263_v62, %v1987_v61  ;;  %v2305_v62 = vld [vmem:[%s2465_s11 + $0x3ec] sm:$0xf] }
  0x69   : > { %1281 = vmatpush.bf16.msrb.mxu3 %v2064_v9  ;;  %v1715_v4 = vld [vmem:[%s2465_s11 + $0x68] sm:$0xf]  ;;  %v2195_v5 = vld [vmem:[%s2465_s11 + $0x74] sm:$0xf0]  ;;  %v2116_v7 = vor.u32 %v2295_v0, %v2115_v63  ;;  %v2165_v63 = vld [vmem:[%s2465_s11 + $0x3f8] sm:$0xf0] }
  0x6a   : > { %1240 = vmatpush.bf16.msrb.mxu0 %v1664_v17  ;;  %v1843_v6 = vld [vmem:[%s2465_s11 + $0x168] sm:$0xf]  ;;  %v2227_v8 = vld [vmem:[%s2465_s11 + $0x174] sm:$0xf0]  ;;  %v1716_v14 = vor.u32 %v2195_v5, %v1715_v4  ;;  %v2205_v4 = vld [vmem:[%s2465_s11 + $0xcc] sm:$0xf] }
  0x6b   : > { %1254 = vmatpush.bf16.msrb.mxu1 %v1792_v22  ;;  %v1971_v9 = vld [vmem:[%s2465_s11 + $0x268] sm:$0xf]  ;;  %v2259_v10 = vld [vmem:[%s2465_s11 + $0x274] sm:$0xf0]  ;;  %v1844_v15 = vor.u32 %v2227_v8, %v1843_v6  ;;  %v1765_v5 = vld [vmem:[%s2465_s11 + $0xd8] sm:$0xf0] }
  0x6c   : > { %1268 = vmatpush.bf16.msrb.mxu2 %v1920_v23  ;;  %v2099_v11 = vld [vmem:[%s2465_s11 + $0x368] sm:$0xf]  ;;  %v2291_v12 = vld [vmem:[%s2465_s11 + $0x374] sm:$0xf0]  ;;  %v1972_v16 = vor.u32 %v2259_v10, %v1971_v9  ;;  %v2237_v6 = vld [vmem:[%s2465_s11 + $0x1cc] sm:$0xf] }
  0x6d   : > { %1282 = vmatpush.bf16.msrb.mxu3 %v2048_v26  ;;  %1241 = vmatmul.bf16.vlgmr.msrb.gmra.mxu0 %v2581_v31  ;;  %v1699_v17 = vld [vmem:[%s2465_s11 + $0x48] sm:$0xf]  ;;  %v2191_v18 = vld [vmem:[%s2465_s11 + $0x54] sm:$0xf0]  ;;  %v2100_v21 = vor.u32 %v2291_v12, %v2099_v11  ;;  %v1893_v8 = vld [vmem:[%s2465_s11 + $0x1d8] sm:$0xf0] }
  0x6e   : > { %1289 = vmatpush.bf16.msra.mxu0 %v1780_v27  ;;  %1255 = vmatmul.bf16.vlgmr.msrb.gmra.mxu1 %v2588_v38  ;;  %v1827_v19 = vld [vmem:[%s2465_s11 + $0x148] sm:$0xf]  ;;  %v2223_v22 = vld [vmem:[%s2465_s11 + $0x154] sm:$0xf0]  ;;  %v1700_v27 = vor.u32 %v2191_v18, %v1699_v17  ;;  %v2269_v9 = vld [vmem:[%s2465_s11 + $0x2cc] sm:$0xf] }
  0x6f   : > { %1303 = vmatpush.bf16.msra.mxu1 %v1908_v28  ;;  %1269 = vmatmul.bf16.vlgmr.msrb.gmra.mxu2 %v2563_v13  ;;  %v1955_v23 = vld [vmem:[%s2465_s11 + $0x248] sm:$0xf]  ;;  %v2255_v24 = vld [vmem:[%s2465_s11 + $0x254] sm:$0xf0]  ;;  %v1828_v28 = vor.u32 %v2223_v22, %v1827_v19  ;;  %v2021_v10 = vld [vmem:[%s2465_s11 + $0x2d8] sm:$0xf0] }
  0x70   : > { %1317 = vmatpush.bf16.msra.mxu2 %v2036_v29  ;;  %1283 = vmatmul.bf16.vlgmr.msrb.gmra.mxu3 %v2570_v20  ;;  %v2083_v25 = vld [vmem:[%s2465_s11 + $0x348] sm:$0xf]  ;;  %v2287_v26 = vld [vmem:[%s2465_s11 + $0x354] sm:$0xf0]  ;;  %v1956_v29 = vor.u32 %v2255_v24, %v1955_v23  ;;  %v2301_v11 = vld [vmem:[%s2465_s11 + $0x3cc] sm:$0xf] }
  0x71   : > { %1331 = vmatpush.bf16.msra.mxu3 %v2164_v34  ;;  %v1683_v30 = vld [vmem:[%s2465_s11 + $0x28] sm:$0xf]  ;;  %v2187_v32 = vld [vmem:[%s2465_s11 + $0x34] sm:$0xf0]  ;;  %v2084_v34 = vor.u32 %v2287_v26, %v2083_v25  ;;  %v2149_v12 = vld [vmem:[%s2465_s11 + $0x3d8] sm:$0xf0] }
  0x72   : > { %1290 = vmatpush.bf16.msra.mxu0 %v1764_v41  ;;  %v1811_v33 = vld [vmem:[%s2465_s11 + $0x128] sm:$0xf]  ;;  %v2219_v35 = vld [vmem:[%s2465_s11 + $0x134] sm:$0xf0]  ;;  %v1684_v41 = vor.u32 %v2187_v32, %v1683_v30  ;;  %v2201_v17 = vld [vmem:[%s2465_s11 + $0xac] sm:$0xf] }
  0x73   : > { %1304 = vmatpush.bf16.msra.mxu1 %v1892_v42  ;;  %v1939_v36 = vld [vmem:[%s2465_s11 + $0x228] sm:$0xf]  ;;  %v2251_v37 = vld [vmem:[%s2465_s11 + $0x234] sm:$0xf0]  ;;  %v1812_v44 = vor.u32 %v2219_v35, %v1811_v33  ;;  %v1749_v18 = vld [vmem:[%s2465_s11 + $0xb8] sm:$0xf0] }
  0x74   : > { %1318 = vmatpush.bf16.msra.mxu2 %v2020_v43  ;;  %v2067_v39 = vld [vmem:[%s2465_s11 + $0x328] sm:$0xf]  ;;  %v2283_v40 = vld [vmem:[%s2465_s11 + $0x334] sm:$0xf0]  ;;  %v1940_v45 = vor.u32 %v2251_v37, %v1939_v36  ;;  %v2233_v19 = vld [vmem:[%s2465_s11 + $0x1ac] sm:$0xf] }
  0x75   : > { %1332 = vmatpush.bf16.msra.mxu3 %v2148_v47  ;;  %v1667_v42 = vld [vmem:[%s2465_s11 + $0x8] sm:$0xf]  ;;  %v2183_v43 = vld [vmem:[%s2465_s11 + $0x14] sm:$0xf0]  ;;  %v2068_v49 = vor.u32 %v2283_v40, %v2067_v39  ;;  %v1877_v22 = vld [vmem:[%s2465_s11 + $0x1b8] sm:$0xf0] }
  0x76   : > { %1291 = vmatpush.bf16.msra.mxu0 %v1748_v53  ;;  %v1795_v46 = vld [vmem:[%s2465_s11 + $0x108] sm:$0xf]  ;;  %v2215_v47 = vld [vmem:[%s2465_s11 + $0x114] sm:$0xf0]  ;;  %v2209_v53 = vld [vmem:[%s2465_s11 + $0xec] sm:$0xf]  ;;  %v1668_v56 = vor.u32 %v2183_v43, %v1667_v42 }
  0x77   : > { %1305 = vmatpush.bf16.msra.mxu1 %v1876_v54  ;;  %v1923_v48 = vld [vmem:[%s2465_s11 + $0x208] sm:$0xf]  ;;  %v2247_v50 = vld [vmem:[%s2465_s11 + $0x214] sm:$0xf0]  ;;  %v1781_v54 = vld [vmem:[%s2465_s11 + $0xf8] sm:$0xf0]  ;;  %v1796_v60 = vor.u32 %v2215_v47, %v1795_v46 }
  0x78   : > { %1319 = vmatpush.bf16.msra.mxu2 %v2004_v55  ;;  %v2051_v51 = vld [vmem:[%s2465_s11 + $0x308] sm:$0xf]  ;;  %v2279_v52 = vld [vmem:[%s2465_s11 + $0x314] sm:$0xf0]  ;;  %v2241_v55 = vld [vmem:[%s2465_s11 + $0x1ec] sm:$0xf]  ;;  %v1924_v61 = vor.u32 %v2247_v50, %v1923_v48 }
  0x79   : > { %1333 = vmatpush.bf16.msra.mxu3 %v2132_v59  ;;  %v2037_v59 = vld [vmem:[%s2465_s11 + $0x2f8] sm:$0xf0]  ;;  %v2052_v0 = vor.u32 %v2279_v52, %v2051_v51  ;;  %v2265_v23 = vld [vmem:[%s2465_s11 + $0x2ac] sm:$0xf] }
  0x7a   : > { %1292 = vmatpush.bf16.msra.mxu0 %v1732_v1  ;;  %v1784_v1 = vor.u32 %v2209_v53, %v1781_v54  ;;  %v2005_v24 = vld [vmem:[%s2465_s11 + $0x2b8] sm:$0xf0]  ;;  %v2297_v25 = vld [vmem:[%s2465_s11 + $0x3ac] sm:$0xf] }
  0x7b   : > { %1306 = vmatpush.bf16.msra.mxu1 %v1860_v2  ;;  %v1912_v2 = vor.u32 %v2241_v55, %v1909_v57  ;;  %v2133_v26 = vld [vmem:[%s2465_s11 + $0x3b8] sm:$0xf0]  ;;  %v2197_v30 = vld [vmem:[%s2465_s11 + $0x8c] sm:$0xf] }
  0x7c   : > { %1320 = vmatpush.bf16.msra.mxu2 %v1988_v3  ;;  %v2040_v3 = vor.u32 %v2273_v58, %v2037_v59  ;;  %v1733_v32 = vld [vmem:[%s2465_s11 + $0x98] sm:$0xf0]  ;;  %v2229_v33 = vld [vmem:[%s2465_s11 + $0x18c] sm:$0xf] }
  0x7d   : > { %1334 = vmatpush.bf16.msra.mxu3 %v2116_v7  ;;  %v2168_v7 = vor.u32 %v2305_v62, %v2165_v63  ;;  %v1861_v35 = vld [vmem:[%s2465_s11 + $0x198] sm:$0xf0]  ;;  %v2261_v36 = vld [vmem:[%s2465_s11 + $0x28c] sm:$0xf] }
  0x7e   : > { %1293 = vmatpush.bf16.msra.mxu0 %v1716_v14  ;;  %v1768_v14 = vor.u32 %v2205_v4, %v1765_v5  ;;  %v1989_v37 = vld [vmem:[%s2465_s11 + $0x298] sm:$0xf0]  ;;  %v2293_v39 = vld [vmem:[%s2465_s11 + $0x38c] sm:$0xf]  ;;  %v1864_v42 = vor.u32 %v2229_v33, %v1861_v35 }
  0x7f   : > { %1307 = vmatpush.bf16.msra.mxu1 %v1844_v15  ;;  %v1896_v15 = vor.u32 %v2237_v6, %v1893_v8  ;;  %v2117_v40 = vld [vmem:[%s2465_s11 + $0x398] sm:$0xf0]  ;;  %v1992_v43 = vor.u32 %v2261_v36, %v1989_v37  ;;  %v2225_v46 = vld [vmem:[%s2465_s11 + $0x16c] sm:$0xf] }
  0x80   : > { %1321 = vmatpush.bf16.msra.mxu2 %v1972_v16  ;;  %v2024_v16 = vor.u32 %v2269_v9, %v2021_v10  ;;  %v2120_v47 = vor.u32 %v2293_v39, %v2117_v40  ;;  %v1845_v48 = vld [vmem:[%s2465_s11 + $0x178] sm:$0xf0]  ;;  %v2289_v51 = vld [vmem:[%s2465_s11 + $0x36c] sm:$0xf]  ;;  %v377_v39 = vld [vmem:[#allocation2 + $0x30] sm:$0xff] }
  0x81   : > { %1335 = vmatpush.bf16.msra.mxu3 %v2100_v21  ;;  %v2152_v21 = vor.u32 %v2301_v11, %v2149_v12  ;;  %v1973_v50 = vld [vmem:[%s2465_s11 + $0x278] sm:$0xf0]  ;;  %v1848_v54 = vor.u32 %v2225_v46, %v1845_v48  ;;  %v2221_v58 = vld [vmem:[%s2465_s11 + $0x14c] sm:$0xf] }
  0x82   : > { %1294 = vmatpush.bf16.msra.mxu0 %v1700_v27  ;;  %v1752_v27 = vor.u32 %v2201_v17, %v1749_v18  ;;  %v2101_v52 = vld [vmem:[%s2465_s11 + $0x378] sm:$0xf0]  ;;  %v2285_v63 = vld [vmem:[%s2465_s11 + $0x34c] sm:$0xf] }
  0x83   : > { %1308 = vmatpush.bf16.msra.mxu1 %v1828_v28  ;;  %v1880_v28 = vor.u32 %v2233_v19, %v1877_v22  ;;  %v1701_v57 = vld [vmem:[%s2465_s11 + $0x58] sm:$0xf0]  ;;  %v2104_v59 = vor.u32 %v2289_v51, %v2101_v52  ;;  %v2185_v4 = vld [vmem:[%s2465_s11 + $0x2c] sm:$0xf] }
  0x84   : > { %1322 = vmatpush.bf16.msra.mxu2 %v1956_v29  ;;  %v2008_v29 = vor.u32 %v2265_v23, %v2005_v24  ;;  %v1957_v62 = vld [vmem:[%s2465_s11 + $0x258] sm:$0xf0]  ;;  %v2217_v6 = vld [vmem:[%s2465_s11 + $0x12c] sm:$0xf] }
  0x85   : > { %1336 = vmatpush.bf16.msra.mxu3 %v2084_v34  ;;  %v2136_v34 = vor.u32 %v2297_v25, %v2133_v26  ;;  %v1685_v5 = vld [vmem:[%s2465_s11 + $0x38] sm:$0xf0]  ;;  %v2249_v9 = vld [vmem:[%s2465_s11 + $0x22c] sm:$0xf] }
  0x86   : > { %1295 = vmatpush.bf16.msra.mxu0 %v1684_v41  ;;  %v1736_v41 = vor.u32 %v2197_v30, %v1733_v32  ;;  %v1813_v8 = vld [vmem:[%s2465_s11 + $0x138] sm:$0xf0]  ;;  %v2281_v11 = vld [vmem:[%s2465_s11 + $0x32c] sm:$0xf] }
  0x87   : > { %1309 = vmatpush.bf16.msra.mxu1 %v1812_v44  ;;  %v2193_v44 = vld [vmem:[%s2465_s11 + $0x6c] sm:$0xf]  ;;  %v1941_v10 = vld [vmem:[%s2465_s11 + $0x238] sm:$0xf0] }
  0x88   : > { %1323 = vmatpush.bf16.msra.mxu2 %v1940_v45  ;;  %v1717_v45 = vld [vmem:[%s2465_s11 + $0x78] sm:$0xf0]  ;;  %v2181_v17 = vld [vmem:[%s2465_s11 + $0xc] sm:$0xf] }
  0x89   : > { %1337 = vmatpush.bf16.msra.mxu3 %v2068_v49  ;;  %v2257_v49 = vld [vmem:[%s2465_s11 + $0x26c] sm:$0xf]  ;;  %v1720_v53 = vor.u32 %v2193_v44, %v1717_v45  ;;  %v2069_v12 = vld [vmem:[%s2465_s11 + $0x338] sm:$0xf0] }
  0x8a   : > { %1296 = vmatpush.bf16.msra.mxu0 %v1668_v56  ;;  %v1976_v55 = vor.u32 %v2257_v49, %v1973_v50  ;;  %v2189_v56 = vld [vmem:[%s2465_s11 + $0x4c] sm:$0xf]  ;;  %v1669_v18 = vld [vmem:[%s2465_s11 + $0x18] sm:$0xf0] }
  0x8b   : > { %1310 = vmatpush.bf16.msra.mxu1 %v1796_v60  ;;  %v1829_v60 = vld [vmem:[%s2465_s11 + $0x158] sm:$0xf0]  ;;  %v2213_v19 = vld [vmem:[%s2465_s11 + $0x10c] sm:$0xf] }
  0x8c   : > { %1324 = vmatpush.bf16.msra.mxu2 %v1924_v61  ;;  %v2253_v61 = vld [vmem:[%s2465_s11 + $0x24c] sm:$0xf]  ;;  %v1797_v22 = vld [vmem:[%s2465_s11 + $0x118] sm:$0xf0] }
  0x8d   : > { %1338 = vmatpush.bf16.msra.mxu3 %v2052_v0  ;;  %1297 = vmatmul.bf16.vlgmr.msra.gmra.mxu0 %v2581_v31  ;;  %v2085_v0 = vld [vmem:[%s2465_s11 + $0x358] sm:$0xf0]  ;;  %v2245_v23 = vld [vmem:[%s2465_s11 + $0x20c] sm:$0xf] }
  0x8e   : > { %1345 = vmatpush.bf16.msrb.mxu0 %v1784_v1  ;;  %1311 = vmatmul.bf16.vlgmr.msra.gmra.mxu1 %v2588_v38  ;;  %v1704_v1 = vor.u32 %v2189_v56, %v1701_v57  ;;  %v1925_v24 = vld [vmem:[%s2465_s11 + $0x218] sm:$0xf0]  ;;  %v2277_v25 = vld [vmem:[%s2465_s11 + $0x30c] sm:$0xf] }
  0x8f   : > { %1359 = vmatpush.bf16.msrb.mxu1 %v1912_v2  ;;  %1325 = vmatmul.bf16.vlgmr.msra.gmra.mxu2 %v2563_v13  ;;  %v1832_v2 = vor.u32 %v2221_v58, %v1829_v60  ;;  %v2053_v26 = vld [vmem:[%s2465_s11 + $0x318] sm:$0xf0]  ;;  %v381_v46 = vld [vmem:[#allocation2 + $0x8] sm:$0xff] }
  0x90   : > { %1373 = vmatpush.bf16.msrb.mxu2 %v2040_v3  ;;  %1339 = vmatmul.bf16.vlgmr.msra.gmra.mxu3 %v2570_v20  ;;  %v1960_v3 = vor.u32 %v2253_v61, %v1957_v62  ;;  %v2056_v30 = vor.u32 %v2277_v25, %v2053_v26  ;;  %v382_v62 = vld [vmem:[#allocation2 + $0x20] sm:$0xff] }
  0x91   : > { %1387 = vmatpush.bf16.msrb.mxu3 %v2168_v7  ;;  %v2088_v7 = vor.u32 %v2285_v63, %v2085_v0 }
  0x92   : > { %1346 = vmatpush.bf16.msrb.mxu0 %v1768_v14  ;;  %v1688_v14 = vor.u32 %v2185_v4, %v1685_v5 }
  0x93   : > { %1360 = vmatpush.bf16.msrb.mxu1 %v1896_v15  ;;  %v1816_v15 = vor.u32 %v2217_v6, %v1813_v8 }
  0x94   : > { %1374 = vmatpush.bf16.msrb.mxu2 %v2024_v16  ;;  %v1944_v16 = vor.u32 %v2249_v9, %v1941_v10 }
  0x95   : > { %1388 = vmatpush.bf16.msrb.mxu3 %v2152_v21  ;;  %v2072_v21 = vor.u32 %v2281_v11, %v2069_v12 }
  0x96   : > { %1347 = vmatpush.bf16.msrb.mxu0 %v1752_v27  ;;  %v1672_v27 = vor.u32 %v2181_v17, %v1669_v18  ;;  %v383_v17 = vld [vmem:[#allocation2 + $0x28] sm:$0xff] }
  0x97   : > { %1361 = vmatpush.bf16.msrb.mxu1 %v1880_v28  ;;  %v1800_v28 = vor.u32 %v2213_v19, %v1797_v22 }
  0x98   : > { %1375 = vmatpush.bf16.msrb.mxu2 %v2008_v29  ;;  %v1928_v29 = vor.u32 %v2245_v23, %v1925_v24 }
  0x99   : > { %1389 = vmatpush.bf16.msrb.mxu3 %v2136_v34 }
  0x9a   : > { %1348 = vmatpush.bf16.msrb.mxu0 %v1736_v41 }
  0x9b   : > { %1362 = vmatpush.bf16.msrb.mxu1 %v1864_v42 }
  0x9c   : > { %1376 = vmatpush.bf16.msrb.mxu2 %v1992_v43 }
  0x9d   : > { %1390 = vmatpush.bf16.msrb.mxu3 %v2120_v47 }
  0x9e   : > { %1349 = vmatpush.bf16.msrb.mxu0 %v1720_v53  ;;  %v378_v53 = vld [vmem:[#allocation2] sm:$0xff] }
  0x9f   : > { %1363 = vmatpush.bf16.msrb.mxu1 %v1848_v54 }
  0xa0   : > { %1377 = vmatpush.bf16.msrb.mxu2 %v1976_v55 }
  0xa1   : > { %1391 = vmatpush.bf16.msrb.mxu3 %v2104_v59 }
  0xa2   : > { %1350 = vmatpush.bf16.msrb.mxu0 %v1704_v1 }
  0xa3   : > { %1364 = vmatpush.bf16.msrb.mxu1 %v1832_v2 }
  0xa4   : > { %1378 = vmatpush.bf16.msrb.mxu2 %v1960_v3 }
  0xa5   : > { %1392 = vmatpush.bf16.msrb.mxu3 %v2088_v7  ;;  %v379_v7 = vld [vmem:[#allocation2 + $0x18] sm:$0xff] }
  0xa6   : > { %1351 = vmatpush.bf16.msrb.mxu0 %v1688_v14 }
  0xa7   : > { %1365 = vmatpush.bf16.msrb.mxu1 %v1816_v15 }
  0xa8   : > { %1379 = vmatpush.bf16.msrb.mxu2 %v1944_v16 }
  0xa9   : > { %1393 = vmatpush.bf16.msrb.mxu3 %v2072_v21 }
  0xaa   : > { %1352 = vmatpush.bf16.msrb.mxu0 %v1672_v27  ;;  %v380_v27 = vld [vmem:[#allocation2 + $0x10] sm:$0xff] }
  0xab   : > { %1366 = vmatpush.bf16.msrb.mxu1 %v1800_v28 }
  0xac   : > { %1380 = vmatpush.bf16.msrb.mxu2 %v1928_v29 }
  0xad   : > { %1394 = vmatpush.bf16.msrb.mxu3 %v2056_v30  ;;  %1353 = vmatmul.bf16.vlgmr.msrb.gmra.mxu0 %v2581_v31 }
  0xae   : > { %1367 = vmatmul.bf16.vlgmr.msrb.gmra.mxu1 %v2588_v38 }
  0xaf   : > { %1381 = vmatmul.bf16.vlgmr.msrb.gmra.mxu2 %v2563_v13 }
  0xb0   : > { %1395 = vmatmul.bf16.vlgmr.msrb.gmra.mxu3 %v2570_v20 }
  0xd0   : > { %v1186_v32 = vpop.f32.mrf.mxu0 }
  0xd2   : > { %v1200_v33 = vpop.f32.mrf.mxu1  ;;  %v1214_v35 = vpop.f32.mrf.mxu2 }
  0xd3   : > { %v1201_v34 = vadd.f32 %v1200_v33, %v1186_v32 }
  0xd5   : > { %v1228_v36 = vpop.f32.mrf.mxu3  ;;  %v1215_v37 = vadd.f32 %v1214_v35, %v1201_v34 }
  0xd7   : > { %v1229_v40 = vadd.f32 %v1228_v36, %v1215_v37  ;;  %v384_v36 = vld [vmem:[#allocation2 + $0x38] sm:$0xff] }
  0xd8   : > { %v1188_v42 = vpop.f32.mrf.mxu0 }
  0xd9   : > { %v1401_v41 = vadd.f32 %v1229_v40, %v377_v39 }
  0xda   : > { %v1202_v43 = vpop.f32.mrf.mxu1  ;;  %v1216_v31 = vpop.f32.mrf.mxu2 }
  0xdb   : > { %1409 = vst [vmem:[#allocation2 + $0x30] sm:$0xff] %v1401_v41  ;;  %v1203_v44 = vadd.f32 %v1202_v43, %v1188_v42 }
  0xdd   : > { %v1230_v45 = vpop.f32.mrf.mxu3  ;;  %v1217_v38 = vadd.f32 %v1216_v31, %v1203_v44 }
  0xdf   : > { %v1231_v13 = vadd.f32 %v1230_v45, %v1217_v38 }
  0xe1   : > { %v1405_v47 = vadd.f32 %v1231_v13, %v381_v46 }
  0xe3   : > { %1413 = vst [vmem:[#allocation2 + $0x8] sm:$0xff] %v1405_v47 }
  0xea   : > { %v1242_v20 = vpop.f32.mrf.mxu0 }
  0xeb   : > { %v1256_v48 = vpop.f32.mrf.mxu1 }
  0xec   : > { %v1257_v49 = vadd.f32 %v1256_v48, %v1242_v20 }
  0xf2   : > { %v1270_v50 = vpop.f32.mrf.mxu2  ;;  %v1244_v55 = vpop.f32.mrf.mxu0 }
  0xf3   : > { %v1271_v51 = vadd.f32 %v1270_v50, %v1257_v49  ;;  %v1284_v52 = vpop.f32.mrf.mxu3  ;;  %v1258_v56 = vpop.f32.mrf.mxu1 }
  0xf4   : > { %v1259_v58 = vadd.f32 %v1258_v56, %v1244_v55 }
  0xf5   : > { %v1285_v54 = vadd.f32 %v1284_v52, %v1271_v51 }
  0xf7   : > { %v1402_v57 = vadd.f32 %v1285_v54, %v378_v53 }
  0xf9   : > { %1410 = vst [vmem:[#allocation2] sm:$0xff] %v1402_v57 }
  0xfa   : > { %v1272_v59 = vpop.f32.mrf.mxu2 }
  0xfb   : > { %v1273_v60 = vadd.f32 %v1272_v59, %v1259_v58  ;;  %v1286_v61 = vpop.f32.mrf.mxu3 }
  0xfd   : > { %v1287_v63 = vadd.f32 %v1286_v61, %v1273_v60 }
  0xff   : > { %v1406_v0 = vadd.f32 %v1287_v63, %v382_v62 }
 0x101   : > { %1414 = vst [vmem:[#allocation2 + $0x20] sm:$0xff] %v1406_v0 }
 0x10a   : > { %v1298_v1 = vpop.f32.mrf.mxu0 }
 0x10b   : > { %v1312_v2 = vpop.f32.mrf.mxu1 }
 0x10c   : > { %v1313_v3 = vadd.f32 %v1312_v2, %v1298_v1 }
 0x112   : > { %v1326_v4 = vpop.f32.mrf.mxu2  ;;  %v1300_v9 = vpop.f32.mrf.mxu0 }
 0x113   : > { %v1327_v5 = vadd.f32 %v1326_v4, %v1313_v3  ;;  %v1340_v6 = vpop.f32.mrf.mxu3  ;;  %v1314_v10 = vpop.f32.mrf.mxu1 }
 0x114   : > { %v1315_v12 = vadd.f32 %v1314_v10, %v1300_v9 }
 0x115   : > { %v1341_v8 = vadd.f32 %v1340_v6, %v1327_v5 }
 0x117   : > { %v1403_v11 = vadd.f32 %v1341_v8, %v379_v7 }
 0x119   : > { %1411 = vst [vmem:[#allocation2 + $0x18] sm:$0xff] %v1403_v11 }
 0x11a   : > { %v1328_v14 = vpop.f32.mrf.mxu2 }
 0x11b   : > { %v1329_v15 = vadd.f32 %v1328_v14, %v1315_v12  ;;  %v1342_v16 = vpop.f32.mrf.mxu3 }
 0x11d   : > { %v1343_v18 = vadd.f32 %v1342_v16, %v1329_v15 }
 0x11f   : > { %v1407_v19 = vadd.f32 %v1343_v18, %v383_v17 }
 0x121   : > { %1415 = vst [vmem:[#allocation2 + $0x28] sm:$0xff] %v1407_v19 }
 0x12a   : > { %v1354_v21 = vpop.f32.mrf.mxu0 }
 0x12b   : > { %v1368_v22 = vpop.f32.mrf.mxu1 }
 0x12c   : > { %v1369_v23 = vadd.f32 %v1368_v22, %v1354_v21 }
 0x132   : > { %v1382_v24 = vpop.f32.mrf.mxu2  ;;  %v1356_v29 = vpop.f32.mrf.mxu0 }
 0x133   : > { %v1383_v25 = vadd.f32 %v1382_v24, %v1369_v23  ;;  %v1396_v26 = vpop.f32.mrf.mxu3  ;;  %v1370_v30 = vpop.f32.mrf.mxu1 }
 0x134   : > { %v1371_v33 = vadd.f32 %v1370_v30, %v1356_v29 }
 0x135   : > { %v1397_v28 = vadd.f32 %v1396_v26, %v1383_v25 }
 0x137   : > { %v1404_v32 = vadd.f32 %v1397_v28, %v380_v27 }
 0x139   : > { %1412 = vst [vmem:[#allocation2 + $0x10] sm:$0xff] %v1404_v32 }
 0x13a   : > { %v1384_v34 = vpop.f32.mrf.mxu2 }
 0x13b   : > { %v1385_v35 = vadd.f32 %v1384_v34, %v1371_v33  ;;  %v1398_v37 = vpop.f32.mrf.mxu3 }
 0x13d   : > { %v1399_v39 = vadd.f32 %v1398_v37, %v1385_v35  ;;  %1420 = sbr.rel (%p2169_p11) target bundleno = 340 (0x154), region = 67 }
 0x13f   : > { %v1408_v40 = vadd.f32 %v1399_v39, %v384_v36 }
 0x141   : > { %1416 = vst [vmem:[#allocation2 + $0x38] sm:$0xff] %v1408_v40 }
 0x142   : > { %v1421_v41 = vld [vmem:[#allocation2 + $0x30] sm:$0xff]  ;;  %v1422_v42 = vld [vmem:[#allocation2] sm:$0xff]  ;;  %v1423_v38 = vld [vmem:[#allocation2 + $0x18] sm:$0xff] }
 0x143   : > { %v1429_v43 = vld [vmem:[%s2803_s2] sm:$0xf]  ;;  %v1424_v46 = vld [vmem:[#allocation2 + $0x10] sm:$0xff]  ;;  %v1448_v49 = vld [vmem:[%s2804_s3 + $0x8] sm:$0xff] }
 0x144   : > { %v1431_v44 = vperm.slane %v1429_v43, 0  ;;  %v1432_v31 = vperm.slane %v1429_v43, 1  ;;  %v1447_v45 = vld [vmem:[%s2804_s3] sm:$0xff]  ;;  %v1433_v13 = vperm.slane %v1429_v43, 2  ;;  %v1434_v48 = vperm.slane %v1429_v43, 3  ;;  %v1425_v50 = vld [vmem:[#allocation2 + $0x8] sm:$0xff] }
 0x145   : > { %v1451_v47 = vunpack.c.l.bf16 %v1447_v45  ;;  %v1452_v20 = vunpack.c.h.bf16 %v1447_v45  ;;  %v1426_v51 = vld [vmem:[#allocation2 + $0x20] sm:$0xff]  ;;  %v1453_v55 = vunpack.c.l.bf16 %v1448_v49  ;;  %v1449_v56 = vld [vmem:[%s2804_s3 + $0x10] sm:$0xff]  ;;  %v1427_v57 = vld [vmem:[#allocation2 + $0x28] sm:$0xff]  ;;  %v1454_v60 = vunpack.c.h.bf16 %v1448_v49 }
 0x146   : > { %v1439_v52 = vadd.f32 %v1431_v44, %v1421_v41  ;;  %v1440_v53 = vadd.f32 %v1432_v31, %v1422_v42  ;;  %v1441_v54 = vadd.f32 %v1433_v13, %v1423_v38  ;;  %v1442_v59 = vadd.f32 %v1434_v48, %v1424_v46  ;;  %v1450_v3 = vld [vmem:[%s2804_s3 + $0x18] sm:$0xff] }
 0x147   : > { %v1443_v61 = vadd.f32 %v1431_v44, %v1425_v50  ;;  %v1444_v62 = vadd.f32 %v1432_v31, %v1426_v51  ;;  %v1455_v2 = vunpack.c.l.bf16 %v1449_v56  ;;  %v1456_v5 = vunpack.c.h.bf16 %v1449_v56 }
 0x148   : > { %v1428_v58 = vld [vmem:[#allocation2 + $0x38] sm:$0xff]  ;;  %v1459_v63 = vadd.f32 %v1451_v47, %v1439_v52  ;;  %v1460_v0 = vadd.f32 %v1452_v20, %v1440_v53  ;;  %v1461_v1 = vadd.f32 %v1453_v55, %v1441_v54  ;;  %v1462_v4 = vadd.f32 %v1454_v60, %v1442_v59 }
 0x149   : > { %v1445_v6 = vadd.f32 %v1433_v13, %v1427_v57  ;;  %v1446_v7 = vadd.f32 %v1434_v48, %v1428_v58  ;;  %v1463_v11 = vadd.f32 %v1455_v2, %v1443_v61  ;;  %v1464_v14 = vadd.f32 %v1456_v5, %v1444_v62 }
 0x14a   : > { %v1467_v8 = vmax.f32 %v1459_v63, 0.0  ;;  %v1468_v9 = vmax.f32 %v1460_v0, 0.0  ;;  %v1469_v10 = vmax.f32 %v1461_v1, 0.0  ;;  %v1470_v12 = vmax.f32 %v1462_v4, 0.0 }
 0x14b   : > { %v1457_v15 = vunpack.c.l.bf16 %v1450_v3  ;;  %v1458_v16 = vunpack.c.h.bf16 %v1450_v3  ;;  %v1471_v18 = vmax.f32 %v1463_v11, 0.0  ;;  %v1472_v21 = vmax.f32 %v1464_v14, 0.0 }
 0x14c   : > { %v1475_v17 = vpack.c.bf16 %v1468_v9, %v1467_v8  ;;  %v1476_v19 = vpack.c.bf16 %v1470_v12, %v1469_v10 }
 0x14d   : > { %v1465_v22 = vadd.f32 %v1457_v15, %v1445_v6  ;;  %v1466_v23 = vadd.f32 %v1458_v16, %v1446_v7  ;;  %v1477_v24 = vpack.c.bf16 %v1472_v21, %v1471_v18 }
 0x14e   : > { %1479 = vst [vmem:[%s2805_s4] sm:$0xff] %v1475_v17 }
 0x14f   : > { %1480 = vst [vmem:[%s2805_s4 + $0x8] sm:$0xff] %v1476_v19  ;;  %v1473_v25 = vmax.f32 %v1465_v22, 0.0  ;;  %v1474_v26 = vmax.f32 %v1466_v23, 0.0 }
 0x150   : > { %1481 = vst [vmem:[%s2805_s4 + $0x10] sm:$0xff] %v1477_v24 }
 0x151   : > { %v1478_v27 = vpack.c.bf16 %v1474_v26, %v1473_v25 }
 0x153   : > { %1482 = vst [vmem:[%s2805_s4 + $0x18] sm:$0xff] %v1478_v27 }
 0x154 PF: > { %s14_s19 = sadd.s32 1, %s2387_s19   ;;  %s2806_s15 = smov %s2375_s16 }
 0x155   : > { %p11_p12 = scmp.ge.s32.totalorder %s14_s19, 11   ;;  %s2807_s16 = smov %s2450_s23 }
 0x156   : > { %s2808_s17 = smov %s2383_s18  ;;  %s2809_s18 = smov %s2811_s20 }
 0x157   :  { %13 = sbr.rel (!%p11_p12) target bundleno = 3 (0x3), region = 111 }

// kernel: se_resnet18_forward.39
= control target key start
LH: loop header
LB: loop body
LE: loop exit
PB: predicated region body
PF: predicated region fallthrough
CT: control target
= control target key end

     0   :  { %s2300_s12 = smov 0   ;;  %s2302_s13 = smov 0   ;;  %s2674_s0 = inlined_call_operand.vmem [shape: bf16[16,4608], index: 0, kind: input, shape index: {}]   ;;  %s2675_s1 = inlined_call_operand.vmem [shape: bf16[4608,512], index: 1, kind: input, shape index: {}]   ;;  %s2676_s2 = inlined_call_operand.vmem [shape: f32[1,512], index: 2, kind: input, shape index: {}]   ;;  %s2677_s3 = inlined_call_operand.vmem [shape: bf16[16,512], index: 3, kind: output, shape index: {}]  }
   0x1   :  { %s2304_s14 = smov 0   ;;  %s2306_s15 = smov 0  }
   0x2   :  { %s2308_s16 = smov 0  }
   0x3 LB: > { %s25_s17 = sadd.s32 1, %s2273_s15  ;;  %p48_p1 = scmp.ne.s32.totalorder %s2265_s13, %s2261_s12  ;;  %s2277_s16 = sphi %s2308_s16, %s13_s16   ;;  %s2273_s15 = sphi %s2306_s15, %s2681_s15   ;;  %s2269_s14 = sphi %s2304_s14, %s2680_s14   ;;  %s2265_s13 = sphi %s2302_s13, %s2679_s13   ;;  %s2261_s12 = sphi %s2300_s12, %s2678_s12  }
   0x4   : > { %p26_p0 = scmp.ge.s32.totalorder %s25_s17, 9  ;;  %p49_p2 = scmp.eq.s32.totalorder %s2277_s16, 0 }
   0x5   : > { %s41_s19 = sadd.s32 1, %s2265_s13  ;;  %p1521_p5 = scmp.ge.s32.totalorder %s2277_s16, 9 }
   0x6   : > { %s2683_s17 = smov (%p26_p0, %s25_s17), 0  ;;  %p50_p3 = por %p49_p2, %p48_p1 }
   0x7   : > { %s37_s18 = ssub.s32 %s2273_s15, %s2683_s17  ;;  %164 = sbr.rel (%p1521_p5) target bundleno = 20 (0x14), region = 20 }
   0x8   : > { %p39_p4 = scmp.eq.s32.totalorder %s37_s18, 0 }
   0xa   : > { %s2335_s20 = scalar_select %p39_p4, %s2265_s13, %s41_s19  }
   0xc   : > { %167 = sbr.rel (!%p50_p3) target bundleno = 20 (0x14), region = 24  ;;  %s169_s21 = sand.u32 (%p50_p3), 1, %s2265_s13  }
   0xd   : > { %s2064_s22 = sshll.u32 (%p50_p3), %s2273_s15, 4  ;;  %s1522_s23 = sshll.u32 (%p50_p3), %s169_s21, 5 }
   0xe   : > { %s177_s26 = scalar_lea.vmem (%p50_p3), %s2674_s0, %s2064_s22  ;;  %s171_s27 = scalar_lea.vmem (%p50_p3), [#allocation3], %s1522_s23 }
   0xf   : > { %v190_v0 = vld [vmem:[%s177_s26] sm:$0xff] (%p50_p3)  ;;  %v192_v1 = vld [vmem:[%s177_s26 + $0x8] sm:$0xff] (%p50_p3)  ;;  %v194_v2 = vld [vmem:[%s177_s26 + $0x90] sm:$0xff] (%p50_p3) }
  0x10   : > { %191 = vst [vmem:[%s171_s27] sm:$0xff] (%p50_p3), %v190_v0  ;;  %v196_v3 = vld [vmem:[%s177_s26 + $0x98] sm:$0xff] (%p50_p3) }
  0x11   : > { %193 = vst [vmem:[%s171_s27 + $0x8] sm:$0xff] %v192_v1 }
  0x12   : > { %195 = vst [vmem:[%s171_s27 + $0x10] sm:$0xff] %v194_v2 }
  0x13   : > { %197 = vst [vmem:[%s171_s27 + $0x18] sm:$0xff] %v196_v3 }
  0x14 PF: > { %p1525_p6 = scmp.ge.s32.totalorder %s2277_s16, 1  ;;  %p217_p7 = scmp.lt.s32.totalorder %s2277_s16, 10 }
  0x16   : > { %p218_p8 = pnand %p1525_p6, %p217_p7 }
  0x17   : > { %s224_s28 = sand.u32 (!%p218_p8), 1, %s2261_s12   ;;  %s1527_s29 = sshll.u32 (!%p218_p8), %s2269_s14, 6 }
  0x18   : > { %221 = sbr.rel (%p218_p8) target bundleno = 336 (0x150), region = 51  ;;  %s1526_s30 = sshll.u32 (!%p218_p8), %s224_s28, 5 }
  0x19   : > { %p270_p9 = scmp.lt.s32.totalorder (!%p218_p8), %s1527_s29, 575  ;;  %s2352_s8 = scalar_lea.vmem (!%p218_p8), [#allocation3], %s1526_s30 }
  0x1a   : > { %p1530_p10 = scmp.ne.s32.totalorder (!%p218_p8), %s2269_s14, 0 }
  0x1d   : > { %s2685_s29 = smov (!%p270_p9, %s1527_s29), 575  ;;  %300 = sbr.rel (%p1530_p10) target bundleno = 43 (0x2b), region = 59 }
  0x1e   : > { %s2065_s4 = sshll.u32 %s2685_s29, 4 }
  0x1f   : > { %s2350_s7 = scalar_lea.vmem %s2675_s1, %s2065_s4 }
  0x22   : > { %v2279_v4 = vmov 0.0  }
  0x23   : > { %301 = vst [vmem:[#allocation2 + $0x30] sm:$0xff] %v2279_v4 }
  0x24   : > { %302 = vst [vmem:[#allocation2] sm:$0xff] %v2279_v4 }
  0x25   : > { %303 = vst [vmem:[#allocation2 + $0x18] sm:$0xff] %v2279_v4 }
  0x26   : > { %304 = vst [vmem:[#allocation2 + $0x10] sm:$0xff] %v2279_v4 }
  0x27   : > { %305 = vst [vmem:[#allocation2 + $0x8] sm:$0xff] %v2279_v4 }
  0x28   : > { %306 = vst [vmem:[#allocation2 + $0x20] sm:$0xff] %v2279_v4 }
  0x29   : > { %307 = vst [vmem:[#allocation2 + $0x28] sm:$0xff] %v2279_v4 }
  0x2a   : > { %308 = vst [vmem:[#allocation2 + $0x38] sm:$0xff] %v2279_v4 }
  0x2b PF: > { %v1661_v5 = vld [vmem:[%s2350_s7 + $0xe0] sm:$0xf]  ;;  %v2100_v6 = vld [vmem:[%s2350_s7 + $0xec] sm:$0xf0]  ;;  %p2059_p11 = scmp.ne.s32.totalorder %s2269_s14, 8 }
  0x2c   : > { %v1789_v7 = vld [vmem:[%s2350_s7 + $0x1e0] sm:$0xf]  ;;  %v1662_v8 = vor.u32 %v2100_v6, %v1661_v5  ;;  %v2132_v9 = vld [vmem:[%s2350_s7 + $0x1ec] sm:$0xf0] }
  0x2d   : > { %v1917_v10 = vld [vmem:[%s2350_s7 + $0x2e0] sm:$0xf]  ;;  %v2164_v11 = vld [vmem:[%s2350_s7 + $0x2ec] sm:$0xf0]  ;;  %v1790_v12 = vor.u32 %v2132_v9, %v1789_v7 }
  0x2e   : > { %v1918_v13 = vor.u32 %v2164_v11, %v1917_v10  ;;  %v2045_v14 = vld [vmem:[%s2350_s7 + $0x3e0] sm:$0xf]  ;;  %v2196_v15 = vld [vmem:[%s2350_s7 + $0x3ec] sm:$0xf0]  ;;  %1109 = vmatpush.bf16.msra.mxu0 %v1662_v8 }
  0x2f   : > { %v1645_v16 = vld [vmem:[%s2350_s7 + $0xc0] sm:$0xf]  ;;  %v2046_v17 = vor.u32 %v2196_v15, %v2045_v14  ;;  %v2096_v18 = vld [vmem:[%s2350_s7 + $0xcc] sm:$0xf0]  ;;  %1123 = vmatpush.bf16.msra.mxu1 %v1790_v12 }
  0x30   : > { %v1773_v19 = vld [vmem:[%s2350_s7 + $0x1c0] sm:$0xf]  ;;  %v2128_v20 = vld [vmem:[%s2350_s7 + $0x1cc] sm:$0xf0]  ;;  %1137 = vmatpush.bf16.msra.mxu2 %v1918_v13  ;;  %v1646_v21 = vor.u32 %v2096_v18, %v1645_v16 }
  0x31   : > { %v1774_v22 = vor.u32 %v2128_v20, %v1773_v19  ;;  %v1901_v23 = vld [vmem:[%s2350_s7 + $0x2c0] sm:$0xf]  ;;  %v2160_v24 = vld [vmem:[%s2350_s7 + $0x2cc] sm:$0xf0]  ;;  %1151 = vmatpush.bf16.msra.mxu3 %v2046_v17 }
  0x32   : > { %v2029_v25 = vld [vmem:[%s2350_s7 + $0x3c0] sm:$0xf]  ;;  %v1902_v26 = vor.u32 %v2160_v24, %v1901_v23  ;;  %v2192_v27 = vld [vmem:[%s2350_s7 + $0x3cc] sm:$0xf0]  ;;  %1110 = vmatpush.bf16.msra.mxu0 %v1646_v21 }
  0x33   : > { %v1629_v28 = vld [vmem:[%s2350_s7 + $0xa0] sm:$0xf]  ;;  %v2092_v29 = vld [vmem:[%s2350_s7 + $0xac] sm:$0xf0]  ;;  %v2030_v30 = vor.u32 %v2192_v27, %v2029_v25  ;;  %1124 = vmatpush.bf16.msra.mxu1 %v1774_v22 }
  0x34   : > { %v1757_v31 = vld [vmem:[%s2350_s7 + $0x1a0] sm:$0xf]  ;;  %v2124_v32 = vld [vmem:[%s2350_s7 + $0x1ac] sm:$0xf0]  ;;  %v1630_v34 = vor.u32 %v2092_v29, %v1629_v28  ;;  %1138 = vmatpush.bf16.msra.mxu2 %v1902_v26 }
  0x35   : > { %v1885_v33 = vld [vmem:[%s2350_s7 + $0x2a0] sm:$0xf]  ;;  %v2156_v35 = vld [vmem:[%s2350_s7 + $0x2ac] sm:$0xf0]  ;;  %v1758_v38 = vor.u32 %v2124_v32, %v1757_v31  ;;  %1152 = vmatpush.bf16.msra.mxu3 %v2030_v30 }
  0x36   : > { %v2013_v36 = vld [vmem:[%s2350_s7 + $0x3a0] sm:$0xf]  ;;  %v2188_v37 = vld [vmem:[%s2350_s7 + $0x3ac] sm:$0xf0]  ;;  %v1886_v39 = vor.u32 %v2156_v35, %v1885_v33  ;;  %1111 = vmatpush.bf16.msra.mxu0 %v1630_v34  ;;  %v2098_v33 = vld [vmem:[%s2350_s7 + $0xe4] sm:$0xf] }
  0x37   : > { %v1613_v40 = vld [vmem:[%s2350_s7 + $0x80] sm:$0xf]  ;;  %v2088_v41 = vld [vmem:[%s2350_s7 + $0x8c] sm:$0xf0]  ;;  %v2014_v43 = vor.u32 %v2188_v37, %v2013_v36  ;;  %1125 = vmatpush.bf16.msra.mxu1 %v1758_v38  ;;  %v1663_v34 = vld [vmem:[%s2350_s7 + $0xf0] sm:$0xf0] }
  0x38   : > { %v1741_v42 = vld [vmem:[%s2350_s7 + $0x180] sm:$0xf]  ;;  %v2120_v44 = vld [vmem:[%s2350_s7 + $0x18c] sm:$0xf0]  ;;  %v1614_v49 = vor.u32 %v2088_v41, %v1613_v40  ;;  %1139 = vmatpush.bf16.msra.mxu2 %v1886_v39  ;;  %v2130_v35 = vld [vmem:[%s2350_s7 + $0x1e4] sm:$0xf] }
  0x39   : > { %v1869_v45 = vld [vmem:[%s2350_s7 + $0x280] sm:$0xf]  ;;  %v2152_v46 = vld [vmem:[%s2350_s7 + $0x28c] sm:$0xf0]  ;;  %v1742_v50 = vor.u32 %v2120_v44, %v1741_v42  ;;  %1153 = vmatpush.bf16.msra.mxu3 %v2014_v43  ;;  %v1791_v37 = vld [vmem:[%s2350_s7 + $0x1f0] sm:$0xf0] }
  0x3a   : > { %v1997_v47 = vld [vmem:[%s2350_s7 + $0x380] sm:$0xf]  ;;  %v2184_v48 = vld [vmem:[%s2350_s7 + $0x38c] sm:$0xf0]  ;;  %v1870_v51 = vor.u32 %v2152_v46, %v1869_v45  ;;  %1112 = vmatpush.bf16.msra.mxu0 %v1614_v49  ;;  %v2162_v38 = vld [vmem:[%s2350_s7 + $0x2e4] sm:$0xf]  ;;  %v1666_v45 = vor.u32 %v2098_v33, %v1663_v34  ;;  %v1794_v46 = vor.u32 %v2130_v35, %v1791_v37 }
  0x3b   : > { %v1597_v52 = vld [vmem:[%s2350_s7 + $0x60] sm:$0xf]  ;;  %v2084_v53 = vld [vmem:[%s2350_s7 + $0x6c] sm:$0xf0]  ;;  %v1998_v55 = vor.u32 %v2184_v48, %v1997_v47  ;;  %1126 = vmatpush.bf16.msra.mxu1 %v1742_v50  ;;  %v1919_v39 = vld [vmem:[%s2350_s7 + $0x2f0] sm:$0xf0] }
  0x3c   : > { %v1725_v54 = vld [vmem:[%s2350_s7 + $0x160] sm:$0xf]  ;;  %v2116_v56 = vld [vmem:[%s2350_s7 + $0x16c] sm:$0xf0]  ;;  %v1598_v61 = vor.u32 %v2084_v53, %v1597_v52  ;;  %1140 = vmatpush.bf16.msra.mxu2 %v1870_v51  ;;  %v2194_v42 = vld [vmem:[%s2350_s7 + $0x3e4] sm:$0xf]  ;;  %v1922_v47 = vor.u32 %v2162_v38, %v1919_v39 }
  0x3d   : > { %v1853_v57 = vld [vmem:[%s2350_s7 + $0x260] sm:$0xf]  ;;  %v2148_v58 = vld [vmem:[%s2350_s7 + $0x26c] sm:$0xf0]  ;;  %v1726_v62 = vor.u32 %v2116_v56, %v1725_v54  ;;  %1154 = vmatpush.bf16.msra.mxu3 %v1998_v55  ;;  %v2047_v43 = vld [vmem:[%s2350_s7 + $0x3f0] sm:$0xf0] }
  0x3e   : > { %v1981_v59 = vld [vmem:[%s2350_s7 + $0x360] sm:$0xf]  ;;  %v2180_v60 = vld [vmem:[%s2350_s7 + $0x36c] sm:$0xf0]  ;;  %v1854_v63 = vor.u32 %v2148_v58, %v1853_v57  ;;  %1113 = vmatpush.bf16.msra.mxu0 %v1598_v61  ;;  %v2094_v48 = vld [vmem:[%s2350_s7 + $0xc4] sm:$0xf]  ;;  %v2050_v51 = vor.u32 %v2194_v42, %v2047_v43 }
  0x3f   : > { %v1581_v0 = vld [vmem:[%s2350_s7 + $0x40] sm:$0xf]  ;;  %v2080_v1 = vld [vmem:[%s2350_s7 + $0x4c] sm:$0xf0]  ;;  %v1982_v3 = vor.u32 %v2180_v60, %v1981_v59  ;;  %1127 = vmatpush.bf16.msra.mxu1 %v1726_v62  ;;  %v1647_v49 = vld [vmem:[%s2350_s7 + $0xd0] sm:$0xf0] }
  0x40   : > { %v1709_v2 = vld [vmem:[%s2350_s7 + $0x140] sm:$0xf]  ;;  %v2112_v4 = vld [vmem:[%s2350_s7 + $0x14c] sm:$0xf0]  ;;  %v1582_v9 = vor.u32 %v2080_v1, %v1581_v0  ;;  %1141 = vmatpush.bf16.msra.mxu2 %v1854_v63  ;;  %v2126_v50 = vld [vmem:[%s2350_s7 + $0x1c4] sm:$0xf]  ;;  %v1650_v57 = vor.u32 %v2094_v48, %v1647_v49 }
  0x41   : > { %v1837_v5 = vld [vmem:[%s2350_s7 + $0x240] sm:$0xf]  ;;  %v2144_v6 = vld [vmem:[%s2350_s7 + $0x24c] sm:$0xf0]  ;;  %v1710_v10 = vor.u32 %v2112_v4, %v1709_v2  ;;  %1155 = vmatpush.bf16.msra.mxu3 %v1982_v3  ;;  %v1775_v52 = vld [vmem:[%s2350_s7 + $0x1d0] sm:$0xf0] }
  0x42   : > { %v1965_v7 = vld [vmem:[%s2350_s7 + $0x340] sm:$0xf]  ;;  %v2176_v8 = vld [vmem:[%s2350_s7 + $0x34c] sm:$0xf0]  ;;  %v1838_v11 = vor.u32 %v2144_v6, %v1837_v5  ;;  %1114 = vmatpush.bf16.msra.mxu0 %v1582_v9  ;;  %v2158_v53 = vld [vmem:[%s2350_s7 + $0x2c4] sm:$0xf]  ;;  %v1778_v58 = vor.u32 %v2126_v50, %v1775_v52 }
  0x43   : > { %v1565_v12 = vld [vmem:[%s2350_s7 + $0x20] sm:$0xf]  ;;  %v2076_v13 = vld [vmem:[%s2350_s7 + $0x2c] sm:$0xf0]  ;;  %v1966_v15 = vor.u32 %v2176_v8, %v1965_v7  ;;  %1128 = vmatpush.bf16.msra.mxu1 %v1710_v10  ;;  %v1903_v54 = vld [vmem:[%s2350_s7 + $0x2d0] sm:$0xf0] }
  0x44   : > { %v1693_v14 = vld [vmem:[%s2350_s7 + $0x120] sm:$0xf]  ;;  %v2108_v16 = vld [vmem:[%s2350_s7 + $0x12c] sm:$0xf0]  ;;  %v1566_v21 = vor.u32 %v2076_v13, %v1565_v12  ;;  %1142 = vmatpush.bf16.msra.mxu2 %v1838_v11  ;;  %v2190_v55 = vld [vmem:[%s2350_s7 + $0x3c4] sm:$0xf]  ;;  %v1906_v59 = vor.u32 %v2158_v53, %v1903_v54 }
  0x45   : > { %v1821_v17 = vld [vmem:[%s2350_s7 + $0x220] sm:$0xf]  ;;  %v2140_v18 = vld [vmem:[%s2350_s7 + $0x22c] sm:$0xf0]  ;;  %v1694_v24 = vor.u32 %v2108_v16, %v1693_v14  ;;  %1156 = vmatpush.bf16.msra.mxu3 %v1966_v15  ;;  %v2031_v56 = vld [vmem:[%s2350_s7 + $0x3d0] sm:$0xf0] }
  0x46   : > { %v1949_v19 = vld [vmem:[%s2350_s7 + $0x320] sm:$0xf]  ;;  %v2172_v20 = vld [vmem:[%s2350_s7 + $0x32c] sm:$0xf0]  ;;  %v1822_v25 = vor.u32 %v2140_v18, %v1821_v17  ;;  %1115 = vmatpush.bf16.msra.mxu0 %v1566_v21  ;;  %v2090_v60 = vld [vmem:[%s2350_s7 + $0xa4] sm:$0xf]  ;;  %v2034_v63 = vor.u32 %v2190_v55, %v2031_v56 }
  0x47   : > { %v1549_v22 = vld [vmem:[%s2350_s7] sm:$0xf]  ;;  %v2072_v23 = vld [vmem:[%s2350_s7 + $0xc] sm:$0xf0]  ;;  %v1950_v29 = vor.u32 %v2172_v20, %v1949_v19  ;;  %1129 = vmatpush.bf16.msra.mxu1 %v1694_v24  ;;  %v1631_v61 = vld [vmem:[%s2350_s7 + $0xb0] sm:$0xf0] }
  0x48   : > { %v1677_v26 = vld [vmem:[%s2350_s7 + $0x100] sm:$0xf]  ;;  %v2104_v27 = vld [vmem:[%s2350_s7 + $0x10c] sm:$0xf0]  ;;  %v1550_v36 = vor.u32 %v2072_v23, %v1549_v22  ;;  %1143 = vmatpush.bf16.msra.mxu2 %v1822_v25  ;;  %v2122_v62 = vld [vmem:[%s2350_s7 + $0x1a4] sm:$0xf]  ;;  %v1634_v6 = vor.u32 %v2090_v60, %v1631_v61 }
  0x49   : > { %v1805_v28 = vld [vmem:[%s2350_s7 + $0x200] sm:$0xf]  ;;  %v2136_v30 = vld [vmem:[%s2350_s7 + $0x20c] sm:$0xf0]  ;;  %v1678_v40 = vor.u32 %v2104_v27, %v1677_v26  ;;  %1157 = vmatpush.bf16.msra.mxu3 %v1950_v29  ;;  %v1759_v0 = vld [vmem:[%s2350_s7 + $0x1b0] sm:$0xf0] }
  0x4a   : > { %v1933_v31 = vld [vmem:[%s2350_s7 + $0x300] sm:$0xf]  ;;  %v2168_v32 = vld [vmem:[%s2350_s7 + $0x30c] sm:$0xf0]  ;;  %v1806_v41 = vor.u32 %v2136_v30, %v1805_v28  ;;  %1116 = vmatpush.bf16.msra.mxu0 %v1550_v36  ;;  %v2154_v1 = vld [vmem:[%s2350_s7 + $0x2a4] sm:$0xf]  ;;  %v1762_v10 = vor.u32 %v2122_v62, %v1759_v0 }
  0x4b   : > { %v1934_v44 = vor.u32 %v2168_v32, %v1933_v31  ;;  %1130 = vmatpush.bf16.msra.mxu1 %v1678_v40  ;;  %v1887_v2 = vld [vmem:[%s2350_s7 + $0x2b0] sm:$0xf0]  ;;  %v2186_v3 = vld [vmem:[%s2350_s7 + $0x3a4] sm:$0xf]  ;;  %v1541_v8 = vld [vmem:[%s2352_s8 + $0x8] sm:$0xf] }
  0x4c   : > { %1144 = vmatpush.bf16.msra.mxu2 %v1806_v41  ;;  %v2015_v4 = vld [vmem:[%s2350_s7 + $0x3b0] sm:$0xf0]  ;;  %v2086_v5 = vld [vmem:[%s2350_s7 + $0x84] sm:$0xf]  ;;  %v2069_v9 = vld [vmem:[%s2352_s8 + $0x14] sm:$0xf0]  ;;  %v1890_v11 = vor.u32 %v2154_v1, %v1887_v2 }
  0x4d   : > { %1158 = vmatpush.bf16.msra.mxu3 %v1934_v44  ;;  %v1615_v7 = vld [vmem:[%s2350_s7 + $0x90] sm:$0xf0]  ;;  %v2118_v12 = vld [vmem:[%s2350_s7 + $0x184] sm:$0xf]  ;;  %v2448_v13 = vor.u32 %v2069_v9, %v1541_v8  ;;  %v2067_v14 = vld [vmem:[%s2352_s8 + $0xc] sm:$0xf]  ;;  %v2018_v16 = vor.u32 %v2186_v3, %v2015_v4 }
  0x4e   : > { %1165 = vmatpush.bf16.msrb.mxu0 %v1666_v45  ;;  %v1543_v15 = vld [vmem:[%s2352_s8 + $0x18] sm:$0xf0]  ;;  %v1743_v17 = vld [vmem:[%s2350_s7 + $0x190] sm:$0xf0]  ;;  %v2150_v18 = vld [vmem:[%s2350_s7 + $0x284] sm:$0xf]  ;;  %v1618_v24 = vor.u32 %v2086_v5, %v1615_v7 }
  0x4f   : > { %1179 = vmatpush.bf16.msrb.mxu1 %v1794_v46  ;;  %v1871_v19 = vld [vmem:[%s2350_s7 + $0x290] sm:$0xf0]  ;;  %v2455_v20 = vor.u32 %v2067_v14, %v1543_v15  ;;  %v2182_v21 = vld [vmem:[%s2350_s7 + $0x384] sm:$0xf]  ;;  %1145 = vmatmul.bf16.vlgmr.msra.gmra.mxu2 %v2448_v13  ;;  %v1533_v26 = vld [vmem:[%s2352_s8] sm:$0xf]  ;;  %v1746_v28 = vor.u32 %v2118_v12, %v1743_v17 }
  0x50   : > { %1193 = vmatpush.bf16.msrb.mxu2 %v1922_v47  ;;  %v1999_v22 = vld [vmem:[%s2350_s7 + $0x390] sm:$0xf0]  ;;  %v2082_v23 = vld [vmem:[%s2350_s7 + $0x64] sm:$0xf]  ;;  %v2068_v27 = vld [vmem:[%s2352_s8 + $0xc] sm:$0xf0]  ;;  %v1874_v29 = vor.u32 %v2150_v18, %v1871_v19 }
  0x51   : > { %1207 = vmatpush.bf16.msrb.mxu3 %v2050_v51  ;;  %v1599_v25 = vld [vmem:[%s2350_s7 + $0x70] sm:$0xf0]  ;;  %v2114_v30 = vld [vmem:[%s2350_s7 + $0x164] sm:$0xf]  ;;  %v2466_v31 = vor.u32 %v2068_v27, %v1533_v26  ;;  %v2002_v34 = vor.u32 %v2182_v21, %v1999_v22  ;;  %v1669_v14 = vld [vmem:[%s2350_s7 + $0xe8] sm:$0xf] }
  0x52   : > { %1166 = vmatpush.bf16.msrb.mxu0 %v1650_v57  ;;  %1159 = vmatmul.bf16.vlgmr.msra.gmra.mxu3 %v2455_v20  ;;  %v2066_v32 = vld [vmem:[%s2352_s8 + $0x4] sm:$0xf]  ;;  %v1535_v33 = vld [vmem:[%s2352_s8 + $0x10] sm:$0xf0]  ;;  %v1602_v41 = vor.u32 %v2082_v23, %v1599_v25  ;;  %v2101_v15 = vld [vmem:[%s2350_s7 + $0xf4] sm:$0xf0] }
  0x53   : > { %1180 = vmatpush.bf16.msrb.mxu1 %v1778_v58  ;;  %v1727_v35 = vld [vmem:[%s2350_s7 + $0x170] sm:$0xf0]  ;;  %v2146_v36 = vld [vmem:[%s2350_s7 + $0x264] sm:$0xf]  ;;  %v2473_v38 = vor.u32 %v2066_v32, %v1535_v33  ;;  %1117 = vmatmul.bf16.vlgmr.msra.gmra.mxu0 %v2466_v31  ;;  %v2133_v18 = vld [vmem:[%s2350_s7 + $0x1f4] sm:$0xf0]  ;;  %v1670_v27 = vor.u32 %v2101_v15, %v1669_v14 }
  0x54   : > { %1194 = vmatpush.bf16.msrb.mxu2 %v1906_v59  ;;  %v1855_v37 = vld [vmem:[%s2350_s7 + $0x270] sm:$0xf0]  ;;  %v2178_v39 = vld [vmem:[%s2350_s7 + $0x364] sm:$0xf]  ;;  %v1730_v42 = vor.u32 %v2114_v30, %v1727_v35  ;;  %v1925_v19 = vld [vmem:[%s2350_s7 + $0x2e8] sm:$0xf] }
  0x55   : > { %1208 = vmatpush.bf16.msrb.mxu3 %v2034_v63  ;;  %v1983_v40 = vld [vmem:[%s2350_s7 + $0x370] sm:$0xf0]  ;;  %1131 = vmatmul.bf16.vlgmr.msra.gmra.mxu1 %v2473_v38  ;;  %v1858_v43 = vor.u32 %v2146_v36, %v1855_v37  ;;  %v2078_v44 = vld [vmem:[%s2350_s7 + $0x44] sm:$0xf]  ;;  %v2165_v21 = vld [vmem:[%s2350_s7 + $0x2f4] sm:$0xf0] }
  0x56   : > { %1167 = vmatpush.bf16.msrb.mxu0 %v1634_v6  ;;  %v1583_v45 = vld [vmem:[%s2350_s7 + $0x50] sm:$0xf0]  ;;  %v2110_v46 = vld [vmem:[%s2350_s7 + $0x144] sm:$0xf]  ;;  %v1986_v47 = vor.u32 %v2178_v39, %v1983_v40  ;;  %v2197_v25 = vld [vmem:[%s2350_s7 + $0x3f4] sm:$0xf0] }
  0x57   : > { %1181 = vmatpush.bf16.msrb.mxu1 %v1762_v10  ;;  %v1711_v48 = vld [vmem:[%s2350_s7 + $0x150] sm:$0xf0]  ;;  %v2142_v49 = vld [vmem:[%s2350_s7 + $0x244] sm:$0xf]  ;;  %v1586_v53 = vor.u32 %v2078_v44, %v1583_v45  ;;  %v1653_v30 = vld [vmem:[%s2350_s7 + $0xc8] sm:$0xf] }
  0x58   : > { %1195 = vmatpush.bf16.msrb.mxu2 %v1890_v11  ;;  %v1839_v50 = vld [vmem:[%s2350_s7 + $0x250] sm:$0xf0]  ;;  %v2174_v51 = vld [vmem:[%s2350_s7 + $0x344] sm:$0xf]  ;;  %v1714_v54 = vor.u32 %v2110_v46, %v1711_v48  ;;  %v2097_v32 = vld [vmem:[%s2350_s7 + $0xd4] sm:$0xf0] }
  0x59   : > { %1209 = vmatpush.bf16.msrb.mxu3 %v2018_v16  ;;  %v1967_v52 = vld [vmem:[%s2350_s7 + $0x350] sm:$0xf0]  ;;  %v1842_v55 = vor.u32 %v2142_v49, %v1839_v50  ;;  %v2074_v56 = vld [vmem:[%s2350_s7 + $0x24] sm:$0xf]  ;;  %v1797_v16 = vld [vmem:[%s2350_s7 + $0x1e8] sm:$0xf] }
  0x5a   : > { %1168 = vmatpush.bf16.msrb.mxu0 %v1618_v24  ;;  %v1567_v57 = vld [vmem:[%s2350_s7 + $0x30] sm:$0xf0]  ;;  %v2106_v58 = vld [vmem:[%s2350_s7 + $0x124] sm:$0xf]  ;;  %v1970_v59 = vor.u32 %v2174_v51, %v1967_v52  ;;  %v2053_v24 = vld [vmem:[%s2350_s7 + $0x3e8] sm:$0xf] }
  0x5b   : > { %1182 = vmatpush.bf16.msrb.mxu1 %v1746_v28  ;;  %v1695_v60 = vld [vmem:[%s2350_s7 + $0x130] sm:$0xf0]  ;;  %v2138_v61 = vld [vmem:[%s2350_s7 + $0x224] sm:$0xf]  ;;  %v1570_v1 = vor.u32 %v2074_v56, %v1567_v57  ;;  %v1798_v28 = vor.u32 %v2133_v18, %v1797_v16  ;;  %v1781_v33 = vld [vmem:[%s2350_s7 + $0x1c8] sm:$0xf] }
  0x5c   : > { %1196 = vmatpush.bf16.msrb.mxu2 %v1874_v29  ;;  %v1823_v62 = vld [vmem:[%s2350_s7 + $0x230] sm:$0xf0]  ;;  %v2170_v63 = vld [vmem:[%s2350_s7 + $0x324] sm:$0xf]  ;;  %v1698_v4 = vor.u32 %v2106_v58, %v1695_v60  ;;  %v1926_v29 = vor.u32 %v2165_v21, %v1925_v19  ;;  %v2129_v35 = vld [vmem:[%s2350_s7 + $0x1d4] sm:$0xf0] }
  0x5d   : > { %1210 = vmatpush.bf16.msrb.mxu3 %v2002_v34  ;;  %v1951_v0 = vld [vmem:[%s2350_s7 + $0x330] sm:$0xf0]  ;;  %v2070_v2 = vld [vmem:[%s2350_s7 + $0x4] sm:$0xf]  ;;  %v1826_v5 = vor.u32 %v2138_v61, %v1823_v62  ;;  %v2054_v34 = vor.u32 %v2197_v25, %v2053_v24  ;;  %v1909_v36 = vld [vmem:[%s2350_s7 + $0x2c8] sm:$0xf] }
  0x5e   : > { %1169 = vmatpush.bf16.msrb.mxu0 %v1602_v41  ;;  %v1551_v3 = vld [vmem:[%s2350_s7 + $0x10] sm:$0xf0]  ;;  %v2102_v6 = vld [vmem:[%s2350_s7 + $0x104] sm:$0xf]  ;;  %v1954_v9 = vor.u32 %v2170_v63, %v1951_v0  ;;  %v2161_v37 = vld [vmem:[%s2350_s7 + $0x2d4] sm:$0xf0]  ;;  %v1654_v41 = vor.u32 %v2097_v32, %v1653_v30 }
  0x5f   : > { %1183 = vmatpush.bf16.msrb.mxu1 %v1730_v42  ;;  %v1679_v7 = vld [vmem:[%s2350_s7 + $0x110] sm:$0xf0]  ;;  %v2134_v8 = vld [vmem:[%s2350_s7 + $0x204] sm:$0xf]  ;;  %v1554_v17 = vor.u32 %v2070_v2, %v1551_v3  ;;  %v2037_v39 = vld [vmem:[%s2350_s7 + $0x3c8] sm:$0xf]  ;;  %v1782_v42 = vor.u32 %v2129_v35, %v1781_v33 }
  0x60   : > { %1197 = vmatpush.bf16.msrb.mxu2 %v1858_v43  ;;  %v1807_v10 = vld [vmem:[%s2350_s7 + $0x210] sm:$0xf0]  ;;  %v2166_v11 = vld [vmem:[%s2350_s7 + $0x304] sm:$0xf]  ;;  %v1682_v22 = vor.u32 %v2102_v6, %v1679_v7  ;;  %v2193_v40 = vld [vmem:[%s2350_s7 + $0x3d4] sm:$0xf0]  ;;  %v1910_v43 = vor.u32 %v2161_v37, %v1909_v36 }
  0x61   : > { %1211 = vmatpush.bf16.msrb.mxu3 %v1986_v47  ;;  %v1935_v12 = vld [vmem:[%s2350_s7 + $0x310] sm:$0xf0]  ;;  %v1810_v23 = vor.u32 %v2134_v8, %v1807_v10  ;;  %v1637_v44 = vld [vmem:[%s2350_s7 + $0xa8] sm:$0xf]  ;;  %v2093_v45 = vld [vmem:[%s2350_s7 + $0xb4] sm:$0xf0]  ;;  %v2038_v47 = vor.u32 %v2193_v40, %v2037_v39 }
  0x62   : > { %1170 = vmatpush.bf16.msrb.mxu0 %v1586_v53  ;;  %v1938_v26 = vor.u32 %v2166_v11, %v1935_v12  ;;  %v1765_v46 = vld [vmem:[%s2350_s7 + $0x1a8] sm:$0xf]  ;;  %v2125_v48 = vld [vmem:[%s2350_s7 + $0x1b4] sm:$0xf0]  ;;  %v1638_v53 = vor.u32 %v2093_v45, %v1637_v44 }
  0x63   : > { %1184 = vmatpush.bf16.msrb.mxu1 %v1714_v54  ;;  %v1893_v49 = vld [vmem:[%s2350_s7 + $0x2a8] sm:$0xf]  ;;  %v2157_v50 = vld [vmem:[%s2350_s7 + $0x2b4] sm:$0xf0]  ;;  %v1766_v54 = vor.u32 %v2125_v48, %v1765_v46 }
  0x64   : > { %1198 = vmatpush.bf16.msrb.mxu2 %v1842_v55  ;;  %v2021_v51 = vld [vmem:[%s2350_s7 + $0x3a8] sm:$0xf]  ;;  %v2189_v52 = vld [vmem:[%s2350_s7 + $0x3b4] sm:$0xf0]  ;;  %v1894_v55 = vor.u32 %v2157_v50, %v1893_v49 }
  0x65   : > { %1212 = vmatpush.bf16.msrb.mxu3 %v1970_v59  ;;  %v1621_v56 = vld [vmem:[%s2350_s7 + $0x88] sm:$0xf]  ;;  %v2089_v57 = vld [vmem:[%s2350_s7 + $0x94] sm:$0xf0]  ;;  %v2022_v59 = vor.u32 %v2189_v52, %v2021_v51 }
  0x66   : > { %1171 = vmatpush.bf16.msrb.mxu0 %v1570_v1  ;;  %v1749_v58 = vld [vmem:[%s2350_s7 + $0x188] sm:$0xf]  ;;  %v2121_v60 = vld [vmem:[%s2350_s7 + $0x194] sm:$0xf0]  ;;  %v1622_v1 = vor.u32 %v2089_v57, %v1621_v56  ;;  %v1799_v57 = vld [vmem:[%s2350_s7 + $0x1f8] sm:$0xf0] }
  0x67   : > { %1185 = vmatpush.bf16.msrb.mxu1 %v1698_v4  ;;  %v1877_v61 = vld [vmem:[%s2350_s7 + $0x288] sm:$0xf]  ;;  %v2153_v62 = vld [vmem:[%s2350_s7 + $0x294] sm:$0xf0]  ;;  %v1750_v2 = vor.u32 %v2121_v60, %v1749_v58  ;;  %v2163_v58 = vld [vmem:[%s2350_s7 + $0x2ec] sm:$0xf] }
  0x68   : > { %1199 = vmatpush.bf16.msrb.mxu2 %v1826_v5  ;;  %v2005_v63 = vld [vmem:[%s2350_s7 + $0x388] sm:$0xf]  ;;  %v2185_v0 = vld [vmem:[%s2350_s7 + $0x394] sm:$0xf0]  ;;  %v1878_v3 = vor.u32 %v2153_v62, %v1877_v61  ;;  %v2195_v62 = vld [vmem:[%s2350_s7 + $0x3ec] sm:$0xf] }
  0x69   : > { %1213 = vmatpush.bf16.msrb.mxu3 %v1954_v9  ;;  %v1605_v4 = vld [vmem:[%s2350_s7 + $0x68] sm:$0xf]  ;;  %v2085_v5 = vld [vmem:[%s2350_s7 + $0x74] sm:$0xf0]  ;;  %v2006_v7 = vor.u32 %v2185_v0, %v2005_v63  ;;  %v2055_v63 = vld [vmem:[%s2350_s7 + $0x3f8] sm:$0xf0] }
  0x6a   : > { %1172 = vmatpush.bf16.msrb.mxu0 %v1554_v17  ;;  %v1733_v6 = vld [vmem:[%s2350_s7 + $0x168] sm:$0xf]  ;;  %v2117_v8 = vld [vmem:[%s2350_s7 + $0x174] sm:$0xf0]  ;;  %v1606_v14 = vor.u32 %v2085_v5, %v1605_v4  ;;  %v2095_v4 = vld [vmem:[%s2350_s7 + $0xcc] sm:$0xf] }
  0x6b   : > { %1186 = vmatpush.bf16.msrb.mxu1 %v1682_v22  ;;  %v1861_v9 = vld [vmem:[%s2350_s7 + $0x268] sm:$0xf]  ;;  %v2149_v10 = vld [vmem:[%s2350_s7 + $0x274] sm:$0xf0]  ;;  %v1734_v15 = vor.u32 %v2117_v8, %v1733_v6  ;;  %v1655_v5 = vld [vmem:[%s2350_s7 + $0xd8] sm:$0xf0] }
  0x6c   : > { %1200 = vmatpush.bf16.msrb.mxu2 %v1810_v23  ;;  %v1989_v11 = vld [vmem:[%s2350_s7 + $0x368] sm:$0xf]  ;;  %v2181_v12 = vld [vmem:[%s2350_s7 + $0x374] sm:$0xf0]  ;;  %v1862_v16 = vor.u32 %v2149_v10, %v1861_v9  ;;  %v2127_v6 = vld [vmem:[%s2350_s7 + $0x1cc] sm:$0xf] }
  0x6d   : > { %1214 = vmatpush.bf16.msrb.mxu3 %v1938_v26  ;;  %1173 = vmatmul.bf16.vlgmr.msrb.gmra.mxu0 %v2466_v31  ;;  %v1589_v17 = vld [vmem:[%s2350_s7 + $0x48] sm:$0xf]  ;;  %v2081_v18 = vld [vmem:[%s2350_s7 + $0x54] sm:$0xf0]  ;;  %v1990_v21 = vor.u32 %v2181_v12, %v1989_v11  ;;  %v1783_v8 = vld [vmem:[%s2350_s7 + $0x1d8] sm:$0xf0] }
  0x6e   : > { %1221 = vmatpush.bf16.msra.mxu0 %v1670_v27  ;;  %1187 = vmatmul.bf16.vlgmr.msrb.gmra.mxu1 %v2473_v38  ;;  %v1717_v19 = vld [vmem:[%s2350_s7 + $0x148] sm:$0xf]  ;;  %v2113_v22 = vld [vmem:[%s2350_s7 + $0x154] sm:$0xf0]  ;;  %v1590_v27 = vor.u32 %v2081_v18, %v1589_v17  ;;  %v2159_v9 = vld [vmem:[%s2350_s7 + $0x2cc] sm:$0xf] }
  0x6f   : > { %1235 = vmatpush.bf16.msra.mxu1 %v1798_v28  ;;  %1201 = vmatmul.bf16.vlgmr.msrb.gmra.mxu2 %v2448_v13  ;;  %v1845_v23 = vld [vmem:[%s2350_s7 + $0x248] sm:$0xf]  ;;  %v2145_v24 = vld [vmem:[%s2350_s7 + $0x254] sm:$0xf0]  ;;  %v1718_v28 = vor.u32 %v2113_v22, %v1717_v19  ;;  %v1911_v10 = vld [vmem:[%s2350_s7 + $0x2d8] sm:$0xf0] }
  0x70   : > { %1249 = vmatpush.bf16.msra.mxu2 %v1926_v29  ;;  %1215 = vmatmul.bf16.vlgmr.msrb.gmra.mxu3 %v2455_v20  ;;  %v1973_v25 = vld [vmem:[%s2350_s7 + $0x348] sm:$0xf]  ;;  %v2177_v26 = vld [vmem:[%s2350_s7 + $0x354] sm:$0xf0]  ;;  %v1846_v29 = vor.u32 %v2145_v24, %v1845_v23  ;;  %v2191_v11 = vld [vmem:[%s2350_s7 + $0x3cc] sm:$0xf] }
  0x71   : > { %1263 = vmatpush.bf16.msra.mxu3 %v2054_v34  ;;  %v1573_v30 = vld [vmem:[%s2350_s7 + $0x28] sm:$0xf]  ;;  %v2077_v32 = vld [vmem:[%s2350_s7 + $0x34] sm:$0xf0]  ;;  %v1974_v34 = vor.u32 %v2177_v26, %v1973_v25  ;;  %v2039_v12 = vld [vmem:[%s2350_s7 + $0x3d8] sm:$0xf0] }
  0x72   : > { %1222 = vmatpush.bf16.msra.mxu0 %v1654_v41  ;;  %v1701_v33 = vld [vmem:[%s2350_s7 + $0x128] sm:$0xf]  ;;  %v2109_v35 = vld [vmem:[%s2350_s7 + $0x134] sm:$0xf0]  ;;  %v1574_v41 = vor.u32 %v2077_v32, %v1573_v30  ;;  %v2091_v17 = vld [vmem:[%s2350_s7 + $0xac] sm:$0xf] }
  0x73   : > { %1236 = vmatpush.bf16.msra.mxu1 %v1782_v42  ;;  %v1829_v36 = vld [vmem:[%s2350_s7 + $0x228] sm:$0xf]  ;;  %v2141_v37 = vld [vmem:[%s2350_s7 + $0x234] sm:$0xf0]  ;;  %v1702_v44 = vor.u32 %v2109_v35, %v1701_v33  ;;  %v1639_v18 = vld [vmem:[%s2350_s7 + $0xb8] sm:$0xf0] }
  0x74   : > { %1250 = vmatpush.bf16.msra.mxu2 %v1910_v43  ;;  %v1957_v39 = vld [vmem:[%s2350_s7 + $0x328] sm:$0xf]  ;;  %v2173_v40 = vld [vmem:[%s2350_s7 + $0x334] sm:$0xf0]  ;;  %v1830_v45 = vor.u32 %v2141_v37, %v1829_v36  ;;  %v2123_v19 = vld [vmem:[%s2350_s7 + $0x1ac] sm:$0xf] }
  0x75   : > { %1264 = vmatpush.bf16.msra.mxu3 %v2038_v47  ;;  %v1557_v42 = vld [vmem:[%s2350_s7 + $0x8] sm:$0xf]  ;;  %v2073_v43 = vld [vmem:[%s2350_s7 + $0x14] sm:$0xf0]  ;;  %v1958_v49 = vor.u32 %v2173_v40, %v1957_v39  ;;  %v1767_v22 = vld [vmem:[%s2350_s7 + $0x1b8] sm:$0xf0] }
  0x76   : > { %1223 = vmatpush.bf16.msra.mxu0 %v1638_v53  ;;  %v1685_v46 = vld [vmem:[%s2350_s7 + $0x108] sm:$0xf]  ;;  %v2105_v47 = vld [vmem:[%s2350_s7 + $0x114] sm:$0xf0]  ;;  %v2099_v53 = vld [vmem:[%s2350_s7 + $0xec] sm:$0xf]  ;;  %v1558_v56 = vor.u32 %v2073_v43, %v1557_v42 }
  0x77   : > { %1237 = vmatpush.bf16.msra.mxu1 %v1766_v54  ;;  %v1813_v48 = vld [vmem:[%s2350_s7 + $0x208] sm:$0xf]  ;;  %v2137_v50 = vld [vmem:[%s2350_s7 + $0x214] sm:$0xf0]  ;;  %v1671_v54 = vld [vmem:[%s2350_s7 + $0xf8] sm:$0xf0]  ;;  %v1686_v60 = vor.u32 %v2105_v47, %v1685_v46 }
  0x78   : > { %1251 = vmatpush.bf16.msra.mxu2 %v1894_v55  ;;  %v1941_v51 = vld [vmem:[%s2350_s7 + $0x308] sm:$0xf]  ;;  %v2169_v52 = vld [vmem:[%s2350_s7 + $0x314] sm:$0xf0]  ;;  %v2131_v55 = vld [vmem:[%s2350_s7 + $0x1ec] sm:$0xf]  ;;  %v1814_v61 = vor.u32 %v2137_v50, %v1813_v48 }
  0x79   : > { %1265 = vmatpush.bf16.msra.mxu3 %v2022_v59  ;;  %v1927_v59 = vld [vmem:[%s2350_s7 + $0x2f8] sm:$0xf0]  ;;  %v1942_v0 = vor.u32 %v2169_v52, %v1941_v51  ;;  %v2155_v23 = vld [vmem:[%s2350_s7 + $0x2ac] sm:$0xf] }
  0x7a   : > { %1224 = vmatpush.bf16.msra.mxu0 %v1622_v1  ;;  %v1674_v1 = vor.u32 %v2099_v53, %v1671_v54  ;;  %v1895_v24 = vld [vmem:[%s2350_s7 + $0x2b8] sm:$0xf0]  ;;  %v2187_v25 = vld [vmem:[%s2350_s7 + $0x3ac] sm:$0xf] }
  0x7b   : > { %1238 = vmatpush.bf16.msra.mxu1 %v1750_v2  ;;  %v1802_v2 = vor.u32 %v2131_v55, %v1799_v57  ;;  %v2023_v26 = vld [vmem:[%s2350_s7 + $0x3b8] sm:$0xf0]  ;;  %v2087_v30 = vld [vmem:[%s2350_s7 + $0x8c] sm:$0xf] }
  0x7c   : > { %1252 = vmatpush.bf16.msra.mxu2 %v1878_v3  ;;  %v1930_v3 = vor.u32 %v2163_v58, %v1927_v59  ;;  %v1623_v32 = vld [vmem:[%s2350_s7 + $0x98] sm:$0xf0]  ;;  %v2119_v33 = vld [vmem:[%s2350_s7 + $0x18c] sm:$0xf] }
  0x7d   : > { %1266 = vmatpush.bf16.msra.mxu3 %v2006_v7  ;;  %v2058_v7 = vor.u32 %v2195_v62, %v2055_v63  ;;  %v1751_v35 = vld [vmem:[%s2350_s7 + $0x198] sm:$0xf0]  ;;  %v2151_v36 = vld [vmem:[%s2350_s7 + $0x28c] sm:$0xf] }
  0x7e   : > { %1225 = vmatpush.bf16.msra.mxu0 %v1606_v14  ;;  %v1658_v14 = vor.u32 %v2095_v4, %v1655_v5  ;;  %v1879_v37 = vld [vmem:[%s2350_s7 + $0x298] sm:$0xf0]  ;;  %v2183_v39 = vld [vmem:[%s2350_s7 + $0x38c] sm:$0xf]  ;;  %v1754_v42 = vor.u32 %v2119_v33, %v1751_v35 }
  0x7f   : > { %1239 = vmatpush.bf16.msra.mxu1 %v1734_v15  ;;  %v1786_v15 = vor.u32 %v2127_v6, %v1783_v8  ;;  %v2007_v40 = vld [vmem:[%s2350_s7 + $0x398] sm:$0xf0]  ;;  %v1882_v43 = vor.u32 %v2151_v36, %v1879_v37  ;;  %v2115_v46 = vld [vmem:[%s2350_s7 + $0x16c] sm:$0xf] }
  0x80   : > { %1253 = vmatpush.bf16.msra.mxu2 %v1862_v16  ;;  %v1914_v16 = vor.u32 %v2159_v9, %v1911_v10  ;;  %v2010_v47 = vor.u32 %v2183_v39, %v2007_v40  ;;  %v1735_v48 = vld [vmem:[%s2350_s7 + $0x178] sm:$0xf0]  ;;  %v2179_v51 = vld [vmem:[%s2350_s7 + $0x36c] sm:$0xf]  ;;  %v309_v39 = vld [vmem:[#allocation2 + $0x30] sm:$0xff] }
  0x81   : > { %1267 = vmatpush.bf16.msra.mxu3 %v1990_v21  ;;  %v2042_v21 = vor.u32 %v2191_v11, %v2039_v12  ;;  %v1863_v50 = vld [vmem:[%s2350_s7 + $0x278] sm:$0xf0]  ;;  %v1738_v54 = vor.u32 %v2115_v46, %v1735_v48  ;;  %v2111_v58 = vld [vmem:[%s2350_s7 + $0x14c] sm:$0xf] }
  0x82   : > { %1226 = vmatpush.bf16.msra.mxu0 %v1590_v27  ;;  %v1642_v27 = vor.u32 %v2091_v17, %v1639_v18  ;;  %v1991_v52 = vld [vmem:[%s2350_s7 + $0x378] sm:$0xf0]  ;;  %v2175_v63 = vld [vmem:[%s2350_s7 + $0x34c] sm:$0xf] }
  0x83   : > { %1240 = vmatpush.bf16.msra.mxu1 %v1718_v28  ;;  %v1770_v28 = vor.u32 %v2123_v19, %v1767_v22  ;;  %v1591_v57 = vld [vmem:[%s2350_s7 + $0x58] sm:$0xf0]  ;;  %v1994_v59 = vor.u32 %v2179_v51, %v1991_v52  ;;  %v2075_v4 = vld [vmem:[%s2350_s7 + $0x2c] sm:$0xf] }
  0x84   : > { %1254 = vmatpush.bf16.msra.mxu2 %v1846_v29  ;;  %v1898_v29 = vor.u32 %v2155_v23, %v1895_v24  ;;  %v1847_v62 = vld [vmem:[%s2350_s7 + $0x258] sm:$0xf0]  ;;  %v2107_v6 = vld [vmem:[%s2350_s7 + $0x12c] sm:$0xf] }
  0x85   : > { %1268 = vmatpush.bf16.msra.mxu3 %v1974_v34  ;;  %v2026_v34 = vor.u32 %v2187_v25, %v2023_v26  ;;  %v1575_v5 = vld [vmem:[%s2350_s7 + $0x38] sm:$0xf0]  ;;  %v2139_v9 = vld [vmem:[%s2350_s7 + $0x22c] sm:$0xf] }
  0x86   : > { %1227 = vmatpush.bf16.msra.mxu0 %v1574_v41  ;;  %v1626_v41 = vor.u32 %v2087_v30, %v1623_v32  ;;  %v1703_v8 = vld [vmem:[%s2350_s7 + $0x138] sm:$0xf0]  ;;  %v2171_v11 = vld [vmem:[%s2350_s7 + $0x32c] sm:$0xf] }
  0x87   : > { %1241 = vmatpush.bf16.msra.mxu1 %v1702_v44  ;;  %v2083_v44 = vld [vmem:[%s2350_s7 + $0x6c] sm:$0xf]  ;;  %v1831_v10 = vld [vmem:[%s2350_s7 + $0x238] sm:$0xf0] }
  0x88   : > { %1255 = vmatpush.bf16.msra.mxu2 %v1830_v45  ;;  %v1607_v45 = vld [vmem:[%s2350_s7 + $0x78] sm:$0xf0]  ;;  %v2071_v17 = vld [vmem:[%s2350_s7 + $0xc] sm:$0xf] }
  0x89   : > { %1269 = vmatpush.bf16.msra.mxu3 %v1958_v49  ;;  %v2147_v49 = vld [vmem:[%s2350_s7 + $0x26c] sm:$0xf]  ;;  %v1610_v53 = vor.u32 %v2083_v44, %v1607_v45  ;;  %v1959_v12 = vld [vmem:[%s2350_s7 + $0x338] sm:$0xf0] }
  0x8a   : > { %1228 = vmatpush.bf16.msra.mxu0 %v1558_v56  ;;  %v1866_v55 = vor.u32 %v2147_v49, %v1863_v50  ;;  %v2079_v56 = vld [vmem:[%s2350_s7 + $0x4c] sm:$0xf]  ;;  %v1559_v18 = vld [vmem:[%s2350_s7 + $0x18] sm:$0xf0] }
  0x8b   : > { %1242 = vmatpush.bf16.msra.mxu1 %v1686_v60  ;;  %v1719_v60 = vld [vmem:[%s2350_s7 + $0x158] sm:$0xf0]  ;;  %v2103_v19 = vld [vmem:[%s2350_s7 + $0x10c] sm:$0xf] }
  0x8c   : > { %1256 = vmatpush.bf16.msra.mxu2 %v1814_v61  ;;  %v2143_v61 = vld [vmem:[%s2350_s7 + $0x24c] sm:$0xf]  ;;  %v1687_v22 = vld [vmem:[%s2350_s7 + $0x118] sm:$0xf0] }
  0x8d   : > { %1270 = vmatpush.bf16.msra.mxu3 %v1942_v0  ;;  %1229 = vmatmul.bf16.vlgmr.msra.gmra.mxu0 %v2466_v31  ;;  %v1975_v0 = vld [vmem:[%s2350_s7 + $0x358] sm:$0xf0]  ;;  %v2135_v23 = vld [vmem:[%s2350_s7 + $0x20c] sm:$0xf] }
  0x8e   : > { %1277 = vmatpush.bf16.msrb.mxu0 %v1674_v1  ;;  %1243 = vmatmul.bf16.vlgmr.msra.gmra.mxu1 %v2473_v38  ;;  %v1594_v1 = vor.u32 %v2079_v56, %v1591_v57  ;;  %v1815_v24 = vld [vmem:[%s2350_s7 + $0x218] sm:$0xf0]  ;;  %v2167_v25 = vld [vmem:[%s2350_s7 + $0x30c] sm:$0xf] }
  0x8f   : > { %1291 = vmatpush.bf16.msrb.mxu1 %v1802_v2  ;;  %1257 = vmatmul.bf16.vlgmr.msra.gmra.mxu2 %v2448_v13  ;;  %v1722_v2 = vor.u32 %v2111_v58, %v1719_v60  ;;  %v1943_v26 = vld [vmem:[%s2350_s7 + $0x318] sm:$0xf0]  ;;  %v313_v46 = vld [vmem:[#allocation2 + $0x8] sm:$0xff] }
  0x90   : > { %1305 = vmatpush.bf16.msrb.mxu2 %v1930_v3  ;;  %1271 = vmatmul.bf16.vlgmr.msra.gmra.mxu3 %v2455_v20  ;;  %v1850_v3 = vor.u32 %v2143_v61, %v1847_v62  ;;  %v1946_v30 = vor.u32 %v2167_v25, %v1943_v26  ;;  %v314_v62 = vld [vmem:[#allocation2 + $0x20] sm:$0xff] }
  0x91   : > { %1319 = vmatpush.bf16.msrb.mxu3 %v2058_v7  ;;  %v1978_v7 = vor.u32 %v2175_v63, %v1975_v0 }
  0x92   : > { %1278 = vmatpush.bf16.msrb.mxu0 %v1658_v14  ;;  %v1578_v14 = vor.u32 %v2075_v4, %v1575_v5 }
  0x93   : > { %1292 = vmatpush.bf16.msrb.mxu1 %v1786_v15  ;;  %v1706_v15 = vor.u32 %v2107_v6, %v1703_v8 }
  0x94   : > { %1306 = vmatpush.bf16.msrb.mxu2 %v1914_v16  ;;  %v1834_v16 = vor.u32 %v2139_v9, %v1831_v10 }
  0x95   : > { %1320 = vmatpush.bf16.msrb.mxu3 %v2042_v21  ;;  %v1962_v21 = vor.u32 %v2171_v11, %v1959_v12 }
  0x96   : > { %1279 = vmatpush.bf16.msrb.mxu0 %v1642_v27  ;;  %v1562_v27 = vor.u32 %v2071_v17, %v1559_v18  ;;  %v315_v17 = vld [vmem:[#allocation2 + $0x28] sm:$0xff] }
  0x97   : > { %1293 = vmatpush.bf16.msrb.mxu1 %v1770_v28  ;;  %v1690_v28 = vor.u32 %v2103_v19, %v1687_v22 }
  0x98   : > { %1307 = vmatpush.bf16.msrb.mxu2 %v1898_v29  ;;  %v1818_v29 = vor.u32 %v2135_v23, %v1815_v24 }
  0x99   : > { %1321 = vmatpush.bf16.msrb.mxu3 %v2026_v34 }
  0x9a   : > { %1280 = vmatpush.bf16.msrb.mxu0 %v1626_v41 }
  0x9b   : > { %1294 = vmatpush.bf16.msrb.mxu1 %v1754_v42 }
  0x9c   : > { %1308 = vmatpush.bf16.msrb.mxu2 %v1882_v43 }
  0x9d   : > { %1322 = vmatpush.bf16.msrb.mxu3 %v2010_v47 }
  0x9e   : > { %1281 = vmatpush.bf16.msrb.mxu0 %v1610_v53  ;;  %v310_v53 = vld [vmem:[#allocation2] sm:$0xff] }
  0x9f   : > { %1295 = vmatpush.bf16.msrb.mxu1 %v1738_v54 }
  0xa0   : > { %1309 = vmatpush.bf16.msrb.mxu2 %v1866_v55 }
  0xa1   : > { %1323 = vmatpush.bf16.msrb.mxu3 %v1994_v59 }
  0xa2   : > { %1282 = vmatpush.bf16.msrb.mxu0 %v1594_v1 }
  0xa3   : > { %1296 = vmatpush.bf16.msrb.mxu1 %v1722_v2 }
  0xa4   : > { %1310 = vmatpush.bf16.msrb.mxu2 %v1850_v3 }
  0xa5   : > { %1324 = vmatpush.bf16.msrb.mxu3 %v1978_v7  ;;  %v311_v7 = vld [vmem:[#allocation2 + $0x18] sm:$0xff] }
  0xa6   : > { %1283 = vmatpush.bf16.msrb.mxu0 %v1578_v14 }
  0xa7   : > { %1297 = vmatpush.bf16.msrb.mxu1 %v1706_v15 }
  0xa8   : > { %1311 = vmatpush.bf16.msrb.mxu2 %v1834_v16 }
  0xa9   : > { %1325 = vmatpush.bf16.msrb.mxu3 %v1962_v21 }
  0xaa   : > { %1284 = vmatpush.bf16.msrb.mxu0 %v1562_v27  ;;  %v312_v27 = vld [vmem:[#allocation2 + $0x10] sm:$0xff] }
  0xab   : > { %1298 = vmatpush.bf16.msrb.mxu1 %v1690_v28 }
  0xac   : > { %1312 = vmatpush.bf16.msrb.mxu2 %v1818_v29 }
  0xad   : > { %1326 = vmatpush.bf16.msrb.mxu3 %v1946_v30  ;;  %1285 = vmatmul.bf16.vlgmr.msrb.gmra.mxu0 %v2466_v31 }
  0xae   : > { %1299 = vmatmul.bf16.vlgmr.msrb.gmra.mxu1 %v2473_v38 }
  0xaf   : > { %1313 = vmatmul.bf16.vlgmr.msrb.gmra.mxu2 %v2448_v13 }
  0xb0   : > { %1327 = vmatmul.bf16.vlgmr.msrb.gmra.mxu3 %v2455_v20 }
  0xd0   : > { %v1118_v32 = vpop.f32.mrf.mxu0 }
  0xd2   : > { %v1132_v33 = vpop.f32.mrf.mxu1  ;;  %v1146_v35 = vpop.f32.mrf.mxu2 }
  0xd3   : > { %v1133_v34 = vadd.f32 %v1132_v33, %v1118_v32 }
  0xd5   : > { %v1160_v36 = vpop.f32.mrf.mxu3  ;;  %v1147_v37 = vadd.f32 %v1146_v35, %v1133_v34 }
  0xd7   : > { %v1161_v40 = vadd.f32 %v1160_v36, %v1147_v37  ;;  %v316_v36 = vld [vmem:[#allocation2 + $0x38] sm:$0xff] }
  0xd8   : > { %v1120_v42 = vpop.f32.mrf.mxu0 }
  0xd9   : > { %v1333_v41 = vadd.f32 %v1161_v40, %v309_v39 }
  0xda   : > { %v1134_v43 = vpop.f32.mrf.mxu1  ;;  %v1148_v31 = vpop.f32.mrf.mxu2 }
  0xdb   : > { %1341 = vst [vmem:[#allocation2 + $0x30] sm:$0xff] %v1333_v41  ;;  %v1135_v44 = vadd.f32 %v1134_v43, %v1120_v42 }
  0xdd   : > { %v1162_v45 = vpop.f32.mrf.mxu3  ;;  %v1149_v38 = vadd.f32 %v1148_v31, %v1135_v44 }
  0xdf   : > { %v1163_v13 = vadd.f32 %v1162_v45, %v1149_v38 }
  0xe1   : > { %v1337_v47 = vadd.f32 %v1163_v13, %v313_v46 }
  0xe3   : > { %1345 = vst [vmem:[#allocation2 + $0x8] sm:$0xff] %v1337_v47 }
  0xea   : > { %v1174_v20 = vpop.f32.mrf.mxu0 }
  0xeb   : > { %v1188_v48 = vpop.f32.mrf.mxu1 }
  0xec   : > { %v1189_v49 = vadd.f32 %v1188_v48, %v1174_v20 }
  0xf2   : > { %v1202_v50 = vpop.f32.mrf.mxu2  ;;  %v1176_v55 = vpop.f32.mrf.mxu0 }
  0xf3   : > { %v1203_v51 = vadd.f32 %v1202_v50, %v1189_v49  ;;  %v1216_v52 = vpop.f32.mrf.mxu3  ;;  %v1190_v56 = vpop.f32.mrf.mxu1 }
  0xf4   : > { %v1191_v58 = vadd.f32 %v1190_v56, %v1176_v55 }
  0xf5   : > { %v1217_v54 = vadd.f32 %v1216_v52, %v1203_v51 }
  0xf7   : > { %v1334_v57 = vadd.f32 %v1217_v54, %v310_v53 }
  0xf9   : > { %1342 = vst [vmem:[#allocation2] sm:$0xff] %v1334_v57 }
  0xfa   : > { %v1204_v59 = vpop.f32.mrf.mxu2 }
  0xfb   : > { %v1205_v60 = vadd.f32 %v1204_v59, %v1191_v58  ;;  %v1218_v61 = vpop.f32.mrf.mxu3 }
  0xfd   : > { %v1219_v63 = vadd.f32 %v1218_v61, %v1205_v60 }
  0xff   : > { %v1338_v0 = vadd.f32 %v1219_v63, %v314_v62 }
 0x101   : > { %1346 = vst [vmem:[#allocation2 + $0x20] sm:$0xff] %v1338_v0 }
 0x10a   : > { %v1230_v1 = vpop.f32.mrf.mxu0 }
 0x10b   : > { %v1244_v2 = vpop.f32.mrf.mxu1 }
 0x10c   : > { %v1245_v3 = vadd.f32 %v1244_v2, %v1230_v1 }
 0x112   : > { %v1258_v4 = vpop.f32.mrf.mxu2  ;;  %v1232_v9 = vpop.f32.mrf.mxu0 }
 0x113   : > { %v1259_v5 = vadd.f32 %v1258_v4, %v1245_v3  ;;  %v1272_v6 = vpop.f32.mrf.mxu3  ;;  %v1246_v10 = vpop.f32.mrf.mxu1 }
 0x114   : > { %v1247_v12 = vadd.f32 %v1246_v10, %v1232_v9 }
 0x115   : > { %v1273_v8 = vadd.f32 %v1272_v6, %v1259_v5 }
 0x117   : > { %v1335_v11 = vadd.f32 %v1273_v8, %v311_v7 }
 0x119   : > { %1343 = vst [vmem:[#allocation2 + $0x18] sm:$0xff] %v1335_v11 }
 0x11a   : > { %v1260_v14 = vpop.f32.mrf.mxu2 }
 0x11b   : > { %v1261_v15 = vadd.f32 %v1260_v14, %v1247_v12  ;;  %v1274_v16 = vpop.f32.mrf.mxu3 }
 0x11d   : > { %v1275_v18 = vadd.f32 %v1274_v16, %v1261_v15 }
 0x11f   : > { %v1339_v19 = vadd.f32 %v1275_v18, %v315_v17 }
 0x121   : > { %1347 = vst [vmem:[#allocation2 + $0x28] sm:$0xff] %v1339_v19 }
 0x12a   : > { %v1286_v21 = vpop.f32.mrf.mxu0 }
 0x12b   : > { %v1300_v22 = vpop.f32.mrf.mxu1 }
 0x12c   : > { %v1301_v23 = vadd.f32 %v1300_v22, %v1286_v21 }
 0x132   : > { %v1314_v24 = vpop.f32.mrf.mxu2  ;;  %v1288_v29 = vpop.f32.mrf.mxu0 }
 0x133   : > { %v1315_v25 = vadd.f32 %v1314_v24, %v1301_v23  ;;  %v1328_v26 = vpop.f32.mrf.mxu3  ;;  %v1302_v30 = vpop.f32.mrf.mxu1 }
 0x134   : > { %v1303_v33 = vadd.f32 %v1302_v30, %v1288_v29 }
 0x135   : > { %v1329_v28 = vadd.f32 %v1328_v26, %v1315_v25 }
 0x137   : > { %v1336_v32 = vadd.f32 %v1329_v28, %v312_v27 }
 0x139   : > { %1344 = vst [vmem:[#allocation2 + $0x10] sm:$0xff] %v1336_v32 }
 0x13a   : > { %v1316_v34 = vpop.f32.mrf.mxu2 }
 0x13b   : > { %v1317_v35 = vadd.f32 %v1316_v34, %v1303_v33  ;;  %v1330_v37 = vpop.f32.mrf.mxu3 }
 0x13d   : > { %v1331_v39 = vadd.f32 %v1330_v37, %v1317_v35  ;;  %1352 = sbr.rel (%p2059_p11) target bundleno = 336 (0x150), region = 63 }
 0x13f   : > { %v1340_v40 = vadd.f32 %v1331_v39, %v316_v36 }
 0x141   : > { %1348 = vst [vmem:[#allocation2 + $0x38] sm:$0xff] %v1340_v40 }
 0x142   : > { %v1353_v41 = vld [vmem:[#allocation2 + $0x30] sm:$0xff]  ;;  %v1354_v42 = vld [vmem:[#allocation2] sm:$0xff]  ;;  %v1355_v45 = vld [vmem:[#allocation2 + $0x18] sm:$0xff] }
 0x143   : > { %v1361_v43 = vld [vmem:[%s2676_s2] sm:$0xf]  ;;  %v1356_v38 = vld [vmem:[#allocation2 + $0x10] sm:$0xff]  ;;  %v1357_v47 = vld [vmem:[#allocation2 + $0x8] sm:$0xff] }
 0x144   : > { %v1363_v44 = vperm.slane %v1361_v43, 0  ;;  %v1364_v31 = vperm.slane %v1361_v43, 1  ;;  %v1365_v46 = vperm.slane %v1361_v43, 2  ;;  %v1366_v13 = vperm.slane %v1361_v43, 3  ;;  %v1358_v20 = vld [vmem:[#allocation2 + $0x20] sm:$0xff]  ;;  %v1359_v48 = vld [vmem:[#allocation2 + $0x28] sm:$0xff] }
 0x146   : > { %v1371_v49 = vadd.f32 %v1363_v44, %v1353_v41  ;;  %v1372_v50 = vadd.f32 %v1364_v31, %v1354_v42  ;;  %v1373_v51 = vadd.f32 %v1365_v46, %v1355_v45  ;;  %v1374_v52 = vadd.f32 %v1366_v13, %v1356_v38 }
 0x147   : > { %v1375_v54 = vadd.f32 %v1363_v44, %v1357_v47  ;;  %v1376_v55 = vadd.f32 %v1364_v31, %v1358_v20  ;;  %v1377_v56 = vadd.f32 %v1365_v46, %v1359_v48 }
 0x148   : > { %v1360_v53 = vld [vmem:[#allocation2 + $0x38] sm:$0xff]  ;;  %v1379_v58 = vmax.f32 %v1371_v49, 0.0  ;;  %v1380_v59 = vmax.f32 %v1372_v50, 0.0  ;;  %v1381_v60 = vmax.f32 %v1373_v51, 0.0  ;;  %v1382_v61 = vmax.f32 %v1374_v52, 0.0 }
 0x149   : > { %v1378_v57 = vadd.f32 %v1366_v13, %v1360_v53  ;;  %v1383_v62 = vmax.f32 %v1375_v54, 0.0  ;;  %v1384_v63 = vmax.f32 %v1376_v55, 0.0  ;;  %v1385_v0 = vmax.f32 %v1377_v56, 0.0 }
 0x14a   : > { %v1387_v2 = vpack.c.bf16 %v1380_v59, %v1379_v58  ;;  %v1388_v3 = vpack.c.bf16 %v1382_v61, %v1381_v60 }
 0x14b   : > { %v1386_v1 = vmax.f32 %v1378_v57, 0.0  ;;  %v1389_v4 = vpack.c.bf16 %v1384_v63, %v1383_v62 }
 0x14c   : > { %1391 = vst [vmem:[%s2677_s3] sm:$0xff] %v1387_v2 }
 0x14d   : > { %v1390_v5 = vpack.c.bf16 %v1386_v1, %v1385_v0  ;;  %1392 = vst [vmem:[%s2677_s3 + $0x8] sm:$0xff] %v1388_v3 }
 0x14e   : > { %1393 = vst [vmem:[%s2677_s3 + $0x10] sm:$0xff] %v1389_v4 }
 0x14f   : > { %1394 = vst [vmem:[%s2677_s3 + $0x18] sm:$0xff] %v1390_v5 }
 0x150 PF: > { %s13_s16 = sadd.s32 1, %s2277_s16   ;;  %s2678_s12 = smov %s2265_s13 }
 0x151   : > { %p10_p12 = scmp.ge.s32.totalorder %s13_s16, 11   ;;  %s2679_s13 = smov %s2335_s20 }
 0x152   : > { %s2680_s14 = smov %s2273_s15  ;;  %s2681_s15 = smov %s2683_s17 }
 0x153   :  { %12 = sbr.rel (!%p10_p12) target bundleno = 3 (0x3), region = 104 }

// kernel: se_resnet18_forward.41
= control target key start
LH: loop header
LB: loop body
LE: loop exit
PB: predicated region body
PF: predicated region fallthrough
CT: control target
= control target key end

     0   :  { %s2553_s12 = smov 0   ;;  %s2555_s13 = smov 0   ;;  %s3223_s0 = inlined_call_operand.vmem [shape: bf16[16,512], index: 0, kind: input, shape index: {}]   ;;  %s3224_s1 = inlined_call_operand.vmem [shape: bf16[512,1024], index: 1, kind: input, shape index: {}]   ;;  %s3225_s2 = inlined_call_operand.vmem [shape: f32[1,1024], index: 2, kind: input, shape index: {}]   ;;  %s3226_s3 = inlined_call_operand.vmem [shape: f32[16,1024], index: 3, kind: output, shape index: {}]  }
   0x1   :  { %s2557_s14 = smov 0   ;;  %s2559_s15 = smov 0  }
   0x2   :  { %s2561_s16 = smov 0  }
   0x3 LB: > { %s28_s17 = sadd.s32 1, %s2527_s15  ;;  %s1774_s18 = sadd.s32 4294967295, %s2531_s16   ;;  %s2531_s16 = sphi %s2561_s16, %s13_s16   ;;  %s2527_s15 = sphi %s2559_s15, %s3231_s15   ;;  %s2523_s14 = sphi %s2557_s14, %s3230_s14   ;;  %s2519_s13 = sphi %s2555_s13, %s3229_s13   ;;  %s2515_s12 = sphi %s2553_s12, %s3228_s12  }
   0x4   : > { %p30_p0 = scmp.ge.s32.totalorder %s28_s17, 2  ;;  %p76_p1 = scmp.ne.s32.totalorder %s2519_s13, %s2515_s12 }
   0x5   : > { %p77_p2 = scmp.eq.s32.totalorder %s2531_s16, 0  ;;  %p134_p4 = scmp.eq.s32.totalorder %s1774_s18, 1 }
   0x6   : > { %s3233_s17 = smov (%p30_p0, %s28_s17), 0  ;;  %s69_s20 = sadd.s32 1, %s2519_s13 }
   0x7   : > { %p78_p3 = por %p77_p2, %p76_p1  ;;  %s65_s19 = ssub.s32 %s2527_s15, %s3233_s17 }
   0x8   : > { %p67_p5 = scmp.eq.s32.totalorder %s65_s19, 0  ;;  %p2588_p6 = por %p134_p4, %p76_p1 }
   0x9   : > { %p1778_p7 = scmp.ge.s32.totalorder %s2531_s16, 2 }
   0xa   : > { %s2593_s22 = scalar_select %p67_p5, %s2519_s13, %s69_s20  }
   0xb   : > { %171 = sbr.rel (%p1778_p7) target bundleno = 148 (0x94), region = 20 }
  0x10   : > { %174 = sbr.rel (!%p78_p3) target bundleno = 148 (0x94), region = 24  ;;  %s176_s23 = sand.u32 (%p78_p3), 1, %s2519_s13  }
  0x11   : > { %s2319_s24 = sshll.u32 (%p78_p3), %s2527_s15, 4  ;;  %s1779_s25 = sshll.u32 (%p78_p3), %s176_s23, 10 }
  0x12   : > { %s2601_s28 = scalar_lea.vmem (%p78_p3), %s3224_s1, %s2319_s24  ;;  %s2606_s29 = scalar_lea.vmem (%p78_p3), [#allocation3], %s1779_s25 }
  0x13   : > { %v197_v0 = vld [vmem:[%s2601_s28] sm:$0xff] (%p78_p3)  ;;  %v199_v1 = vld [vmem:[%s2601_s28 + $0x8] sm:$0xff] (%p78_p3) }
  0x14   : > { %v201_v2 = vld [vmem:[%s2601_s28 + $0x20] sm:$0xff] (%p78_p3)  ;;  %198 = vst [vmem:[%s2606_s29] sm:$0xff] (%p78_p3), %v197_v0  ;;  %v203_v3 = vld [vmem:[%s2601_s28 + $0x28] sm:$0xff] (%p78_p3) }
  0x15   : > { %200 = vst [vmem:[%s2606_s29 + $0x8] sm:$0xff] %v199_v1  ;;  %v205_v4 = vld [vmem:[%s2601_s28 + $0x40] sm:$0xff]  ;;  %v207_v5 = vld [vmem:[%s2601_s28 + $0x48] sm:$0xff] }
  0x16   : > { %202 = vst [vmem:[%s2606_s29 + $0x10] sm:$0xff] %v201_v2  ;;  %v209_v6 = vld [vmem:[%s2601_s28 + $0x60] sm:$0xff]  ;;  %v211_v7 = vld [vmem:[%s2601_s28 + $0x68] sm:$0xff] }
  0x17   : > { %204 = vst [vmem:[%s2606_s29 + $0x18] sm:$0xff] %v203_v3  ;;  %v213_v8 = vld [vmem:[%s2601_s28 + $0x80] sm:$0xff]  ;;  %v215_v9 = vld [vmem:[%s2601_s28 + $0x88] sm:$0xff] }
  0x18   : > { %206 = vst [vmem:[%s2606_s29 + $0x20] sm:$0xff] %v205_v4  ;;  %v217_v10 = vld [vmem:[%s2601_s28 + $0xa0] sm:$0xff]  ;;  %v219_v11 = vld [vmem:[%s2601_s28 + $0xa8] sm:$0xff] }
  0x19   : > { %208 = vst [vmem:[%s2606_s29 + $0x28] sm:$0xff] %v207_v5  ;;  %v221_v12 = vld [vmem:[%s2601_s28 + $0xc0] sm:$0xff]  ;;  %v223_v13 = vld [vmem:[%s2601_s28 + $0xc8] sm:$0xff] }
  0x1a   : > { %210 = vst [vmem:[%s2606_s29 + $0x30] sm:$0xff] %v209_v6  ;;  %v225_v14 = vld [vmem:[%s2601_s28 + $0xe0] sm:$0xff]  ;;  %v227_v15 = vld [vmem:[%s2601_s28 + $0xe8] sm:$0xff] }
  0x1b   : > { %212 = vst [vmem:[%s2606_s29 + $0x38] sm:$0xff] %v211_v7  ;;  %v229_v16 = vld [vmem:[%s2601_s28 + $0x100] sm:$0xff]  ;;  %v231_v17 = vld [vmem:[%s2601_s28 + $0x108] sm:$0xff] }
  0x1c   : > { %214 = vst [vmem:[%s2606_s29 + $0x40] sm:$0xff] %v213_v8  ;;  %v233_v18 = vld [vmem:[%s2601_s28 + $0x120] sm:$0xff]  ;;  %v235_v19 = vld [vmem:[%s2601_s28 + $0x128] sm:$0xff] }
  0x1d   : > { %216 = vst [vmem:[%s2606_s29 + $0x48] sm:$0xff] %v215_v9  ;;  %v237_v20 = vld [vmem:[%s2601_s28 + $0x140] sm:$0xff]  ;;  %v239_v21 = vld [vmem:[%s2601_s28 + $0x148] sm:$0xff] }
  0x1e   : > { %218 = vst [vmem:[%s2606_s29 + $0x50] sm:$0xff] %v217_v10  ;;  %v241_v22 = vld [vmem:[%s2601_s28 + $0x160] sm:$0xff]  ;;  %v243_v23 = vld [vmem:[%s2601_s28 + $0x168] sm:$0xff] }
  0x1f   : > { %220 = vst [vmem:[%s2606_s29 + $0x58] sm:$0xff] %v219_v11  ;;  %v245_v24 = vld [vmem:[%s2601_s28 + $0x180] sm:$0xff]  ;;  %v247_v25 = vld [vmem:[%s2601_s28 + $0x188] sm:$0xff] }
  0x20   : > { %222 = vst [vmem:[%s2606_s29 + $0x60] sm:$0xff] %v221_v12  ;;  %v249_v26 = vld [vmem:[%s2601_s28 + $0x1a0] sm:$0xff]  ;;  %v251_v27 = vld [vmem:[%s2601_s28 + $0x1a8] sm:$0xff] }
  0x21   : > { %224 = vst [vmem:[%s2606_s29 + $0x68] sm:$0xff] %v223_v13  ;;  %v253_v28 = vld [vmem:[%s2601_s28 + $0x1c0] sm:$0xff]  ;;  %v255_v29 = vld [vmem:[%s2601_s28 + $0x1c8] sm:$0xff] }
  0x22   : > { %226 = vst [vmem:[%s2606_s29 + $0x70] sm:$0xff] %v225_v14  ;;  %v257_v30 = vld [vmem:[%s2601_s28 + $0x1e0] sm:$0xff]  ;;  %v259_v31 = vld [vmem:[%s2601_s28 + $0x1e8] sm:$0xff] }
  0x23   : > { %228 = vst [vmem:[%s2606_s29 + $0x78] sm:$0xff] %v227_v15  ;;  %v261_v32 = vld [vmem:[%s2601_s28 + $0x200] sm:$0xff]  ;;  %v263_v33 = vld [vmem:[%s2601_s28 + $0x208] sm:$0xff] }
  0x24   : > { %230 = vst [vmem:[%s2606_s29 + $0x80] sm:$0xff] %v229_v16  ;;  %v265_v34 = vld [vmem:[%s2601_s28 + $0x220] sm:$0xff]  ;;  %v267_v35 = vld [vmem:[%s2601_s28 + $0x228] sm:$0xff] }
  0x25   : > { %232 = vst [vmem:[%s2606_s29 + $0x88] sm:$0xff] %v231_v17  ;;  %v269_v36 = vld [vmem:[%s2601_s28 + $0x240] sm:$0xff]  ;;  %v271_v37 = vld [vmem:[%s2601_s28 + $0x248] sm:$0xff] }
  0x26   : > { %234 = vst [vmem:[%s2606_s29 + $0x90] sm:$0xff] %v233_v18  ;;  %v273_v38 = vld [vmem:[%s2601_s28 + $0x260] sm:$0xff]  ;;  %v275_v39 = vld [vmem:[%s2601_s28 + $0x268] sm:$0xff] }
  0x27   : > { %236 = vst [vmem:[%s2606_s29 + $0x98] sm:$0xff] %v235_v19  ;;  %v277_v40 = vld [vmem:[%s2601_s28 + $0x280] sm:$0xff]  ;;  %v279_v41 = vld [vmem:[%s2601_s28 + $0x288] sm:$0xff] }
  0x28   : > { %238 = vst [vmem:[%s2606_s29 + $0xa0] sm:$0xff] %v237_v20  ;;  %v281_v42 = vld [vmem:[%s2601_s28 + $0x2a0] sm:$0xff]  ;;  %v283_v43 = vld [vmem:[%s2601_s28 + $0x2a8] sm:$0xff] }
  0x29   : > { %240 = vst [vmem:[%s2606_s29 + $0xa8] sm:$0xff] %v239_v21  ;;  %v285_v44 = vld [vmem:[%s2601_s28 + $0x2c0] sm:$0xff]  ;;  %v287_v45 = vld [vmem:[%s2601_s28 + $0x2c8] sm:$0xff] }
  0x2a   : > { %242 = vst [vmem:[%s2606_s29 + $0xb0] sm:$0xff] %v241_v22  ;;  %v289_v46 = vld [vmem:[%s2601_s28 + $0x2e0] sm:$0xff]  ;;  %v291_v47 = vld [vmem:[%s2601_s28 + $0x2e8] sm:$0xff] }
  0x2b   : > { %244 = vst [vmem:[%s2606_s29 + $0xb8] sm:$0xff] %v243_v23  ;;  %v293_v48 = vld [vmem:[%s2601_s28 + $0x300] sm:$0xff]  ;;  %v295_v49 = vld [vmem:[%s2601_s28 + $0x308] sm:$0xff] }
  0x2c   : > { %246 = vst [vmem:[%s2606_s29 + $0xc0] sm:$0xff] %v245_v24  ;;  %v297_v50 = vld [vmem:[%s2601_s28 + $0x320] sm:$0xff]  ;;  %v299_v51 = vld [vmem:[%s2601_s28 + $0x328] sm:$0xff] }
  0x2d   : > { %248 = vst [vmem:[%s2606_s29 + $0xc8] sm:$0xff] %v247_v25  ;;  %v301_v52 = vld [vmem:[%s2601_s28 + $0x340] sm:$0xff]  ;;  %v303_v53 = vld [vmem:[%s2601_s28 + $0x348] sm:$0xff] }
  0x2e   : > { %250 = vst [vmem:[%s2606_s29 + $0xd0] sm:$0xff] %v249_v26  ;;  %v305_v54 = vld [vmem:[%s2601_s28 + $0x360] sm:$0xff]  ;;  %v307_v55 = vld [vmem:[%s2601_s28 + $0x368] sm:$0xff] }
  0x2f   : > { %252 = vst [vmem:[%s2606_s29 + $0xd8] sm:$0xff] %v251_v27  ;;  %v309_v56 = vld [vmem:[%s2601_s28 + $0x380] sm:$0xff]  ;;  %v311_v57 = vld [vmem:[%s2601_s28 + $0x388] sm:$0xff] }
  0x30   : > { %254 = vst [vmem:[%s2606_s29 + $0xe0] sm:$0xff] %v253_v28  ;;  %v313_v58 = vld [vmem:[%s2601_s28 + $0x3a0] sm:$0xff]  ;;  %v315_v59 = vld [vmem:[%s2601_s28 + $0x3a8] sm:$0xff] }
  0x31   : > { %256 = vst [vmem:[%s2606_s29 + $0xe8] sm:$0xff] %v255_v29  ;;  %v317_v60 = vld [vmem:[%s2601_s28 + $0x3c0] sm:$0xff]  ;;  %v319_v61 = vld [vmem:[%s2601_s28 + $0x3c8] sm:$0xff] }
  0x32   : > { %258 = vst [vmem:[%s2606_s29 + $0xf0] sm:$0xff] %v257_v30  ;;  %v321_v62 = vld [vmem:[%s2601_s28 + $0x3e0] sm:$0xff]  ;;  %v323_v63 = vld [vmem:[%s2601_s28 + $0x3e8] sm:$0xff] }
  0x33   : > { %260 = vst [vmem:[%s2606_s29 + $0xf8] sm:$0xff] %v259_v31  ;;  %v325_v0 = vld [vmem:[%s2601_s28 + $0x400] sm:$0xff]  ;;  %v327_v1 = vld [vmem:[%s2601_s28 + $0x408] sm:$0xff] }
  0x34   : > { %262 = vst [vmem:[%s2606_s29 + $0x100] sm:$0xff] %v261_v32  ;;  %v329_v2 = vld [vmem:[%s2601_s28 + $0x420] sm:$0xff]  ;;  %v331_v3 = vld [vmem:[%s2601_s28 + $0x428] sm:$0xff] }
  0x35   : > { %264 = vst [vmem:[%s2606_s29 + $0x108] sm:$0xff] %v263_v33  ;;  %v333_v4 = vld [vmem:[%s2601_s28 + $0x440] sm:$0xff]  ;;  %v335_v5 = vld [vmem:[%s2601_s28 + $0x448] sm:$0xff] }
  0x36   : > { %266 = vst [vmem:[%s2606_s29 + $0x110] sm:$0xff] %v265_v34  ;;  %v337_v6 = vld [vmem:[%s2601_s28 + $0x460] sm:$0xff]  ;;  %v339_v7 = vld [vmem:[%s2601_s28 + $0x468] sm:$0xff] }
  0x37   : > { %268 = vst [vmem:[%s2606_s29 + $0x118] sm:$0xff] %v267_v35  ;;  %v341_v8 = vld [vmem:[%s2601_s28 + $0x480] sm:$0xff]  ;;  %v343_v9 = vld [vmem:[%s2601_s28 + $0x488] sm:$0xff] }
  0x38   : > { %270 = vst [vmem:[%s2606_s29 + $0x120] sm:$0xff] %v269_v36  ;;  %v345_v10 = vld [vmem:[%s2601_s28 + $0x4a0] sm:$0xff]  ;;  %v347_v11 = vld [vmem:[%s2601_s28 + $0x4a8] sm:$0xff] }
  0x39   : > { %272 = vst [vmem:[%s2606_s29 + $0x128] sm:$0xff] %v271_v37  ;;  %v349_v12 = vld [vmem:[%s2601_s28 + $0x4c0] sm:$0xff]  ;;  %v351_v13 = vld [vmem:[%s2601_s28 + $0x4c8] sm:$0xff] }
  0x3a   : > { %274 = vst [vmem:[%s2606_s29 + $0x130] sm:$0xff] %v273_v38  ;;  %v353_v14 = vld [vmem:[%s2601_s28 + $0x4e0] sm:$0xff]  ;;  %v355_v15 = vld [vmem:[%s2601_s28 + $0x4e8] sm:$0xff] }
  0x3b   : > { %276 = vst [vmem:[%s2606_s29 + $0x138] sm:$0xff] %v275_v39  ;;  %v357_v16 = vld [vmem:[%s2601_s28 + $0x500] sm:$0xff]  ;;  %v359_v17 = vld [vmem:[%s2601_s28 + $0x508] sm:$0xff] }
  0x3c   : > { %278 = vst [vmem:[%s2606_s29 + $0x140] sm:$0xff] %v277_v40  ;;  %v361_v18 = vld [vmem:[%s2601_s28 + $0x520] sm:$0xff]  ;;  %v363_v19 = vld [vmem:[%s2601_s28 + $0x528] sm:$0xff] }
  0x3d   : > { %280 = vst [vmem:[%s2606_s29 + $0x148] sm:$0xff] %v279_v41  ;;  %v365_v20 = vld [vmem:[%s2601_s28 + $0x540] sm:$0xff]  ;;  %v367_v21 = vld [vmem:[%s2601_s28 + $0x548] sm:$0xff] }
  0x3e   : > { %282 = vst [vmem:[%s2606_s29 + $0x150] sm:$0xff] %v281_v42  ;;  %v369_v22 = vld [vmem:[%s2601_s28 + $0x560] sm:$0xff]  ;;  %v371_v23 = vld [vmem:[%s2601_s28 + $0x568] sm:$0xff] }
  0x3f   : > { %284 = vst [vmem:[%s2606_s29 + $0x158] sm:$0xff] %v283_v43  ;;  %v373_v24 = vld [vmem:[%s2601_s28 + $0x580] sm:$0xff]  ;;  %v375_v25 = vld [vmem:[%s2601_s28 + $0x588] sm:$0xff] }
  0x40   : > { %286 = vst [vmem:[%s2606_s29 + $0x160] sm:$0xff] %v285_v44  ;;  %v377_v26 = vld [vmem:[%s2601_s28 + $0x5a0] sm:$0xff]  ;;  %v379_v27 = vld [vmem:[%s2601_s28 + $0x5a8] sm:$0xff] }
  0x41   : > { %288 = vst [vmem:[%s2606_s29 + $0x168] sm:$0xff] %v287_v45  ;;  %v381_v28 = vld [vmem:[%s2601_s28 + $0x5c0] sm:$0xff]  ;;  %v383_v29 = vld [vmem:[%s2601_s28 + $0x5c8] sm:$0xff] }
  0x42   : > { %290 = vst [vmem:[%s2606_s29 + $0x170] sm:$0xff] %v289_v46  ;;  %v385_v30 = vld [vmem:[%s2601_s28 + $0x5e0] sm:$0xff]  ;;  %v387_v31 = vld [vmem:[%s2601_s28 + $0x5e8] sm:$0xff] }
  0x43   : > { %292 = vst [vmem:[%s2606_s29 + $0x178] sm:$0xff] %v291_v47  ;;  %v389_v32 = vld [vmem:[%s2601_s28 + $0x600] sm:$0xff]  ;;  %v391_v33 = vld [vmem:[%s2601_s28 + $0x608] sm:$0xff] }
  0x44   : > { %294 = vst [vmem:[%s2606_s29 + $0x180] sm:$0xff] %v293_v48  ;;  %v393_v34 = vld [vmem:[%s2601_s28 + $0x620] sm:$0xff]  ;;  %v395_v35 = vld [vmem:[%s2601_s28 + $0x628] sm:$0xff] }
  0x45   : > { %296 = vst [vmem:[%s2606_s29 + $0x188] sm:$0xff] %v295_v49  ;;  %v397_v36 = vld [vmem:[%s2601_s28 + $0x640] sm:$0xff]  ;;  %v399_v37 = vld [vmem:[%s2601_s28 + $0x648] sm:$0xff] }
  0x46   : > { %298 = vst [vmem:[%s2606_s29 + $0x190] sm:$0xff] %v297_v50  ;;  %v401_v38 = vld [vmem:[%s2601_s28 + $0x660] sm:$0xff]  ;;  %v403_v39 = vld [vmem:[%s2601_s28 + $0x668] sm:$0xff] }
  0x47   : > { %300 = vst [vmem:[%s2606_s29 + $0x198] sm:$0xff] %v299_v51  ;;  %v405_v40 = vld [vmem:[%s2601_s28 + $0x680] sm:$0xff]  ;;  %v407_v41 = vld [vmem:[%s2601_s28 + $0x688] sm:$0xff] }
  0x48   : > { %302 = vst [vmem:[%s2606_s29 + $0x1a0] sm:$0xff] %v301_v52  ;;  %v409_v42 = vld [vmem:[%s2601_s28 + $0x6a0] sm:$0xff]  ;;  %v411_v43 = vld [vmem:[%s2601_s28 + $0x6a8] sm:$0xff] }
  0x49   : > { %304 = vst [vmem:[%s2606_s29 + $0x1a8] sm:$0xff] %v303_v53  ;;  %v413_v44 = vld [vmem:[%s2601_s28 + $0x6c0] sm:$0xff]  ;;  %v415_v45 = vld [vmem:[%s2601_s28 + $0x6c8] sm:$0xff] }
  0x4a   : > { %306 = vst [vmem:[%s2606_s29 + $0x1b0] sm:$0xff] %v305_v54  ;;  %v417_v46 = vld [vmem:[%s2601_s28 + $0x6e0] sm:$0xff]  ;;  %v419_v47 = vld [vmem:[%s2601_s28 + $0x6e8] sm:$0xff] }
  0x4b   : > { %308 = vst [vmem:[%s2606_s29 + $0x1b8] sm:$0xff] %v307_v55  ;;  %v421_v48 = vld [vmem:[%s2601_s28 + $0x700] sm:$0xff]  ;;  %v423_v49 = vld [vmem:[%s2601_s28 + $0x708] sm:$0xff] }
  0x4c   : > { %310 = vst [vmem:[%s2606_s29 + $0x1c0] sm:$0xff] %v309_v56  ;;  %v425_v50 = vld [vmem:[%s2601_s28 + $0x720] sm:$0xff]  ;;  %v427_v51 = vld [vmem:[%s2601_s28 + $0x728] sm:$0xff] }
  0x4d   : > { %312 = vst [vmem:[%s2606_s29 + $0x1c8] sm:$0xff] %v311_v57  ;;  %v429_v52 = vld [vmem:[%s2601_s28 + $0x740] sm:$0xff]  ;;  %v431_v53 = vld [vmem:[%s2601_s28 + $0x748] sm:$0xff] }
  0x4e   : > { %314 = vst [vmem:[%s2606_s29 + $0x1d0] sm:$0xff] %v313_v58  ;;  %v433_v54 = vld [vmem:[%s2601_s28 + $0x760] sm:$0xff]  ;;  %v435_v55 = vld [vmem:[%s2601_s28 + $0x768] sm:$0xff] }
  0x4f   : > { %316 = vst [vmem:[%s2606_s29 + $0x1d8] sm:$0xff] %v315_v59  ;;  %v437_v56 = vld [vmem:[%s2601_s28 + $0x780] sm:$0xff]  ;;  %v439_v57 = vld [vmem:[%s2601_s28 + $0x788] sm:$0xff] }
  0x50   : > { %318 = vst [vmem:[%s2606_s29 + $0x1e0] sm:$0xff] %v317_v60  ;;  %v441_v58 = vld [vmem:[%s2601_s28 + $0x7a0] sm:$0xff]  ;;  %v443_v59 = vld [vmem:[%s2601_s28 + $0x7a8] sm:$0xff] }
  0x51   : > { %320 = vst [vmem:[%s2606_s29 + $0x1e8] sm:$0xff] %v319_v61  ;;  %v445_v60 = vld [vmem:[%s2601_s28 + $0x7c0] sm:$0xff]  ;;  %v447_v61 = vld [vmem:[%s2601_s28 + $0x7c8] sm:$0xff] }
  0x52   : > { %322 = vst [vmem:[%s2606_s29 + $0x1f0] sm:$0xff] %v321_v62  ;;  %v449_v62 = vld [vmem:[%s2601_s28 + $0x7e0] sm:$0xff] }
  0x53   : > { %324 = vst [vmem:[%s2606_s29 + $0x1f8] sm:$0xff] %v323_v63  ;;  %v451_v63 = vld [vmem:[%s2601_s28 + $0x7e8] sm:$0xff] }
  0x54   : > { %326 = vst [vmem:[%s2606_s29 + $0x200] sm:$0xff] %v325_v0 }
  0x55   : > { %328 = vst [vmem:[%s2606_s29 + $0x208] sm:$0xff] %v327_v1 }
  0x56   : > { %330 = vst [vmem:[%s2606_s29 + $0x210] sm:$0xff] %v329_v2 }
  0x57   : > { %332 = vst [vmem:[%s2606_s29 + $0x218] sm:$0xff] %v331_v3 }
  0x58   : > { %334 = vst [vmem:[%s2606_s29 + $0x220] sm:$0xff] %v333_v4 }
  0x59   : > { %336 = vst [vmem:[%s2606_s29 + $0x228] sm:$0xff] %v335_v5 }
  0x5a   : > { %338 = vst [vmem:[%s2606_s29 + $0x230] sm:$0xff] %v337_v6 }
  0x5b   : > { %340 = vst [vmem:[%s2606_s29 + $0x238] sm:$0xff] %v339_v7 }
  0x5c   : > { %342 = vst [vmem:[%s2606_s29 + $0x240] sm:$0xff] %v341_v8 }
  0x5d   : > { %344 = vst [vmem:[%s2606_s29 + $0x248] sm:$0xff] %v343_v9 }
  0x5e   : > { %346 = vst [vmem:[%s2606_s29 + $0x250] sm:$0xff] %v345_v10 }
  0x5f   : > { %348 = vst [vmem:[%s2606_s29 + $0x258] sm:$0xff] %v347_v11 }
  0x60   : > { %350 = vst [vmem:[%s2606_s29 + $0x260] sm:$0xff] %v349_v12 }
  0x61   : > { %352 = vst [vmem:[%s2606_s29 + $0x268] sm:$0xff] %v351_v13 }
  0x62   : > { %354 = vst [vmem:[%s2606_s29 + $0x270] sm:$0xff] %v353_v14 }
  0x63   : > { %356 = vst [vmem:[%s2606_s29 + $0x278] sm:$0xff] %v355_v15 }
  0x64   : > { %358 = vst [vmem:[%s2606_s29 + $0x280] sm:$0xff] %v357_v16 }
  0x65   : > { %360 = vst [vmem:[%s2606_s29 + $0x288] sm:$0xff] %v359_v17 }
  0x66   : > { %362 = vst [vmem:[%s2606_s29 + $0x290] sm:$0xff] %v361_v18 }
  0x67   : > { %364 = vst [vmem:[%s2606_s29 + $0x298] sm:$0xff] %v363_v19 }
  0x68   : > { %366 = vst [vmem:[%s2606_s29 + $0x2a0] sm:$0xff] %v365_v20 }
  0x69   : > { %368 = vst [vmem:[%s2606_s29 + $0x2a8] sm:$0xff] %v367_v21 }
  0x6a   : > { %370 = vst [vmem:[%s2606_s29 + $0x2b0] sm:$0xff] %v369_v22 }
  0x6b   : > { %372 = vst [vmem:[%s2606_s29 + $0x2b8] sm:$0xff] %v371_v23 }
  0x6c   : > { %374 = vst [vmem:[%s2606_s29 + $0x2c0] sm:$0xff] %v373_v24 }
  0x6d   : > { %376 = vst [vmem:[%s2606_s29 + $0x2c8] sm:$0xff] %v375_v25 }
  0x6e   : > { %378 = vst [vmem:[%s2606_s29 + $0x2d0] sm:$0xff] %v377_v26 }
  0x6f   : > { %380 = vst [vmem:[%s2606_s29 + $0x2d8] sm:$0xff] %v379_v27 }
  0x70   : > { %382 = vst [vmem:[%s2606_s29 + $0x2e0] sm:$0xff] %v381_v28 }
  0x71   : > { %384 = vst [vmem:[%s2606_s29 + $0x2e8] sm:$0xff] %v383_v29 }
  0x72   : > { %386 = vst [vmem:[%s2606_s29 + $0x2f0] sm:$0xff] %v385_v30 }
  0x73   : > { %388 = vst [vmem:[%s2606_s29 + $0x2f8] sm:$0xff] %v387_v31 }
  0x74   : > { %390 = vst [vmem:[%s2606_s29 + $0x300] sm:$0xff] %v389_v32 }
  0x75   : > { %392 = vst [vmem:[%s2606_s29 + $0x308] sm:$0xff] %v391_v33 }
  0x76   : > { %394 = vst [vmem:[%s2606_s29 + $0x310] sm:$0xff] %v393_v34 }
  0x77   : > { %396 = vst [vmem:[%s2606_s29 + $0x318] sm:$0xff] %v395_v35 }
  0x78   : > { %398 = vst [vmem:[%s2606_s29 + $0x320] sm:$0xff] %v397_v36 }
  0x79   : > { %400 = vst [vmem:[%s2606_s29 + $0x328] sm:$0xff] %v399_v37 }
  0x7a   : > { %402 = vst [vmem:[%s2606_s29 + $0x330] sm:$0xff] %v401_v38 }
  0x7b   : > { %404 = vst [vmem:[%s2606_s29 + $0x338] sm:$0xff] %v403_v39 }
  0x7c   : > { %406 = vst [vmem:[%s2606_s29 + $0x340] sm:$0xff] %v405_v40 }
  0x7d   : > { %408 = vst [vmem:[%s2606_s29 + $0x348] sm:$0xff] %v407_v41 }
  0x7e   : > { %410 = vst [vmem:[%s2606_s29 + $0x350] sm:$0xff] %v409_v42 }
  0x7f   : > { %412 = vst [vmem:[%s2606_s29 + $0x358] sm:$0xff] %v411_v43 }
  0x80   : > { %414 = vst [vmem:[%s2606_s29 + $0x360] sm:$0xff] %v413_v44 }
  0x81   : > { %416 = vst [vmem:[%s2606_s29 + $0x368] sm:$0xff] %v415_v45 }
  0x82   : > { %418 = vst [vmem:[%s2606_s29 + $0x370] sm:$0xff] %v417_v46 }
  0x83   : > { %420 = vst [vmem:[%s2606_s29 + $0x378] sm:$0xff] %v419_v47 }
  0x84   : > { %422 = vst [vmem:[%s2606_s29 + $0x380] sm:$0xff] %v421_v48 }
  0x85   : > { %424 = vst [vmem:[%s2606_s29 + $0x388] sm:$0xff] %v423_v49 }
  0x86   : > { %426 = vst [vmem:[%s2606_s29 + $0x390] sm:$0xff] %v425_v50 }
  0x87   : > { %428 = vst [vmem:[%s2606_s29 + $0x398] sm:$0xff] %v427_v51 }
  0x88   : > { %430 = vst [vmem:[%s2606_s29 + $0x3a0] sm:$0xff] %v429_v52 }
  0x89   : > { %432 = vst [vmem:[%s2606_s29 + $0x3a8] sm:$0xff] %v431_v53 }
  0x8a   : > { %434 = vst [vmem:[%s2606_s29 + $0x3b0] sm:$0xff] %v433_v54 }
  0x8b   : > { %436 = vst [vmem:[%s2606_s29 + $0x3b8] sm:$0xff] %v435_v55 }
  0x8c   : > { %438 = vst [vmem:[%s2606_s29 + $0x3c0] sm:$0xff] %v437_v56 }
  0x8d   : > { %440 = vst [vmem:[%s2606_s29 + $0x3c8] sm:$0xff] %v439_v57 }
  0x8e   : > { %442 = vst [vmem:[%s2606_s29 + $0x3d0] sm:$0xff] %v441_v58 }
  0x8f   : > { %444 = vst [vmem:[%s2606_s29 + $0x3d8] sm:$0xff] %v443_v59 }
  0x90   : > { %446 = vst [vmem:[%s2606_s29 + $0x3e0] sm:$0xff] %v445_v60 }
  0x91   : > { %448 = vst [vmem:[%s2606_s29 + $0x3e8] sm:$0xff] %v447_v61 }
  0x92   : > { %450 = vst [vmem:[%s2606_s29 + $0x3f0] sm:$0xff] %v449_v62 }
  0x93   : > { %452 = vst [vmem:[%s2606_s29 + $0x3f8] sm:$0xff] %v451_v63 }
  0x94 PF: > { %p1782_p8 = scmp.ge.s32.totalorder %s2531_s16, 1  ;;  %p465_p9 = scmp.lt.s32.totalorder %s2531_s16, 3 }
  0x96   : > { %p466_p10 = pnand %p1782_p8, %p465_p9 }
  0x97   : > { %s472_s30 = sand.u32 (!%p466_p10), 1, %s2515_s12  }
  0x98   : > { %469 = sbr.rel (%p466_p10) target bundleno = 446 (0x1be), region = 51  ;;  %s1783_s4 = sshll.u32 (!%p466_p10), %s472_s30, 10 }
  0x99   : > { %s2866_s5 = scalar_lea.vmem (!%p466_p10), [#allocation3], %s1783_s4  ;;  %s1785_s4 = sshll.u32 (!%p466_p10), %s2523_s14, 2 }
  0x9a   : > { %p523_p11 = scmp.lt.s32.totalorder (!%p466_p10), %s1785_s4, 7  ;;  %s1784_s8 = sshll.u32 (!%p466_p10), %s472_s30, 6 }
  0x9b   : > { %s3181_s9 = scalar_lea.vmem (!%p466_p10), [#allocation4], %s1784_s8 }
  0x9d   : > { %v1916_v0 = vld [vmem:[%s2866_s5 + $0xe0] sm:$0xf]  ;;  %v2354_v1 = vld [vmem:[%s2866_s5 + $0xec] sm:$0xf0]  ;;  %s3235_s4 = smov (!%p523_p11, %s1785_s4), 7  ;;  %s2452_s12 = sshll.u32 (%p2588_p6), %s2523_s14, 5 }
  0x9e   : > { %v2044_v2 = vld [vmem:[%s2866_s5 + $0x1e0] sm:$0xf]  ;;  %v1917_v3 = vor.u32 %v2354_v1, %v1916_v0  ;;  %v2386_v4 = vld [vmem:[%s2866_s5 + $0x1ec] sm:$0xf0]  ;;  %s525_s7 = scalar_lea.vmem %s3225_s2, %s3235_s4  ;;  %s1638_s11 = scalar_lea.vmem (%p2588_p6), %s3226_s3, %s2452_s12 }
  0x9f   : > { %v2172_v5 = vld [vmem:[%s2866_s5 + $0x2e0] sm:$0xf]  ;;  %v2418_v6 = vld [vmem:[%s2866_s5 + $0x2ec] sm:$0xf0]  ;;  %v2045_v7 = vor.u32 %v2386_v4, %v2044_v2 }
  0xa0   : > { %v2173_v8 = vor.u32 %v2418_v6, %v2172_v5  ;;  %v2300_v9 = vld [vmem:[%s2866_s5 + $0x3e0] sm:$0xf]  ;;  %v2450_v10 = vld [vmem:[%s2866_s5 + $0x3ec] sm:$0xf0]  ;;  %1341 = vmatpush.bf16.msra.mxu0 %v1917_v3 }
  0xa1   : > { %v1900_v11 = vld [vmem:[%s2866_s5 + $0xc0] sm:$0xf]  ;;  %v2301_v12 = vor.u32 %v2450_v10, %v2300_v9  ;;  %v2350_v13 = vld [vmem:[%s2866_s5 + $0xcc] sm:$0xf0]  ;;  %1355 = vmatpush.bf16.msra.mxu1 %v2045_v7 }
  0xa2   : > { %v2028_v14 = vld [vmem:[%s2866_s5 + $0x1c0] sm:$0xf]  ;;  %v2382_v15 = vld [vmem:[%s2866_s5 + $0x1cc] sm:$0xf0]  ;;  %1369 = vmatpush.bf16.msra.mxu2 %v2173_v8  ;;  %v1901_v16 = vor.u32 %v2350_v13, %v1900_v11 }
  0xa3   : > { %v2029_v17 = vor.u32 %v2382_v15, %v2028_v14  ;;  %v2156_v18 = vld [vmem:[%s2866_s5 + $0x2c0] sm:$0xf]  ;;  %v2414_v19 = vld [vmem:[%s2866_s5 + $0x2cc] sm:$0xf0]  ;;  %1383 = vmatpush.bf16.msra.mxu3 %v2301_v12 }
  0xa4   : > { %v2284_v20 = vld [vmem:[%s2866_s5 + $0x3c0] sm:$0xf]  ;;  %v2157_v21 = vor.u32 %v2414_v19, %v2156_v18  ;;  %v2446_v22 = vld [vmem:[%s2866_s5 + $0x3cc] sm:$0xf0]  ;;  %1342 = vmatpush.bf16.msra.mxu0 %v1901_v16 }
  0xa5   : > { %v1884_v23 = vld [vmem:[%s2866_s5 + $0xa0] sm:$0xf]  ;;  %v2346_v24 = vld [vmem:[%s2866_s5 + $0xac] sm:$0xf0]  ;;  %v2285_v25 = vor.u32 %v2446_v22, %v2284_v20  ;;  %1356 = vmatpush.bf16.msra.mxu1 %v2029_v17 }
  0xa6   : > { %v2012_v26 = vld [vmem:[%s2866_s5 + $0x1a0] sm:$0xf]  ;;  %v2378_v27 = vld [vmem:[%s2866_s5 + $0x1ac] sm:$0xf0]  ;;  %v1885_v29 = vor.u32 %v2346_v24, %v1884_v23  ;;  %1370 = vmatpush.bf16.msra.mxu2 %v2157_v21 }
  0xa7   : > { %v2140_v28 = vld [vmem:[%s2866_s5 + $0x2a0] sm:$0xf]  ;;  %v2410_v30 = vld [vmem:[%s2866_s5 + $0x2ac] sm:$0xf0]  ;;  %v2013_v33 = vor.u32 %v2378_v27, %v2012_v26  ;;  %1384 = vmatpush.bf16.msra.mxu3 %v2285_v25 }
  0xa8   : > { %v2268_v31 = vld [vmem:[%s2866_s5 + $0x3a0] sm:$0xf]  ;;  %v2442_v32 = vld [vmem:[%s2866_s5 + $0x3ac] sm:$0xf0]  ;;  %v2141_v34 = vor.u32 %v2410_v30, %v2140_v28  ;;  %1343 = vmatpush.bf16.msra.mxu0 %v1885_v29  ;;  %v2352_v28 = vld [vmem:[%s2866_s5 + $0xe4] sm:$0xf] }
  0xa9   : > { %v1868_v35 = vld [vmem:[%s2866_s5 + $0x80] sm:$0xf]  ;;  %v2342_v36 = vld [vmem:[%s2866_s5 + $0x8c] sm:$0xf0]  ;;  %v2269_v38 = vor.u32 %v2442_v32, %v2268_v31  ;;  %1357 = vmatpush.bf16.msra.mxu1 %v2013_v33  ;;  %v1918_v29 = vld [vmem:[%s2866_s5 + $0xf0] sm:$0xf0] }
  0xaa   : > { %v1996_v37 = vld [vmem:[%s2866_s5 + $0x180] sm:$0xf]  ;;  %v2374_v39 = vld [vmem:[%s2866_s5 + $0x18c] sm:$0xf0]  ;;  %v1869_v44 = vor.u32 %v2342_v36, %v1868_v35  ;;  %1371 = vmatpush.bf16.msra.mxu2 %v2141_v34  ;;  %v2384_v30 = vld [vmem:[%s2866_s5 + $0x1e4] sm:$0xf] }
  0xab   : > { %v2124_v40 = vld [vmem:[%s2866_s5 + $0x280] sm:$0xf]  ;;  %v2406_v41 = vld [vmem:[%s2866_s5 + $0x28c] sm:$0xf0]  ;;  %v1997_v45 = vor.u32 %v2374_v39, %v1996_v37  ;;  %1385 = vmatpush.bf16.msra.mxu3 %v2269_v38  ;;  %v2046_v32 = vld [vmem:[%s2866_s5 + $0x1f0] sm:$0xf0] }
  0xac   : > { %v2252_v42 = vld [vmem:[%s2866_s5 + $0x380] sm:$0xf]  ;;  %v2438_v43 = vld [vmem:[%s2866_s5 + $0x38c] sm:$0xf0]  ;;  %v2125_v46 = vor.u32 %v2406_v41, %v2124_v40  ;;  %1344 = vmatpush.bf16.msra.mxu0 %v1869_v44  ;;  %v2416_v33 = vld [vmem:[%s2866_s5 + $0x2e4] sm:$0xf]  ;;  %v1921_v40 = vor.u32 %v2352_v28, %v1918_v29  ;;  %v2049_v41 = vor.u32 %v2384_v30, %v2046_v32 }
  0xad   : > { %v1852_v47 = vld [vmem:[%s2866_s5 + $0x60] sm:$0xf]  ;;  %v2338_v48 = vld [vmem:[%s2866_s5 + $0x6c] sm:$0xf0]  ;;  %v2253_v50 = vor.u32 %v2438_v43, %v2252_v42  ;;  %1358 = vmatpush.bf16.msra.mxu1 %v1997_v45  ;;  %v2174_v34 = vld [vmem:[%s2866_s5 + $0x2f0] sm:$0xf0] }
  0xae   : > { %v1980_v49 = vld [vmem:[%s2866_s5 + $0x160] sm:$0xf]  ;;  %v2370_v51 = vld [vmem:[%s2866_s5 + $0x16c] sm:$0xf0]  ;;  %v1853_v56 = vor.u32 %v2338_v48, %v1852_v47  ;;  %1372 = vmatpush.bf16.msra.mxu2 %v2125_v46  ;;  %v2448_v37 = vld [vmem:[%s2866_s5 + $0x3e4] sm:$0xf]  ;;  %v2177_v42 = vor.u32 %v2416_v33, %v2174_v34 }
  0xaf   : > { %v2108_v52 = vld [vmem:[%s2866_s5 + $0x260] sm:$0xf]  ;;  %v2402_v53 = vld [vmem:[%s2866_s5 + $0x26c] sm:$0xf0]  ;;  %v1981_v57 = vor.u32 %v2370_v51, %v1980_v49  ;;  %1386 = vmatpush.bf16.msra.mxu3 %v2253_v50  ;;  %v2302_v38 = vld [vmem:[%s2866_s5 + $0x3f0] sm:$0xf0] }
  0xb0   : > { %v2236_v54 = vld [vmem:[%s2866_s5 + $0x360] sm:$0xf]  ;;  %v2434_v55 = vld [vmem:[%s2866_s5 + $0x36c] sm:$0xf0]  ;;  %v2109_v58 = vor.u32 %v2402_v53, %v2108_v52  ;;  %1345 = vmatpush.bf16.msra.mxu0 %v1853_v56  ;;  %v2348_v43 = vld [vmem:[%s2866_s5 + $0xc4] sm:$0xf]  ;;  %v2305_v46 = vor.u32 %v2448_v37, %v2302_v38 }
  0xb1   : > { %v1836_v59 = vld [vmem:[%s2866_s5 + $0x40] sm:$0xf]  ;;  %v2334_v60 = vld [vmem:[%s2866_s5 + $0x4c] sm:$0xf0]  ;;  %v2237_v62 = vor.u32 %v2434_v55, %v2236_v54  ;;  %1359 = vmatpush.bf16.msra.mxu1 %v1981_v57  ;;  %v1902_v44 = vld [vmem:[%s2866_s5 + $0xd0] sm:$0xf0] }
  0xb2   : > { %v1964_v61 = vld [vmem:[%s2866_s5 + $0x140] sm:$0xf]  ;;  %v2366_v63 = vld [vmem:[%s2866_s5 + $0x14c] sm:$0xf0]  ;;  %v1837_v4 = vor.u32 %v2334_v60, %v1836_v59  ;;  %1373 = vmatpush.bf16.msra.mxu2 %v2109_v58  ;;  %v2380_v45 = vld [vmem:[%s2866_s5 + $0x1c4] sm:$0xf]  ;;  %v1905_v52 = vor.u32 %v2348_v43, %v1902_v44 }
  0xb3   : > { %v2092_v0 = vld [vmem:[%s2866_s5 + $0x240] sm:$0xf]  ;;  %v2398_v1 = vld [vmem:[%s2866_s5 + $0x24c] sm:$0xf0]  ;;  %v1965_v5 = vor.u32 %v2366_v63, %v1964_v61  ;;  %1387 = vmatpush.bf16.msra.mxu3 %v2237_v62  ;;  %v2030_v47 = vld [vmem:[%s2866_s5 + $0x1d0] sm:$0xf0] }
  0xb4   : > { %v2220_v2 = vld [vmem:[%s2866_s5 + $0x340] sm:$0xf]  ;;  %v2430_v3 = vld [vmem:[%s2866_s5 + $0x34c] sm:$0xf0]  ;;  %v2093_v6 = vor.u32 %v2398_v1, %v2092_v0  ;;  %1346 = vmatpush.bf16.msra.mxu0 %v1837_v4  ;;  %v2412_v48 = vld [vmem:[%s2866_s5 + $0x2c4] sm:$0xf]  ;;  %v2033_v53 = vor.u32 %v2380_v45, %v2030_v47 }
  0xb5   : > { %v1820_v7 = vld [vmem:[%s2866_s5 + $0x20] sm:$0xf]  ;;  %v2330_v8 = vld [vmem:[%s2866_s5 + $0x2c] sm:$0xf0]  ;;  %v2221_v10 = vor.u32 %v2430_v3, %v2220_v2  ;;  %1360 = vmatpush.bf16.msra.mxu1 %v1965_v5  ;;  %v2158_v49 = vld [vmem:[%s2866_s5 + $0x2d0] sm:$0xf0] }
  0xb6   : > { %v1948_v9 = vld [vmem:[%s2866_s5 + $0x120] sm:$0xf]  ;;  %v2362_v11 = vld [vmem:[%s2866_s5 + $0x12c] sm:$0xf0]  ;;  %v1821_v16 = vor.u32 %v2330_v8, %v1820_v7  ;;  %1374 = vmatpush.bf16.msra.mxu2 %v2093_v6  ;;  %v2444_v50 = vld [vmem:[%s2866_s5 + $0x3c4] sm:$0xf]  ;;  %v2161_v54 = vor.u32 %v2412_v48, %v2158_v49 }
  0xb7   : > { %v2076_v12 = vld [vmem:[%s2866_s5 + $0x220] sm:$0xf]  ;;  %v2394_v13 = vld [vmem:[%s2866_s5 + $0x22c] sm:$0xf0]  ;;  %v1949_v19 = vor.u32 %v2362_v11, %v1948_v9  ;;  %1388 = vmatpush.bf16.msra.mxu3 %v2221_v10  ;;  %v2286_v51 = vld [vmem:[%s2866_s5 + $0x3d0] sm:$0xf0] }
  0xb8   : > { %v2204_v14 = vld [vmem:[%s2866_s5 + $0x320] sm:$0xf]  ;;  %v2426_v15 = vld [vmem:[%s2866_s5 + $0x32c] sm:$0xf0]  ;;  %v2077_v20 = vor.u32 %v2394_v13, %v2076_v12  ;;  %1347 = vmatpush.bf16.msra.mxu0 %v1821_v16  ;;  %v2344_v55 = vld [vmem:[%s2866_s5 + $0xa4] sm:$0xf]  ;;  %v2289_v58 = vor.u32 %v2444_v50, %v2286_v51 }
  0xb9   : > { %v1804_v17 = vld [vmem:[%s2866_s5] sm:$0xf]  ;;  %v2326_v18 = vld [vmem:[%s2866_s5 + $0xc] sm:$0xf0]  ;;  %v2205_v24 = vor.u32 %v2426_v15, %v2204_v14  ;;  %1361 = vmatpush.bf16.msra.mxu1 %v1949_v19  ;;  %v1886_v56 = vld [vmem:[%s2866_s5 + $0xb0] sm:$0xf0] }
  0xba   : > { %v1932_v21 = vld [vmem:[%s2866_s5 + $0x100] sm:$0xf]  ;;  %v2358_v22 = vld [vmem:[%s2866_s5 + $0x10c] sm:$0xf0]  ;;  %v1805_v31 = vor.u32 %v2326_v18, %v1804_v17  ;;  %1375 = vmatpush.bf16.msra.mxu2 %v2077_v20  ;;  %v2376_v57 = vld [vmem:[%s2866_s5 + $0x1a4] sm:$0xf]  ;;  %v1889_v1 = vor.u32 %v2344_v55, %v1886_v56 }
  0xbb   : > { %v2060_v23 = vld [vmem:[%s2866_s5 + $0x200] sm:$0xf]  ;;  %v2390_v25 = vld [vmem:[%s2866_s5 + $0x20c] sm:$0xf0]  ;;  %v1933_v35 = vor.u32 %v2358_v22, %v1932_v21  ;;  %1389 = vmatpush.bf16.msra.mxu3 %v2205_v24  ;;  %v2014_v59 = vld [vmem:[%s2866_s5 + $0x1b0] sm:$0xf0] }
  0xbc   : > { %v2188_v26 = vld [vmem:[%s2866_s5 + $0x300] sm:$0xf]  ;;  %v2422_v27 = vld [vmem:[%s2866_s5 + $0x30c] sm:$0xf0]  ;;  %v2061_v36 = vor.u32 %v2390_v25, %v2060_v23  ;;  %1348 = vmatpush.bf16.msra.mxu0 %v1805_v31  ;;  %v2408_v60 = vld [vmem:[%s2866_s5 + $0x2a4] sm:$0xf]  ;;  %v2017_v5 = vor.u32 %v2376_v57, %v2014_v59 }
  0xbd   : > { %v2189_v39 = vor.u32 %v2422_v27, %v2188_v26  ;;  %1362 = vmatpush.bf16.msra.mxu1 %v1933_v35  ;;  %v2142_v61 = vld [vmem:[%s2866_s5 + $0x2b0] sm:$0xf0]  ;;  %v2440_v62 = vld [vmem:[%s2866_s5 + $0x3a4] sm:$0xf]  ;;  %v1796_v3 = vld [vmem:[%s3223_s0 + $0x8] sm:$0xf] }
  0xbe   : > { %1376 = vmatpush.bf16.msra.mxu2 %v2061_v36  ;;  %v2270_v63 = vld [vmem:[%s2866_s5 + $0x3b0] sm:$0xf0]  ;;  %v2340_v0 = vld [vmem:[%s2866_s5 + $0x84] sm:$0xf]  ;;  %v2323_v4 = vld [vmem:[%s3223_s0 + $0x14] sm:$0xf0]  ;;  %v2145_v6 = vor.u32 %v2408_v60, %v2142_v61 }
  0xbf   : > { %1390 = vmatpush.bf16.msra.mxu3 %v2189_v39  ;;  %v1870_v2 = vld [vmem:[%s2866_s5 + $0x90] sm:$0xf0]  ;;  %v2372_v7 = vld [vmem:[%s2866_s5 + $0x184] sm:$0xf]  ;;  %v2965_v8 = vor.u32 %v2323_v4, %v1796_v3  ;;  %v2321_v9 = vld [vmem:[%s3223_s0 + $0xc] sm:$0xf]  ;;  %v2273_v11 = vor.u32 %v2440_v62, %v2270_v63 }
  0xc0   : > { %1397 = vmatpush.bf16.msrb.mxu0 %v1921_v40  ;;  %v1798_v10 = vld [vmem:[%s3223_s0 + $0x18] sm:$0xf0]  ;;  %v1998_v12 = vld [vmem:[%s2866_s5 + $0x190] sm:$0xf0]  ;;  %v2404_v13 = vld [vmem:[%s2866_s5 + $0x284] sm:$0xf]  ;;  %v1873_v19 = vor.u32 %v2340_v0, %v1870_v2 }
  0xc1   : > { %1411 = vmatpush.bf16.msrb.mxu1 %v2049_v41  ;;  %v2126_v14 = vld [vmem:[%s2866_s5 + $0x290] sm:$0xf0]  ;;  %v2976_v15 = vor.u32 %v2321_v9, %v1798_v10  ;;  %v2436_v16 = vld [vmem:[%s2866_s5 + $0x384] sm:$0xf]  ;;  %1377 = vmatmul.bf16.vlgmr.msra.gmra.mxu2 %v2965_v8  ;;  %v1788_v21 = vld [vmem:[%s3223_s0] sm:$0xf]  ;;  %v2001_v23 = vor.u32 %v2372_v7, %v1998_v12 }
  0xc2   : > { %1425 = vmatpush.bf16.msrb.mxu2 %v2177_v42  ;;  %v2254_v17 = vld [vmem:[%s2866_s5 + $0x390] sm:$0xf0]  ;;  %v2336_v18 = vld [vmem:[%s2866_s5 + $0x64] sm:$0xf]  ;;  %v2322_v22 = vld [vmem:[%s3223_s0 + $0xc] sm:$0xf0]  ;;  %v2129_v24 = vor.u32 %v2404_v13, %v2126_v14 }
  0xc3   : > { %1439 = vmatpush.bf16.msrb.mxu3 %v2305_v46  ;;  %v1854_v20 = vld [vmem:[%s2866_s5 + $0x70] sm:$0xf0]  ;;  %v2368_v25 = vld [vmem:[%s2866_s5 + $0x164] sm:$0xf]  ;;  %v2991_v26 = vor.u32 %v2322_v22, %v1788_v21  ;;  %v2257_v29 = vor.u32 %v2436_v16, %v2254_v17  ;;  %v1924_v9 = vld [vmem:[%s2866_s5 + $0xe8] sm:$0xf] }
  0xc4   : > { %1398 = vmatpush.bf16.msrb.mxu0 %v1905_v52  ;;  %1391 = vmatmul.bf16.vlgmr.msra.gmra.mxu3 %v2976_v15  ;;  %v2320_v27 = vld [vmem:[%s3223_s0 + $0x4] sm:$0xf]  ;;  %v1790_v28 = vld [vmem:[%s3223_s0 + $0x10] sm:$0xf0]  ;;  %v1857_v36 = vor.u32 %v2336_v18, %v1854_v20  ;;  %v2355_v10 = vld [vmem:[%s2866_s5 + $0xf4] sm:$0xf0] }
  0xc5   : > { %1412 = vmatpush.bf16.msrb.mxu1 %v2033_v53  ;;  %v1982_v30 = vld [vmem:[%s2866_s5 + $0x170] sm:$0xf0]  ;;  %v2400_v31 = vld [vmem:[%s2866_s5 + $0x264] sm:$0xf]  ;;  %v3002_v33 = vor.u32 %v2320_v27, %v1790_v28  ;;  %1349 = vmatmul.bf16.vlgmr.msra.gmra.mxu0 %v2991_v26  ;;  %v2387_v13 = vld [vmem:[%s2866_s5 + $0x1f4] sm:$0xf0]  ;;  %v1925_v22 = vor.u32 %v2355_v10, %v1924_v9 }
  0xc6   : > { %1426 = vmatpush.bf16.msrb.mxu2 %v2161_v54  ;;  %v2110_v32 = vld [vmem:[%s2866_s5 + $0x270] sm:$0xf0]  ;;  %v2432_v34 = vld [vmem:[%s2866_s5 + $0x364] sm:$0xf]  ;;  %v1985_v37 = vor.u32 %v2368_v25, %v1982_v30  ;;  %v2180_v14 = vld [vmem:[%s2866_s5 + $0x2e8] sm:$0xf] }
  0xc7   : > { %1440 = vmatpush.bf16.msrb.mxu3 %v2289_v58  ;;  %v2238_v35 = vld [vmem:[%s2866_s5 + $0x370] sm:$0xf0]  ;;  %1363 = vmatmul.bf16.vlgmr.msra.gmra.mxu1 %v3002_v33  ;;  %v2113_v38 = vor.u32 %v2400_v31, %v2110_v32  ;;  %v2332_v39 = vld [vmem:[%s2866_s5 + $0x44] sm:$0xf]  ;;  %v2419_v16 = vld [vmem:[%s2866_s5 + $0x2f4] sm:$0xf0] }
  0xc8   : > { %1399 = vmatpush.bf16.msrb.mxu0 %v1889_v1  ;;  %v1838_v40 = vld [vmem:[%s2866_s5 + $0x50] sm:$0xf0]  ;;  %v2364_v41 = vld [vmem:[%s2866_s5 + $0x144] sm:$0xf]  ;;  %v2241_v42 = vor.u32 %v2432_v34, %v2238_v35  ;;  %v2451_v20 = vld [vmem:[%s2866_s5 + $0x3f4] sm:$0xf0] }
  0xc9   : > { %1413 = vmatpush.bf16.msrb.mxu1 %v2017_v5  ;;  %v1966_v43 = vld [vmem:[%s2866_s5 + $0x150] sm:$0xf0]  ;;  %v2396_v44 = vld [vmem:[%s2866_s5 + $0x244] sm:$0xf]  ;;  %v1841_v48 = vor.u32 %v2332_v39, %v1838_v40  ;;  %v1908_v25 = vld [vmem:[%s2866_s5 + $0xc8] sm:$0xf] }
  0xca   : > { %1427 = vmatpush.bf16.msrb.mxu2 %v2145_v6  ;;  %v2094_v45 = vld [vmem:[%s2866_s5 + $0x250] sm:$0xf0]  ;;  %v2428_v46 = vld [vmem:[%s2866_s5 + $0x344] sm:$0xf]  ;;  %v1969_v49 = vor.u32 %v2364_v41, %v1966_v43  ;;  %v2351_v27 = vld [vmem:[%s2866_s5 + $0xd4] sm:$0xf0] }
  0xcb   : > { %1441 = vmatpush.bf16.msrb.mxu3 %v2273_v11  ;;  %v2222_v47 = vld [vmem:[%s2866_s5 + $0x350] sm:$0xf0]  ;;  %v2097_v50 = vor.u32 %v2396_v44, %v2094_v45  ;;  %v2328_v51 = vld [vmem:[%s2866_s5 + $0x24] sm:$0xf]  ;;  %v2052_v11 = vld [vmem:[%s2866_s5 + $0x1e8] sm:$0xf] }
  0xcc   : > { %1400 = vmatpush.bf16.msrb.mxu0 %v1873_v19  ;;  %v1822_v52 = vld [vmem:[%s2866_s5 + $0x30] sm:$0xf0]  ;;  %v2360_v53 = vld [vmem:[%s2866_s5 + $0x124] sm:$0xf]  ;;  %v2225_v54 = vor.u32 %v2428_v46, %v2222_v47  ;;  %v2308_v19 = vld [vmem:[%s2866_s5 + $0x3e8] sm:$0xf] }
  0xcd   : > { %1414 = vmatpush.bf16.msrb.mxu1 %v2001_v23  ;;  %v1950_v55 = vld [vmem:[%s2866_s5 + $0x130] sm:$0xf0]  ;;  %v2392_v56 = vld [vmem:[%s2866_s5 + $0x224] sm:$0xf]  ;;  %v1825_v60 = vor.u32 %v2328_v51, %v1822_v52  ;;  %v2053_v23 = vor.u32 %v2387_v13, %v2052_v11  ;;  %v2036_v28 = vld [vmem:[%s2866_s5 + $0x1c8] sm:$0xf] }
  0xce   : > { %1428 = vmatpush.bf16.msrb.mxu2 %v2129_v24  ;;  %v2078_v57 = vld [vmem:[%s2866_s5 + $0x230] sm:$0xf0]  ;;  %v2424_v58 = vld [vmem:[%s2866_s5 + $0x324] sm:$0xf]  ;;  %v1953_v63 = vor.u32 %v2360_v53, %v1950_v55  ;;  %v2181_v24 = vor.u32 %v2419_v16, %v2180_v14  ;;  %v2383_v30 = vld [vmem:[%s2866_s5 + $0x1d4] sm:$0xf0] }
  0xcf   : > { %1442 = vmatpush.bf16.msrb.mxu3 %v2257_v29  ;;  %v2206_v59 = vld [vmem:[%s2866_s5 + $0x330] sm:$0xf0]  ;;  %v2324_v61 = vld [vmem:[%s2866_s5 + $0x4] sm:$0xf]  ;;  %v2081_v0 = vor.u32 %v2392_v56, %v2078_v57  ;;  %v2309_v29 = vor.u32 %v2451_v20, %v2308_v19  ;;  %v2164_v31 = vld [vmem:[%s2866_s5 + $0x2c8] sm:$0xf] }
  0xd0   : > { %1401 = vmatpush.bf16.msrb.mxu0 %v1857_v36  ;;  %v1806_v62 = vld [vmem:[%s2866_s5 + $0x10] sm:$0xf0]  ;;  %v2356_v1 = vld [vmem:[%s2866_s5 + $0x104] sm:$0xf]  ;;  %v2209_v4 = vor.u32 %v2424_v58, %v2206_v59  ;;  %v2415_v32 = vld [vmem:[%s2866_s5 + $0x2d4] sm:$0xf0]  ;;  %v1909_v36 = vor.u32 %v2351_v27, %v1908_v25 }
  0xd1   : > { %1415 = vmatpush.bf16.msrb.mxu1 %v1985_v37  ;;  %v1934_v2 = vld [vmem:[%s2866_s5 + $0x110] sm:$0xf0]  ;;  %v2388_v3 = vld [vmem:[%s2866_s5 + $0x204] sm:$0xf]  ;;  %v1809_v12 = vor.u32 %v2324_v61, %v1806_v62  ;;  %v2292_v34 = vld [vmem:[%s2866_s5 + $0x3c8] sm:$0xf]  ;;  %v2037_v37 = vor.u32 %v2383_v30, %v2036_v28 }
  0xd2   : > { %1429 = vmatpush.bf16.msrb.mxu2 %v2113_v38  ;;  %v2062_v5 = vld [vmem:[%s2866_s5 + $0x210] sm:$0xf0]  ;;  %v2420_v6 = vld [vmem:[%s2866_s5 + $0x304] sm:$0xf]  ;;  %v1937_v17 = vor.u32 %v2356_v1, %v1934_v2  ;;  %v2447_v35 = vld [vmem:[%s2866_s5 + $0x3d4] sm:$0xf0]  ;;  %v2165_v38 = vor.u32 %v2415_v32, %v2164_v31 }
  0xd3   : > { %1443 = vmatpush.bf16.msrb.mxu3 %v2241_v42  ;;  %v2190_v7 = vld [vmem:[%s2866_s5 + $0x310] sm:$0xf0]  ;;  %v2065_v18 = vor.u32 %v2388_v3, %v2062_v5  ;;  %v1892_v39 = vld [vmem:[%s2866_s5 + $0xa8] sm:$0xf]  ;;  %v2347_v40 = vld [vmem:[%s2866_s5 + $0xb4] sm:$0xf0]  ;;  %v2293_v42 = vor.u32 %v2447_v35, %v2292_v34 }
  0xd4   : > { %1402 = vmatpush.bf16.msrb.mxu0 %v1841_v48  ;;  %v2193_v21 = vor.u32 %v2420_v6, %v2190_v7  ;;  %v2020_v41 = vld [vmem:[%s2866_s5 + $0x1a8] sm:$0xf]  ;;  %v2379_v43 = vld [vmem:[%s2866_s5 + $0x1b4] sm:$0xf0]  ;;  %v1893_v48 = vor.u32 %v2347_v40, %v1892_v39 }
  0xd5   : > { %1416 = vmatpush.bf16.msrb.mxu1 %v1969_v49  ;;  %v2148_v44 = vld [vmem:[%s2866_s5 + $0x2a8] sm:$0xf]  ;;  %v2411_v45 = vld [vmem:[%s2866_s5 + $0x2b4] sm:$0xf0]  ;;  %v2021_v49 = vor.u32 %v2379_v43, %v2020_v41 }
  0xd6   : > { %1430 = vmatpush.bf16.msrb.mxu2 %v2097_v50  ;;  %v2276_v46 = vld [vmem:[%s2866_s5 + $0x3a8] sm:$0xf]  ;;  %v2443_v47 = vld [vmem:[%s2866_s5 + $0x3b4] sm:$0xf0]  ;;  %v2149_v50 = vor.u32 %v2411_v45, %v2148_v44 }
  0xd7   : > { %1444 = vmatpush.bf16.msrb.mxu3 %v2225_v54  ;;  %v1876_v51 = vld [vmem:[%s2866_s5 + $0x88] sm:$0xf]  ;;  %v2343_v52 = vld [vmem:[%s2866_s5 + $0x94] sm:$0xf0]  ;;  %v2277_v54 = vor.u32 %v2443_v47, %v2276_v46 }
  0xd8   : > { %1403 = vmatpush.bf16.msrb.mxu0 %v1825_v60  ;;  %v2004_v53 = vld [vmem:[%s2866_s5 + $0x188] sm:$0xf]  ;;  %v2375_v55 = vld [vmem:[%s2866_s5 + $0x194] sm:$0xf0]  ;;  %v1877_v60 = vor.u32 %v2343_v52, %v1876_v51  ;;  %v2054_v52 = vld [vmem:[%s2866_s5 + $0x1f8] sm:$0xf0] }
  0xd9   : > { %1417 = vmatpush.bf16.msrb.mxu1 %v1953_v63  ;;  %v2132_v56 = vld [vmem:[%s2866_s5 + $0x288] sm:$0xf]  ;;  %v2407_v57 = vld [vmem:[%s2866_s5 + $0x294] sm:$0xf0]  ;;  %v2005_v61 = vor.u32 %v2375_v55, %v2004_v53  ;;  %v2417_v53 = vld [vmem:[%s2866_s5 + $0x2ec] sm:$0xf] }
  0xda   : > { %1431 = vmatpush.bf16.msrb.mxu2 %v2081_v0  ;;  %v2260_v58 = vld [vmem:[%s2866_s5 + $0x388] sm:$0xf]  ;;  %v2439_v59 = vld [vmem:[%s2866_s5 + $0x394] sm:$0xf0]  ;;  %v2133_v62 = vor.u32 %v2407_v57, %v2132_v56  ;;  %v2449_v57 = vld [vmem:[%s2866_s5 + $0x3ec] sm:$0xf] }
  0xdb   : > { %1445 = vmatpush.bf16.msrb.mxu3 %v2209_v4  ;;  %v1860_v63 = vld [vmem:[%s2866_s5 + $0x68] sm:$0xf]  ;;  %v2339_v0 = vld [vmem:[%s2866_s5 + $0x74] sm:$0xf0]  ;;  %v2261_v2 = vor.u32 %v2439_v59, %v2260_v58  ;;  %v2310_v58 = vld [vmem:[%s2866_s5 + $0x3f8] sm:$0xf0] }
  0xdc   : > { %1404 = vmatpush.bf16.msrb.mxu0 %v1809_v12  ;;  %v1988_v1 = vld [vmem:[%s2866_s5 + $0x168] sm:$0xf]  ;;  %v2371_v3 = vld [vmem:[%s2866_s5 + $0x174] sm:$0xf0]  ;;  %v1861_v9 = vor.u32 %v2339_v0, %v1860_v63  ;;  %v2349_v63 = vld [vmem:[%s2866_s5 + $0xcc] sm:$0xf] }
  0xdd   : > { %1418 = vmatpush.bf16.msrb.mxu1 %v1937_v17  ;;  %v2116_v4 = vld [vmem:[%s2866_s5 + $0x268] sm:$0xf]  ;;  %v2403_v5 = vld [vmem:[%s2866_s5 + $0x274] sm:$0xf0]  ;;  %v1989_v10 = vor.u32 %v2371_v3, %v1988_v1  ;;  %v1910_v0 = vld [vmem:[%s2866_s5 + $0xd8] sm:$0xf0] }
  0xde   : > { %1432 = vmatpush.bf16.msrb.mxu2 %v2065_v18  ;;  %v2244_v6 = vld [vmem:[%s2866_s5 + $0x368] sm:$0xf]  ;;  %v2435_v7 = vld [vmem:[%s2866_s5 + $0x374] sm:$0xf0]  ;;  %v2117_v11 = vor.u32 %v2403_v5, %v2116_v4  ;;  %v2381_v1 = vld [vmem:[%s2866_s5 + $0x1cc] sm:$0xf] }
  0xdf   : > { %1446 = vmatpush.bf16.msrb.mxu3 %v2193_v21  ;;  %1405 = vmatmul.bf16.vlgmr.msrb.gmra.mxu0 %v2991_v26  ;;  %v1844_v12 = vld [vmem:[%s2866_s5 + $0x48] sm:$0xf]  ;;  %v2335_v13 = vld [vmem:[%s2866_s5 + $0x54] sm:$0xf0]  ;;  %v2245_v16 = vor.u32 %v2435_v7, %v2244_v6  ;;  %v2038_v3 = vld [vmem:[%s2866_s5 + $0x1d8] sm:$0xf0] }
  0xe0   : > { %1453 = vmatpush.bf16.msra.mxu0 %v1925_v22  ;;  %1419 = vmatmul.bf16.vlgmr.msrb.gmra.mxu1 %v3002_v33  ;;  %v1972_v14 = vld [vmem:[%s2866_s5 + $0x148] sm:$0xf]  ;;  %v2367_v17 = vld [vmem:[%s2866_s5 + $0x154] sm:$0xf0]  ;;  %v1845_v22 = vor.u32 %v2335_v13, %v1844_v12  ;;  %v2413_v4 = vld [vmem:[%s2866_s5 + $0x2cc] sm:$0xf] }
  0xe1   : > { %1467 = vmatpush.bf16.msra.mxu1 %v2053_v23  ;;  %1433 = vmatmul.bf16.vlgmr.msrb.gmra.mxu2 %v2965_v8  ;;  %v2100_v18 = vld [vmem:[%s2866_s5 + $0x248] sm:$0xf]  ;;  %v2399_v19 = vld [vmem:[%s2866_s5 + $0x254] sm:$0xf0]  ;;  %v1973_v23 = vor.u32 %v2367_v17, %v1972_v14  ;;  %v2166_v5 = vld [vmem:[%s2866_s5 + $0x2d8] sm:$0xf0] }
  0xe2   : > { %1481 = vmatpush.bf16.msra.mxu2 %v2181_v24  ;;  %1447 = vmatmul.bf16.vlgmr.msrb.gmra.mxu3 %v2976_v15  ;;  %v2228_v20 = vld [vmem:[%s2866_s5 + $0x348] sm:$0xf]  ;;  %v2431_v21 = vld [vmem:[%s2866_s5 + $0x354] sm:$0xf0]  ;;  %v2101_v24 = vor.u32 %v2399_v19, %v2100_v18  ;;  %v2445_v6 = vld [vmem:[%s2866_s5 + $0x3cc] sm:$0xf] }
  0xe3   : > { %1495 = vmatpush.bf16.msra.mxu3 %v2309_v29  ;;  %v1828_v25 = vld [vmem:[%s2866_s5 + $0x28] sm:$0xf]  ;;  %v2331_v27 = vld [vmem:[%s2866_s5 + $0x34] sm:$0xf0]  ;;  %v2229_v29 = vor.u32 %v2431_v21, %v2228_v20  ;;  %v2294_v7 = vld [vmem:[%s2866_s5 + $0x3d8] sm:$0xf0] }
  0xe4   : > { %1454 = vmatpush.bf16.msra.mxu0 %v1909_v36  ;;  %v1956_v28 = vld [vmem:[%s2866_s5 + $0x128] sm:$0xf]  ;;  %v2363_v30 = vld [vmem:[%s2866_s5 + $0x134] sm:$0xf0]  ;;  %v1829_v36 = vor.u32 %v2331_v27, %v1828_v25  ;;  %v2345_v12 = vld [vmem:[%s2866_s5 + $0xac] sm:$0xf] }
  0xe5   : > { %1468 = vmatpush.bf16.msra.mxu1 %v2037_v37  ;;  %v2084_v31 = vld [vmem:[%s2866_s5 + $0x228] sm:$0xf]  ;;  %v2395_v32 = vld [vmem:[%s2866_s5 + $0x234] sm:$0xf0]  ;;  %v1957_v39 = vor.u32 %v2363_v30, %v1956_v28  ;;  %v1894_v13 = vld [vmem:[%s2866_s5 + $0xb8] sm:$0xf0] }
  0xe6   : > { %1482 = vmatpush.bf16.msra.mxu2 %v2165_v38  ;;  %v2212_v34 = vld [vmem:[%s2866_s5 + $0x328] sm:$0xf]  ;;  %v2427_v35 = vld [vmem:[%s2866_s5 + $0x334] sm:$0xf0]  ;;  %v2085_v40 = vor.u32 %v2395_v32, %v2084_v31  ;;  %v2377_v14 = vld [vmem:[%s2866_s5 + $0x1ac] sm:$0xf] }
  0xe7   : > { %1496 = vmatpush.bf16.msra.mxu3 %v2293_v42  ;;  %v1812_v37 = vld [vmem:[%s2866_s5 + $0x8] sm:$0xf]  ;;  %v2327_v38 = vld [vmem:[%s2866_s5 + $0x14] sm:$0xf0]  ;;  %v2213_v44 = vor.u32 %v2427_v35, %v2212_v34  ;;  %v2022_v17 = vld [vmem:[%s2866_s5 + $0x1b8] sm:$0xf0] }
  0xe8   : > { %1455 = vmatpush.bf16.msra.mxu0 %v1893_v48  ;;  %v1940_v41 = vld [vmem:[%s2866_s5 + $0x108] sm:$0xf]  ;;  %v2359_v42 = vld [vmem:[%s2866_s5 + $0x114] sm:$0xf0]  ;;  %v2353_v48 = vld [vmem:[%s2866_s5 + $0xec] sm:$0xf]  ;;  %v1813_v51 = vor.u32 %v2327_v38, %v1812_v37 }
  0xe9   : > { %1469 = vmatpush.bf16.msra.mxu1 %v2021_v49  ;;  %v2068_v43 = vld [vmem:[%s2866_s5 + $0x208] sm:$0xf]  ;;  %v2391_v45 = vld [vmem:[%s2866_s5 + $0x214] sm:$0xf0]  ;;  %v1926_v49 = vld [vmem:[%s2866_s5 + $0xf8] sm:$0xf0]  ;;  %v1941_v55 = vor.u32 %v2359_v42, %v1940_v41 }
  0xea   : > { %1483 = vmatpush.bf16.msra.mxu2 %v2149_v50  ;;  %v2196_v46 = vld [vmem:[%s2866_s5 + $0x308] sm:$0xf]  ;;  %v2423_v47 = vld [vmem:[%s2866_s5 + $0x314] sm:$0xf0]  ;;  %v2385_v50 = vld [vmem:[%s2866_s5 + $0x1ec] sm:$0xf]  ;;  %v2069_v56 = vor.u32 %v2391_v45, %v2068_v43 }
  0xeb   : > { %1497 = vmatpush.bf16.msra.mxu3 %v2277_v54  ;;  %v2182_v54 = vld [vmem:[%s2866_s5 + $0x2f8] sm:$0xf0]  ;;  %v2197_v59 = vor.u32 %v2423_v47, %v2196_v46  ;;  %v2409_v18 = vld [vmem:[%s2866_s5 + $0x2ac] sm:$0xf] }
  0xec   : > { %1456 = vmatpush.bf16.msra.mxu0 %v1877_v60  ;;  %v1929_v60 = vor.u32 %v2353_v48, %v1926_v49  ;;  %v2150_v19 = vld [vmem:[%s2866_s5 + $0x2b8] sm:$0xf0]  ;;  %v2441_v20 = vld [vmem:[%s2866_s5 + $0x3ac] sm:$0xf] }
  0xed   : > { %1470 = vmatpush.bf16.msra.mxu1 %v2005_v61  ;;  %v2057_v61 = vor.u32 %v2385_v50, %v2054_v52  ;;  %v2278_v21 = vld [vmem:[%s2866_s5 + $0x3b8] sm:$0xf0]  ;;  %v2341_v25 = vld [vmem:[%s2866_s5 + $0x8c] sm:$0xf] }
  0xee   : > { %1484 = vmatpush.bf16.msra.mxu2 %v2133_v62  ;;  %v2185_v62 = vor.u32 %v2417_v53, %v2182_v54  ;;  %v1878_v27 = vld [vmem:[%s2866_s5 + $0x98] sm:$0xf0]  ;;  %v2373_v28 = vld [vmem:[%s2866_s5 + $0x18c] sm:$0xf] }
  0xef   : > { %1498 = vmatpush.bf16.msra.mxu3 %v2261_v2  ;;  %v2313_v2 = vor.u32 %v2449_v57, %v2310_v58  ;;  %v2006_v30 = vld [vmem:[%s2866_s5 + $0x198] sm:$0xf0]  ;;  %v2405_v31 = vld [vmem:[%s2866_s5 + $0x28c] sm:$0xf] }
  0xf0   : > { %1457 = vmatpush.bf16.msra.mxu0 %v1861_v9  ;;  %v1913_v9 = vor.u32 %v2349_v63, %v1910_v0  ;;  %v2134_v32 = vld [vmem:[%s2866_s5 + $0x298] sm:$0xf0]  ;;  %v2437_v34 = vld [vmem:[%s2866_s5 + $0x38c] sm:$0xf]  ;;  %v2009_v37 = vor.u32 %v2373_v28, %v2006_v30 }
  0xf1   : > { %1471 = vmatpush.bf16.msra.mxu1 %v1989_v10  ;;  %v2041_v10 = vor.u32 %v2381_v1, %v2038_v3  ;;  %v2262_v35 = vld [vmem:[%s2866_s5 + $0x398] sm:$0xf0]  ;;  %v2137_v38 = vor.u32 %v2405_v31, %v2134_v32  ;;  %v2369_v41 = vld [vmem:[%s2866_s5 + $0x16c] sm:$0xf] }
  0xf2   : > { %1485 = vmatpush.bf16.msra.mxu2 %v2117_v11  ;;  %v2169_v11 = vor.u32 %v2413_v4, %v2166_v5  ;;  %v2265_v42 = vor.u32 %v2437_v34, %v2262_v35  ;;  %v1990_v43 = vld [vmem:[%s2866_s5 + $0x178] sm:$0xf0]  ;;  %v2433_v46 = vld [vmem:[%s2866_s5 + $0x36c] sm:$0xf] }
  0xf3   : > { %1499 = vmatpush.bf16.msra.mxu3 %v2245_v16  ;;  %v2297_v16 = vor.u32 %v2445_v6, %v2294_v7  ;;  %v2118_v45 = vld [vmem:[%s2866_s5 + $0x278] sm:$0xf0]  ;;  %v1993_v49 = vor.u32 %v2369_v41, %v1990_v43  ;;  %v2365_v53 = vld [vmem:[%s2866_s5 + $0x14c] sm:$0xf] }
  0xf4   : > { %1458 = vmatpush.bf16.msra.mxu0 %v1845_v22  ;;  %v1897_v22 = vor.u32 %v2345_v12, %v1894_v13  ;;  %v2246_v47 = vld [vmem:[%s2866_s5 + $0x378] sm:$0xf0]  ;;  %v2429_v58 = vld [vmem:[%s2866_s5 + $0x34c] sm:$0xf] }
  0xf5   : > { %1472 = vmatpush.bf16.msra.mxu1 %v1973_v23  ;;  %v2025_v23 = vor.u32 %v2377_v14, %v2022_v17  ;;  %v1846_v52 = vld [vmem:[%s2866_s5 + $0x58] sm:$0xf0]  ;;  %v2249_v54 = vor.u32 %v2433_v46, %v2246_v47  ;;  %v2329_v63 = vld [vmem:[%s2866_s5 + $0x2c] sm:$0xf] }
  0xf6   : > { %1486 = vmatpush.bf16.msra.mxu2 %v2101_v24  ;;  %v2153_v24 = vor.u32 %v2409_v18, %v2150_v19  ;;  %v2102_v57 = vld [vmem:[%s2866_s5 + $0x258] sm:$0xf0]  ;;  %v2361_v1 = vld [vmem:[%s2866_s5 + $0x12c] sm:$0xf] }
  0xf7   : > { %1500 = vmatpush.bf16.msra.mxu3 %v2229_v29  ;;  %v2281_v29 = vor.u32 %v2441_v20, %v2278_v21  ;;  %v1830_v0 = vld [vmem:[%s2866_s5 + $0x38] sm:$0xf0]  ;;  %v2393_v4 = vld [vmem:[%s2866_s5 + $0x22c] sm:$0xf] }
  0xf8   : > { %1459 = vmatpush.bf16.msra.mxu0 %v1829_v36  ;;  %v1881_v36 = vor.u32 %v2341_v25, %v1878_v27  ;;  %v1958_v3 = vld [vmem:[%s2866_s5 + $0x138] sm:$0xf0]  ;;  %v2425_v6 = vld [vmem:[%s2866_s5 + $0x32c] sm:$0xf] }
  0xf9   : > { %1473 = vmatpush.bf16.msra.mxu1 %v1957_v39  ;;  %v2337_v39 = vld [vmem:[%s2866_s5 + $0x6c] sm:$0xf]  ;;  %v2086_v5 = vld [vmem:[%s2866_s5 + $0x238] sm:$0xf0] }
  0xfa   : > { %1487 = vmatpush.bf16.msra.mxu2 %v2085_v40  ;;  %v1862_v40 = vld [vmem:[%s2866_s5 + $0x78] sm:$0xf0]  ;;  %v2325_v12 = vld [vmem:[%s2866_s5 + $0xc] sm:$0xf] }
  0xfb   : > { %1501 = vmatpush.bf16.msra.mxu3 %v2213_v44  ;;  %v2401_v44 = vld [vmem:[%s2866_s5 + $0x26c] sm:$0xf]  ;;  %v1865_v48 = vor.u32 %v2337_v39, %v1862_v40  ;;  %v2214_v7 = vld [vmem:[%s2866_s5 + $0x338] sm:$0xf0] }
  0xfc   : > { %1460 = vmatpush.bf16.msra.mxu0 %v1813_v51  ;;  %v2121_v50 = vor.u32 %v2401_v44, %v2118_v45  ;;  %v2333_v51 = vld [vmem:[%s2866_s5 + $0x4c] sm:$0xf]  ;;  %v1814_v13 = vld [vmem:[%s2866_s5 + $0x18] sm:$0xf0] }
  0xfd   : > { %1474 = vmatpush.bf16.msra.mxu1 %v1941_v55  ;;  %v1974_v55 = vld [vmem:[%s2866_s5 + $0x158] sm:$0xf0]  ;;  %v2357_v14 = vld [vmem:[%s2866_s5 + $0x10c] sm:$0xf] }
  0xfe   : > { %1488 = vmatpush.bf16.msra.mxu2 %v2069_v56  ;;  %v2397_v56 = vld [vmem:[%s2866_s5 + $0x24c] sm:$0xf]  ;;  %v1942_v17 = vld [vmem:[%s2866_s5 + $0x118] sm:$0xf0] }
  0xff   : > { %1502 = vmatpush.bf16.msra.mxu3 %v2197_v59  ;;  %1461 = vmatmul.bf16.vlgmr.msra.gmra.mxu0 %v2991_v26  ;;  %v2230_v59 = vld [vmem:[%s2866_s5 + $0x358] sm:$0xf0]  ;;  %v2389_v18 = vld [vmem:[%s2866_s5 + $0x20c] sm:$0xf] }
 0x100   : > { %1509 = vmatpush.bf16.msrb.mxu0 %v1929_v60  ;;  %1475 = vmatmul.bf16.vlgmr.msra.gmra.mxu1 %v3002_v33  ;;  %v1849_v60 = vor.u32 %v2333_v51, %v1846_v52  ;;  %v2070_v19 = vld [vmem:[%s2866_s5 + $0x218] sm:$0xf0]  ;;  %v2421_v20 = vld [vmem:[%s2866_s5 + $0x30c] sm:$0xf] }
 0x101   : > { %1523 = vmatpush.bf16.msrb.mxu1 %v2057_v61  ;;  %1489 = vmatmul.bf16.vlgmr.msra.gmra.mxu2 %v2965_v8  ;;  %v1977_v61 = vor.u32 %v2365_v53, %v1974_v55  ;;  %v2198_v21 = vld [vmem:[%s2866_s5 + $0x318] sm:$0xf0] }
 0x102   : > { %1537 = vmatpush.bf16.msrb.mxu2 %v2185_v62  ;;  %1503 = vmatmul.bf16.vlgmr.msra.gmra.mxu3 %v2976_v15  ;;  %v2105_v62 = vor.u32 %v2397_v56, %v2102_v57  ;;  %v2201_v25 = vor.u32 %v2421_v20, %v2198_v21 }
 0x103   : > { %1551 = vmatpush.bf16.msrb.mxu3 %v2313_v2  ;;  %v2233_v2 = vor.u32 %v2429_v58, %v2230_v59 }
 0x104   : > { %1510 = vmatpush.bf16.msrb.mxu0 %v1913_v9  ;;  %v1833_v9 = vor.u32 %v2329_v63, %v1830_v0 }
 0x105   : > { %1524 = vmatpush.bf16.msrb.mxu1 %v2041_v10  ;;  %v1961_v10 = vor.u32 %v2361_v1, %v1958_v3 }
 0x106   : > { %1538 = vmatpush.bf16.msrb.mxu2 %v2169_v11  ;;  %v2089_v11 = vor.u32 %v2393_v4, %v2086_v5 }
 0x107   : > { %1552 = vmatpush.bf16.msrb.mxu3 %v2297_v16  ;;  %v2217_v16 = vor.u32 %v2425_v6, %v2214_v7 }
 0x108   : > { %1511 = vmatpush.bf16.msrb.mxu0 %v1897_v22  ;;  %v1817_v22 = vor.u32 %v2325_v12, %v1814_v13 }
 0x109   : > { %1525 = vmatpush.bf16.msrb.mxu1 %v2025_v23  ;;  %v1945_v23 = vor.u32 %v2357_v14, %v1942_v17 }
 0x10a   : > { %1539 = vmatpush.bf16.msrb.mxu2 %v2153_v24  ;;  %v2073_v24 = vor.u32 %v2389_v18, %v2070_v19 }
 0x10b   : > { %1553 = vmatpush.bf16.msrb.mxu3 %v2281_v29  ;;  %v3176_v29 = vld [vmem:[%s525_s7] sm:$0xf] }
 0x10c   : > { %1512 = vmatpush.bf16.msrb.mxu0 %v1881_v36  ;;  %v1596_v5 = vperm.slane %v3176_v29, 2 }
 0x10d   : > { %1526 = vmatpush.bf16.msrb.mxu1 %v2009_v37 }
 0x10e   : > { %1540 = vmatpush.bf16.msrb.mxu2 %v2137_v38 }
 0x10f   : > { %1554 = vmatpush.bf16.msrb.mxu3 %v2265_v42 }
 0x110   : > { %1513 = vmatpush.bf16.msrb.mxu0 %v1865_v48 }
 0x111   : > { %1527 = vmatpush.bf16.msrb.mxu1 %v1993_v49 }
 0x112   : > { %1541 = vmatpush.bf16.msrb.mxu2 %v2121_v50  ;;  %v1595_v50 = vperm.slane %v3176_v29, 1 }
 0x113   : > { %1555 = vmatpush.bf16.msrb.mxu3 %v2249_v54 }
 0x114   : > { %1514 = vmatpush.bf16.msrb.mxu0 %v1849_v60 }
 0x115   : > { %1528 = vmatpush.bf16.msrb.mxu1 %v1977_v61 }
 0x116   : > { %1542 = vmatpush.bf16.msrb.mxu2 %v2105_v62 }
 0x117   : > { %1556 = vmatpush.bf16.msrb.mxu3 %v2233_v2 }
 0x118   : > { %1515 = vmatpush.bf16.msrb.mxu0 %v1833_v9 }
 0x119   : > { %1529 = vmatpush.bf16.msrb.mxu1 %v1961_v10 }
 0x11a   : > { %1543 = vmatpush.bf16.msrb.mxu2 %v2089_v11 }
 0x11b   : > { %1557 = vmatpush.bf16.msrb.mxu3 %v2217_v16 }
 0x11c   : > { %1516 = vmatpush.bf16.msrb.mxu0 %v1817_v22 }
 0x11d   : > { %1530 = vmatpush.bf16.msrb.mxu1 %v1945_v23 }
 0x11e   : > { %1544 = vmatpush.bf16.msrb.mxu2 %v2073_v24 }
 0x11f   : > { %1558 = vmatpush.bf16.msrb.mxu3 %v2201_v25  ;;  %1517 = vmatmul.bf16.vlgmr.msrb.gmra.mxu0 %v2991_v26 }
 0x120   : > { %1531 = vmatmul.bf16.vlgmr.msrb.gmra.mxu1 %v3002_v33  ;;  %v1594_v33 = vperm.slane %v3176_v29, 0 }
 0x121   : > { %1545 = vmatmul.bf16.vlgmr.msrb.gmra.mxu2 %v2965_v8 }
 0x122   : > { %1559 = vmatmul.bf16.vlgmr.msrb.gmra.mxu3 %v2976_v15 }
 0x142   : > { %v1350_v27 = vpop.f32.mrf.mxu0 }
 0x144   : > { %v1364_v28 = vpop.f32.mrf.mxu1  ;;  %v1378_v26 = vpop.f32.mrf.mxu2 }
 0x145   : > { %v1365_v30 = vadd.f32 %v1364_v28, %v1350_v27  ;;  %v1597_v27 = vperm.slane %v3176_v29, 3 }
 0x147   : > { %v1392_v31 = vpop.f32.mrf.mxu3  ;;  %v1379_v32 = vadd.f32 %v1378_v26, %v1365_v30 }
 0x149   : > { %v1393_v8 = vadd.f32 %v1392_v31, %v1379_v32 }
 0x14a   : > { %v1352_v34 = vpop.f32.mrf.mxu0 }
 0x14b   : > { %v1602_v15 = vadd.f32 %v1594_v33, %v1393_v8 }
 0x14c   : > { %v1366_v35 = vpop.f32.mrf.mxu1  ;;  %v1380_v38 = vpop.f32.mrf.mxu2 }
 0x14d   : > { %v1610_v36 = vmax.f32 %v1602_v15, 0.0  ;;  %v1367_v37 = vadd.f32 %v1366_v35, %v1352_v34 }
 0x14f   : > { %v1394_v39 = vpop.f32.mrf.mxu3  ;;  %1618 = vst [vmem:[%s3181_s9] sm:$0xff] %v1610_v36  ;;  %v1381_v40 = vadd.f32 %v1380_v38, %v1367_v37 }
 0x151   : > { %v1395_v41 = vadd.f32 %v1394_v39, %v1381_v40 }
 0x153   : > { %v1606_v42 = vadd.f32 %v1594_v33, %v1395_v41 }
 0x155   : > { %v1614_v43 = vmax.f32 %v1606_v42, 0.0 }
 0x156   : > { %v1651_v29 = vld [vmem:[%s3181_s9] sm:$0xff] (%p2588_p6) }
 0x157   : > { %1622 = vst [vmem:[%s3181_s9 + $0x20] sm:$0xff] %v1614_v43 }
 0x158   : > { %1652 = vst [vmem:[%s1638_s11] sm:$0xff] (%p2588_p6), %v1651_v29 }
 0x15c   : > { %v1406_v44 = vpop.f32.mrf.mxu0 }
 0x15d   : > { %v1420_v45 = vpop.f32.mrf.mxu1 }
 0x15e   : > { %v1421_v46 = vadd.f32 %v1420_v45, %v1406_v44  ;;  %v1659_v41 = vld [vmem:[%s3181_s9 + $0x20] sm:$0xff] (%p2588_p6) }
 0x15f   : > { %1660 = vst [vmem:[%s1638_s11 + $0x40] sm:$0xff] (%p2588_p6), %v1659_v41 }
 0x164   : > { %v1434_v47 = vpop.f32.mrf.mxu2  ;;  %v1408_v52 = vpop.f32.mrf.mxu0 }
 0x165   : > { %v1435_v48 = vadd.f32 %v1434_v47, %v1421_v46  ;;  %v1448_v49 = vpop.f32.mrf.mxu3  ;;  %v1422_v53 = vpop.f32.mrf.mxu1 }
 0x166   : > { %v1423_v55 = vadd.f32 %v1422_v53, %v1408_v52 }
 0x167   : > { %v1449_v51 = vadd.f32 %v1448_v49, %v1435_v48 }
 0x169   : > { %v1603_v54 = vadd.f32 %v1595_v50, %v1449_v51 }
 0x16b   : > { %v1611_v56 = vmax.f32 %v1603_v54, 0.0 }
 0x16c   : > { %v1436_v57 = vpop.f32.mrf.mxu2 }
 0x16d   : > { %1619 = vst [vmem:[%s3181_s9 + $0x8] sm:$0xff] %v1611_v56  ;;  %v1437_v58 = vadd.f32 %v1436_v57, %v1423_v55  ;;  %v1450_v59 = vpop.f32.mrf.mxu3 }
 0x16f   : > { %v1451_v60 = vadd.f32 %v1450_v59, %v1437_v58 }
 0x171   : > { %v1607_v61 = vadd.f32 %v1595_v50, %v1451_v60 }
 0x173   : > { %v1615_v62 = vmax.f32 %v1607_v61, 0.0 }
 0x174   : > { %v1653_v38 = vld [vmem:[%s3181_s9 + $0x8] sm:$0xff] (%p2588_p6) }
 0x175   : > { %1623 = vst [vmem:[%s3181_s9 + $0x28] sm:$0xff] %v1615_v62 }
 0x176   : > { %1654 = vst [vmem:[%s1638_s11 + $0x8] sm:$0xff] (%p2588_p6), %v1653_v38 }
 0x17c   : > { %v1462_v63 = vpop.f32.mrf.mxu0  ;;  %v1661_v42 = vld [vmem:[%s3181_s9 + $0x28] sm:$0xff] (%p2588_p6) }
 0x17d   : > { %v1476_v0 = vpop.f32.mrf.mxu1  ;;  %1662 = vst [vmem:[%s1638_s11 + $0x48] sm:$0xff] (%p2588_p6), %v1661_v42 }
 0x17e   : > { %v1477_v1 = vadd.f32 %v1476_v0, %v1462_v63 }
 0x184   : > { %v1490_v2 = vpop.f32.mrf.mxu2  ;;  %v1464_v7 = vpop.f32.mrf.mxu0 }
 0x185   : > { %v1491_v3 = vadd.f32 %v1490_v2, %v1477_v1  ;;  %v1504_v4 = vpop.f32.mrf.mxu3  ;;  %v1478_v9 = vpop.f32.mrf.mxu1 }
 0x186   : > { %v1479_v11 = vadd.f32 %v1478_v9, %v1464_v7 }
 0x187   : > { %v1505_v6 = vadd.f32 %v1504_v4, %v1491_v3 }
 0x189   : > { %v1604_v10 = vadd.f32 %v1596_v5, %v1505_v6 }
 0x18b   : > { %v1612_v12 = vmax.f32 %v1604_v10, 0.0 }
 0x18c   : > { %v1492_v13 = vpop.f32.mrf.mxu2 }
 0x18d   : > { %1620 = vst [vmem:[%s3181_s9 + $0x10] sm:$0xff] %v1612_v12  ;;  %v1493_v14 = vadd.f32 %v1492_v13, %v1479_v11  ;;  %v1506_v16 = vpop.f32.mrf.mxu3 }
 0x18f   : > { %v1507_v17 = vadd.f32 %v1506_v16, %v1493_v14 }
 0x191   : > { %v1608_v18 = vadd.f32 %v1596_v5, %v1507_v17 }
 0x193   : > { %v1616_v19 = vmax.f32 %v1608_v18, 0.0 }
 0x194   : > { %v1655_v39 = vld [vmem:[%s3181_s9 + $0x10] sm:$0xff] (%p2588_p6) }
 0x195   : > { %1624 = vst [vmem:[%s3181_s9 + $0x30] sm:$0xff] %v1616_v19 }
 0x196   : > { %1656 = vst [vmem:[%s1638_s11 + $0x10] sm:$0xff] (%p2588_p6), %v1655_v39 }
 0x19c   : > { %v1518_v20 = vpop.f32.mrf.mxu0  ;;  %v1663_v43 = vld [vmem:[%s3181_s9 + $0x30] sm:$0xff] (%p2588_p6) }
 0x19d   : > { %v1532_v21 = vpop.f32.mrf.mxu1  ;;  %1664 = vst [vmem:[%s1638_s11 + $0x50] sm:$0xff] (%p2588_p6), %v1663_v43 }
 0x19e   : > { %v1533_v22 = vadd.f32 %v1532_v21, %v1518_v20 }
 0x1a4   : > { %v1546_v23 = vpop.f32.mrf.mxu2  ;;  %v1520_v30 = vpop.f32.mrf.mxu0 }
 0x1a5   : > { %v1547_v24 = vadd.f32 %v1546_v23, %v1533_v22  ;;  %v1560_v25 = vpop.f32.mrf.mxu3  ;;  %v1534_v26 = vpop.f32.mrf.mxu1 }
 0x1a6   : > { %v1535_v33 = vadd.f32 %v1534_v26, %v1520_v30 }
 0x1a7   : > { %v1561_v28 = vadd.f32 %v1560_v25, %v1547_v24 }
 0x1a9   : > { %v1605_v31 = vadd.f32 %v1597_v27, %v1561_v28 }
 0x1ab   : > { %v1613_v32 = vmax.f32 %v1605_v31, 0.0 }
 0x1ac   : > { %v1548_v8 = vpop.f32.mrf.mxu2 }
 0x1ad   : > { %1621 = vst [vmem:[%s3181_s9 + $0x18] sm:$0xff] %v1613_v32  ;;  %v1549_v15 = vadd.f32 %v1548_v8, %v1535_v33  ;;  %v1562_v34 = vpop.f32.mrf.mxu3 }
 0x1af   : > { %v1563_v35 = vadd.f32 %v1562_v34, %v1549_v15 }
 0x1b1   : > { %v1609_v36 = vadd.f32 %v1597_v27, %v1563_v35  ;;  %1632 = sbr.rel (!%p2588_p6) target bundleno = 446 (0x1be), region = 67 }
 0x1b3   : > { %v1617_v37 = vmax.f32 %v1609_v36, 0.0 }
 0x1b4   : > { %v1657_v40 = vld [vmem:[%s3181_s9 + $0x18] sm:$0xff] (%p2588_p6) }
 0x1b5   : > { %1625 = vst [vmem:[%s3181_s9 + $0x38] sm:$0xff] %v1617_v37 }
 0x1b6   : > { %1658 = vst [vmem:[%s1638_s11 + $0x18] sm:$0xff] %v1657_v40 }
 0x1bc   : > { %v1665_v44 = vld [vmem:[%s3181_s9 + $0x38] sm:$0xff] }
 0x1bd   : > { %1666 = vst [vmem:[%s1638_s11 + $0x58] sm:$0xff] %v1665_v44 }
 0x1be PF: > { %s13_s16 = sadd.s32 1, %s2531_s16   ;;  %s3228_s12 = smov %s2519_s13 }
 0x1bf   : > { %p10_p12 = scmp.ge.s32.totalorder %s13_s16, 4   ;;  %s3229_s13 = smov %s2593_s22 }
 0x1c0   : > { %s3230_s14 = smov %s2527_s15  ;;  %s3231_s15 = smov %s3233_s17 }
 0x1c1   :  { %12 = sbr.rel (!%p10_p12) target bundleno = 3 (0x3), region = 127 }

</bundles_post_ra>
